<compile_context>
chip_gen: v6e
topology: v6e:2x2x1
jax: 0.10.0
libtpu: 0.0.40
codegen_flags: <defaults>
</compile_context>

<pallas_src>
import functools

import jax
import jax.numpy as jnp
from jax.experimental import pallas as pl
from jax.experimental.pallas import tpu as pltpu

EPS = 1e-5
OUT_SPLITS = (1, 2, 2)            # hmap, regs, w_h_ output channels
OUT_TOTAL = sum(OUT_SPLITS)       # 5


# ----------------------------------------------------------------------------
# In-kernel helpers (operate on VMEM values)
# ----------------------------------------------------------------------------
def _dw3x3(x3, w9, scale, bias):
    """Depthwise 3x3 'valid' conv (no bias) + folded BN + ReLU on (H, W, C)."""
    H, W, C = x3.shape
    Ho, Wo = H - 2, W - 2
    acc = x3[0:Ho, 0:Wo, :] * w9[0]
    for t in range(1, 9):
        di, dj = t // 3, t % 3
        acc = acc + x3[di:di + Ho, dj:dj + Wo, :] * w9[t]
    return jnp.maximum(acc * scale + bias, 0.0)


def _xcorr(s3, k3):
    """Per-channel cross-correlation (pysot xcorr_depthwise) on (H, W, C) values."""
    Hs, Ws, _ = s3.shape
    Hk, Wk, _ = k3.shape
    Ho, Wo = Hs - Hk + 1, Ws - Wk + 1
    acc = s3[0:Ho, 0:Wo, :] * k3[0, 0]
    for di in range(Hk):
        for dj in range(Wk):
            if di == 0 and dj == 0:
                continue
            acc = acc + s3[di:di + Ho, dj:dj + Wo, :] * k3[di, dj]
    return acc


# ----------------------------------------------------------------------------
# Fused per-branch kernel: adapt(z) + crop + dw3x3, adapt(x) + dw3x3,
# depthwise xcorr, fused 2-layer head -- all three heads at once.
# ----------------------------------------------------------------------------
def _branch_kernel(z_ref, x_ref,
                   wz1_ref, az1_ref, wzd_ref, azd_ref,
                   wx1_ref, ax1_ref, wxd_ref, axd_ref,
                   hw1_ref, ah1_ref, hw2t_ref, hb2_ref,
                   o_ref,
                   yz_ref, yx_ref, feat_ref,
                   *, crop):
    _, Hz, Wz, _ = z_ref.shape
    _, Hx, Wx, _ = x_ref.shape

    # ---- adapt(z): 1x1 conv (Cin -> 3*hidden for the 3 heads) + BN + ReLU ----
    zv = z_ref[0]                                       # (Hz, Wz, Cin)
    wz1 = wz1_ref[...]
    sz1, bz1 = az1_ref[0], az1_ref[1]
    for h in range(Hz):                                 # per-row MXU matmuls
        r = jnp.dot(zv[h], wz1, preferred_element_type=jnp.float32)
        yz_ref[h] = jnp.maximum(r * sz1 + bz1, 0.0)

    # center crop (l computed from the W size, as in the PyTorch module), dw 3x3
    l = (Wz - crop) // 2
    yz = yz_ref[...]
    k3 = _dw3x3(yz[l:l + crop, l:l + crop, :],
                wzd_ref[...], azd_ref[0], azd_ref[1])   # (crop-2, crop-2, C3)

    # ---- adapt(x): 1x1 conv + BN + ReLU, then dw 3x3 + BN + ReLU -------------
    xv = x_ref[0]
    wx1 = wx1_ref[...]
    sx1, bx1 = ax1_ref[0], ax1_ref[1]
    for h in range(Hx):
        r = jnp.dot(xv[h], wx1, preferred_element_type=jnp.float32)
        yx_ref[h] = jnp.maximum(r * sx1 + bx1, 0.0)
    s3 = _dw3x3(yx_ref[...], wxd_ref[...], axd_ref[0], axd_ref[1])

    # ---- depthwise cross-correlation (all 3 heads at once, per channel) ------
    f3 = _xcorr(s3, k3)                                 # (Ho, Wo, C3)
    Ho, Wo, _ = f3.shape
    for i in range(Ho):                                 # flatten spatial -> rows
        feat_ref[i * Wo:(i + 1) * Wo, :] = f3[i]

    # ---- fused head: block-diag 1x1 conv + BN + ReLU, then 1x1 conv (+bias) --
    # Final matmul is (Cout, C3) x (Mo, C3)^T so the output is stored lane-dense
    # with the spatial axis (Mo) on the 128-wide lane dimension.
    h1 = jnp.dot(feat_ref[...], hw1_ref[...], preferred_element_type=jnp.float32)
    h1 = jnp.maximum(h1 * ah1_ref[0] + ah1_ref[1], 0.0)           # (Mo, C3)
    out = jax.lax.dot_general(hw2t_ref[...], h1,
                              (((1,), (1,)), ((), ())),
                              preferred_element_type=jnp.float32)  # (Cout, Mo)
    o_ref[0] = out + hb2_ref[...]


def _branch_forward(z_nhwc, x_nhwc, fp, crop=7):
    """Run one DepthwiseAFPN branch (all three heads fused) via a single pallas_call."""
    B, Hz, Wz, Cin = z_nhwc.shape
    _, Hx, Wx, _ = x_nhwc.shape
    C3 = fp["wz1"].shape[1]
    Hk = crop - 2                          # template spatial after crop + dw3x3
    Ho = (Hx - 2) - Hk + 1
    Wo = (Wx - 2) - Hk + 1
    Mo = Ho * Wo
    Cout = fp["hw2t"].shape[0]

    def full_spec(arr):
        nd = arr.ndim
        return pl.BlockSpec(arr.shape, lambda b: (0,) * nd)

    weights = (fp["wz1"], fp["az1"], fp["wzd"], fp["azd"],
               fp["wx1"], fp["ax1"], fp["wxd"], fp["axd"],
               fp["hw1"], fp["ah1"], fp["hw2t"], fp["hb2"])

    out = pl.pallas_call(
        functools.partial(_branch_kernel, crop=crop),
        grid=(B,),
        in_specs=[pl.BlockSpec((1, Hz, Wz, Cin), lambda b: (b, 0, 0, 0)),
                  pl.BlockSpec((1, Hx, Wx, Cin), lambda b: (b, 0, 0, 0))]
                 + [full_spec(w) for w in weights],
        out_specs=pl.BlockSpec((1, Cout, Mo), lambda b: (b, 0, 0)),
        out_shape=jax.ShapeDtypeStruct((B, Cout, Mo), jnp.float32),
        scratch_shapes=[
            pltpu.VMEM((Hz, Wz, C3), jnp.float32),   # adapted template (pre-crop)
            pltpu.VMEM((Hx, Wx, C3), jnp.float32),   # adapted search
            pltpu.VMEM((Mo, C3), jnp.float32),       # flattened xcorr feature
        ],
        compiler_params=pltpu.CompilerParams(
            dimension_semantics=("parallel",),       # batch elts across TCs (v7x)
            vmem_limit_bytes=32 * 1024 * 1024,
        ),
    )(z_nhwc, x_nhwc, *weights)
    return out.reshape(B, Cout, Ho, Wo)


# ----------------------------------------------------------------------------
# Weight fusion: concat the 3 heads, fold BN and the branch-combination weight
# ----------------------------------------------------------------------------
def _block_diag(mats):
    rows = sum(m.shape[0] for m in mats)
    cols = sum(m.shape[1] for m in mats)
    out = jnp.zeros((rows, cols), jnp.float32)
    r = c = 0
    for m in mats:
        out = out.at[r:r + m.shape[0], c:c + m.shape[1]].set(m)
        r += m.shape[0]
        c += m.shape[1]
    return out


def _fuse_branch(branch, head_weights):
    """Concatenate hmap/regs/w_h_ weights into one wide stream; fold the per-branch
    combination weight (softmax or 1/n) into the final head conv + bias."""
    heads = [branch["hmap"], branch["regs"], branch["w_h_"]]

    def cat_adapt(key):
        w1 = jnp.concatenate([h[key]["w1"] for h in heads], axis=1)
        a1 = jnp.stack([jnp.concatenate([h[key]["bn1"][0] for h in heads]),
                        jnp.concatenate([h[key]["bn1"][1] for h in heads])])
        wd = jnp.concatenate([h[key]["wd"] for h in heads], axis=1)
        ad = jnp.stack([jnp.concatenate([h[key]["bnd"][0] for h in heads]),
                        jnp.concatenate([h[key]["bnd"][1] for h in heads])])
        return w1, a1, wd, ad

    wz1, az1, wzd, azd = cat_adapt("conv_kernel")
    wx1, ax1, wxd, axd = cat_adapt("conv_search")

    hw1 = _block_diag([h["head_w1"] for h in heads])
    ah1 = jnp.stack([jnp.concatenate([h["head_bn1"][0] for h in heads]),
                     jnp.concatenate([h["head_bn1"][1] for h in heads])])
    hw2 = _block_diag([h["head_w2"] * w for h, w in zip(heads, head_weights)])
    hb2 = jnp.concatenate([h["head_b2"] * w for h, w in zip(heads, head_weights)])
    return dict(wz1=wz1, az1=az1, wzd=wzd, azd=azd,
                wx1=wx1, ax1=ax1, wxd=wxd, axd=axd,
                hw1=hw1, ah1=ah1, hw2t=hw2.T, hb2=hb2.reshape(-1, 1))


# ----------------------------------------------------------------------------
# Deterministic parameter init (shapes follow the PyTorch module __init__)
# ----------------------------------------------------------------------------
class KeyGen:
    def __init__(self, seed):
        self.key = jax.random.PRNGKey(seed)

    def __call__(self):
        self.key, sub = jax.random.split(self.key)
        return sub


def _fold_bn(gamma, beta, mean, var, eps=EPS):
    scale = gamma / jnp.sqrt(var + eps)
    bias = beta - mean * scale
    return scale, bias


def _init_bn(kg, c):
    gamma = 1.0 + 0.1 * jax.random.normal(kg(), (c,), jnp.float32)
    beta = 0.1 * jax.random.normal(kg(), (c,), jnp.float32)
    mean = 0.05 * jax.random.normal(kg(), (c,), jnp.float32)
    var = 1.0 + 0.1 * jnp.abs(jax.random.normal(kg(), (c,), jnp.float32))
    return _fold_bn(gamma, beta, mean, var)


def _init_adapt(kg, in_c, hidden):
    return {
        "w1": 0.1 * jax.random.normal(kg(), (in_c, hidden), jnp.float32),   # 1x1 conv
        "bn1": _init_bn(kg, hidden),
        "wd": 0.1 * jax.random.normal(kg(), (9, hidden), jnp.float32),      # dw 3x3
        "bnd": _init_bn(kg, hidden),
    }


def _init_dwxcorr(kg, in_c, hidden, out_c):
    return {
        "conv_kernel": _init_adapt(kg, in_c, hidden),
        "conv_search": _init_adapt(kg, in_c, hidden),
        "head_w1": 0.1 * jax.random.normal(kg(), (hidden, hidden), jnp.float32),
        "head_bn1": _init_bn(kg, hidden),
        "head_w2": 0.1 * jax.random.normal(kg(), (hidden, out_c), jnp.float32),
        "head_b2": 0.1 * jax.random.normal(kg(), (out_c,), jnp.float32),
    }


def init_multi_afpn(seed, in_channels, weighted=False):
    kg = KeyGen(seed)
    params = {"weighted": weighted, "branches": []}
    for c in in_channels:
        params["branches"].append({
            "hmap": _init_dwxcorr(kg, c, c, 1),
            "regs": _init_dwxcorr(kg, c, c, 2),
            "w_h_": _init_dwxcorr(kg, c, c, 2),
        })
    if weighted:
        params["hmap_weight"] = jnp.ones((len(in_channels),), jnp.float32)
        params["regs_weight"] = jnp.ones((len(in_channels),), jnp.float32)
        params["w_h__weight"] = jnp.ones((len(in_channels),), jnp.float32)
    return params


# ----------------------------------------------------------------------------
# Forward pass
# ----------------------------------------------------------------------------
def multi_afpn_fwd(params, z_fs, x_fs):
    """z_fs / x_fs: lists of NCHW float arrays (PyTorch convention)."""
    n = len(params["branches"])
    if params["weighted"]:
        wh = jax.nn.softmax(params["hmap_weight"])
        wr = jax.nn.softmax(params["regs_weight"])
        ww = jax.nn.softmax(params["w_h__weight"])
    else:
        uni = jnp.full((n,), 1.0 / n, jnp.float32)
        wh = wr = ww = uni

    total = None
    for i, (branch, z_nchw, x_nchw) in enumerate(zip(params["branches"], z_fs, x_fs)):
        z = jnp.transpose(z_nchw.astype(jnp.float32), (0, 2, 3, 1))   # NCHW -> NHWC
        x = jnp.transpose(x_nchw.astype(jnp.float32), (0, 2, 3, 1))
        fp = _fuse_branch(branch, (wh[i], wr[i], ww[i]))
        o = _branch_forward(z, x, fp)      # (B, 5, Ho, Wo); combine weight pre-folded
        total = o if total is None else total + o

    c0, c1, c2 = OUT_SPLITS
    hmap = total[:, :c0]
    regs = total[:, c0:c0 + c1]
    w_h_ = total[:, c0 + c1:c0 + c1 + c2]
    return hmap, regs, w_h_


# ----------------------------------------------------------------------------
if __name__ == "__main__":
    in_channels = [4, 4]          # two FPN levels, hidden == in_channels[i]
    B = 2
    key = jax.random.PRNGKey(0)
    k1, k2, k3, k4 = jax.random.split(key, 4)
    # template features (>= 9 spatial so the 7x7 center crop is valid)
    z_fs = [jax.random.normal(k1, (B, 4, 9, 9), jnp.float32),
            jax.random.normal(k2, (B, 4, 9, 9), jnp.float32)]
    # search features
    x_fs = [jax.random.normal(k3, (B, 4, 16, 16), jnp.float32),
            jax.random.normal(k4, (B, 4, 16, 16), jnp.float32)]

    params = init_multi_afpn(42, in_channels, weighted=False)

    hmap, regs, w_h_ = multi_afpn_fwd(params, z_fs, x_fs)
    jax.block_until_ready((hmap, regs, w_h_))

    # search 16 -> dw3x3 -> 14 ; xcorr with 5x5 template -> 10
    assert hmap.shape == (B, 1, 10, 10), hmap.shape
    assert regs.shape == (B, 2, 10, 10), regs.shape
    assert w_h_.shape == (B, 2, 10, 10), w_h_.shape
    print("KERNEL_OK")
</pallas_src>

<mosaic_0001>
module attributes {stable_mosaic.version = 11 : i64} {
  func.func @_branch_kernel(%arg0: i32, %arg1: memref<1x9x9x4xf32, #tpu.memory_space<vmem>>, %arg2: memref<1x16x16x4xf32, #tpu.memory_space<vmem>>, %arg3: memref<4x12xf32, #tpu.memory_space<vmem>>, %arg4: memref<2x12xf32, #tpu.memory_space<vmem>>, %arg5: memref<9x12xf32, #tpu.memory_space<vmem>>, %arg6: memref<2x12xf32, #tpu.memory_space<vmem>>, %arg7: memref<4x12xf32, #tpu.memory_space<vmem>>, %arg8: memref<2x12xf32, #tpu.memory_space<vmem>>, %arg9: memref<9x12xf32, #tpu.memory_space<vmem>>, %arg10: memref<2x12xf32, #tpu.memory_space<vmem>>, %arg11: memref<12x12xf32, #tpu.memory_space<vmem>>, %arg12: memref<2x12xf32, #tpu.memory_space<vmem>>, %arg13: memref<5x12xf32, #tpu.memory_space<vmem>>, %arg14: memref<5x1xf32, #tpu.memory_space<vmem>>, %arg15: memref<1x5x100xf32, #tpu.memory_space<vmem>>, %arg16: memref<9x9x12xf32, #tpu.memory_space<vmem>>, %arg17: memref<16x16x12xf32, #tpu.memory_space<vmem>>, %arg18: memref<100x12xf32, #tpu.memory_space<vmem>>) attributes {dimension_semantics = [#tpu.dimension_semantics<parallel>], iteration_bounds = array<i64: 2>, scalar_prefetch = 0 : i64, scratch_operands = 3 : i64, tpu.core_type = #tpu.core_type<tc>, window_params = [{transform_indices = @transform_0, window_bounds = array<i64: 1, 9, 9, 4>}, {transform_indices = @transform_1, window_bounds = array<i64: 1, 16, 16, 4>}, {pipeline_mode = #tpu.pipeline_mode<synchronous>, transform_indices = @transform_2, window_bounds = array<i64: 4, 12>}, {pipeline_mode = #tpu.pipeline_mode<synchronous>, transform_indices = @transform_3, window_bounds = array<i64: 2, 12>}, {pipeline_mode = #tpu.pipeline_mode<synchronous>, transform_indices = @transform_4, window_bounds = array<i64: 9, 12>}, {pipeline_mode = #tpu.pipeline_mode<synchronous>, transform_indices = @transform_5, window_bounds = array<i64: 2, 12>}, {pipeline_mode = #tpu.pipeline_mode<synchronous>, transform_indices = @transform_6, window_bounds = array<i64: 4, 12>}, {pipeline_mode = #tpu.pipeline_mode<synchronous>, transform_indices = @transform_7, window_bounds = array<i64: 2, 12>}, {pipeline_mode = #tpu.pipeline_mode<synchronous>, transform_indices = @transform_8, window_bounds = array<i64: 9, 12>}, {pipeline_mode = #tpu.pipeline_mode<synchronous>, transform_indices = @transform_9, window_bounds = array<i64: 2, 12>}, {pipeline_mode = #tpu.pipeline_mode<synchronous>, transform_indices = @transform_10, window_bounds = array<i64: 12, 12>}, {pipeline_mode = #tpu.pipeline_mode<synchronous>, transform_indices = @transform_11, window_bounds = array<i64: 2, 12>}, {pipeline_mode = #tpu.pipeline_mode<synchronous>, transform_indices = @transform_12, window_bounds = array<i64: 5, 12>}, {pipeline_mode = #tpu.pipeline_mode<synchronous>, transform_indices = @transform_13, window_bounds = array<i64: 5, 1>}, {transform_indices = @transform_14, window_bounds = array<i64: 1, 5, 100>}]} {
    %c0 = arith.constant 0 : index
    %c0_0 = arith.constant 0 : index
    %c0_1 = arith.constant 0 : index
    %c0_2 = arith.constant 0 : index
    %0 = vector.load %arg1[%c0, %c0_0, %c0_1, %c0_2] : memref<1x9x9x4xf32, #tpu.memory_space<vmem>>, vector<1x9x9x4xf32>
    %1 = vector.shape_cast %0 : vector<1x9x9x4xf32> to vector<9x9x4xf32>
    %c0_3 = arith.constant 0 : index
    %c0_4 = arith.constant 0 : index
    %2 = vector.load %arg3[%c0_3, %c0_4] : memref<4x12xf32, #tpu.memory_space<vmem>>, vector<4x12xf32>
    %c0_5 = arith.constant 0 : index
    %c0_6 = arith.constant 0 : index
    %3 = vector.load %arg4[%c0_5, %c0_6] : memref<2x12xf32, #tpu.memory_space<vmem>>, vector<1x12xf32>
    %4 = vector.shape_cast %3 : vector<1x12xf32> to vector<12xf32>
    %c1 = arith.constant 1 : index
    %c0_7 = arith.constant 0 : index
    %5 = vector.load %arg4[%c1, %c0_7] : memref<2x12xf32, #tpu.memory_space<vmem>>, vector<1x12xf32>
    %6 = vector.shape_cast %5 : vector<1x12xf32> to vector<12xf32>
    %7 = vector.extract_strided_slice %1 {offsets = [0, 0, 0], sizes = [1, 9, 4], strides = [1, 1, 1]} : vector<9x9x4xf32> to vector<1x9x4xf32>
    %8 = vector.shape_cast %7 : vector<1x9x4xf32> to vector<9x4xf32>
    %cst = arith.constant dense<0.000000e+00> : vector<9x12xf32>
    %9 = tpu.matmul %8, %2, %cst {dimension_numbers = #tpu.dot_dimension_numbers<[1], [0], [0], [1], [0, 0, 1, 1], [], []>} : vector<9x4xf32>, vector<4x12xf32>, vector<9x12xf32> -> vector<9x12xf32>
    %10 = vector.shape_cast %4 : vector<12xf32> to vector<1x12xf32>
    %11 = vector.broadcast %10 : vector<1x12xf32> to vector<9x12xf32>
    %12 = arith.mulf %9, %11 : vector<9x12xf32>
    %13 = vector.shape_cast %6 : vector<12xf32> to vector<1x12xf32>
    %14 = vector.broadcast %13 : vector<1x12xf32> to vector<9x12xf32>
    %15 = arith.addf %12, %14 : vector<9x12xf32>
    %cst_8 = arith.constant 0.000000e+00 : f32
    %16 = vector.broadcast %cst_8 : f32 to vector<9x12xf32>
    %17 = arith.maximumf %15, %16 : vector<9x12xf32>
    %c0_9 = arith.constant 0 : index
    %c0_10 = arith.constant 0 : index
    %c0_11 = arith.constant 0 : index
    %18 = vector.load %arg16[%c0_9, %c0_10, %c0_11] : memref<9x9x12xf32, #tpu.memory_space<vmem>>, vector<1x9x12xf32>
    %19 = vector.shape_cast %18 : vector<1x9x12xf32> to vector<9x12xf32>
    %20 = vector.shape_cast %17 : vector<9x12xf32> to vector<1x9x12xf32>
    tpu.vector_store %arg16[%c0_9, %c0_10, %c0_11], %20 {strides = array<i32>} : memref<9x9x12xf32, #tpu.memory_space<vmem>>, vector<1x9x12xf32>,
    %21 = vector.extract_strided_slice %1 {offsets = [1, 0, 0], sizes = [1, 9, 4], strides = [1, 1, 1]} : vector<9x9x4xf32> to vector<1x9x4xf32>
    %22 = vector.shape_cast %21 : vector<1x9x4xf32> to vector<9x4xf32>
    %cst_12 = arith.constant dense<0.000000e+00> : vector<9x12xf32>
    %23 = tpu.matmul %22, %2, %cst_12 {dimension_numbers = #tpu.dot_dimension_numbers<[1], [0], [0], [1], [0, 0, 1, 1], [], []>} : vector<9x4xf32>, vector<4x12xf32>, vector<9x12xf32> -> vector<9x12xf32>
    %24 = vector.shape_cast %4 : vector<12xf32> to vector<1x12xf32>
    %25 = vector.broadcast %24 : vector<1x12xf32> to vector<9x12xf32>
    %26 = arith.mulf %23, %25 : vector<9x12xf32>
    %27 = vector.shape_cast %6 : vector<12xf32> to vector<1x12xf32>
    %28 = vector.broadcast %27 : vector<1x12xf32> to vector<9x12xf32>
    %29 = arith.addf %26, %28 : vector<9x12xf32>
    %cst_13 = arith.constant 0.000000e+00 : f32
    %30 = vector.broadcast %cst_13 : f32 to vector<9x12xf32>
    %31 = arith.maximumf %29, %30 : vector<9x12xf32>
    %c1_14 = arith.constant 1 : index
    %c0_15 = arith.constant 0 : index
    %c0_16 = arith.constant 0 : index
    %32 = vector.load %arg16[%c1_14, %c0_15, %c0_16] : memref<9x9x12xf32, #tpu.memory_space<vmem>>, vector<1x9x12xf32>
    %33 = vector.shape_cast %32 : vector<1x9x12xf32> to vector<9x12xf32>
    %34 = vector.shape_cast %31 : vector<9x12xf32> to vector<1x9x12xf32>
    tpu.vector_store %arg16[%c1_14, %c0_15, %c0_16], %34 {strides = array<i32>} : memref<9x9x12xf32, #tpu.memory_space<vmem>>, vector<1x9x12xf32>,
    %35 = vector.extract_strided_slice %1 {offsets = [2, 0, 0], sizes = [1, 9, 4], strides = [1, 1, 1]} : vector<9x9x4xf32> to vector<1x9x4xf32>
    %36 = vector.shape_cast %35 : vector<1x9x4xf32> to vector<9x4xf32>
    %cst_17 = arith.constant dense<0.000000e+00> : vector<9x12xf32>
    %37 = tpu.matmul %36, %2, %cst_17 {dimension_numbers = #tpu.dot_dimension_numbers<[1], [0], [0], [1], [0, 0, 1, 1], [], []>} : vector<9x4xf32>, vector<4x12xf32>, vector<9x12xf32> -> vector<9x12xf32>
    %38 = vector.shape_cast %4 : vector<12xf32> to vector<1x12xf32>
    %39 = vector.broadcast %38 : vector<1x12xf32> to vector<9x12xf32>
    %40 = arith.mulf %37, %39 : vector<9x12xf32>
    %41 = vector.shape_cast %6 : vector<12xf32> to vector<1x12xf32>
    %42 = vector.broadcast %41 : vector<1x12xf32> to vector<9x12xf32>
    %43 = arith.addf %40, %42 : vector<9x12xf32>
    %cst_18 = arith.constant 0.000000e+00 : f32
    %44 = vector.broadcast %cst_18 : f32 to vector<9x12xf32>
    %45 = arith.maximumf %43, %44 : vector<9x12xf32>
    %c2 = arith.constant 2 : index
    %c0_19 = arith.constant 0 : index
    %c0_20 = arith.constant 0 : index
    %46 = vector.load %arg16[%c2, %c0_19, %c0_20] : memref<9x9x12xf32, #tpu.memory_space<vmem>>, vector<1x9x12xf32>
    %47 = vector.shape_cast %46 : vector<1x9x12xf32> to vector<9x12xf32>
    %48 = vector.shape_cast %45 : vector<9x12xf32> to vector<1x9x12xf32>
    tpu.vector_store %arg16[%c2, %c0_19, %c0_20], %48 {strides = array<i32>} : memref<9x9x12xf32, #tpu.memory_space<vmem>>, vector<1x9x12xf32>,
    %49 = vector.extract_strided_slice %1 {offsets = [3, 0, 0], sizes = [1, 9, 4], strides = [1, 1, 1]} : vector<9x9x4xf32> to vector<1x9x4xf32>
    %50 = vector.shape_cast %49 : vector<1x9x4xf32> to vector<9x4xf32>
    %cst_21 = arith.constant dense<0.000000e+00> : vector<9x12xf32>
    %51 = tpu.matmul %50, %2, %cst_21 {dimension_numbers = #tpu.dot_dimension_numbers<[1], [0], [0], [1], [0, 0, 1, 1], [], []>} : vector<9x4xf32>, vector<4x12xf32>, vector<9x12xf32> -> vector<9x12xf32>
    %52 = vector.shape_cast %4 : vector<12xf32> to vector<1x12xf32>
    %53 = vector.broadcast %52 : vector<1x12xf32> to vector<9x12xf32>
    %54 = arith.mulf %51, %53 : vector<9x12xf32>
    %55 = vector.shape_cast %6 : vector<12xf32> to vector<1x12xf32>
    %56 = vector.broadcast %55 : vector<1x12xf32> to vector<9x12xf32>
    %57 = arith.addf %54, %56 : vector<9x12xf32>
    %cst_22 = arith.constant 0.000000e+00 : f32
    %58 = vector.broadcast %cst_22 : f32 to vector<9x12xf32>
    %59 = arith.maximumf %57, %58 : vector<9x12xf32>
    %c3 = arith.constant 3 : index
    %c0_23 = arith.constant 0 : index
    %c0_24 = arith.constant 0 : index
    %60 = vector.load %arg16[%c3, %c0_23, %c0_24] : memref<9x9x12xf32, #tpu.memory_space<vmem>>, vector<1x9x12xf32>
    %61 = vector.shape_cast %60 : vector<1x9x12xf32> to vector<9x12xf32>
    %62 = vector.shape_cast %59 : vector<9x12xf32> to vector<1x9x12xf32>
    tpu.vector_store %arg16[%c3, %c0_23, %c0_24], %62 {strides = array<i32>} : memref<9x9x12xf32, #tpu.memory_space<vmem>>, vector<1x9x12xf32>,
    %63 = vector.extract_strided_slice %1 {offsets = [4, 0, 0], sizes = [1, 9, 4], strides = [1, 1, 1]} : vector<9x9x4xf32> to vector<1x9x4xf32>
    %64 = vector.shape_cast %63 : vector<1x9x4xf32> to vector<9x4xf32>
    %cst_25 = arith.constant dense<0.000000e+00> : vector<9x12xf32>
    %65 = tpu.matmul %64, %2, %cst_25 {dimension_numbers = #tpu.dot_dimension_numbers<[1], [0], [0], [1], [0, 0, 1, 1], [], []>} : vector<9x4xf32>, vector<4x12xf32>, vector<9x12xf32> -> vector<9x12xf32>
    %66 = vector.shape_cast %4 : vector<12xf32> to vector<1x12xf32>
    %67 = vector.broadcast %66 : vector<1x12xf32> to vector<9x12xf32>
    %68 = arith.mulf %65, %67 : vector<9x12xf32>
    %69 = vector.shape_cast %6 : vector<12xf32> to vector<1x12xf32>
    %70 = vector.broadcast %69 : vector<1x12xf32> to vector<9x12xf32>
    %71 = arith.addf %68, %70 : vector<9x12xf32>
    %cst_26 = arith.constant 0.000000e+00 : f32
    %72 = vector.broadcast %cst_26 : f32 to vector<9x12xf32>
    %73 = arith.maximumf %71, %72 : vector<9x12xf32>
    %c4 = arith.constant 4 : index
    %c0_27 = arith.constant 0 : index
    %c0_28 = arith.constant 0 : index
    %74 = vector.load %arg16[%c4, %c0_27, %c0_28] : memref<9x9x12xf32, #tpu.memory_space<vmem>>, vector<1x9x12xf32>
    %75 = vector.shape_cast %74 : vector<1x9x12xf32> to vector<9x12xf32>
    %76 = vector.shape_cast %73 : vector<9x12xf32> to vector<1x9x12xf32>
    tpu.vector_store %arg16[%c4, %c0_27, %c0_28], %76 {strides = array<i32>} : memref<9x9x12xf32, #tpu.memory_space<vmem>>, vector<1x9x12xf32>,
    %77 = vector.extract_strided_slice %1 {offsets = [5, 0, 0], sizes = [1, 9, 4], strides = [1, 1, 1]} : vector<9x9x4xf32> to vector<1x9x4xf32>
    %78 = vector.shape_cast %77 : vector<1x9x4xf32> to vector<9x4xf32>
    %cst_29 = arith.constant dense<0.000000e+00> : vector<9x12xf32>
    %79 = tpu.matmul %78, %2, %cst_29 {dimension_numbers = #tpu.dot_dimension_numbers<[1], [0], [0], [1], [0, 0, 1, 1], [], []>} : vector<9x4xf32>, vector<4x12xf32>, vector<9x12xf32> -> vector<9x12xf32>
    %80 = vector.shape_cast %4 : vector<12xf32> to vector<1x12xf32>
    %81 = vector.broadcast %80 : vector<1x12xf32> to vector<9x12xf32>
    %82 = arith.mulf %79, %81 : vector<9x12xf32>
    %83 = vector.shape_cast %6 : vector<12xf32> to vector<1x12xf32>
    %84 = vector.broadcast %83 : vector<1x12xf32> to vector<9x12xf32>
    %85 = arith.addf %82, %84 : vector<9x12xf32>
    %cst_30 = arith.constant 0.000000e+00 : f32
    %86 = vector.broadcast %cst_30 : f32 to vector<9x12xf32>
    %87 = arith.maximumf %85, %86 : vector<9x12xf32>
    %c5 = arith.constant 5 : index
    %c0_31 = arith.constant 0 : index
    %c0_32 = arith.constant 0 : index
    %88 = vector.load %arg16[%c5, %c0_31, %c0_32] : memref<9x9x12xf32, #tpu.memory_space<vmem>>, vector<1x9x12xf32>
    %89 = vector.shape_cast %88 : vector<1x9x12xf32> to vector<9x12xf32>
    %90 = vector.shape_cast %87 : vector<9x12xf32> to vector<1x9x12xf32>
    tpu.vector_store %arg16[%c5, %c0_31, %c0_32], %90 {strides = array<i32>} : memref<9x9x12xf32, #tpu.memory_space<vmem>>, vector<1x9x12xf32>,
    %91 = vector.extract_strided_slice %1 {offsets = [6, 0, 0], sizes = [1, 9, 4], strides = [1, 1, 1]} : vector<9x9x4xf32> to vector<1x9x4xf32>
    %92 = vector.shape_cast %91 : vector<1x9x4xf32> to vector<9x4xf32>
    %cst_33 = arith.constant dense<0.000000e+00> : vector<9x12xf32>
    %93 = tpu.matmul %92, %2, %cst_33 {dimension_numbers = #tpu.dot_dimension_numbers<[1], [0], [0], [1], [0, 0, 1, 1], [], []>} : vector<9x4xf32>, vector<4x12xf32>, vector<9x12xf32> -> vector<9x12xf32>
    %94 = vector.shape_cast %4 : vector<12xf32> to vector<1x12xf32>
    %95 = vector.broadcast %94 : vector<1x12xf32> to vector<9x12xf32>
    %96 = arith.mulf %93, %95 : vector<9x12xf32>
    %97 = vector.shape_cast %6 : vector<12xf32> to vector<1x12xf32>
    %98 = vector.broadcast %97 : vector<1x12xf32> to vector<9x12xf32>
    %99 = arith.addf %96, %98 : vector<9x12xf32>
    %cst_34 = arith.constant 0.000000e+00 : f32
    %100 = vector.broadcast %cst_34 : f32 to vector<9x12xf32>
    %101 = arith.maximumf %99, %100 : vector<9x12xf32>
    %c6 = arith.constant 6 : index
    %c0_35 = arith.constant 0 : index
    %c0_36 = arith.constant 0 : index
    %102 = vector.load %arg16[%c6, %c0_35, %c0_36] : memref<9x9x12xf32, #tpu.memory_space<vmem>>, vector<1x9x12xf32>
    %103 = vector.shape_cast %102 : vector<1x9x12xf32> to vector<9x12xf32>
    %104 = vector.shape_cast %101 : vector<9x12xf32> to vector<1x9x12xf32>
    tpu.vector_store %arg16[%c6, %c0_35, %c0_36], %104 {strides = array<i32>} : memref<9x9x12xf32, #tpu.memory_space<vmem>>, vector<1x9x12xf32>,
    %105 = vector.extract_strided_slice %1 {offsets = [7, 0, 0], sizes = [1, 9, 4], strides = [1, 1, 1]} : vector<9x9x4xf32> to vector<1x9x4xf32>
    %106 = vector.shape_cast %105 : vector<1x9x4xf32> to vector<9x4xf32>
    %cst_37 = arith.constant dense<0.000000e+00> : vector<9x12xf32>
    %107 = tpu.matmul %106, %2, %cst_37 {dimension_numbers = #tpu.dot_dimension_numbers<[1], [0], [0], [1], [0, 0, 1, 1], [], []>} : vector<9x4xf32>, vector<4x12xf32>, vector<9x12xf32> -> vector<9x12xf32>
    %108 = vector.shape_cast %4 : vector<12xf32> to vector<1x12xf32>
    %109 = vector.broadcast %108 : vector<1x12xf32> to vector<9x12xf32>
    %110 = arith.mulf %107, %109 : vector<9x12xf32>
    %111 = vector.shape_cast %6 : vector<12xf32> to vector<1x12xf32>
    %112 = vector.broadcast %111 : vector<1x12xf32> to vector<9x12xf32>
    %113 = arith.addf %110, %112 : vector<9x12xf32>
    %cst_38 = arith.constant 0.000000e+00 : f32
    %114 = vector.broadcast %cst_38 : f32 to vector<9x12xf32>
    %115 = arith.maximumf %113, %114 : vector<9x12xf32>
    %c7 = arith.constant 7 : index
    %c0_39 = arith.constant 0 : index
    %c0_40 = arith.constant 0 : index
    %116 = vector.load %arg16[%c7, %c0_39, %c0_40] : memref<9x9x12xf32, #tpu.memory_space<vmem>>, vector<1x9x12xf32>
    %117 = vector.shape_cast %116 : vector<1x9x12xf32> to vector<9x12xf32>
    %118 = vector.shape_cast %115 : vector<9x12xf32> to vector<1x9x12xf32>
    tpu.vector_store %arg16[%c7, %c0_39, %c0_40], %118 {strides = array<i32>} : memref<9x9x12xf32, #tpu.memory_space<vmem>>, vector<1x9x12xf32>,
    %119 = vector.extract_strided_slice %1 {offsets = [8, 0, 0], sizes = [1, 9, 4], strides = [1, 1, 1]} : vector<9x9x4xf32> to vector<1x9x4xf32>
    %120 = vector.shape_cast %119 : vector<1x9x4xf32> to vector<9x4xf32>
    %cst_41 = arith.constant dense<0.000000e+00> : vector<9x12xf32>
    %121 = tpu.matmul %120, %2, %cst_41 {dimension_numbers = #tpu.dot_dimension_numbers<[1], [0], [0], [1], [0, 0, 1, 1], [], []>} : vector<9x4xf32>, vector<4x12xf32>, vector<9x12xf32> -> vector<9x12xf32>
    %122 = vector.shape_cast %4 : vector<12xf32> to vector<1x12xf32>
    %123 = vector.broadcast %122 : vector<1x12xf32> to vector<9x12xf32>
    %124 = arith.mulf %121, %123 : vector<9x12xf32>
    %125 = vector.shape_cast %6 : vector<12xf32> to vector<1x12xf32>
    %126 = vector.broadcast %125 : vector<1x12xf32> to vector<9x12xf32>
    %127 = arith.addf %124, %126 : vector<9x12xf32>
    %cst_42 = arith.constant 0.000000e+00 : f32
    %128 = vector.broadcast %cst_42 : f32 to vector<9x12xf32>
    %129 = arith.maximumf %127, %128 : vector<9x12xf32>
    %c8 = arith.constant 8 : index
    %c0_43 = arith.constant 0 : index
    %c0_44 = arith.constant 0 : index
    %130 = vector.load %arg16[%c8, %c0_43, %c0_44] : memref<9x9x12xf32, #tpu.memory_space<vmem>>, vector<1x9x12xf32>
    %131 = vector.shape_cast %130 : vector<1x9x12xf32> to vector<9x12xf32>
    %132 = vector.shape_cast %129 : vector<9x12xf32> to vector<1x9x12xf32>
    tpu.vector_store %arg16[%c8, %c0_43, %c0_44], %132 {strides = array<i32>} : memref<9x9x12xf32, #tpu.memory_space<vmem>>, vector<1x9x12xf32>,
    %c0_45 = arith.constant 0 : index
    %c0_46 = arith.constant 0 : index
    %c0_47 = arith.constant 0 : index
    %133 = vector.load %arg16[%c0_45, %c0_46, %c0_47] : memref<9x9x12xf32, #tpu.memory_space<vmem>>, vector<9x9x12xf32>
    %134 = vector.extract_strided_slice %133 {offsets = [1, 1, 0], sizes = [7, 7, 12], strides = [1, 1, 1]} : vector<9x9x12xf32> to vector<7x7x12xf32>
    %c0_48 = arith.constant 0 : index
    %c0_49 = arith.constant 0 : index
    %135 = vector.load %arg5[%c0_48, %c0_49] : memref<9x12xf32, #tpu.memory_space<vmem>>, vector<9x12xf32>
    %c0_50 = arith.constant 0 : index
    %c0_51 = arith.constant 0 : index
    %136 = vector.load %arg6[%c0_50, %c0_51] : memref<2x12xf32, #tpu.memory_space<vmem>>, vector<1x12xf32>
    %137 = vector.shape_cast %136 : vector<1x12xf32> to vector<12xf32>
    %c1_52 = arith.constant 1 : index
    %c0_53 = arith.constant 0 : index
    %138 = vector.load %arg6[%c1_52, %c0_53] : memref<2x12xf32, #tpu.memory_space<vmem>>, vector<1x12xf32>
    %139 = vector.shape_cast %138 : vector<1x12xf32> to vector<12xf32>
    %140 = vector.extract_strided_slice %134 {offsets = [0, 0, 0], sizes = [5, 5, 12], strides = [1, 1, 1]} : vector<7x7x12xf32> to vector<5x5x12xf32>
    %141 = vector.extract_strided_slice %135 {offsets = [0, 0], sizes = [1, 12], strides = [1, 1]} : vector<9x12xf32> to vector<1x12xf32>
    %142 = vector.shape_cast %141 : vector<1x12xf32> to vector<12xf32>
    %143 = vector.shape_cast %142 : vector<12xf32> to vector<1x1x12xf32>
    %144 = vector.broadcast %143 : vector<1x1x12xf32> to vector<5x5x12xf32>
    %145 = arith.mulf %140, %144 : vector<5x5x12xf32>
    %146 = vector.extract_strided_slice %134 {offsets = [0, 1, 0], sizes = [5, 5, 12], strides = [1, 1, 1]} : vector<7x7x12xf32> to vector<5x5x12xf32>
    %147 = vector.extract_strided_slice %135 {offsets = [1, 0], sizes = [1, 12], strides = [1, 1]} : vector<9x12xf32> to vector<1x12xf32>
    %148 = vector.shape_cast %147 : vector<1x12xf32> to vector<12xf32>
    %149 = vector.shape_cast %148 : vector<12xf32> to vector<1x1x12xf32>
    %150 = vector.broadcast %149 : vector<1x1x12xf32> to vector<5x5x12xf32>
    %151 = arith.mulf %146, %150 : vector<5x5x12xf32>
    %152 = arith.addf %145, %151 : vector<5x5x12xf32>
    %153 = vector.extract_strided_slice %134 {offsets = [0, 2, 0], sizes = [5, 5, 12], strides = [1, 1, 1]} : vector<7x7x12xf32> to vector<5x5x12xf32>
    %154 = vector.extract_strided_slice %135 {offsets = [2, 0], sizes = [1, 12], strides = [1, 1]} : vector<9x12xf32> to vector<1x12xf32>
    %155 = vector.shape_cast %154 : vector<1x12xf32> to vector<12xf32>
    %156 = vector.shape_cast %155 : vector<12xf32> to vector<1x1x12xf32>
    %157 = vector.broadcast %156 : vector<1x1x12xf32> to vector<5x5x12xf32>
    %158 = arith.mulf %153, %157 : vector<5x5x12xf32>
    %159 = arith.addf %152, %158 : vector<5x5x12xf32>
    %160 = vector.extract_strided_slice %134 {offsets = [1, 0, 0], sizes = [5, 5, 12], strides = [1, 1, 1]} : vector<7x7x12xf32> to vector<5x5x12xf32>
    %161 = vector.extract_strided_slice %135 {offsets = [3, 0], sizes = [1, 12], strides = [1, 1]} : vector<9x12xf32> to vector<1x12xf32>
    %162 = vector.shape_cast %161 : vector<1x12xf32> to vector<12xf32>
    %163 = vector.shape_cast %162 : vector<12xf32> to vector<1x1x12xf32>
    %164 = vector.broadcast %163 : vector<1x1x12xf32> to vector<5x5x12xf32>
    %165 = arith.mulf %160, %164 : vector<5x5x12xf32>
    %166 = arith.addf %159, %165 : vector<5x5x12xf32>
    %167 = vector.extract_strided_slice %134 {offsets = [1, 1, 0], sizes = [5, 5, 12], strides = [1, 1, 1]} : vector<7x7x12xf32> to vector<5x5x12xf32>
    %168 = vector.extract_strided_slice %135 {offsets = [4, 0], sizes = [1, 12], strides = [1, 1]} : vector<9x12xf32> to vector<1x12xf32>
    %169 = vector.shape_cast %168 : vector<1x12xf32> to vector<12xf32>
    %170 = vector.shape_cast %169 : vector<12xf32> to vector<1x1x12xf32>
    %171 = vector.broadcast %170 : vector<1x1x12xf32> to vector<5x5x12xf32>
    %172 = arith.mulf %167, %171 : vector<5x5x12xf32>
    %173 = arith.addf %166, %172 : vector<5x5x12xf32>
    %174 = vector.extract_strided_slice %134 {offsets = [1, 2, 0], sizes = [5, 5, 12], strides = [1, 1, 1]} : vector<7x7x12xf32> to vector<5x5x12xf32>
    %175 = vector.extract_strided_slice %135 {offsets = [5, 0], sizes = [1, 12], strides = [1, 1]} : vector<9x12xf32> to vector<1x12xf32>
    %176 = vector.shape_cast %175 : vector<1x12xf32> to vector<12xf32>
    %177 = vector.shape_cast %176 : vector<12xf32> to vector<1x1x12xf32>
    %178 = vector.broadcast %177 : vector<1x1x12xf32> to vector<5x5x12xf32>
    %179 = arith.mulf %174, %178 : vector<5x5x12xf32>
    %180 = arith.addf %173, %179 : vector<5x5x12xf32>
    %181 = vector.extract_strided_slice %134 {offsets = [2, 0, 0], sizes = [5, 5, 12], strides = [1, 1, 1]} : vector<7x7x12xf32> to vector<5x5x12xf32>
    %182 = vector.extract_strided_slice %135 {offsets = [6, 0], sizes = [1, 12], strides = [1, 1]} : vector<9x12xf32> to vector<1x12xf32>
    %183 = vector.shape_cast %182 : vector<1x12xf32> to vector<12xf32>
    %184 = vector.shape_cast %183 : vector<12xf32> to vector<1x1x12xf32>
    %185 = vector.broadcast %184 : vector<1x1x12xf32> to vector<5x5x12xf32>
    %186 = arith.mulf %181, %185 : vector<5x5x12xf32>
    %187 = arith.addf %180, %186 : vector<5x5x12xf32>
    %188 = vector.extract_strided_slice %134 {offsets = [2, 1, 0], sizes = [5, 5, 12], strides = [1, 1, 1]} : vector<7x7x12xf32> to vector<5x5x12xf32>
    %189 = vector.extract_strided_slice %135 {offsets = [7, 0], sizes = [1, 12], strides = [1, 1]} : vector<9x12xf32> to vector<1x12xf32>
    %190 = vector.shape_cast %189 : vector<1x12xf32> to vector<12xf32>
    %191 = vector.shape_cast %190 : vector<12xf32> to vector<1x1x12xf32>
    %192 = vector.broadcast %191 : vector<1x1x12xf32> to vector<5x5x12xf32>
    %193 = arith.mulf %188, %192 : vector<5x5x12xf32>
    %194 = arith.addf %187, %193 : vector<5x5x12xf32>
    %195 = vector.extract_strided_slice %134 {offsets = [2, 2, 0], sizes = [5, 5, 12], strides = [1, 1, 1]} : vector<7x7x12xf32> to vector<5x5x12xf32>
    %196 = vector.extract_strided_slice %135 {offsets = [8, 0], sizes = [1, 12], strides = [1, 1]} : vector<9x12xf32> to vector<1x12xf32>
    %197 = vector.shape_cast %196 : vector<1x12xf32> to vector<12xf32>
    %198 = vector.shape_cast %197 : vector<12xf32> to vector<1x1x12xf32>
    %199 = vector.broadcast %198 : vector<1x1x12xf32> to vector<5x5x12xf32>
    %200 = arith.mulf %195, %199 : vector<5x5x12xf32>
    %201 = arith.addf %194, %200 : vector<5x5x12xf32>
    %202 = vector.shape_cast %137 : vector<12xf32> to vector<1x1x12xf32>
    %203 = vector.broadcast %202 : vector<1x1x12xf32> to vector<5x5x12xf32>
    %204 = arith.mulf %201, %203 : vector<5x5x12xf32>
    %205 = vector.shape_cast %139 : vector<12xf32> to vector<1x1x12xf32>
    %206 = vector.broadcast %205 : vector<1x1x12xf32> to vector<5x5x12xf32>
    %207 = arith.addf %204, %206 : vector<5x5x12xf32>
    %cst_54 = arith.constant 0.000000e+00 : f32
    %208 = vector.broadcast %cst_54 : f32 to vector<5x5x12xf32>
    %209 = arith.maximumf %207, %208 : vector<5x5x12xf32>
    %c0_55 = arith.constant 0 : index
    %c0_56 = arith.constant 0 : index
    %c0_57 = arith.constant 0 : index
    %c0_58 = arith.constant 0 : index
    %210 = vector.load %arg2[%c0_55, %c0_56, %c0_57, %c0_58] : memref<1x16x16x4xf32, #tpu.memory_space<vmem>>, vector<1x16x16x4xf32>
    %211 = vector.shape_cast %210 : vector<1x16x16x4xf32> to vector<16x16x4xf32>
    %c0_59 = arith.constant 0 : index
    %c0_60 = arith.constant 0 : index
    %212 = vector.load %arg7[%c0_59, %c0_60] : memref<4x12xf32, #tpu.memory_space<vmem>>, vector<4x12xf32>
    %c0_61 = arith.constant 0 : index
    %c0_62 = arith.constant 0 : index
    %213 = vector.load %arg8[%c0_61, %c0_62] : memref<2x12xf32, #tpu.memory_space<vmem>>, vector<1x12xf32>
    %214 = vector.shape_cast %213 : vector<1x12xf32> to vector<12xf32>
    %c1_63 = arith.constant 1 : index
    %c0_64 = arith.constant 0 : index
    %215 = vector.load %arg8[%c1_63, %c0_64] : memref<2x12xf32, #tpu.memory_space<vmem>>, vector<1x12xf32>
    %216 = vector.shape_cast %215 : vector<1x12xf32> to vector<12xf32>
    %217 = vector.extract_strided_slice %211 {offsets = [0, 0, 0], sizes = [1, 16, 4], strides = [1, 1, 1]} : vector<16x16x4xf32> to vector<1x16x4xf32>
    %218 = vector.shape_cast %217 : vector<1x16x4xf32> to vector<16x4xf32>
    %cst_65 = arith.constant dense<0.000000e+00> : vector<16x12xf32>
    %219 = tpu.matmul %218, %212, %cst_65 {dimension_numbers = #tpu.dot_dimension_numbers<[1], [0], [0], [1], [0, 0, 1, 1], [], []>} : vector<16x4xf32>, vector<4x12xf32>, vector<16x12xf32> -> vector<16x12xf32>
    %220 = vector.shape_cast %214 : vector<12xf32> to vector<1x12xf32>
    %221 = vector.broadcast %220 : vector<1x12xf32> to vector<16x12xf32>
    %222 = arith.mulf %219, %221 : vector<16x12xf32>
    %223 = vector.shape_cast %216 : vector<12xf32> to vector<1x12xf32>
    %224 = vector.broadcast %223 : vector<1x12xf32> to vector<16x12xf32>
    %225 = arith.addf %222, %224 : vector<16x12xf32>
    %cst_66 = arith.constant 0.000000e+00 : f32
    %226 = vector.broadcast %cst_66 : f32 to vector<16x12xf32>
    %227 = arith.maximumf %225, %226 : vector<16x12xf32>
    %c0_67 = arith.constant 0 : index
    %c0_68 = arith.constant 0 : index
    %c0_69 = arith.constant 0 : index
    %228 = vector.load %arg17[%c0_67, %c0_68, %c0_69] : memref<16x16x12xf32, #tpu.memory_space<vmem>>, vector<1x16x12xf32>
    %229 = vector.shape_cast %228 : vector<1x16x12xf32> to vector<16x12xf32>
    %230 = vector.shape_cast %227 : vector<16x12xf32> to vector<1x16x12xf32>
    tpu.vector_store %arg17[%c0_67, %c0_68, %c0_69], %230 {strides = array<i32>} : memref<16x16x12xf32, #tpu.memory_space<vmem>>, vector<1x16x12xf32>,
    %231 = vector.extract_strided_slice %211 {offsets = [1, 0, 0], sizes = [1, 16, 4], strides = [1, 1, 1]} : vector<16x16x4xf32> to vector<1x16x4xf32>
    %232 = vector.shape_cast %231 : vector<1x16x4xf32> to vector<16x4xf32>
    %cst_70 = arith.constant dense<0.000000e+00> : vector<16x12xf32>
    %233 = tpu.matmul %232, %212, %cst_70 {dimension_numbers = #tpu.dot_dimension_numbers<[1], [0], [0], [1], [0, 0, 1, 1], [], []>} : vector<16x4xf32>, vector<4x12xf32>, vector<16x12xf32> -> vector<16x12xf32>
    %234 = vector.shape_cast %214 : vector<12xf32> to vector<1x12xf32>
    %235 = vector.broadcast %234 : vector<1x12xf32> to vector<16x12xf32>
    %236 = arith.mulf %233, %235 : vector<16x12xf32>
    %237 = vector.shape_cast %216 : vector<12xf32> to vector<1x12xf32>
    %238 = vector.broadcast %237 : vector<1x12xf32> to vector<16x12xf32>
    %239 = arith.addf %236, %238 : vector<16x12xf32>
    %cst_71 = arith.constant 0.000000e+00 : f32
    %240 = vector.broadcast %cst_71 : f32 to vector<16x12xf32>
    %241 = arith.maximumf %239, %240 : vector<16x12xf32>
    %c1_72 = arith.constant 1 : index
    %c0_73 = arith.constant 0 : index
    %c0_74 = arith.constant 0 : index
    %242 = vector.load %arg17[%c1_72, %c0_73, %c0_74] : memref<16x16x12xf32, #tpu.memory_space<vmem>>, vector<1x16x12xf32>
    %243 = vector.shape_cast %242 : vector<1x16x12xf32> to vector<16x12xf32>
    %244 = vector.shape_cast %241 : vector<16x12xf32> to vector<1x16x12xf32>
    tpu.vector_store %arg17[%c1_72, %c0_73, %c0_74], %244 {strides = array<i32>} : memref<16x16x12xf32, #tpu.memory_space<vmem>>, vector<1x16x12xf32>,
    %245 = vector.extract_strided_slice %211 {offsets = [2, 0, 0], sizes = [1, 16, 4], strides = [1, 1, 1]} : vector<16x16x4xf32> to vector<1x16x4xf32>
    %246 = vector.shape_cast %245 : vector<1x16x4xf32> to vector<16x4xf32>
    %cst_75 = arith.constant dense<0.000000e+00> : vector<16x12xf32>
    %247 = tpu.matmul %246, %212, %cst_75 {dimension_numbers = #tpu.dot_dimension_numbers<[1], [0], [0], [1], [0, 0, 1, 1], [], []>} : vector<16x4xf32>, vector<4x12xf32>, vector<16x12xf32> -> vector<16x12xf32>
    %248 = vector.shape_cast %214 : vector<12xf32> to vector<1x12xf32>
    %249 = vector.broadcast %248 : vector<1x12xf32> to vector<16x12xf32>
    %250 = arith.mulf %247, %249 : vector<16x12xf32>
    %251 = vector.shape_cast %216 : vector<12xf32> to vector<1x12xf32>
    %252 = vector.broadcast %251 : vector<1x12xf32> to vector<16x12xf32>
    %253 = arith.addf %250, %252 : vector<16x12xf32>
    %cst_76 = arith.constant 0.000000e+00 : f32
    %254 = vector.broadcast %cst_76 : f32 to vector<16x12xf32>
    %255 = arith.maximumf %253, %254 : vector<16x12xf32>
    %c2_77 = arith.constant 2 : index
    %c0_78 = arith.constant 0 : index
    %c0_79 = arith.constant 0 : index
    %256 = vector.load %arg17[%c2_77, %c0_78, %c0_79] : memref<16x16x12xf32, #tpu.memory_space<vmem>>, vector<1x16x12xf32>
    %257 = vector.shape_cast %256 : vector<1x16x12xf32> to vector<16x12xf32>
    %258 = vector.shape_cast %255 : vector<16x12xf32> to vector<1x16x12xf32>
    tpu.vector_store %arg17[%c2_77, %c0_78, %c0_79], %258 {strides = array<i32>} : memref<16x16x12xf32, #tpu.memory_space<vmem>>, vector<1x16x12xf32>,
    %259 = vector.extract_strided_slice %211 {offsets = [3, 0, 0], sizes = [1, 16, 4], strides = [1, 1, 1]} : vector<16x16x4xf32> to vector<1x16x4xf32>
    %260 = vector.shape_cast %259 : vector<1x16x4xf32> to vector<16x4xf32>
    %cst_80 = arith.constant dense<0.000000e+00> : vector<16x12xf32>
    %261 = tpu.matmul %260, %212, %cst_80 {dimension_numbers = #tpu.dot_dimension_numbers<[1], [0], [0], [1], [0, 0, 1, 1], [], []>} : vector<16x4xf32>, vector<4x12xf32>, vector<16x12xf32> -> vector<16x12xf32>
    %262 = vector.shape_cast %214 : vector<12xf32> to vector<1x12xf32>
    %263 = vector.broadcast %262 : vector<1x12xf32> to vector<16x12xf32>
    %264 = arith.mulf %261, %263 : vector<16x12xf32>
    %265 = vector.shape_cast %216 : vector<12xf32> to vector<1x12xf32>
    %266 = vector.broadcast %265 : vector<1x12xf32> to vector<16x12xf32>
    %267 = arith.addf %264, %266 : vector<16x12xf32>
    %cst_81 = arith.constant 0.000000e+00 : f32
    %268 = vector.broadcast %cst_81 : f32 to vector<16x12xf32>
    %269 = arith.maximumf %267, %268 : vector<16x12xf32>
    %c3_82 = arith.constant 3 : index
    %c0_83 = arith.constant 0 : index
    %c0_84 = arith.constant 0 : index
    %270 = vector.load %arg17[%c3_82, %c0_83, %c0_84] : memref<16x16x12xf32, #tpu.memory_space<vmem>>, vector<1x16x12xf32>
    %271 = vector.shape_cast %270 : vector<1x16x12xf32> to vector<16x12xf32>
    %272 = vector.shape_cast %269 : vector<16x12xf32> to vector<1x16x12xf32>
    tpu.vector_store %arg17[%c3_82, %c0_83, %c0_84], %272 {strides = array<i32>} : memref<16x16x12xf32, #tpu.memory_space<vmem>>, vector<1x16x12xf32>,
    %273 = vector.extract_strided_slice %211 {offsets = [4, 0, 0], sizes = [1, 16, 4], strides = [1, 1, 1]} : vector<16x16x4xf32> to vector<1x16x4xf32>
    %274 = vector.shape_cast %273 : vector<1x16x4xf32> to vector<16x4xf32>
    %cst_85 = arith.constant dense<0.000000e+00> : vector<16x12xf32>
    %275 = tpu.matmul %274, %212, %cst_85 {dimension_numbers = #tpu.dot_dimension_numbers<[1], [0], [0], [1], [0, 0, 1, 1], [], []>} : vector<16x4xf32>, vector<4x12xf32>, vector<16x12xf32> -> vector<16x12xf32>
    %276 = vector.shape_cast %214 : vector<12xf32> to vector<1x12xf32>
    %277 = vector.broadcast %276 : vector<1x12xf32> to vector<16x12xf32>
    %278 = arith.mulf %275, %277 : vector<16x12xf32>
    %279 = vector.shape_cast %216 : vector<12xf32> to vector<1x12xf32>
    %280 = vector.broadcast %279 : vector<1x12xf32> to vector<16x12xf32>
    %281 = arith.addf %278, %280 : vector<16x12xf32>
    %cst_86 = arith.constant 0.000000e+00 : f32
    %282 = vector.broadcast %cst_86 : f32 to vector<16x12xf32>
    %283 = arith.maximumf %281, %282 : vector<16x12xf32>
    %c4_87 = arith.constant 4 : index
    %c0_88 = arith.constant 0 : index
    %c0_89 = arith.constant 0 : index
    %284 = vector.load %arg17[%c4_87, %c0_88, %c0_89] : memref<16x16x12xf32, #tpu.memory_space<vmem>>, vector<1x16x12xf32>
    %285 = vector.shape_cast %284 : vector<1x16x12xf32> to vector<16x12xf32>
    %286 = vector.shape_cast %283 : vector<16x12xf32> to vector<1x16x12xf32>
    tpu.vector_store %arg17[%c4_87, %c0_88, %c0_89], %286 {strides = array<i32>} : memref<16x16x12xf32, #tpu.memory_space<vmem>>, vector<1x16x12xf32>,
    %287 = vector.extract_strided_slice %211 {offsets = [5, 0, 0], sizes = [1, 16, 4], strides = [1, 1, 1]} : vector<16x16x4xf32> to vector<1x16x4xf32>
    %288 = vector.shape_cast %287 : vector<1x16x4xf32> to vector<16x4xf32>
    %cst_90 = arith.constant dense<0.000000e+00> : vector<16x12xf32>
    %289 = tpu.matmul %288, %212, %cst_90 {dimension_numbers = #tpu.dot_dimension_numbers<[1], [0], [0], [1], [0, 0, 1, 1], [], []>} : vector<16x4xf32>, vector<4x12xf32>, vector<16x12xf32> -> vector<16x12xf32>
    %290 = vector.shape_cast %214 : vector<12xf32> to vector<1x12xf32>
    %291 = vector.broadcast %290 : vector<1x12xf32> to vector<16x12xf32>
    %292 = arith.mulf %289, %291 : vector<16x12xf32>
    %293 = vector.shape_cast %216 : vector<12xf32> to vector<1x12xf32>
    %294 = vector.broadcast %293 : vector<1x12xf32> to vector<16x12xf32>
    %295 = arith.addf %292, %294 : vector<16x12xf32>
    %cst_91 = arith.constant 0.000000e+00 : f32
    %296 = vector.broadcast %cst_91 : f32 to vector<16x12xf32>
    %297 = arith.maximumf %295, %296 : vector<16x12xf32>
    %c5_92 = arith.constant 5 : index
    %c0_93 = arith.constant 0 : index
    %c0_94 = arith.constant 0 : index
    %298 = vector.load %arg17[%c5_92, %c0_93, %c0_94] : memref<16x16x12xf32, #tpu.memory_space<vmem>>, vector<1x16x12xf32>
    %299 = vector.shape_cast %298 : vector<1x16x12xf32> to vector<16x12xf32>
    %300 = vector.shape_cast %297 : vector<16x12xf32> to vector<1x16x12xf32>
    tpu.vector_store %arg17[%c5_92, %c0_93, %c0_94], %300 {strides = array<i32>} : memref<16x16x12xf32, #tpu.memory_space<vmem>>, vector<1x16x12xf32>,
    %301 = vector.extract_strided_slice %211 {offsets = [6, 0, 0], sizes = [1, 16, 4], strides = [1, 1, 1]} : vector<16x16x4xf32> to vector<1x16x4xf32>
    %302 = vector.shape_cast %301 : vector<1x16x4xf32> to vector<16x4xf32>
    %cst_95 = arith.constant dense<0.000000e+00> : vector<16x12xf32>
    %303 = tpu.matmul %302, %212, %cst_95 {dimension_numbers = #tpu.dot_dimension_numbers<[1], [0], [0], [1], [0, 0, 1, 1], [], []>} : vector<16x4xf32>, vector<4x12xf32>, vector<16x12xf32> -> vector<16x12xf32>
    %304 = vector.shape_cast %214 : vector<12xf32> to vector<1x12xf32>
    %305 = vector.broadcast %304 : vector<1x12xf32> to vector<16x12xf32>
    %306 = arith.mulf %303, %305 : vector<16x12xf32>
    %307 = vector.shape_cast %216 : vector<12xf32> to vector<1x12xf32>
    %308 = vector.broadcast %307 : vector<1x12xf32> to vector<16x12xf32>
    %309 = arith.addf %306, %308 : vector<16x12xf32>
    %cst_96 = arith.constant 0.000000e+00 : f32
    %310 = vector.broadcast %cst_96 : f32 to vector<16x12xf32>
    %311 = arith.maximumf %309, %310 : vector<16x12xf32>
    %c6_97 = arith.constant 6 : index
    %c0_98 = arith.constant 0 : index
    %c0_99 = arith.constant 0 : index
    %312 = vector.load %arg17[%c6_97, %c0_98, %c0_99] : memref<16x16x12xf32, #tpu.memory_space<vmem>>, vector<1x16x12xf32>
    %313 = vector.shape_cast %312 : vector<1x16x12xf32> to vector<16x12xf32>
    %314 = vector.shape_cast %311 : vector<16x12xf32> to vector<1x16x12xf32>
    tpu.vector_store %arg17[%c6_97, %c0_98, %c0_99], %314 {strides = array<i32>} : memref<16x16x12xf32, #tpu.memory_space<vmem>>, vector<1x16x12xf32>,
    %315 = vector.extract_strided_slice %211 {offsets = [7, 0, 0], sizes = [1, 16, 4], strides = [1, 1, 1]} : vector<16x16x4xf32> to vector<1x16x4xf32>
    %316 = vector.shape_cast %315 : vector<1x16x4xf32> to vector<16x4xf32>
    %cst_100 = arith.constant dense<0.000000e+00> : vector<16x12xf32>
    %317 = tpu.matmul %316, %212, %cst_100 {dimension_numbers = #tpu.dot_dimension_numbers<[1], [0], [0], [1], [0, 0, 1, 1], [], []>} : vector<16x4xf32>, vector<4x12xf32>, vector<16x12xf32> -> vector<16x12xf32>
    %318 = vector.shape_cast %214 : vector<12xf32> to vector<1x12xf32>
    %319 = vector.broadcast %318 : vector<1x12xf32> to vector<16x12xf32>
    %320 = arith.mulf %317, %319 : vector<16x12xf32>
    %321 = vector.shape_cast %216 : vector<12xf32> to vector<1x12xf32>
    %322 = vector.broadcast %321 : vector<1x12xf32> to vector<16x12xf32>
    %323 = arith.addf %320, %322 : vector<16x12xf32>
    %cst_101 = arith.constant 0.000000e+00 : f32
    %324 = vector.broadcast %cst_101 : f32 to vector<16x12xf32>
    %325 = arith.maximumf %323, %324 : vector<16x12xf32>
    %c7_102 = arith.constant 7 : index
    %c0_103 = arith.constant 0 : index
    %c0_104 = arith.constant 0 : index
    %326 = vector.load %arg17[%c7_102, %c0_103, %c0_104] : memref<16x16x12xf32, #tpu.memory_space<vmem>>, vector<1x16x12xf32>
    %327 = vector.shape_cast %326 : vector<1x16x12xf32> to vector<16x12xf32>
    %328 = vector.shape_cast %325 : vector<16x12xf32> to vector<1x16x12xf32>
    tpu.vector_store %arg17[%c7_102, %c0_103, %c0_104], %328 {strides = array<i32>} : memref<16x16x12xf32, #tpu.memory_space<vmem>>, vector<1x16x12xf32>,
    %329 = vector.extract_strided_slice %211 {offsets = [8, 0, 0], sizes = [1, 16, 4], strides = [1, 1, 1]} : vector<16x16x4xf32> to vector<1x16x4xf32>
    %330 = vector.shape_cast %329 : vector<1x16x4xf32> to vector<16x4xf32>
    %cst_105 = arith.constant dense<0.000000e+00> : vector<16x12xf32>
    %331 = tpu.matmul %330, %212, %cst_105 {dimension_numbers = #tpu.dot_dimension_numbers<[1], [0], [0], [1], [0, 0, 1, 1], [], []>} : vector<16x4xf32>, vector<4x12xf32>, vector<16x12xf32> -> vector<16x12xf32>
    %332 = vector.shape_cast %214 : vector<12xf32> to vector<1x12xf32>
    %333 = vector.broadcast %332 : vector<1x12xf32> to vector<16x12xf32>
    %334 = arith.mulf %331, %333 : vector<16x12xf32>
    %335 = vector.shape_cast %216 : vector<12xf32> to vector<1x12xf32>
    %336 = vector.broadcast %335 : vector<1x12xf32> to vector<16x12xf32>
    %337 = arith.addf %334, %336 : vector<16x12xf32>
    %cst_106 = arith.constant 0.000000e+00 : f32
    %338 = vector.broadcast %cst_106 : f32 to vector<16x12xf32>
    %339 = arith.maximumf %337, %338 : vector<16x12xf32>
    %c8_107 = arith.constant 8 : index
    %c0_108 = arith.constant 0 : index
    %c0_109 = arith.constant 0 : index
    %340 = vector.load %arg17[%c8_107, %c0_108, %c0_109] : memref<16x16x12xf32, #tpu.memory_space<vmem>>, vector<1x16x12xf32>
    %341 = vector.shape_cast %340 : vector<1x16x12xf32> to vector<16x12xf32>
    %342 = vector.shape_cast %339 : vector<16x12xf32> to vector<1x16x12xf32>
    tpu.vector_store %arg17[%c8_107, %c0_108, %c0_109], %342 {strides = array<i32>} : memref<16x16x12xf32, #tpu.memory_space<vmem>>, vector<1x16x12xf32>,
    %343 = vector.extract_strided_slice %211 {offsets = [9, 0, 0], sizes = [1, 16, 4], strides = [1, 1, 1]} : vector<16x16x4xf32> to vector<1x16x4xf32>
    %344 = vector.shape_cast %343 : vector<1x16x4xf32> to vector<16x4xf32>
    %cst_110 = arith.constant dense<0.000000e+00> : vector<16x12xf32>
    %345 = tpu.matmul %344, %212, %cst_110 {dimension_numbers = #tpu.dot_dimension_numbers<[1], [0], [0], [1], [0, 0, 1, 1], [], []>} : vector<16x4xf32>, vector<4x12xf32>, vector<16x12xf32> -> vector<16x12xf32>
    %346 = vector.shape_cast %214 : vector<12xf32> to vector<1x12xf32>
    %347 = vector.broadcast %346 : vector<1x12xf32> to vector<16x12xf32>
    %348 = arith.mulf %345, %347 : vector<16x12xf32>
    %349 = vector.shape_cast %216 : vector<12xf32> to vector<1x12xf32>
    %350 = vector.broadcast %349 : vector<1x12xf32> to vector<16x12xf32>
    %351 = arith.addf %348, %350 : vector<16x12xf32>
    %cst_111 = arith.constant 0.000000e+00 : f32
    %352 = vector.broadcast %cst_111 : f32 to vector<16x12xf32>
    %353 = arith.maximumf %351, %352 : vector<16x12xf32>
    %c9 = arith.constant 9 : index
    %c0_112 = arith.constant 0 : index
    %c0_113 = arith.constant 0 : index
    %354 = vector.load %arg17[%c9, %c0_112, %c0_113] : memref<16x16x12xf32, #tpu.memory_space<vmem>>, vector<1x16x12xf32>
    %355 = vector.shape_cast %354 : vector<1x16x12xf32> to vector<16x12xf32>
    %356 = vector.shape_cast %353 : vector<16x12xf32> to vector<1x16x12xf32>
    tpu.vector_store %arg17[%c9, %c0_112, %c0_113], %356 {strides = array<i32>} : memref<16x16x12xf32, #tpu.memory_space<vmem>>, vector<1x16x12xf32>,
    %357 = vector.extract_strided_slice %211 {offsets = [10, 0, 0], sizes = [1, 16, 4], strides = [1, 1, 1]} : vector<16x16x4xf32> to vector<1x16x4xf32>
    %358 = vector.shape_cast %357 : vector<1x16x4xf32> to vector<16x4xf32>
    %cst_114 = arith.constant dense<0.000000e+00> : vector<16x12xf32>
    %359 = tpu.matmul %358, %212, %cst_114 {dimension_numbers = #tpu.dot_dimension_numbers<[1], [0], [0], [1], [0, 0, 1, 1], [], []>} : vector<16x4xf32>, vector<4x12xf32>, vector<16x12xf32> -> vector<16x12xf32>
    %360 = vector.shape_cast %214 : vector<12xf32> to vector<1x12xf32>
    %361 = vector.broadcast %360 : vector<1x12xf32> to vector<16x12xf32>
    %362 = arith.mulf %359, %361 : vector<16x12xf32>
    %363 = vector.shape_cast %216 : vector<12xf32> to vector<1x12xf32>
    %364 = vector.broadcast %363 : vector<1x12xf32> to vector<16x12xf32>
    %365 = arith.addf %362, %364 : vector<16x12xf32>
    %cst_115 = arith.constant 0.000000e+00 : f32
    %366 = vector.broadcast %cst_115 : f32 to vector<16x12xf32>
    %367 = arith.maximumf %365, %366 : vector<16x12xf32>
    %c10 = arith.constant 10 : index
    %c0_116 = arith.constant 0 : index
    %c0_117 = arith.constant 0 : index
    %368 = vector.load %arg17[%c10, %c0_116, %c0_117] : memref<16x16x12xf32, #tpu.memory_space<vmem>>, vector<1x16x12xf32>
    %369 = vector.shape_cast %368 : vector<1x16x12xf32> to vector<16x12xf32>
    %370 = vector.shape_cast %367 : vector<16x12xf32> to vector<1x16x12xf32>
    tpu.vector_store %arg17[%c10, %c0_116, %c0_117], %370 {strides = array<i32>} : memref<16x16x12xf32, #tpu.memory_space<vmem>>, vector<1x16x12xf32>,
    %371 = vector.extract_strided_slice %211 {offsets = [11, 0, 0], sizes = [1, 16, 4], strides = [1, 1, 1]} : vector<16x16x4xf32> to vector<1x16x4xf32>
    %372 = vector.shape_cast %371 : vector<1x16x4xf32> to vector<16x4xf32>
    %cst_118 = arith.constant dense<0.000000e+00> : vector<16x12xf32>
    %373 = tpu.matmul %372, %212, %cst_118 {dimension_numbers = #tpu.dot_dimension_numbers<[1], [0], [0], [1], [0, 0, 1, 1], [], []>} : vector<16x4xf32>, vector<4x12xf32>, vector<16x12xf32> -> vector<16x12xf32>
    %374 = vector.shape_cast %214 : vector<12xf32> to vector<1x12xf32>
    %375 = vector.broadcast %374 : vector<1x12xf32> to vector<16x12xf32>
    %376 = arith.mulf %373, %375 : vector<16x12xf32>
    %377 = vector.shape_cast %216 : vector<12xf32> to vector<1x12xf32>
    %378 = vector.broadcast %377 : vector<1x12xf32> to vector<16x12xf32>
    %379 = arith.addf %376, %378 : vector<16x12xf32>
    %cst_119 = arith.constant 0.000000e+00 : f32
    %380 = vector.broadcast %cst_119 : f32 to vector<16x12xf32>
    %381 = arith.maximumf %379, %380 : vector<16x12xf32>
    %c11 = arith.constant 11 : index
    %c0_120 = arith.constant 0 : index
    %c0_121 = arith.constant 0 : index
    %382 = vector.load %arg17[%c11, %c0_120, %c0_121] : memref<16x16x12xf32, #tpu.memory_space<vmem>>, vector<1x16x12xf32>
    %383 = vector.shape_cast %382 : vector<1x16x12xf32> to vector<16x12xf32>
    %384 = vector.shape_cast %381 : vector<16x12xf32> to vector<1x16x12xf32>
    tpu.vector_store %arg17[%c11, %c0_120, %c0_121], %384 {strides = array<i32>} : memref<16x16x12xf32, #tpu.memory_space<vmem>>, vector<1x16x12xf32>,
    %385 = vector.extract_strided_slice %211 {offsets = [12, 0, 0], sizes = [1, 16, 4], strides = [1, 1, 1]} : vector<16x16x4xf32> to vector<1x16x4xf32>
    %386 = vector.shape_cast %385 : vector<1x16x4xf32> to vector<16x4xf32>
    %cst_122 = arith.constant dense<0.000000e+00> : vector<16x12xf32>
    %387 = tpu.matmul %386, %212, %cst_122 {dimension_numbers = #tpu.dot_dimension_numbers<[1], [0], [0], [1], [0, 0, 1, 1], [], []>} : vector<16x4xf32>, vector<4x12xf32>, vector<16x12xf32> -> vector<16x12xf32>
    %388 = vector.shape_cast %214 : vector<12xf32> to vector<1x12xf32>
    %389 = vector.broadcast %388 : vector<1x12xf32> to vector<16x12xf32>
    %390 = arith.mulf %387, %389 : vector<16x12xf32>
    %391 = vector.shape_cast %216 : vector<12xf32> to vector<1x12xf32>
    %392 = vector.broadcast %391 : vector<1x12xf32> to vector<16x12xf32>
    %393 = arith.addf %390, %392 : vector<16x12xf32>
    %cst_123 = arith.constant 0.000000e+00 : f32
    %394 = vector.broadcast %cst_123 : f32 to vector<16x12xf32>
    %395 = arith.maximumf %393, %394 : vector<16x12xf32>
    %c12 = arith.constant 12 : index
    %c0_124 = arith.constant 0 : index
    %c0_125 = arith.constant 0 : index
    %396 = vector.load %arg17[%c12, %c0_124, %c0_125] : memref<16x16x12xf32, #tpu.memory_space<vmem>>, vector<1x16x12xf32>
    %397 = vector.shape_cast %396 : vector<1x16x12xf32> to vector<16x12xf32>
    %398 = vector.shape_cast %395 : vector<16x12xf32> to vector<1x16x12xf32>
    tpu.vector_store %arg17[%c12, %c0_124, %c0_125], %398 {strides = array<i32>} : memref<16x16x12xf32, #tpu.memory_space<vmem>>, vector<1x16x12xf32>,
    %399 = vector.extract_strided_slice %211 {offsets = [13, 0, 0], sizes = [1, 16, 4], strides = [1, 1, 1]} : vector<16x16x4xf32> to vector<1x16x4xf32>
    %400 = vector.shape_cast %399 : vector<1x16x4xf32> to vector<16x4xf32>
    %cst_126 = arith.constant dense<0.000000e+00> : vector<16x12xf32>
    %401 = tpu.matmul %400, %212, %cst_126 {dimension_numbers = #tpu.dot_dimension_numbers<[1], [0], [0], [1], [0, 0, 1, 1], [], []>} : vector<16x4xf32>, vector<4x12xf32>, vector<16x12xf32> -> vector<16x12xf32>
    %402 = vector.shape_cast %214 : vector<12xf32> to vector<1x12xf32>
    %403 = vector.broadcast %402 : vector<1x12xf32> to vector<16x12xf32>
    %404 = arith.mulf %401, %403 : vector<16x12xf32>
    %405 = vector.shape_cast %216 : vector<12xf32> to vector<1x12xf32>
    %406 = vector.broadcast %405 : vector<1x12xf32> to vector<16x12xf32>
    %407 = arith.addf %404, %406 : vector<16x12xf32>
    %cst_127 = arith.constant 0.000000e+00 : f32
    %408 = vector.broadcast %cst_127 : f32 to vector<16x12xf32>
    %409 = arith.maximumf %407, %408 : vector<16x12xf32>
    %c13 = arith.constant 13 : index
    %c0_128 = arith.constant 0 : index
    %c0_129 = arith.constant 0 : index
    %410 = vector.load %arg17[%c13, %c0_128, %c0_129] : memref<16x16x12xf32, #tpu.memory_space<vmem>>, vector<1x16x12xf32>
    %411 = vector.shape_cast %410 : vector<1x16x12xf32> to vector<16x12xf32>
    %412 = vector.shape_cast %409 : vector<16x12xf32> to vector<1x16x12xf32>
    tpu.vector_store %arg17[%c13, %c0_128, %c0_129], %412 {strides = array<i32>} : memref<16x16x12xf32, #tpu.memory_space<vmem>>, vector<1x16x12xf32>,
    %413 = vector.extract_strided_slice %211 {offsets = [14, 0, 0], sizes = [1, 16, 4], strides = [1, 1, 1]} : vector<16x16x4xf32> to vector<1x16x4xf32>
    %414 = vector.shape_cast %413 : vector<1x16x4xf32> to vector<16x4xf32>
    %cst_130 = arith.constant dense<0.000000e+00> : vector<16x12xf32>
    %415 = tpu.matmul %414, %212, %cst_130 {dimension_numbers = #tpu.dot_dimension_numbers<[1], [0], [0], [1], [0, 0, 1, 1], [], []>} : vector<16x4xf32>, vector<4x12xf32>, vector<16x12xf32> -> vector<16x12xf32>
    %416 = vector.shape_cast %214 : vector<12xf32> to vector<1x12xf32>
    %417 = vector.broadcast %416 : vector<1x12xf32> to vector<16x12xf32>
    %418 = arith.mulf %415, %417 : vector<16x12xf32>
    %419 = vector.shape_cast %216 : vector<12xf32> to vector<1x12xf32>
    %420 = vector.broadcast %419 : vector<1x12xf32> to vector<16x12xf32>
    %421 = arith.addf %418, %420 : vector<16x12xf32>
    %cst_131 = arith.constant 0.000000e+00 : f32
    %422 = vector.broadcast %cst_131 : f32 to vector<16x12xf32>
    %423 = arith.maximumf %421, %422 : vector<16x12xf32>
    %c14 = arith.constant 14 : index
    %c0_132 = arith.constant 0 : index
    %c0_133 = arith.constant 0 : index
    %424 = vector.load %arg17[%c14, %c0_132, %c0_133] : memref<16x16x12xf32, #tpu.memory_space<vmem>>, vector<1x16x12xf32>
    %425 = vector.shape_cast %424 : vector<1x16x12xf32> to vector<16x12xf32>
    %426 = vector.shape_cast %423 : vector<16x12xf32> to vector<1x16x12xf32>
    tpu.vector_store %arg17[%c14, %c0_132, %c0_133], %426 {strides = array<i32>} : memref<16x16x12xf32, #tpu.memory_space<vmem>>, vector<1x16x12xf32>,
    %427 = vector.extract_strided_slice %211 {offsets = [15, 0, 0], sizes = [1, 16, 4], strides = [1, 1, 1]} : vector<16x16x4xf32> to vector<1x16x4xf32>
    %428 = vector.shape_cast %427 : vector<1x16x4xf32> to vector<16x4xf32>
    %cst_134 = arith.constant dense<0.000000e+00> : vector<16x12xf32>
    %429 = tpu.matmul %428, %212, %cst_134 {dimension_numbers = #tpu.dot_dimension_numbers<[1], [0], [0], [1], [0, 0, 1, 1], [], []>} : vector<16x4xf32>, vector<4x12xf32>, vector<16x12xf32> -> vector<16x12xf32>
    %430 = vector.shape_cast %214 : vector<12xf32> to vector<1x12xf32>
    %431 = vector.broadcast %430 : vector<1x12xf32> to vector<16x12xf32>
    %432 = arith.mulf %429, %431 : vector<16x12xf32>
    %433 = vector.shape_cast %216 : vector<12xf32> to vector<1x12xf32>
    %434 = vector.broadcast %433 : vector<1x12xf32> to vector<16x12xf32>
    %435 = arith.addf %432, %434 : vector<16x12xf32>
    %cst_135 = arith.constant 0.000000e+00 : f32
    %436 = vector.broadcast %cst_135 : f32 to vector<16x12xf32>
    %437 = arith.maximumf %435, %436 : vector<16x12xf32>
    %c15 = arith.constant 15 : index
    %c0_136 = arith.constant 0 : index
    %c0_137 = arith.constant 0 : index
    %438 = vector.load %arg17[%c15, %c0_136, %c0_137] : memref<16x16x12xf32, #tpu.memory_space<vmem>>, vector<1x16x12xf32>
    %439 = vector.shape_cast %438 : vector<1x16x12xf32> to vector<16x12xf32>
    %440 = vector.shape_cast %437 : vector<16x12xf32> to vector<1x16x12xf32>
    tpu.vector_store %arg17[%c15, %c0_136, %c0_137], %440 {strides = array<i32>} : memref<16x16x12xf32, #tpu.memory_space<vmem>>, vector<1x16x12xf32>,
    %c0_138 = arith.constant 0 : index
    %c0_139 = arith.constant 0 : index
    %c0_140 = arith.constant 0 : index
    %441 = vector.load %arg17[%c0_138, %c0_139, %c0_140] : memref<16x16x12xf32, #tpu.memory_space<vmem>>, vector<16x16x12xf32>
    %c0_141 = arith.constant 0 : index
    %c0_142 = arith.constant 0 : index
    %442 = vector.load %arg9[%c0_141, %c0_142] : memref<9x12xf32, #tpu.memory_space<vmem>>, vector<9x12xf32>
    %c0_143 = arith.constant 0 : index
    %c0_144 = arith.constant 0 : index
    %443 = vector.load %arg10[%c0_143, %c0_144] : memref<2x12xf32, #tpu.memory_space<vmem>>, vector<1x12xf32>
    %444 = vector.shape_cast %443 : vector<1x12xf32> to vector<12xf32>
    %c1_145 = arith.constant 1 : index
    %c0_146 = arith.constant 0 : index
    %445 = vector.load %arg10[%c1_145, %c0_146] : memref<2x12xf32, #tpu.memory_space<vmem>>, vector<1x12xf32>
    %446 = vector.shape_cast %445 : vector<1x12xf32> to vector<12xf32>
    %447 = vector.extract_strided_slice %441 {offsets = [0, 0, 0], sizes = [14, 14, 12], strides = [1, 1, 1]} : vector<16x16x12xf32> to vector<14x14x12xf32>
    %448 = vector.extract_strided_slice %442 {offsets = [0, 0], sizes = [1, 12], strides = [1, 1]} : vector<9x12xf32> to vector<1x12xf32>
    %449 = vector.shape_cast %448 : vector<1x12xf32> to vector<12xf32>
    %450 = vector.shape_cast %449 : vector<12xf32> to vector<1x1x12xf32>
    %451 = vector.broadcast %450 : vector<1x1x12xf32> to vector<14x14x12xf32>
    %452 = arith.mulf %447, %451 : vector<14x14x12xf32>
    %453 = vector.extract_strided_slice %441 {offsets = [0, 1, 0], sizes = [14, 14, 12], strides = [1, 1, 1]} : vector<16x16x12xf32> to vector<14x14x12xf32>
    %454 = vector.extract_strided_slice %442 {offsets = [1, 0], sizes = [1, 12], strides = [1, 1]} : vector<9x12xf32> to vector<1x12xf32>
    %455 = vector.shape_cast %454 : vector<1x12xf32> to vector<12xf32>
    %456 = vector.shape_cast %455 : vector<12xf32> to vector<1x1x12xf32>
    %457 = vector.broadcast %456 : vector<1x1x12xf32> to vector<14x14x12xf32>
    %458 = arith.mulf %453, %457 : vector<14x14x12xf32>
    %459 = arith.addf %452, %458 : vector<14x14x12xf32>
    %460 = vector.extract_strided_slice %441 {offsets = [0, 2, 0], sizes = [14, 14, 12], strides = [1, 1, 1]} : vector<16x16x12xf32> to vector<14x14x12xf32>
    %461 = vector.extract_strided_slice %442 {offsets = [2, 0], sizes = [1, 12], strides = [1, 1]} : vector<9x12xf32> to vector<1x12xf32>
    %462 = vector.shape_cast %461 : vector<1x12xf32> to vector<12xf32>
    %463 = vector.shape_cast %462 : vector<12xf32> to vector<1x1x12xf32>
    %464 = vector.broadcast %463 : vector<1x1x12xf32> to vector<14x14x12xf32>
    %465 = arith.mulf %460, %464 : vector<14x14x12xf32>
    %466 = arith.addf %459, %465 : vector<14x14x12xf32>
    %467 = vector.extract_strided_slice %441 {offsets = [1, 0, 0], sizes = [14, 14, 12], strides = [1, 1, 1]} : vector<16x16x12xf32> to vector<14x14x12xf32>
    %468 = vector.extract_strided_slice %442 {offsets = [3, 0], sizes = [1, 12], strides = [1, 1]} : vector<9x12xf32> to vector<1x12xf32>
    %469 = vector.shape_cast %468 : vector<1x12xf32> to vector<12xf32>
    %470 = vector.shape_cast %469 : vector<12xf32> to vector<1x1x12xf32>
    %471 = vector.broadcast %470 : vector<1x1x12xf32> to vector<14x14x12xf32>
    %472 = arith.mulf %467, %471 : vector<14x14x12xf32>
    %473 = arith.addf %466, %472 : vector<14x14x12xf32>
    %474 = vector.extract_strided_slice %441 {offsets = [1, 1, 0], sizes = [14, 14, 12], strides = [1, 1, 1]} : vector<16x16x12xf32> to vector<14x14x12xf32>
    %475 = vector.extract_strided_slice %442 {offsets = [4, 0], sizes = [1, 12], strides = [1, 1]} : vector<9x12xf32> to vector<1x12xf32>
    %476 = vector.shape_cast %475 : vector<1x12xf32> to vector<12xf32>
    %477 = vector.shape_cast %476 : vector<12xf32> to vector<1x1x12xf32>
    %478 = vector.broadcast %477 : vector<1x1x12xf32> to vector<14x14x12xf32>
    %479 = arith.mulf %474, %478 : vector<14x14x12xf32>
    %480 = arith.addf %473, %479 : vector<14x14x12xf32>
    %481 = vector.extract_strided_slice %441 {offsets = [1, 2, 0], sizes = [14, 14, 12], strides = [1, 1, 1]} : vector<16x16x12xf32> to vector<14x14x12xf32>
    %482 = vector.extract_strided_slice %442 {offsets = [5, 0], sizes = [1, 12], strides = [1, 1]} : vector<9x12xf32> to vector<1x12xf32>
    %483 = vector.shape_cast %482 : vector<1x12xf32> to vector<12xf32>
    %484 = vector.shape_cast %483 : vector<12xf32> to vector<1x1x12xf32>
    %485 = vector.broadcast %484 : vector<1x1x12xf32> to vector<14x14x12xf32>
    %486 = arith.mulf %481, %485 : vector<14x14x12xf32>
    %487 = arith.addf %480, %486 : vector<14x14x12xf32>
    %488 = vector.extract_strided_slice %441 {offsets = [2, 0, 0], sizes = [14, 14, 12], strides = [1, 1, 1]} : vector<16x16x12xf32> to vector<14x14x12xf32>
    %489 = vector.extract_strided_slice %442 {offsets = [6, 0], sizes = [1, 12], strides = [1, 1]} : vector<9x12xf32> to vector<1x12xf32>
    %490 = vector.shape_cast %489 : vector<1x12xf32> to vector<12xf32>
    %491 = vector.shape_cast %490 : vector<12xf32> to vector<1x1x12xf32>
    %492 = vector.broadcast %491 : vector<1x1x12xf32> to vector<14x14x12xf32>
    %493 = arith.mulf %488, %492 : vector<14x14x12xf32>
    %494 = arith.addf %487, %493 : vector<14x14x12xf32>
    %495 = vector.extract_strided_slice %441 {offsets = [2, 1, 0], sizes = [14, 14, 12], strides = [1, 1, 1]} : vector<16x16x12xf32> to vector<14x14x12xf32>
    %496 = vector.extract_strided_slice %442 {offsets = [7, 0], sizes = [1, 12], strides = [1, 1]} : vector<9x12xf32> to vector<1x12xf32>
    %497 = vector.shape_cast %496 : vector<1x12xf32> to vector<12xf32>
    %498 = vector.shape_cast %497 : vector<12xf32> to vector<1x1x12xf32>
    %499 = vector.broadcast %498 : vector<1x1x12xf32> to vector<14x14x12xf32>
    %500 = arith.mulf %495, %499 : vector<14x14x12xf32>
    %501 = arith.addf %494, %500 : vector<14x14x12xf32>
    %502 = vector.extract_strided_slice %441 {offsets = [2, 2, 0], sizes = [14, 14, 12], strides = [1, 1, 1]} : vector<16x16x12xf32> to vector<14x14x12xf32>
    %503 = vector.extract_strided_slice %442 {offsets = [8, 0], sizes = [1, 12], strides = [1, 1]} : vector<9x12xf32> to vector<1x12xf32>
    %504 = vector.shape_cast %503 : vector<1x12xf32> to vector<12xf32>
    %505 = vector.shape_cast %504 : vector<12xf32> to vector<1x1x12xf32>
    %506 = vector.broadcast %505 : vector<1x1x12xf32> to vector<14x14x12xf32>
    %507 = arith.mulf %502, %506 : vector<14x14x12xf32>
    %508 = arith.addf %501, %507 : vector<14x14x12xf32>
    %509 = vector.shape_cast %444 : vector<12xf32> to vector<1x1x12xf32>
    %510 = vector.broadcast %509 : vector<1x1x12xf32> to vector<14x14x12xf32>
    %511 = arith.mulf %508, %510 : vector<14x14x12xf32>
    %512 = vector.shape_cast %446 : vector<12xf32> to vector<1x1x12xf32>
    %513 = vector.broadcast %512 : vector<1x1x12xf32> to vector<14x14x12xf32>
    %514 = arith.addf %511, %513 : vector<14x14x12xf32>
    %cst_147 = arith.constant 0.000000e+00 : f32
    %515 = vector.broadcast %cst_147 : f32 to vector<14x14x12xf32>
    %516 = arith.maximumf %514, %515 : vector<14x14x12xf32>
    %517 = vector.extract_strided_slice %516 {offsets = [0, 0, 0], sizes = [10, 10, 12], strides = [1, 1, 1]} : vector<14x14x12xf32> to vector<10x10x12xf32>
    %518 = vector.extract_strided_slice %209 {offsets = [0, 0, 0], sizes = [1, 1, 12], strides = [1, 1, 1]} : vector<5x5x12xf32> to vector<1x1x12xf32>
    %519 = vector.shape_cast %518 : vector<1x1x12xf32> to vector<12xf32>
    %520 = vector.shape_cast %519 : vector<12xf32> to vector<1x1x12xf32>
    %521 = vector.broadcast %520 : vector<1x1x12xf32> to vector<10x10x12xf32>
    %522 = arith.mulf %517, %521 : vector<10x10x12xf32>
    %523 = vector.extract_strided_slice %516 {offsets = [0, 1, 0], sizes = [10, 10, 12], strides = [1, 1, 1]} : vector<14x14x12xf32> to vector<10x10x12xf32>
    %524 = vector.extract_strided_slice %209 {offsets = [0, 1, 0], sizes = [1, 1, 12], strides = [1, 1, 1]} : vector<5x5x12xf32> to vector<1x1x12xf32>
    %525 = vector.shape_cast %524 : vector<1x1x12xf32> to vector<12xf32>
    %526 = vector.shape_cast %525 : vector<12xf32> to vector<1x1x12xf32>
    %527 = vector.broadcast %526 : vector<1x1x12xf32> to vector<10x10x12xf32>
    %528 = arith.mulf %523, %527 : vector<10x10x12xf32>
    %529 = arith.addf %522, %528 : vector<10x10x12xf32>
    %530 = vector.extract_strided_slice %516 {offsets = [0, 2, 0], sizes = [10, 10, 12], strides = [1, 1, 1]} : vector<14x14x12xf32> to vector<10x10x12xf32>
    %531 = vector.extract_strided_slice %209 {offsets = [0, 2, 0], sizes = [1, 1, 12], strides = [1, 1, 1]} : vector<5x5x12xf32> to vector<1x1x12xf32>
    %532 = vector.shape_cast %531 : vector<1x1x12xf32> to vector<12xf32>
    %533 = vector.shape_cast %532 : vector<12xf32> to vector<1x1x12xf32>
    %534 = vector.broadcast %533 : vector<1x1x12xf32> to vector<10x10x12xf32>
    %535 = arith.mulf %530, %534 : vector<10x10x12xf32>
    %536 = arith.addf %529, %535 : vector<10x10x12xf32>
    %537 = vector.extract_strided_slice %516 {offsets = [0, 3, 0], sizes = [10, 10, 12], strides = [1, 1, 1]} : vector<14x14x12xf32> to vector<10x10x12xf32>
    %538 = vector.extract_strided_slice %209 {offsets = [0, 3, 0], sizes = [1, 1, 12], strides = [1, 1, 1]} : vector<5x5x12xf32> to vector<1x1x12xf32>
    %539 = vector.shape_cast %538 : vector<1x1x12xf32> to vector<12xf32>
    %540 = vector.shape_cast %539 : vector<12xf32> to vector<1x1x12xf32>
    %541 = vector.broadcast %540 : vector<1x1x12xf32> to vector<10x10x12xf32>
    %542 = arith.mulf %537, %541 : vector<10x10x12xf32>
    %543 = arith.addf %536, %542 : vector<10x10x12xf32>
    %544 = vector.extract_strided_slice %516 {offsets = [0, 4, 0], sizes = [10, 10, 12], strides = [1, 1, 1]} : vector<14x14x12xf32> to vector<10x10x12xf32>
    %545 = vector.extract_strided_slice %209 {offsets = [0, 4, 0], sizes = [1, 1, 12], strides = [1, 1, 1]} : vector<5x5x12xf32> to vector<1x1x12xf32>
    %546 = vector.shape_cast %545 : vector<1x1x12xf32> to vector<12xf32>
    %547 = vector.shape_cast %546 : vector<12xf32> to vector<1x1x12xf32>
    %548 = vector.broadcast %547 : vector<1x1x12xf32> to vector<10x10x12xf32>
    %549 = arith.mulf %544, %548 : vector<10x10x12xf32>
    %550 = arith.addf %543, %549 : vector<10x10x12xf32>
    %551 = vector.extract_strided_slice %516 {offsets = [1, 0, 0], sizes = [10, 10, 12], strides = [1, 1, 1]} : vector<14x14x12xf32> to vector<10x10x12xf32>
    %552 = vector.extract_strided_slice %209 {offsets = [1, 0, 0], sizes = [1, 1, 12], strides = [1, 1, 1]} : vector<5x5x12xf32> to vector<1x1x12xf32>
    %553 = vector.shape_cast %552 : vector<1x1x12xf32> to vector<12xf32>
    %554 = vector.shape_cast %553 : vector<12xf32> to vector<1x1x12xf32>
    %555 = vector.broadcast %554 : vector<1x1x12xf32> to vector<10x10x12xf32>
    %556 = arith.mulf %551, %555 : vector<10x10x12xf32>
    %557 = arith.addf %550, %556 : vector<10x10x12xf32>
    %558 = vector.extract_strided_slice %516 {offsets = [1, 1, 0], sizes = [10, 10, 12], strides = [1, 1, 1]} : vector<14x14x12xf32> to vector<10x10x12xf32>
    %559 = vector.extract_strided_slice %209 {offsets = [1, 1, 0], sizes = [1, 1, 12], strides = [1, 1, 1]} : vector<5x5x12xf32> to vector<1x1x12xf32>
    %560 = vector.shape_cast %559 : vector<1x1x12xf32> to vector<12xf32>
    %561 = vector.shape_cast %560 : vector<12xf32> to vector<1x1x12xf32>
    %562 = vector.broadcast %561 : vector<1x1x12xf32> to vector<10x10x12xf32>
    %563 = arith.mulf %558, %562 : vector<10x10x12xf32>
    %564 = arith.addf %557, %563 : vector<10x10x12xf32>
    %565 = vector.extract_strided_slice %516 {offsets = [1, 2, 0], sizes = [10, 10, 12], strides = [1, 1, 1]} : vector<14x14x12xf32> to vector<10x10x12xf32>
    %566 = vector.extract_strided_slice %209 {offsets = [1, 2, 0], sizes = [1, 1, 12], strides = [1, 1, 1]} : vector<5x5x12xf32> to vector<1x1x12xf32>
    %567 = vector.shape_cast %566 : vector<1x1x12xf32> to vector<12xf32>
    %568 = vector.shape_cast %567 : vector<12xf32> to vector<1x1x12xf32>
    %569 = vector.broadcast %568 : vector<1x1x12xf32> to vector<10x10x12xf32>
    %570 = arith.mulf %565, %569 : vector<10x10x12xf32>
    %571 = arith.addf %564, %570 : vector<10x10x12xf32>
    %572 = vector.extract_strided_slice %516 {offsets = [1, 3, 0], sizes = [10, 10, 12], strides = [1, 1, 1]} : vector<14x14x12xf32> to vector<10x10x12xf32>
    %573 = vector.extract_strided_slice %209 {offsets = [1, 3, 0], sizes = [1, 1, 12], strides = [1, 1, 1]} : vector<5x5x12xf32> to vector<1x1x12xf32>
    %574 = vector.shape_cast %573 : vector<1x1x12xf32> to vector<12xf32>
    %575 = vector.shape_cast %574 : vector<12xf32> to vector<1x1x12xf32>
    %576 = vector.broadcast %575 : vector<1x1x12xf32> to vector<10x10x12xf32>
    %577 = arith.mulf %572, %576 : vector<10x10x12xf32>
    %578 = arith.addf %571, %577 : vector<10x10x12xf32>
    %579 = vector.extract_strided_slice %516 {offsets = [1, 4, 0], sizes = [10, 10, 12], strides = [1, 1, 1]} : vector<14x14x12xf32> to vector<10x10x12xf32>
    %580 = vector.extract_strided_slice %209 {offsets = [1, 4, 0], sizes = [1, 1, 12], strides = [1, 1, 1]} : vector<5x5x12xf32> to vector<1x1x12xf32>
    %581 = vector.shape_cast %580 : vector<1x1x12xf32> to vector<12xf32>
    %582 = vector.shape_cast %581 : vector<12xf32> to vector<1x1x12xf32>
    %583 = vector.broadcast %582 : vector<1x1x12xf32> to vector<10x10x12xf32>
    %584 = arith.mulf %579, %583 : vector<10x10x12xf32>
    %585 = arith.addf %578, %584 : vector<10x10x12xf32>
    %586 = vector.extract_strided_slice %516 {offsets = [2, 0, 0], sizes = [10, 10, 12], strides = [1, 1, 1]} : vector<14x14x12xf32> to vector<10x10x12xf32>
    %587 = vector.extract_strided_slice %209 {offsets = [2, 0, 0], sizes = [1, 1, 12], strides = [1, 1, 1]} : vector<5x5x12xf32> to vector<1x1x12xf32>
    %588 = vector.shape_cast %587 : vector<1x1x12xf32> to vector<12xf32>
    %589 = vector.shape_cast %588 : vector<12xf32> to vector<1x1x12xf32>
    %590 = vector.broadcast %589 : vector<1x1x12xf32> to vector<10x10x12xf32>
    %591 = arith.mulf %586, %590 : vector<10x10x12xf32>
    %592 = arith.addf %585, %591 : vector<10x10x12xf32>
    %593 = vector.extract_strided_slice %516 {offsets = [2, 1, 0], sizes = [10, 10, 12], strides = [1, 1, 1]} : vector<14x14x12xf32> to vector<10x10x12xf32>
    %594 = vector.extract_strided_slice %209 {offsets = [2, 1, 0], sizes = [1, 1, 12], strides = [1, 1, 1]} : vector<5x5x12xf32> to vector<1x1x12xf32>
    %595 = vector.shape_cast %594 : vector<1x1x12xf32> to vector<12xf32>
    %596 = vector.shape_cast %595 : vector<12xf32> to vector<1x1x12xf32>
    %597 = vector.broadcast %596 : vector<1x1x12xf32> to vector<10x10x12xf32>
    %598 = arith.mulf %593, %597 : vector<10x10x12xf32>
    %599 = arith.addf %592, %598 : vector<10x10x12xf32>
    %600 = vector.extract_strided_slice %516 {offsets = [2, 2, 0], sizes = [10, 10, 12], strides = [1, 1, 1]} : vector<14x14x12xf32> to vector<10x10x12xf32>
    %601 = vector.extract_strided_slice %209 {offsets = [2, 2, 0], sizes = [1, 1, 12], strides = [1, 1, 1]} : vector<5x5x12xf32> to vector<1x1x12xf32>
    %602 = vector.shape_cast %601 : vector<1x1x12xf32> to vector<12xf32>
    %603 = vector.shape_cast %602 : vector<12xf32> to vector<1x1x12xf32>
    %604 = vector.broadcast %603 : vector<1x1x12xf32> to vector<10x10x12xf32>
    %605 = arith.mulf %600, %604 : vector<10x10x12xf32>
    %606 = arith.addf %599, %605 : vector<10x10x12xf32>
    %607 = vector.extract_strided_slice %516 {offsets = [2, 3, 0], sizes = [10, 10, 12], strides = [1, 1, 1]} : vector<14x14x12xf32> to vector<10x10x12xf32>
    %608 = vector.extract_strided_slice %209 {offsets = [2, 3, 0], sizes = [1, 1, 12], strides = [1, 1, 1]} : vector<5x5x12xf32> to vector<1x1x12xf32>
    %609 = vector.shape_cast %608 : vector<1x1x12xf32> to vector<12xf32>
    %610 = vector.shape_cast %609 : vector<12xf32> to vector<1x1x12xf32>
    %611 = vector.broadcast %610 : vector<1x1x12xf32> to vector<10x10x12xf32>
    %612 = arith.mulf %607, %611 : vector<10x10x12xf32>
    %613 = arith.addf %606, %612 : vector<10x10x12xf32>
    %614 = vector.extract_strided_slice %516 {offsets = [2, 4, 0], sizes = [10, 10, 12], strides = [1, 1, 1]} : vector<14x14x12xf32> to vector<10x10x12xf32>
    %615 = vector.extract_strided_slice %209 {offsets = [2, 4, 0], sizes = [1, 1, 12], strides = [1, 1, 1]} : vector<5x5x12xf32> to vector<1x1x12xf32>
    %616 = vector.shape_cast %615 : vector<1x1x12xf32> to vector<12xf32>
    %617 = vector.shape_cast %616 : vector<12xf32> to vector<1x1x12xf32>
    %618 = vector.broadcast %617 : vector<1x1x12xf32> to vector<10x10x12xf32>
    %619 = arith.mulf %614, %618 : vector<10x10x12xf32>
    %620 = arith.addf %613, %619 : vector<10x10x12xf32>
    %621 = vector.extract_strided_slice %516 {offsets = [3, 0, 0], sizes = [10, 10, 12], strides = [1, 1, 1]} : vector<14x14x12xf32> to vector<10x10x12xf32>
    %622 = vector.extract_strided_slice %209 {offsets = [3, 0, 0], sizes = [1, 1, 12], strides = [1, 1, 1]} : vector<5x5x12xf32> to vector<1x1x12xf32>
    %623 = vector.shape_cast %622 : vector<1x1x12xf32> to vector<12xf32>
    %624 = vector.shape_cast %623 : vector<12xf32> to vector<1x1x12xf32>
    %625 = vector.broadcast %624 : vector<1x1x12xf32> to vector<10x10x12xf32>
    %626 = arith.mulf %621, %625 : vector<10x10x12xf32>
    %627 = arith.addf %620, %626 : vector<10x10x12xf32>
    %628 = vector.extract_strided_slice %516 {offsets = [3, 1, 0], sizes = [10, 10, 12], strides = [1, 1, 1]} : vector<14x14x12xf32> to vector<10x10x12xf32>
    %629 = vector.extract_strided_slice %209 {offsets = [3, 1, 0], sizes = [1, 1, 12], strides = [1, 1, 1]} : vector<5x5x12xf32> to vector<1x1x12xf32>
    %630 = vector.shape_cast %629 : vector<1x1x12xf32> to vector<12xf32>
    %631 = vector.shape_cast %630 : vector<12xf32> to vector<1x1x12xf32>
    %632 = vector.broadcast %631 : vector<1x1x12xf32> to vector<10x10x12xf32>
    %633 = arith.mulf %628, %632 : vector<10x10x12xf32>
    %634 = arith.addf %627, %633 : vector<10x10x12xf32>
    %635 = vector.extract_strided_slice %516 {offsets = [3, 2, 0], sizes = [10, 10, 12], strides = [1, 1, 1]} : vector<14x14x12xf32> to vector<10x10x12xf32>
    %636 = vector.extract_strided_slice %209 {offsets = [3, 2, 0], sizes = [1, 1, 12], strides = [1, 1, 1]} : vector<5x5x12xf32> to vector<1x1x12xf32>
    %637 = vector.shape_cast %636 : vector<1x1x12xf32> to vector<12xf32>
    %638 = vector.shape_cast %637 : vector<12xf32> to vector<1x1x12xf32>
    %639 = vector.broadcast %638 : vector<1x1x12xf32> to vector<10x10x12xf32>
    %640 = arith.mulf %635, %639 : vector<10x10x12xf32>
    %641 = arith.addf %634, %640 : vector<10x10x12xf32>
    %642 = vector.extract_strided_slice %516 {offsets = [3, 3, 0], sizes = [10, 10, 12], strides = [1, 1, 1]} : vector<14x14x12xf32> to vector<10x10x12xf32>
    %643 = vector.extract_strided_slice %209 {offsets = [3, 3, 0], sizes = [1, 1, 12], strides = [1, 1, 1]} : vector<5x5x12xf32> to vector<1x1x12xf32>
    %644 = vector.shape_cast %643 : vector<1x1x12xf32> to vector<12xf32>
    %645 = vector.shape_cast %644 : vector<12xf32> to vector<1x1x12xf32>
    %646 = vector.broadcast %645 : vector<1x1x12xf32> to vector<10x10x12xf32>
    %647 = arith.mulf %642, %646 : vector<10x10x12xf32>
    %648 = arith.addf %641, %647 : vector<10x10x12xf32>
    %649 = vector.extract_strided_slice %516 {offsets = [3, 4, 0], sizes = [10, 10, 12], strides = [1, 1, 1]} : vector<14x14x12xf32> to vector<10x10x12xf32>
    %650 = vector.extract_strided_slice %209 {offsets = [3, 4, 0], sizes = [1, 1, 12], strides = [1, 1, 1]} : vector<5x5x12xf32> to vector<1x1x12xf32>
    %651 = vector.shape_cast %650 : vector<1x1x12xf32> to vector<12xf32>
    %652 = vector.shape_cast %651 : vector<12xf32> to vector<1x1x12xf32>
    %653 = vector.broadcast %652 : vector<1x1x12xf32> to vector<10x10x12xf32>
    %654 = arith.mulf %649, %653 : vector<10x10x12xf32>
    %655 = arith.addf %648, %654 : vector<10x10x12xf32>
    %656 = vector.extract_strided_slice %516 {offsets = [4, 0, 0], sizes = [10, 10, 12], strides = [1, 1, 1]} : vector<14x14x12xf32> to vector<10x10x12xf32>
    %657 = vector.extract_strided_slice %209 {offsets = [4, 0, 0], sizes = [1, 1, 12], strides = [1, 1, 1]} : vector<5x5x12xf32> to vector<1x1x12xf32>
    %658 = vector.shape_cast %657 : vector<1x1x12xf32> to vector<12xf32>
    %659 = vector.shape_cast %658 : vector<12xf32> to vector<1x1x12xf32>
    %660 = vector.broadcast %659 : vector<1x1x12xf32> to vector<10x10x12xf32>
    %661 = arith.mulf %656, %660 : vector<10x10x12xf32>
    %662 = arith.addf %655, %661 : vector<10x10x12xf32>
    %663 = vector.extract_strided_slice %516 {offsets = [4, 1, 0], sizes = [10, 10, 12], strides = [1, 1, 1]} : vector<14x14x12xf32> to vector<10x10x12xf32>
    %664 = vector.extract_strided_slice %209 {offsets = [4, 1, 0], sizes = [1, 1, 12], strides = [1, 1, 1]} : vector<5x5x12xf32> to vector<1x1x12xf32>
    %665 = vector.shape_cast %664 : vector<1x1x12xf32> to vector<12xf32>
    %666 = vector.shape_cast %665 : vector<12xf32> to vector<1x1x12xf32>
    %667 = vector.broadcast %666 : vector<1x1x12xf32> to vector<10x10x12xf32>
    %668 = arith.mulf %663, %667 : vector<10x10x12xf32>
    %669 = arith.addf %662, %668 : vector<10x10x12xf32>
    %670 = vector.extract_strided_slice %516 {offsets = [4, 2, 0], sizes = [10, 10, 12], strides = [1, 1, 1]} : vector<14x14x12xf32> to vector<10x10x12xf32>
    %671 = vector.extract_strided_slice %209 {offsets = [4, 2, 0], sizes = [1, 1, 12], strides = [1, 1, 1]} : vector<5x5x12xf32> to vector<1x1x12xf32>
    %672 = vector.shape_cast %671 : vector<1x1x12xf32> to vector<12xf32>
    %673 = vector.shape_cast %672 : vector<12xf32> to vector<1x1x12xf32>
    %674 = vector.broadcast %673 : vector<1x1x12xf32> to vector<10x10x12xf32>
    %675 = arith.mulf %670, %674 : vector<10x10x12xf32>
    %676 = arith.addf %669, %675 : vector<10x10x12xf32>
    %677 = vector.extract_strided_slice %516 {offsets = [4, 3, 0], sizes = [10, 10, 12], strides = [1, 1, 1]} : vector<14x14x12xf32> to vector<10x10x12xf32>
    %678 = vector.extract_strided_slice %209 {offsets = [4, 3, 0], sizes = [1, 1, 12], strides = [1, 1, 1]} : vector<5x5x12xf32> to vector<1x1x12xf32>
    %679 = vector.shape_cast %678 : vector<1x1x12xf32> to vector<12xf32>
    %680 = vector.shape_cast %679 : vector<12xf32> to vector<1x1x12xf32>
    %681 = vector.broadcast %680 : vector<1x1x12xf32> to vector<10x10x12xf32>
    %682 = arith.mulf %677, %681 : vector<10x10x12xf32>
    %683 = arith.addf %676, %682 : vector<10x10x12xf32>
    %684 = vector.extract_strided_slice %516 {offsets = [4, 4, 0], sizes = [10, 10, 12], strides = [1, 1, 1]} : vector<14x14x12xf32> to vector<10x10x12xf32>
    %685 = vector.extract_strided_slice %209 {offsets = [4, 4, 0], sizes = [1, 1, 12], strides = [1, 1, 1]} : vector<5x5x12xf32> to vector<1x1x12xf32>
    %686 = vector.shape_cast %685 : vector<1x1x12xf32> to vector<12xf32>
    %687 = vector.shape_cast %686 : vector<12xf32> to vector<1x1x12xf32>
    %688 = vector.broadcast %687 : vector<1x1x12xf32> to vector<10x10x12xf32>
    %689 = arith.mulf %684, %688 : vector<10x10x12xf32>
    %690 = arith.addf %683, %689 : vector<10x10x12xf32>
    %691 = vector.extract_strided_slice %690 {offsets = [0, 0, 0], sizes = [1, 10, 12], strides = [1, 1, 1]} : vector<10x10x12xf32> to vector<1x10x12xf32>
    %692 = vector.shape_cast %691 : vector<1x10x12xf32> to vector<10x12xf32>
    %c0_148 = arith.constant 0 : index
    %c0_149 = arith.constant 0 : index
    %693 = vector.load %arg18[%c0_148, %c0_149] : memref<100x12xf32, #tpu.memory_space<vmem>>, vector<10x12xf32>
    tpu.vector_store %arg18[%c0_148, %c0_149], %692 {strides = array<i32>} : memref<100x12xf32, #tpu.memory_space<vmem>>, vector<10x12xf32>,
    %694 = vector.extract_strided_slice %690 {offsets = [1, 0, 0], sizes = [1, 10, 12], strides = [1, 1, 1]} : vector<10x10x12xf32> to vector<1x10x12xf32>
    %695 = vector.shape_cast %694 : vector<1x10x12xf32> to vector<10x12xf32>
    %c10_150 = arith.constant 10 : index
    %c0_151 = arith.constant 0 : index
    %696 = vector.load %arg18[%c10_150, %c0_151] : memref<100x12xf32, #tpu.memory_space<vmem>>, vector<10x12xf32>
    tpu.vector_store %arg18[%c10_150, %c0_151], %695 {strides = array<i32>} : memref<100x12xf32, #tpu.memory_space<vmem>>, vector<10x12xf32>,
    %697 = vector.extract_strided_slice %690 {offsets = [2, 0, 0], sizes = [1, 10, 12], strides = [1, 1, 1]} : vector<10x10x12xf32> to vector<1x10x12xf32>
    %698 = vector.shape_cast %697 : vector<1x10x12xf32> to vector<10x12xf32>
    %c20 = arith.constant 20 : index
    %c0_152 = arith.constant 0 : index
    %699 = vector.load %arg18[%c20, %c0_152] : memref<100x12xf32, #tpu.memory_space<vmem>>, vector<10x12xf32>
    tpu.vector_store %arg18[%c20, %c0_152], %698 {strides = array<i32>} : memref<100x12xf32, #tpu.memory_space<vmem>>, vector<10x12xf32>,
    %700 = vector.extract_strided_slice %690 {offsets = [3, 0, 0], sizes = [1, 10, 12], strides = [1, 1, 1]} : vector<10x10x12xf32> to vector<1x10x12xf32>
    %701 = vector.shape_cast %700 : vector<1x10x12xf32> to vector<10x12xf32>
    %c30 = arith.constant 30 : index
    %c0_153 = arith.constant 0 : index
    %702 = vector.load %arg18[%c30, %c0_153] : memref<100x12xf32, #tpu.memory_space<vmem>>, vector<10x12xf32>
    tpu.vector_store %arg18[%c30, %c0_153], %701 {strides = array<i32>} : memref<100x12xf32, #tpu.memory_space<vmem>>, vector<10x12xf32>,
    %703 = vector.extract_strided_slice %690 {offsets = [4, 0, 0], sizes = [1, 10, 12], strides = [1, 1, 1]} : vector<10x10x12xf32> to vector<1x10x12xf32>
    %704 = vector.shape_cast %703 : vector<1x10x12xf32> to vector<10x12xf32>
    %c40 = arith.constant 40 : index
    %c0_154 = arith.constant 0 : index
    %705 = vector.load %arg18[%c40, %c0_154] : memref<100x12xf32, #tpu.memory_space<vmem>>, vector<10x12xf32>
    tpu.vector_store %arg18[%c40, %c0_154], %704 {strides = array<i32>} : memref<100x12xf32, #tpu.memory_space<vmem>>, vector<10x12xf32>,
    %706 = vector.extract_strided_slice %690 {offsets = [5, 0, 0], sizes = [1, 10, 12], strides = [1, 1, 1]} : vector<10x10x12xf32> to vector<1x10x12xf32>
    %707 = vector.shape_cast %706 : vector<1x10x12xf32> to vector<10x12xf32>
    %c50 = arith.constant 50 : index
    %c0_155 = arith.constant 0 : index
    %708 = vector.load %arg18[%c50, %c0_155] : memref<100x12xf32, #tpu.memory_space<vmem>>, vector<10x12xf32>
    tpu.vector_store %arg18[%c50, %c0_155], %707 {strides = array<i32>} : memref<100x12xf32, #tpu.memory_space<vmem>>, vector<10x12xf32>,
    %709 = vector.extract_strided_slice %690 {offsets = [6, 0, 0], sizes = [1, 10, 12], strides = [1, 1, 1]} : vector<10x10x12xf32> to vector<1x10x12xf32>
    %710 = vector.shape_cast %709 : vector<1x10x12xf32> to vector<10x12xf32>
    %c60 = arith.constant 60 : index
    %c0_156 = arith.constant 0 : index
    %711 = vector.load %arg18[%c60, %c0_156] : memref<100x12xf32, #tpu.memory_space<vmem>>, vector<10x12xf32>
    tpu.vector_store %arg18[%c60, %c0_156], %710 {strides = array<i32>} : memref<100x12xf32, #tpu.memory_space<vmem>>, vector<10x12xf32>,
    %712 = vector.extract_strided_slice %690 {offsets = [7, 0, 0], sizes = [1, 10, 12], strides = [1, 1, 1]} : vector<10x10x12xf32> to vector<1x10x12xf32>
    %713 = vector.shape_cast %712 : vector<1x10x12xf32> to vector<10x12xf32>
    %c70 = arith.constant 70 : index
    %c0_157 = arith.constant 0 : index
    %714 = vector.load %arg18[%c70, %c0_157] : memref<100x12xf32, #tpu.memory_space<vmem>>, vector<10x12xf32>
    tpu.vector_store %arg18[%c70, %c0_157], %713 {strides = array<i32>} : memref<100x12xf32, #tpu.memory_space<vmem>>, vector<10x12xf32>,
    %715 = vector.extract_strided_slice %690 {offsets = [8, 0, 0], sizes = [1, 10, 12], strides = [1, 1, 1]} : vector<10x10x12xf32> to vector<1x10x12xf32>
    %716 = vector.shape_cast %715 : vector<1x10x12xf32> to vector<10x12xf32>
    %c80 = arith.constant 80 : index
    %c0_158 = arith.constant 0 : index
    %717 = vector.load %arg18[%c80, %c0_158] : memref<100x12xf32, #tpu.memory_space<vmem>>, vector<10x12xf32>
    tpu.vector_store %arg18[%c80, %c0_158], %716 {strides = array<i32>} : memref<100x12xf32, #tpu.memory_space<vmem>>, vector<10x12xf32>,
    %718 = vector.extract_strided_slice %690 {offsets = [9, 0, 0], sizes = [1, 10, 12], strides = [1, 1, 1]} : vector<10x10x12xf32> to vector<1x10x12xf32>
    %719 = vector.shape_cast %718 : vector<1x10x12xf32> to vector<10x12xf32>
    %c90 = arith.constant 90 : index
    %c0_159 = arith.constant 0 : index
    %720 = vector.load %arg18[%c90, %c0_159] : memref<100x12xf32, #tpu.memory_space<vmem>>, vector<10x12xf32>
    tpu.vector_store %arg18[%c90, %c0_159], %719 {strides = array<i32>} : memref<100x12xf32, #tpu.memory_space<vmem>>, vector<10x12xf32>,
    %c0_160 = arith.constant 0 : index
    %c0_161 = arith.constant 0 : index
    %721 = vector.load %arg18[%c0_160, %c0_161] : memref<100x12xf32, #tpu.memory_space<vmem>>, vector<100x12xf32>
    %c0_162 = arith.constant 0 : index
    %c0_163 = arith.constant 0 : index
    %722 = vector.load %arg11[%c0_162, %c0_163] : memref<12x12xf32, #tpu.memory_space<vmem>>, vector<12x12xf32>
    %cst_164 = arith.constant dense<0.000000e+00> : vector<100x12xf32>
    %723 = tpu.matmul %721, %722, %cst_164 {dimension_numbers = #tpu.dot_dimension_numbers<[1], [0], [0], [1], [0, 0, 1, 1], [], []>} : vector<100x12xf32>, vector<12x12xf32>, vector<100x12xf32> -> vector<100x12xf32>
    %c0_165 = arith.constant 0 : index
    %c0_166 = arith.constant 0 : index
    %724 = vector.load %arg12[%c0_165, %c0_166] : memref<2x12xf32, #tpu.memory_space<vmem>>, vector<1x12xf32>
    %725 = vector.shape_cast %724 : vector<1x12xf32> to vector<12xf32>
    %726 = vector.shape_cast %725 : vector<12xf32> to vector<1x12xf32>
    %727 = vector.broadcast %726 : vector<1x12xf32> to vector<100x12xf32>
    %728 = arith.mulf %723, %727 : vector<100x12xf32>
    %c1_167 = arith.constant 1 : index
    %c0_168 = arith.constant 0 : index
    %729 = vector.load %arg12[%c1_167, %c0_168] : memref<2x12xf32, #tpu.memory_space<vmem>>, vector<1x12xf32>
    %730 = vector.shape_cast %729 : vector<1x12xf32> to vector<12xf32>
    %731 = vector.shape_cast %730 : vector<12xf32> to vector<1x12xf32>
    %732 = vector.broadcast %731 : vector<1x12xf32> to vector<100x12xf32>
    %733 = arith.addf %728, %732 : vector<100x12xf32>
    %cst_169 = arith.constant 0.000000e+00 : f32
    %734 = vector.broadcast %cst_169 : f32 to vector<100x12xf32>
    %735 = arith.maximumf %733, %734 : vector<100x12xf32>
    %c0_170 = arith.constant 0 : index
    %c0_171 = arith.constant 0 : index
    %736 = vector.load %arg13[%c0_170, %c0_171] : memref<5x12xf32, #tpu.memory_space<vmem>>, vector<5x12xf32>
    %cst_172 = arith.constant dense<0.000000e+00> : vector<5x100xf32>
    %737 = tpu.matmul %736, %735, %cst_172 {dimension_numbers = #tpu.dot_dimension_numbers<[1], [1], [0], [0], [0, 0, 1, 0], [], []>} : vector<5x12xf32>, vector<100x12xf32>, vector<5x100xf32> -> vector<5x100xf32>
    %c0_173 = arith.constant 0 : index
    %c0_174 = arith.constant 0 : index
    %738 = vector.load %arg14[%c0_173, %c0_174] : memref<5x1xf32, #tpu.memory_space<vmem>>, vector<5x1xf32>
    %739 = vector.broadcast %738 : vector<5x1xf32> to vector<5x100xf32>
    %740 = arith.addf %737, %739 : vector<5x100xf32>
    %c0_175 = arith.constant 0 : index
    %c0_176 = arith.constant 0 : index
    %c0_177 = arith.constant 0 : index
    %741 = vector.load %arg15[%c0_175, %c0_176, %c0_177] : memref<1x5x100xf32, #tpu.memory_space<vmem>>, vector<1x5x100xf32>
    %742 = vector.shape_cast %741 : vector<1x5x100xf32> to vector<5x100xf32>
    %743 = vector.shape_cast %740 : vector<5x100xf32> to vector<1x5x100xf32>
    tpu.vector_store %arg15[%c0_175, %c0_176, %c0_177], %743 {strides = array<i32>} : memref<1x5x100xf32, #tpu.memory_space<vmem>>, vector<1x5x100xf32>,
    return
  }
  func.func @transform_0(%arg0: i32) -> (i32, i32, i32, i32) {
    %c0_i32 = arith.constant 0 : i32
    %c0_i32_0 = arith.constant 0 : i32
    %c0_i32_1 = arith.constant 0 : i32
    %c0_i32_2 = arith.constant 0 : i32
    return %arg0, %c0_i32, %c0_i32_0, %c0_i32_1 : i32, i32, i32, i32
  }
  func.func @transform_1(%arg0: i32) -> (i32, i32, i32, i32) {
    %c0_i32 = arith.constant 0 : i32
    %c0_i32_0 = arith.constant 0 : i32
    %c0_i32_1 = arith.constant 0 : i32
    %c0_i32_2 = arith.constant 0 : i32
    return %arg0, %c0_i32, %c0_i32_0, %c0_i32_1 : i32, i32, i32, i32
  }
  func.func @transform_2(%arg0: i32) -> (i32, i32) {
    %c0_i32 = arith.constant 0 : i32
    %c0_i32_0 = arith.constant 0 : i32
    %c0_i32_1 = arith.constant 0 : i32
    return %c0_i32, %c0_i32_0 : i32, i32
  }
  func.func @transform_3(%arg0: i32) -> (i32, i32) {
    %c0_i32 = arith.constant 0 : i32
    %c0_i32_0 = arith.constant 0 : i32
    %c0_i32_1 = arith.constant 0 : i32
    return %c0_i32, %c0_i32_0 : i32, i32
  }
  func.func @transform_4(%arg0: i32) -> (i32, i32) {
    %c0_i32 = arith.constant 0 : i32
    %c0_i32_0 = arith.constant 0 : i32
    %c0_i32_1 = arith.constant 0 : i32
    return %c0_i32, %c0_i32_0 : i32, i32
  }
  func.func @transform_5(%arg0: i32) -> (i32, i32) {
    %c0_i32 = arith.constant 0 : i32
    %c0_i32_0 = arith.constant 0 : i32
    %c0_i32_1 = arith.constant 0 : i32
    return %c0_i32, %c0_i32_0 : i32, i32
  }
  func.func @transform_6(%arg0: i32) -> (i32, i32) {
    %c0_i32 = arith.constant 0 : i32
    %c0_i32_0 = arith.constant 0 : i32
    %c0_i32_1 = arith.constant 0 : i32
    return %c0_i32, %c0_i32_0 : i32, i32
  }
  func.func @transform_7(%arg0: i32) -> (i32, i32) {
    %c0_i32 = arith.constant 0 : i32
    %c0_i32_0 = arith.constant 0 : i32
    %c0_i32_1 = arith.constant 0 : i32
    return %c0_i32, %c0_i32_0 : i32, i32
  }
  func.func @transform_8(%arg0: i32) -> (i32, i32) {
    %c0_i32 = arith.constant 0 : i32
    %c0_i32_0 = arith.constant 0 : i32
    %c0_i32_1 = arith.constant 0 : i32
    return %c0_i32, %c0_i32_0 : i32, i32
  }
  func.func @transform_9(%arg0: i32) -> (i32, i32) {
    %c0_i32 = arith.constant 0 : i32
    %c0_i32_0 = arith.constant 0 : i32
    %c0_i32_1 = arith.constant 0 : i32
    return %c0_i32, %c0_i32_0 : i32, i32
  }
  func.func @transform_10(%arg0: i32) -> (i32, i32) {
    %c0_i32 = arith.constant 0 : i32
    %c0_i32_0 = arith.constant 0 : i32
    %c0_i32_1 = arith.constant 0 : i32
    return %c0_i32, %c0_i32_0 : i32, i32
  }
  func.func @transform_11(%arg0: i32) -> (i32, i32) {
    %c0_i32 = arith.constant 0 : i32
    %c0_i32_0 = arith.constant 0 : i32
    %c0_i32_1 = arith.constant 0 : i32
    return %c0_i32, %c0_i32_0 : i32, i32
  }
  func.func @transform_12(%arg0: i32) -> (i32, i32) {
    %c0_i32 = arith.constant 0 : i32
    %c0_i32_0 = arith.constant 0 : i32
    %c0_i32_1 = arith.constant 0 : i32
    return %c0_i32, %c0_i32_0 : i32, i32
  }
  func.func @transform_13(%arg0: i32) -> (i32, i32) {
    %c0_i32 = arith.constant 0 : i32
    %c0_i32_0 = arith.constant 0 : i32
    %c0_i32_1 = arith.constant 0 : i32
    return %c0_i32, %c0_i32_0 : i32, i32
  }
  func.func @transform_14(%arg0: i32) -> (i32, i32, i32) {
    %c0_i32 = arith.constant 0 : i32
    %c0_i32_0 = arith.constant 0 : i32
    %c0_i32_1 = arith.constant 0 : i32
    return %arg0, %c0_i32, %c0_i32_0 : i32, i32, i32
  }
}

</mosaic_0001>

<bundles_post_ra>
// kernel: tpu_custom_call.1
= control target key start
LH: loop header
LB: loop body
LE: loop exit
PB: predicated region body
PF: predicated region fallthrough
CT: control target
= control target key end

     0   :  { %s7747_s29 = smov 0   ;;  %s12217_s0 = inlined_call_operand.vmem [shape: f32[2,9,9,4], index: 0, kind: input, shape index: {}]   ;;  %s12218_s1 = inlined_call_operand.vmem [shape: f32[2,16,16,4], index: 1, kind: input, shape index: {}]   ;;  %s12219_s2 = inlined_call_operand.vmem [shape: f32[4,12], index: 2, kind: input, shape index: {}]   ;;  %s12220_s3 = inlined_call_operand.vmem [shape: f32[2,12], index: 3, kind: input, shape index: {}]   ;;  %s12221_s4 = inlined_call_operand.vmem [shape: f32[9,12], index: 4, kind: input, shape index: {}]   ;;  %s12222_s5 = inlined_call_operand.vmem [shape: f32[2,12], index: 5, kind: input, shape index: {}]   ;;  %s12223_s6 = inlined_call_operand.vmem [shape: f32[4,12], index: 6, kind: input, shape index: {}]   ;;  %s12224_s7 = inlined_call_operand.vmem [shape: f32[2,12], index: 7, kind: input, shape index: {}]   ;;  %s12225_s8 = inlined_call_operand.vmem [shape: f32[9,12], index: 8, kind: input, shape index: {}]   ;;  %s12226_s9 = inlined_call_operand.vmem [shape: f32[2,12], index: 9, kind: input, shape index: {}]   ;;  %s12227_s10 = inlined_call_operand.vmem [shape: f32[12,12], index: 10, kind: input, shape index: {}]   ;;  %s12228_s11 = inlined_call_operand.vmem [shape: f32[2,12], index: 11, kind: input, shape index: {}]   ;;  %s12229_s12 = inlined_call_operand.vmem [shape: f32[5,12], index: 12, kind: input, shape index: {}]   ;;  %s12230_s13 = inlined_call_operand.vmem [shape: f32[5,1], index: 13, kind: input, shape index: {}]   ;;  %s12231_s14 = inlined_call_operand.vmem [shape: f32[2,5,100], index: 14, kind: output, shape index: {}]  }
   0x1 LB: > { %s7215_s30 = sadd.s32 4294967295, %s7667_s29   ;;  %p7219_p0 = scmp.ge.s32.totalorder %s7667_s29, 1  ;;  %s7667_s29 = sphi %s7747_s29, %s24_s29  }
   0x2   : > { %p422_p1 = scmp.lt.s32.totalorder %s7667_s29, 3 }
   0x4   : > { %p423_p2 = pnand %p7219_p0, %p422_p1 }
   0x6   : > { %426 = sbr.rel (%p423_p2) target bundleno = 1451 (0x5ab), region = 76 }
   0xb   : > { %v504_v0 = vld [vmem:[%s12219_s2] sm:$0xf]  ;;  %vm514_vm0 = vcmask 1043456   ;;  %p472_p3 = scmp.lt.s32.totalorder %s7215_s30, 1  ;;  %vm507_vm1 = vcmask 31744   ;;  %v1342_v52 = vlaneseq  ;;  %vm607_vm2 = vcmask 97280  }
   0xc   : > { %7446 = vmatprep.subr.msk.mxu0 %vm514_vm0, %v504_v0  ;;  %7451 = vmatprep.subr.msk.mxu1 %vm514_vm0, %v504_v0  ;;  %v7815_v15 = vld [vmem:[%s12223_s6] sm:$0xf]  ;;  %vm3189_vm3 = vcmask 1046528   ;;  %vm3348_vm4 = vcmask 1045504   ;;  %vm7670_vm5 = vmmov 0   ;;  %vm4587_vm6 = vcmask 1044480  }
   0xd   : > { %7447 = vmatpush3.msk.msra.mxu0 %vm514_vm0, %v504_v0  ;;  %7452 = vmatpush3.msk.msra.mxu1 %vm514_vm0, %v504_v0  ;;  %s13288_s30 = smov (!%p472_p3, %s7215_s30), 1  ;;  %v7959_v53 = vshrl.u32 %v1342_v52, 7  ;;  %v7227_v54 = vld [vmem:[%s12220_s3] ss:$0 sm:$0xff]  ;;  %v7971_v57 = vld [vmem:[%s12220_s3 + $0x1] ss:$0 sm:$0xff] }
   0xe   : > { %7456 = vmatprep.subr.msk.mxu0 %vm514_vm0, %v504_v0  ;;  %7461 = vmatprep.subr.msk.mxu1 %vm514_vm0, %v504_v0  ;;  %s7643_s17 = smul.u32 144, %s13288_s30  ;;  %s7341_s21 = sshll.u32 %s13288_s30, 8  ;;  %v1338_v56 = vld [vmem:[%s12221_s4] sm:$0xff]  ;;  %vm6773_vm7 = vcmask 91136   ;;  %vm7148_vm8 = vcmask 815104  }
   0xf   : > { %s7808_s24 = scalar_lea.vmem %s12218_s1, %s7341_s21  ;;  %v1344_v55 = vsub.s32 0, %v7959_v53  ;;  %v7974_v60 = vsub.s32 1, %v7959_v53  ;;  %v7977_v61 = vsub.s32 2, %v7959_v53  ;;  %v7980_v62 = vsub.s32 3, %v7959_v53  ;;  %v8055_v52 = vld [vmem:[%s12224_s7] ss:$0 sm:$0xff] }
  0x10   : > { %s7770_s20 = scalar_lea.vmem %s12217_s0, %s7643_s17  ;;  %v1576_v19 = vld [vmem:[%s7808_s24] sm:$0xff]  ;;  %v1577_v21 = vld [vmem:[%s7808_s24 + $0x8] sm:$0xff]  ;;  %v1578_v22 = vld [vmem:[%s7808_s24 + $0x10] sm:$0xff]  ;;  %v7983_v63 = vsub.s32 4, %v7959_v53  ;;  %s7223_s17 = sshll.u32 %s13288_s30, 3 }
  0x11   : > { %v486_v1 = vld [vmem:[%s7770_s20] sm:$0xff]  ;;  %v488_v2 = vld [vmem:[%s7770_s20 + $0x10] sm:$0xff]  ;;  %v487_v3 = vld [vmem:[%s7770_s20 + $0x8] sm:$0x1] }
  0x12   : > { %7448 = vmatprep.mubr.msk.f32.mxu0 %vm507_vm1, %v486_v1  ;;  %7453 = vmatprep.mubr.msk.f32.mxu1 %vm507_vm1, %v488_v2  ;;  %v489_v4 = vld [vmem:[%s7770_s20 + $0x18] sm:$0x1]  ;;  %v490_v5 = vld [vmem:[%s7770_s20 + $0x20] sm:$0xff]  ;;  %v492_v6 = vld [vmem:[%s7770_s20 + $0x30] sm:$0xff]  ;;  %v7985_v2 = vrot.slane %v1338_v56, %v1344_v55 }
  0x13   : > { %7449 = vmatmul.mubr.msk.f32.vlgmr.msra.gmra.mxu0 %vm507_vm1, %v487_v3  ;;  %7454 = vmatmul.mubr.msk.f32.vlgmr.msra.gmra.mxu1 %vm507_vm1, %v489_v4  ;;  %v491_v7 = vld [vmem:[%s7770_s20 + $0x28] sm:$0x1]  ;;  %v493_v8 = vld [vmem:[%s7770_s20 + $0x38] sm:$0x1]  ;;  %v494_v9 = vld [vmem:[%s7770_s20 + $0x40] sm:$0xff]  ;;  %v7988_v3 = vsub.s32 5, %v7959_v53 }
  0x14   : > { %7457 = vmatpush3.msk.msra.mxu0 %vm514_vm0, %v504_v0  ;;  %7462 = vmatpush3.msk.msra.mxu1 %vm514_vm0, %v504_v0  ;;  %v496_v10 = vld [vmem:[%s7770_s20 + $0x50] sm:$0xff]  ;;  %v495_v11 = vld [vmem:[%s7770_s20 + $0x48] sm:$0x1]  ;;  %v497_v12 = vld [vmem:[%s7770_s20 + $0x58] sm:$0x1] }
  0x15   : > { %7458 = vmatprep.mubr.msk.f32.mxu0 %vm507_vm1, %v490_v5  ;;  %7463 = vmatprep.mubr.msk.f32.mxu1 %vm507_vm1, %v492_v6  ;;  %v498_v13 = vld [vmem:[%s7770_s20 + $0x60] sm:$0xff]  ;;  %v500_v14 = vld [vmem:[%s7770_s20 + $0x70] sm:$0xff]  ;;  %v499_v16 = vld [vmem:[%s7770_s20 + $0x68] sm:$0x1]  ;;  %v7996_v6 = vrot.slane %v1338_v56, %v7974_v60 }
  0x16   : > { %7466 = vmatprep.subr.msk.mxu0 %vm514_vm0, %v504_v0  ;;  %7471 = vmatprep.subr.msk.mxu1 %vm514_vm0, %v504_v0  ;;  %v501_v17 = vld [vmem:[%s7770_s20 + $0x78] sm:$0x1]  ;;  %v502_v18 = vld [vmem:[%s7770_s20 + $0x80] sm:$0xff]  ;;  %v503_v20 = vld [vmem:[%s7770_s20 + $0x88] sm:$0x1]  ;;  %s485_s20 = scalar_lea.vmem %s12231_s14, %s7223_s17 }
  0x17   : > { %7459 = vmatmul.mubr.msk.f32.vlgmr.msra.gmra.mxu0 %vm507_vm1, %v491_v7  ;;  %7464 = vmatmul.mubr.msk.f32.vlgmr.msra.gmra.mxu1 %vm507_vm1, %v493_v8  ;;  %v1580_v23 = vld [vmem:[%s7808_s24 + $0x20] sm:$0xff]  ;;  %v1579_v24 = vld [vmem:[%s7808_s24 + $0x18] sm:$0xff]  ;;  %v1581_v25 = vld [vmem:[%s7808_s24 + $0x28] sm:$0xff]  ;;  %v7999_v7 = vrot.slane %v1338_v56, %v7977_v61 }
  0x18   : > { %7467 = vmatpush3.msk.msra.mxu0 %vm514_vm0, %v504_v0  ;;  %7472 = vmatpush3.msk.msra.mxu1 %vm514_vm0, %v504_v0  ;;  %v1582_v26 = vld [vmem:[%s7808_s24 + $0x30] sm:$0xff]  ;;  %v1584_v27 = vld [vmem:[%s7808_s24 + $0x40] sm:$0xff]  ;;  %v1583_v28 = vld [vmem:[%s7808_s24 + $0x38] sm:$0xff] }
  0x19   : > { %7468 = vmatprep.mubr.msk.f32.mxu0 %vm507_vm1, %v494_v9  ;;  %7473 = vmatprep.mubr.msk.f32.mxu1 %vm507_vm1, %v496_v10  ;;  %v1585_v29 = vld [vmem:[%s7808_s24 + $0x48] sm:$0xff]  ;;  %v1586_v30 = vld [vmem:[%s7808_s24 + $0x50] sm:$0xff]  ;;  %v1588_v31 = vld [vmem:[%s7808_s24 + $0x60] sm:$0xff]  ;;  %v8002_v10 = vrot.slane %v1338_v56, %v7980_v62 }
  0x1a   : > { %7476 = vmatprep.subr.msk.mxu0 %vm514_vm0, %v504_v0  ;;  %7481 = vmatprep.subr.msk.mxu1 %vm514_vm0, %v504_v0  ;;  %v1587_v32 = vld [vmem:[%s7808_s24 + $0x58] sm:$0xff]  ;;  %v1589_v33 = vld [vmem:[%s7808_s24 + $0x68] sm:$0xff]  ;;  %v1590_v34 = vld [vmem:[%s7808_s24 + $0x70] sm:$0xff] }
  0x1b   : > { %7469 = vmatmul.mubr.msk.f32.vlgmr.msra.gmra.mxu0 %vm507_vm1, %v495_v11  ;;  %7474 = vmatmul.mubr.msk.f32.vlgmr.msra.gmra.mxu1 %vm507_vm1, %v497_v12  ;;  %v1592_v35 = vld [vmem:[%s7808_s24 + $0x80] sm:$0xff]  ;;  %v1591_v36 = vld [vmem:[%s7808_s24 + $0x78] sm:$0xff]  ;;  %v1593_v37 = vld [vmem:[%s7808_s24 + $0x88] sm:$0xff]  ;;  %v8005_v11 = vrot.slane %v1338_v56, %v7983_v63 }
  0x1c   : > { %7477 = vmatpush3.msk.msra.mxu0 %vm514_vm0, %v504_v0  ;;  %7482 = vmatpush3.msk.msra.mxu1 %vm514_vm0, %v504_v0  ;;  %v1594_v38 = vld [vmem:[%s7808_s24 + $0x90] sm:$0xff]  ;;  %v1596_v39 = vld [vmem:[%s7808_s24 + $0xa0] sm:$0xff]  ;;  %v1595_v40 = vld [vmem:[%s7808_s24 + $0x98] sm:$0xff] }
  0x1d   : > { %7478 = vmatprep.mubr.msk.f32.mxu0 %vm507_vm1, %v498_v13  ;;  %7483 = vmatprep.mubr.msk.f32.mxu1 %vm507_vm1, %v500_v14  ;;  %v1597_v41 = vld [vmem:[%s7808_s24 + $0xa8] sm:$0xff]  ;;  %v1598_v42 = vld [vmem:[%s7808_s24 + $0xb0] sm:$0xff]  ;;  %v1600_v43 = vld [vmem:[%s7808_s24 + $0xc0] sm:$0xff] }
  0x1e   : > { %7486 = vmatprep.subr.msk.mxu0 %vm514_vm0, %v504_v0  ;;  %7491 = vmatprep.subr.msk.mxu1 %vm514_vm0, %v7815_v15  ;;  %v1599_v44 = vld [vmem:[%s7808_s24 + $0xb8] sm:$0xff]  ;;  %v1601_v45 = vld [vmem:[%s7808_s24 + $0xc8] sm:$0xff]  ;;  %v1602_v46 = vld [vmem:[%s7808_s24 + $0xd0] sm:$0xff] }
  0x1f   : > { %7479 = vmatmul.mubr.msk.f32.vlgmr.msra.gmra.mxu0 %vm507_vm1, %v499_v16  ;;  %7484 = vmatmul.mubr.msk.f32.vlgmr.msra.gmra.mxu1 %vm507_vm1, %v501_v17  ;;  %v1604_v47 = vld [vmem:[%s7808_s24 + $0xe0] sm:$0xff]  ;;  %v1603_v48 = vld [vmem:[%s7808_s24 + $0xd8] sm:$0xff]  ;;  %v1605_v49 = vld [vmem:[%s7808_s24 + $0xe8] sm:$0xff] }
  0x20   : > { %7487 = vmatpush3.msk.msra.mxu0 %vm514_vm0, %v504_v0  ;;  %7492 = vmatpush3.msk.msra.mxu1 %vm514_vm0, %v7815_v15  ;;  %v1606_v50 = vld [vmem:[%s7808_s24 + $0xf0] sm:$0xff]  ;;  %v1607_v51 = vld [vmem:[%s7808_s24 + $0xf8] sm:$0xff]  ;;  %v7993_v5 = vld [vmem:[%s12225_s8] sm:$0xff] }
  0x21   : > { %7488 = vmatprep.mubr.msk.f32.mxu0 %vm507_vm1, %v502_v18  ;;  %7493 = vmatprep.mubr.msk.f32.mxu1 %vm507_vm1, %v1576_v19  ;;  %v8009_v13 = vrot.slane %v7993_v5, %v1344_v55 }
  0x22   : > { %7496 = vmatprep.subr.msk.mxu0 %vm514_vm0, %v7815_v15  ;;  %7501 = vmatprep.subr.msk.mxu1 %vm514_vm0, %v7815_v15 }
  0x23   : > { %7489 = vmatmul.mubr.msk.f32.vlgmr.msra.gmra.mxu0 %vm507_vm1, %v503_v20  ;;  %7494 = vmatmul.mubr.msk.f32.vlgmr.msra.gmra.mxu1 %vm507_vm1, %v1577_v21 }
  0x24   : > { %7497 = vmatpush3.msk.msra.mxu0 %vm514_vm0, %v7815_v15  ;;  %7498 = vmatprep.mubr.msk.f32.mxu0 %vm507_vm1, %v1578_v22  ;;  %v1483_v22 = vsub.s32 6, %v7959_v53 }
  0x25   : > { %7502 = vmatpush3.msk.msra.mxu1 %vm514_vm0, %v7815_v15  ;;  %7503 = vmatprep.mubr.msk.f32.mxu1 %vm507_vm1, %v1580_v23  ;;  %v1497_v23 = vsub.s32 7, %v7959_v53 }
  0x26   : > { %7506 = vmatprep.subr.msk.mxu0 %vm514_vm0, %v7815_v15  ;;  %7511 = vmatprep.subr.msk.mxu1 %vm514_vm0, %v7815_v15 }
  0x27   : > { %7499 = vmatmul.mubr.msk.f32.vlgmr.msra.gmra.mxu0 %vm507_vm1, %v1579_v24  ;;  %7504 = vmatmul.mubr.msk.f32.vlgmr.msra.gmra.mxu1 %vm507_vm1, %v1581_v25 }
  0x28   : > { %7507 = vmatpush3.msk.msra.mxu0 %vm514_vm0, %v7815_v15  ;;  %7508 = vmatprep.mubr.msk.f32.mxu0 %vm507_vm1, %v1582_v26  ;;  %v8021_v26 = vrot.slane %v7993_v5, %v7974_v60 }
  0x29   : > { %7512 = vmatpush3.msk.msra.mxu1 %vm514_vm0, %v7815_v15  ;;  %7513 = vmatprep.mubr.msk.f32.mxu1 %vm507_vm1, %v1584_v27  ;;  %v8025_v27 = vrot.slane %v7993_v5, %v7977_v61 }
  0x2a   : > { %7516 = vmatprep.subr.msk.mxu0 %vm514_vm0, %v7815_v15  ;;  %7521 = vmatprep.subr.msk.mxu1 %vm514_vm0, %v7815_v15 }
  0x2b   : > { %7509 = vmatmul.mubr.msk.f32.vlgmr.msra.gmra.mxu0 %vm507_vm1, %v1583_v28  ;;  %7514 = vmatmul.mubr.msk.f32.vlgmr.msra.gmra.mxu1 %vm507_vm1, %v1585_v29 }
  0x2c   : > { %7517 = vmatpush3.msk.msra.mxu0 %vm514_vm0, %v7815_v15  ;;  %7518 = vmatprep.mubr.msk.f32.mxu0 %vm507_vm1, %v1586_v30 }
  0x2d   : > { %7522 = vmatpush3.msk.msra.mxu1 %vm514_vm0, %v7815_v15  ;;  %7523 = vmatprep.mubr.msk.f32.mxu1 %vm507_vm1, %v1588_v31 }
  0x2e   : > { %7526 = vmatprep.subr.msk.mxu0 %vm514_vm0, %v7815_v15  ;;  %7531 = vmatprep.subr.msk.mxu1 %vm514_vm0, %v7815_v15 }
  0x2f   : > { %7519 = vmatmul.mubr.msk.f32.vlgmr.msra.gmra.mxu0 %vm507_vm1, %v1587_v32  ;;  %7524 = vmatmul.mubr.msk.f32.vlgmr.msra.gmra.mxu1 %vm507_vm1, %v1589_v33 }
  0x30   : > { %7527 = vmatpush3.msk.msra.mxu0 %vm514_vm0, %v7815_v15  ;;  %7528 = vmatprep.mubr.msk.f32.mxu0 %vm507_vm1, %v1590_v34 }
  0x31   : > { %7532 = vmatpush3.msk.msra.mxu1 %vm514_vm0, %v7815_v15  ;;  %7533 = vmatprep.mubr.msk.f32.mxu1 %vm507_vm1, %v1592_v35 }
  0x32   : > { %7536 = vmatprep.subr.msk.mxu0 %vm514_vm0, %v7815_v15  ;;  %7541 = vmatprep.subr.msk.mxu1 %vm514_vm0, %v7815_v15 }
  0x33   : > { %7529 = vmatmul.mubr.msk.f32.vlgmr.msra.gmra.mxu0 %vm507_vm1, %v1591_v36  ;;  %7534 = vmatmul.mubr.msk.f32.vlgmr.msra.gmra.mxu1 %vm507_vm1, %v1593_v37  ;;  %v8027_v36 = vrot.slane %v1338_v56, %v1483_v22  ;;  %v8031_v37 = vrot.slane %v1338_v56, %v1497_v23 }
  0x34   : > { %7537 = vmatpush3.msk.msra.mxu0 %vm514_vm0, %v7815_v15  ;;  %7538 = vmatprep.mubr.msk.f32.mxu0 %vm507_vm1, %v1594_v38  ;;  %v8037_v38 = vrot.slane %v7993_v5, %v7980_v62 }
  0x35   : > { %7542 = vmatpush3.msk.msra.mxu1 %vm514_vm0, %v7815_v15  ;;  %7543 = vmatprep.mubr.msk.f32.mxu1 %vm507_vm1, %v1596_v39  ;;  %v8041_v39 = vrot.slane %v7993_v5, %v7983_v63 }
  0x36   : > { %7546 = vmatprep.subr.msk.mxu0 %vm514_vm0, %v7815_v15  ;;  %7551 = vmatprep.subr.msk.mxu1 %vm514_vm0, %v7815_v15 }
  0x37   : > { %7539 = vmatmul.mubr.msk.f32.vlgmr.msra.gmra.mxu0 %vm507_vm1, %v1595_v40  ;;  %7544 = vmatmul.mubr.msk.f32.vlgmr.msra.gmra.mxu1 %vm507_vm1, %v1597_v41 }
  0x38   : > { %7547 = vmatpush3.msk.msra.mxu0 %vm514_vm0, %v7815_v15  ;;  %7548 = vmatprep.mubr.msk.f32.mxu0 %vm507_vm1, %v1598_v42 }
  0x39   : > { %7552 = vmatpush3.msk.msra.mxu1 %vm514_vm0, %v7815_v15  ;;  %7553 = vmatprep.mubr.msk.f32.mxu1 %vm507_vm1, %v1600_v43 }
  0x3a   : > { %7556 = vmatprep.subr.msk.mxu0 %vm514_vm0, %v7815_v15  ;;  %7561 = vmatprep.subr.msk.mxu1 %vm514_vm0, %v7815_v15 }
  0x3b   : > { %7549 = vmatmul.mubr.msk.f32.vlgmr.msra.gmra.mxu0 %vm507_vm1, %v1599_v44  ;;  %7554 = vmatmul.mubr.msk.f32.vlgmr.msra.gmra.mxu1 %vm507_vm1, %v1601_v45 }
  0x3c   : > { %7557 = vmatpush3.msk.msra.mxu0 %vm514_vm0, %v7815_v15  ;;  %7558 = vmatprep.mubr.msk.f32.mxu0 %vm507_vm1, %v1602_v46 }
  0x3d   : > { %7562 = vmatpush3.msk.msra.mxu1 %vm514_vm0, %v7815_v15  ;;  %7563 = vmatprep.mubr.msk.f32.mxu1 %vm507_vm1, %v1604_v47  ;;  %v8047_v47 = vrot.slane %v7993_v5, %v7988_v3 }
  0x3e   : > { %7566 = vmatprep.subr.msk.mxu0 %vm514_vm0, %v7815_v15 }
  0x3f   : > { %7559 = vmatmul.mubr.msk.f32.vlgmr.msra.gmra.mxu0 %vm507_vm1, %v1603_v48  ;;  %7564 = vmatmul.mubr.msk.f32.vlgmr.msra.gmra.mxu1 %vm507_vm1, %v1605_v49 }
  0x40   : > { %7567 = vmatpush3.msk.msra.mxu0 %vm514_vm0, %v7815_v15  ;;  %7568 = vmatprep.mubr.msk.f32.mxu0 %vm507_vm1, %v1606_v50  ;;  %v8012_v15 = vrot.slane %v1338_v56, %v7988_v3  ;;  %v8050_v50 = vrot.slane %v7993_v5, %v1483_v22 }
  0x43   : > { %7569 = vmatmul.mubr.msk.f32.vlgmr.msra.gmra.mxu0 %vm507_vm1, %v1607_v51 }
  0xd3   : > { %v7450_v58 = vpop.f32.mrf.mxu0  ;;  %v7455_v59 = vpop.f32.mrf.mxu1 }
  0xd5   : > { %v584_v0 = vpop.f32.mrf.mxu0  ;;  %v683_v1 = vpop.f32.mrf.mxu1 }
  0xd6   : > { %v692_v4 = vmul.f32 %v7227_v54, %v683_v1 }
  0xd7   : > { %v7460_v8 = vpop.f32.mrf.mxu0  ;;  %v7465_v9 = vpop.f32.mrf.mxu1 }
  0xd8   : > { %v694_v12 = vadd.f32 %v7971_v57, %v692_v4 }
  0xd9   : > { %v773_v14 = vpop.f32.mrf.mxu0  ;;  %v863_v16 = vpop.f32.mrf.mxu1 }
  0xda   : > { %v696_v17 = vmax.f32 %v694_v12, 0.0  ;;  %v782_v18 = vmul.f32 %v7227_v54, %v773_v14  ;;  %v872_v19 = vmul.f32 %v7227_v54, %v863_v16 }
  0xdb   : > { %v7470_v20 = vpop.f32.mrf.mxu0  ;;  %v7475_v21 = vpop.f32.mrf.mxu1 }
  0xdc   : > { %699 = vst.msk [vmem:[#allocation2 + $0x10] sm:$0xff] %vm607_vm2, %v696_v17  ;;  %v784_v24 = vadd.f32 %v7971_v57, %v782_v18  ;;  %v874_v25 = vadd.f32 %v7971_v57, %v872_v19 }
  0xdd   : > { %v953_v28 = vpop.f32.mrf.mxu0  ;;  %v1043_v29 = vpop.f32.mrf.mxu1 }
  0xde   : > { %v786_v30 = vmax.f32 %v784_v24, 0.0  ;;  %v876_v31 = vmax.f32 %v874_v25, 0.0  ;;  %v962_v32 = vmul.f32 %v7227_v54, %v953_v28  ;;  %v1052_v33 = vmul.f32 %v7227_v54, %v1043_v29 }
  0xdf   : > { %v7480_v34 = vpop.f32.mrf.mxu0  ;;  %v7485_v35 = vpop.f32.mrf.mxu1 }
  0xe0   : > { %789 = vst.msk [vmem:[#allocation2 + $0x20] sm:$0xff] %vm607_vm2, %v786_v30  ;;  %879 = vst.msk [vmem:[#allocation2 + $0x30] sm:$0xff] %vm607_vm2, %v876_v31  ;;  %v964_v40 = vadd.f32 %v7971_v57, %v962_v32  ;;  %v1054_v41 = vadd.f32 %v7971_v57, %v1052_v33 }
  0xe1   : > { %v1133_v42 = vpop.f32.mrf.mxu0  ;;  %v1223_v43 = vpop.f32.mrf.mxu1 }
  0xe2   : > { %v1142_v44 = vmul.f32 %v7227_v54, %v1133_v42  ;;  %v1232_v45 = vmul.f32 %v7227_v54, %v1223_v43  ;;  %v966_v48 = vmax.f32 %v964_v40, 0.0  ;;  %v1056_v49 = vmax.f32 %v1054_v41, 0.0 }
  0xe3   : > { %v1331_v46 = vld [vmem:[#allocation2 + $0x10] sm:$0xff]  ;;  %v7490_v51 = vpop.f32.mrf.mxu0  ;;  %v7495_v55 = vpop.f32.mrf.mxu1 }
  0xe4   : > { %v1346_v56 = vmul.f32 %v7985_v2, %v1331_v46  ;;  %v1355_v54 = vmul.f32 %v7996_v6, %v1331_v46  ;;  %v1384_v58 = vmul.f32 %v7999_v7, %v1331_v46  ;;  %969 = vst.msk [vmem:[#allocation2 + $0x40] sm:$0xff] %vm607_vm2, %v966_v48  ;;  %1059 = vst.msk [vmem:[#allocation2 + $0x50] sm:$0xff] %vm607_vm2, %v1056_v49 }
  0xe5   : > { %v1144_v59 = vadd.f32 %v7971_v57, %v1142_v44  ;;  %v1234_v0 = vadd.f32 %v7971_v57, %v1232_v45  ;;  %v1313_v1 = vpop.f32.mrf.mxu0  ;;  %v1686_v4 = vpop.f32.mrf.mxu1  ;;  %v8065_v12 = vmul.f32 %v7495_v55, %v8055_v52 }
  0xe6   : > { %v1365_v8 = vrot.slane %v1355_v54, 1  ;;  %v1394_v9 = vrot.slane %v1384_v58, 2  ;;  %v8070_v19 = vmul.f32 %v8055_v52, %v1686_v4 }
  0xe7   : > { %v1332_v14 = vld [vmem:[#allocation2 + $0x20] sm:$0xff]  ;;  %v8067_v16 = vld [vmem:[#allocation2 + $0x30] sm:$0xff]  ;;  %v1146_v17 = vmax.f32 %v1144_v59, 0.0  ;;  %v1236_v18 = vmax.f32 %v1234_v0, 0.0 }
  0xe8   : > { %v1375_v20 = vadd.f32 %v1365_v8, %v1346_v56  ;;  %v1347_v21 = vmul.f32 %v7985_v2, %v1332_v14  ;;  %v1356_v57 = vmul.f32 %v7996_v6, %v1332_v14  ;;  %v1385_v22 = vmul.f32 %v7999_v7, %v1332_v14 }
  0xe9   : > { %v1413_v24 = vmul.f32 %v8002_v10, %v1332_v14  ;;  %v1427_v25 = vmul.f32 %v8005_v11, %v1332_v14  ;;  %v1456_v28 = vmul.f32 %v8012_v15, %v1332_v14  ;;  %v1348_v29 = vmul.f32 %v7985_v2, %v8067_v16  ;;  %1149 = vst.msk [vmem:[#allocation2 + $0x60] sm:$0xff] %vm607_vm2, %v1146_v17 }
  0xea   : > { %1239 = vst.msk [vmem:[#allocation2 + $0x70] sm:$0xff] %vm607_vm2, %v1236_v18  ;;  %v1404_v30 = vadd.f32 %v1394_v9, %v1375_v20  ;;  %v1366_v31 = vrot.slane %v1356_v57, 1  ;;  %v1395_v32 = vrot.slane %v1385_v22, 2  ;;  %v1357_v33 = vmul.f32 %v7996_v6, %v8067_v16 }
  0xeb   : > { %v1437_v34 = vrot.slane %v1427_v25, 1  ;;  %v1466_v35 = vrot.slane %v1456_v28, 2  ;;  %v1386_v40 = vmul.f32 %v7999_v7, %v8067_v16  ;;  %v1414_v41 = vmul.f32 %v8002_v10, %v8067_v16  ;;  %v8090_v46 = vld [vmem:[#allocation2 + $0x40] sm:$0xff]  ;;  %v8098_v0 = vld [vmem:[#allocation2 + $0x50] sm:$0xff] }
  0xec   : > { %v1376_v42 = vadd.f32 %v1366_v31, %v1347_v21  ;;  %v1418_v43 = vadd.f32 %v1413_v24, %v1404_v30  ;;  %v1367_v44 = vrot.slane %v1357_v33, 1  ;;  %v1428_v45 = vmul.f32 %v8005_v11, %v8067_v16 }
  0xed   : > { %v1396_v48 = vrot.slane %v1386_v40, 2  ;;  %v1457_v49 = vmul.f32 %v8012_v15, %v8067_v16  ;;  %v1349_v51 = vmul.f32 %v7985_v2, %v8090_v46  ;;  %v1358_v55 = vmul.f32 %v7996_v6, %v8090_v46 }
  0xee   : > { %v1405_v56 = vadd.f32 %v1395_v32, %v1376_v42  ;;  %v1447_v54 = vadd.f32 %v1437_v34, %v1418_v43  ;;  %v1377_v58 = vadd.f32 %v1367_v44, %v1348_v29  ;;  %v1438_v59 = vrot.slane %v1428_v45, 1 }
  0xef   : > { %v1467_v1 = vrot.slane %v1457_v49, 2  ;;  %v1368_v4 = vrot.slane %v1358_v55, 1  ;;  %v1387_v8 = vmul.f32 %v7999_v7, %v8090_v46  ;;  %v1415_v9 = vmul.f32 %v8002_v10, %v8090_v46 }
  0xf0   : > { %v1476_v14 = vadd.f32 %v1466_v35, %v1447_v54  ;;  %v1406_v17 = vadd.f32 %v1396_v48, %v1377_v58  ;;  %v1419_v18 = vadd.f32 %v1414_v41, %v1405_v56  ;;  %v1429_v20 = vmul.f32 %v8005_v11, %v8090_v46  ;;  %v1336_v21 = vld [vmem:[#allocation2 + $0x60] sm:$0xff] }
  0xf1   : > { %v1397_v57 = vrot.slane %v1387_v8, 2  ;;  %v1458_v22 = vmul.f32 %v8012_v15, %v8090_v46  ;;  %v1378_v24 = vadd.f32 %v1368_v4, %v1349_v51  ;;  %v1416_v25 = vmul.f32 %v8002_v10, %v8098_v0  ;;  %v1337_v55 = vld [vmem:[#allocation2 + $0x70] sm:$0xff] }
  0xf2   : > { %v1448_v28 = vadd.f32 %v1438_v59, %v1419_v18  ;;  %v1420_v29 = vadd.f32 %v1415_v9, %v1406_v17  ;;  %v1439_v30 = vrot.slane %v1429_v20, 1  ;;  %v1417_v31 = vmul.f32 %v8002_v10, %v1336_v21 }
  0xf3   : > { %v1468_v32 = vrot.slane %v1458_v22, 2  ;;  %v1407_v33 = vadd.f32 %v1397_v57, %v1378_v24  ;;  %v1430_v34 = vmul.f32 %v8005_v11, %v8098_v0  ;;  %v1431_v35 = vmul.f32 %v8005_v11, %v1336_v21 }
  0xf4   : > { %v1477_v40 = vadd.f32 %v1467_v1, %v1448_v28  ;;  %v1449_v41 = vadd.f32 %v1439_v30, %v1420_v29  ;;  %v1459_v42 = vmul.f32 %v8012_v15, %v8098_v0  ;;  %v1488_v43 = vmul.f32 %v8027_v36, %v1336_v21 }
  0xf5   : > { %v1421_v44 = vadd.f32 %v1416_v25, %v1407_v33  ;;  %v1440_v45 = vrot.slane %v1430_v34, 1  ;;  %v1441_v48 = vrot.slane %v1431_v35, 1  ;;  %v1502_v49 = vmul.f32 %v8031_v37, %v1336_v21 }
  0xf6   : > { %v1478_v10 = vadd.f32 %v1468_v32, %v1449_v41  ;;  %v1469_v51 = vrot.slane %v1459_v42, 2  ;;  %v1350_v56 = vmul.f32 %v7985_v2, %v8098_v0  ;;  %v1359_v11 = vmul.f32 %v7996_v6, %v8098_v0  ;;  %v7253_v6 = vld [vmem:[%s12221_s4 + $0x8] ss:$0 sm:$0xff] }
  0xf7   : > { %v1450_v54 = vadd.f32 %v1440_v45, %v1421_v44  ;;  %v1512_v58 = vrot.slane %v1502_v49, 1  ;;  %v1388_v59 = vmul.f32 %v7999_v7, %v8098_v0  ;;  %v1460_v1 = vmul.f32 %v8012_v15, %v1336_v21  ;;  %v8148_v49 = vld [vmem:[%s12224_s7 + $0x1] ss:$0 sm:$0xff] }
  0xf8   : > { %v1369_v4 = vrot.slane %v1359_v11, 1  ;;  %v1485_v8 = vmul.f32 %v8027_v36, %v8067_v16  ;;  %v1486_v9 = vmul.f32 %v8027_v36, %v8090_v46  ;;  %v1487_v2 = vmul.f32 %v8027_v36, %v8098_v0 }
  0xf9   : > { %v1479_v17 = vadd.f32 %v1469_v51, %v1450_v54  ;;  %v1398_v18 = vrot.slane %v1388_v59, 2  ;;  %v1470_v20 = vrot.slane %v1460_v1, 2  ;;  %v1489_v7 = vmul.f32 %v8027_v36, %v1337_v55 }
  0xfa   : > { %v1379_v15 = vadd.f32 %v1369_v4, %v1350_v56  ;;  %v1490_v57 = vadd.f32 %v1485_v8, %v1476_v14  ;;  %v1491_v22 = vadd.f32 %v1486_v9, %v1477_v40  ;;  %v1492_v24 = vadd.f32 %v1487_v2, %v1478_v10 }
  0xfb   : > { %v1493_v25 = vadd.f32 %v1488_v43, %v1479_v17  ;;  %v1499_v28 = vmul.f32 %v8031_v37, %v8067_v16  ;;  %v1500_v29 = vmul.f32 %v8031_v37, %v8090_v46  ;;  %v1501_v30 = vmul.f32 %v8031_v37, %v8098_v0 }
  0xfc   : > { %v1408_v32 = vadd.f32 %v1398_v18, %v1379_v15  ;;  %v1503_v33 = vmul.f32 %v8031_v37, %v1337_v55  ;;  %v1528_v34 = vmul.f32 %v7253_v6, %v8067_v16  ;;  %v1529_v36 = vmul.f32 %v7253_v6, %v8090_v46 }
  0xfd   : > { %v1522_v14 = vadd.f32 %v1512_v58, %v1493_v25  ;;  %v1509_v35 = vrot.slane %v1499_v28, 1  ;;  %v1510_v40 = vrot.slane %v1500_v29, 1  ;;  %v1511_v41 = vrot.slane %v1501_v30, 1  ;;  %v7500_v58 = vpop.f32.mrf.mxu0 }
  0xfe   : > { %v1422_v42 = vadd.f32 %v1417_v31, %v1408_v32  ;;  %v1513_v43 = vrot.slane %v1503_v33, 1  ;;  %v1530_v44 = vmul.f32 %v7253_v6, %v8098_v0  ;;  %v1531_v45 = vmul.f32 %v7253_v6, %v1336_v21  ;;  %v7254_v31 = vld [vmem:[%s12222_s5] ss:$0 sm:$0xff] }
  0xff   : > { %v1519_v10 = vadd.f32 %v1509_v35, %v1490_v57  ;;  %v1520_v37 = vadd.f32 %v1510_v40, %v1491_v22  ;;  %v1521_v51 = vadd.f32 %v1511_v41, %v1492_v24  ;;  %v1532_v16 = vmul.f32 %v7253_v6, %v1337_v55  ;;  %v7505_v22 = vpop.f32.mrf.mxu1  ;;  %v1783_v24 = vpop.f32.mrf.mxu0 }
 0x100   : > { %v1451_v56 = vadd.f32 %v1441_v48, %v1422_v42  ;;  %v1538_v46 = vrot.slane %v1528_v34, 2  ;;  %v1539_v11 = vrot.slane %v1529_v36, 2  ;;  %v1540_v54 = vrot.slane %v1530_v44, 2  ;;  %v7255_v48 = vld [vmem:[%s12222_s5 + $0x1] ss:$0 sm:$0xff] }
 0x101   : > { %v1541_v0 = vrot.slane %v1531_v45, 2  ;;  %v1542_v21 = vrot.slane %v1532_v16, 2  ;;  %v1706_v59 = vadd.f32 %v8148_v49, %v8065_v12  ;;  %v1705_v17 = vadd.f32 %v8148_v49, %v8070_v19 }
 0x102   : > { %v1480_v1 = vadd.f32 %v1470_v20, %v1451_v56  ;;  %v1548_v4 = vadd.f32 %v1538_v46, %v1519_v10  ;;  %v1549_v8 = vadd.f32 %v1539_v11, %v1520_v37  ;;  %v1550_v9 = vadd.f32 %v1540_v54, %v1521_v51 }
 0x103   : > { %v1551_v55 = vadd.f32 %v1541_v0, %v1522_v14  ;;  %v1708_v2 = vmax.f32 %v1706_v59, 0.0  ;;  %v1707_v20 = vmax.f32 %v1705_v17, 0.0  ;;  %v1793_v25 = vmul.f32 %v7500_v58, %v8055_v52 }
 0x104   : > { %v1494_v6 = vadd.f32 %v1489_v7, %v1480_v1  ;;  %v1557_v18 = vmul.f32 %v7254_v31, %v1548_v4  ;;  %v1558_v15 = vmul.f32 %v7254_v31, %v1549_v8  ;;  %v1559_v57 = vmul.f32 %v7254_v31, %v1550_v9 }
 0x105   : > { %v1560_v12 = vmul.f32 %v7254_v31, %v1551_v55  ;;  %1710 = vst.msk [vmem:[#allocation3 + $0x8] sm:$0xff] %vm607_vm2, %v1708_v2  ;;  %1709 = vst.msk [vmem:[#allocation3] sm:$0xff] %vm607_vm2, %v1707_v20  ;;  %v1795_v19 = vadd.f32 %v8148_v49, %v1793_v25  ;;  %v1883_v7 = vmul.f32 %v7505_v22, %v8055_v52 }
 0x106   : > { %v1523_v28 = vadd.f32 %v1513_v43, %v1494_v6  ;;  %v1566_v29 = vadd.f32 %v7255_v48, %v1557_v18  ;;  %v1567_v30 = vadd.f32 %v7255_v48, %v1558_v15  ;;  %v1568_v32 = vadd.f32 %v7255_v48, %v1559_v57  ;;  %v1873_v18 = vpop.f32.mrf.mxu1 }
 0x107   : > { %v1569_v33 = vadd.f32 %v7255_v48, %v1560_v12  ;;  %v1792_v34 = vmul.f32 %v8055_v52, %v1783_v24  ;;  %v8169_v36 = vrot.slane %v7993_v5, %v1497_v23  ;;  %v1797_v43 = vmax.f32 %v1795_v19, 0.0  ;;  %v7510_v12 = vpop.f32.mrf.mxu0 }
 0x108   : > { %v1552_v14 = vadd.f32 %v1542_v21, %v1523_v28  ;;  %v1571_v35 = vmax.f32 %v1566_v29, 0.0  ;;  %v1572_v40 = vmax.f32 %v1567_v30, 0.0  ;;  %v1573_v41 = vmax.f32 %v1568_v32, 0.0 }
 0x109   : > { %v1574_v42 = vmax.f32 %v1569_v33, 0.0  ;;  %v1885_v44 = vadd.f32 %v8148_v49, %v1883_v7  ;;  %v1794_v53 = vadd.f32 %v8148_v49, %v1792_v34  ;;  %1800 = vst.msk [vmem:[#allocation3 + $0x18] sm:$0xff] %vm607_vm2, %v1797_v43 }
 0x10a   : > { %v1561_v45 = vmul.f32 %v7254_v31, %v1552_v14  ;;  %v8173_v10 = vrot.slane %v1571_v35, %v7974_v60  ;;  %v8176_v37 = vrot.slane %v1571_v35, %v7977_v61  ;;  %v8180_v5 = vrot.slane %v1571_v35, %v7980_v62 }
 0x10b   : > { %v8183_v23 = vrot.slane %v1571_v35, %v7983_v63  ;;  %v8186_v51 = vrot.slane %v1571_v35, %v7988_v3  ;;  %v8189_v16 = vrot.slane %v1572_v40, %v7974_v60  ;;  %v8193_v46 = vrot.slane %v1572_v40, %v7977_v61 }
 0x10c   : > { %12673 = vst [vmem:[#allocation5_spill] sm:$0xff] %v8173_v10  ;;  %12674 = vst [vmem:[#allocation6_spill] sm:$0xff] %v8176_v37  ;;  %v1570_v56 = vadd.f32 %v7255_v48, %v1561_v45  ;;  %v8196_v11 = vrot.slane %v1572_v40, %v7980_v62  ;;  %v8199_v54 = vrot.slane %v1572_v40, %v7983_v63  ;;  %v3062_v59 = vld [vmem:[#allocation3 + $0x8] sm:$0xff]  ;;  %v3061_v6 = vld [vmem:[#allocation3] sm:$0xff]  ;;  %v1796_v32 = vmax.f32 %v1794_v53, 0.0 }
 0x10d   : > { %12675 = vst [vmem:[#allocation7_spill] sm:$0xff] %v8180_v5  ;;  %12676 = vst [vmem:[#allocation8_spill] sm:$0xff] %v8183_v23  ;;  %v8202_v58 = vrot.slane %v1572_v40, %v7988_v3  ;;  %v8205_v31 = vrot.slane %v1573_v41, %v7974_v60  ;;  %v8208_v0 = vrot.slane %v1573_v41, %v7977_v61 }
 0x10e   : > { %12677 = vst [vmem:[#allocation9_spill] sm:$0xff] %v8186_v51  ;;  %12678 = vst [vmem:[#allocation10_spill] sm:$0xff] %v8193_v46  ;;  %v8211_v21 = vrot.slane %v1573_v41, %v7980_v62  ;;  %v1575_v1 = vmax.f32 %v1570_v56, 0.0  ;;  %v8214_v4 = vrot.slane %v1573_v41, %v7983_v63  ;;  %v8217_v8 = vrot.slane %v1573_v41, %v7988_v3  ;;  %v1963_v41 = vpop.f32.mrf.mxu0 }
 0x10f   : > { %12679 = vst [vmem:[#allocation11_spill] sm:$0xff] %v8196_v11  ;;  %12680 = vst [vmem:[#allocation12_spill] sm:$0xff] %v8199_v54  ;;  %v8220_v9 = vrot.slane %v1574_v42, %v7974_v60  ;;  %v8223_v48 = vrot.slane %v1574_v42, %v7977_v61  ;;  %v8226_v55 = vrot.slane %v1574_v42, %v7980_v62 }
 0x110   : > { %12681 = vst [vmem:[#allocation13_spill] sm:$0xff] %v8202_v58  ;;  %12682 = vst [vmem:[#allocation14_spill] sm:$0xff] %v8205_v31  ;;  %v8229_v2 = vrot.slane %v1574_v42, %v7983_v63  ;;  %v8232_v17 = vrot.slane %v1574_v42, %v7988_v3  ;;  %v8235_v15 = vrot.slane %v1575_v1, %v7974_v60  ;;  %v3064_v30 = vld [vmem:[#allocation3 + $0x18] sm:$0xff] }
 0x111   : > { %12683 = vst [vmem:[#allocation15_spill] sm:$0xff] %v8208_v0  ;;  %12684 = vst [vmem:[#allocation16_spill] sm:$0xff] %v8211_v21  ;;  %v8238_v57 = vrot.slane %v1575_v1, %v7977_v61  ;;  %v8241_v22 = vrot.slane %v1575_v1, %v7980_v62  ;;  %v3102_v24 = vmul.f32 %v8009_v13, %v3062_v59  ;;  %v1887_v62 = vmax.f32 %v1885_v44, 0.0 }
 0x112   : > { %12685 = vst [vmem:[#allocation17_spill] sm:$0xff] %v8214_v4  ;;  %12686 = vst [vmem:[#allocation18_spill] sm:$0xff] %v8217_v8  ;;  %v8245_v20 = vrot.slane %v1575_v1, %v7983_v63  ;;  %v8248_v25 = vrot.slane %v1575_v1, %v7988_v3  ;;  %v3134_v28 = vmul.f32 %v8021_v26, %v3062_v59  ;;  %v7515_v3 = vpop.f32.mrf.mxu1 }
 0x113   : > { %12687 = vst [vmem:[#allocation19_spill] sm:$0xff] %v8220_v9  ;;  %12688 = vst [vmem:[#allocation20_spill] sm:$0xff] %v8223_v48  ;;  %v3293_v60 = vmul.f32 %v8025_v27, %v3062_v59  ;;  %v3133_v29 = vmul.f32 %v8021_v26, %v3061_v6  ;;  %v3292_v61 = vmul.f32 %v8025_v27, %v3061_v6 }
 0x114   : > { %12689 = vst [vmem:[#allocation21_spill] sm:$0xff] %v8226_v55  ;;  %12690 = vst [vmem:[#allocation22_spill] sm:$0xff] %v8229_v2  ;;  %v3191_v33 = vrot.slane %v3134_v28, 1  ;;  %v3101_v7 = vmul.f32 %v8009_v13, %v3061_v6  ;;  %v8256_v63 = vmul.f32 %v8021_v26, %v3064_v30  ;;  %v3104_v35 = vmul.f32 %v8009_v13, %v3064_v30 }
 0x115   : > { %12691 = vst [vmem:[#allocation23_spill] sm:$0xff] %v8232_v17  ;;  %12692 = vst [vmem:[#allocation24_spill] sm:$0xff] %v8235_v15  ;;  %v3350_v19 = vrot.slane %v3293_v60, 2  ;;  %v3190_v34 = vrot.slane %v3133_v29, 1  ;;  %v3349_v14 = vrot.slane %v3292_v61, 2  ;;  %v8260_v40 = vmul.f32 %v8025_v27, %v3064_v30  ;;  %v2053_v29 = vpop.f32.mrf.mxu1 }
 0x116   : > { %12693 = vst [vmem:[#allocation25_spill] sm:$0xff] %v8238_v57  ;;  %12694 = vst [vmem:[#allocation26_spill] sm:$0xff] %v8241_v22  ;;  %v3261_v42 = vadd.f32 %v3191_v33, %v3102_v24  ;;  %v12234_v43 = vrot.slane %v8256_v63, 1  ;;  %v8266_v44 = vmul.f32 %v8041_v39, %v3064_v30  ;;  %v8269_v45 = vmul.f32 %v8047_v47, %v3064_v30  ;;  %v8350_v57 = vld [vmem:[%s12226_s9] ss:$0 sm:$0xff] }
 0x117   : > { %12695 = vst [vmem:[#allocation27_spill] sm:$0xff] %v8245_v20  ;;  %12696 = vst [vmem:[#allocation28_spill] sm:$0xff] %v8248_v25  ;;  %v3192_v53 = vsel %vm3189_vm3, %v3190_v34, %v3191_v33  ;;  %v3351_v56 = vsel %vm3348_vm4, %v3349_v14, %v3350_v19  ;;  %v3452_v59 = vmul.f32 %v8037_v38, %v3064_v30  ;;  %v12233_v60 = vrot.slane %v8260_v40, 2  ;;  %v7520_v34 = vpop.f32.mrf.mxu0 }
 0x118   : > { %1890 = vst.msk [vmem:[#allocation3 + $0x28] sm:$0xff] %vm607_vm2, %v1887_v62  ;;  %1799 = vst.msk [vmem:[#allocation3 + $0x10] sm:$0xff] %vm607_vm2, %v1796_v32  ;;  %v1882_v1 = vmul.f32 %v8055_v52, %v1873_v18  ;;  %v3420_v6 = vadd.f32 %v3350_v19, %v3261_v42  ;;  %v3260_v28 = vadd.f32 %v3192_v53, %v3101_v7  ;;  %v12232_v61 = vrot.slane %v8266_v44, 1 }
 0x119   : > { %v3263_v24 = vadd.f32 %v12234_v43, %v3104_v35  ;;  %v1973_v32 = vmul.f32 %v7510_v12, %v8055_v52  ;;  %v2063_v33 = vmul.f32 %v7515_v3, %v8055_v52  ;;  %v12236_v18 = vrot.slane %v8269_v45, 2 }
 0x11a   : > { %v1884_v62 = vadd.f32 %v8148_v49, %v1882_v1  ;;  %v3419_v30 = vadd.f32 %v3351_v56, %v3260_v28  ;;  %v3480_v14 = vadd.f32 %v3452_v59, %v3420_v6  ;;  %v1972_v19 = vmul.f32 %v8055_v52, %v1963_v41  ;;  %v7525_v1 = vpop.f32.mrf.mxu1  ;;  %v8306_v6 = vld [vmem:[%s12225_s8 + $0x8] ss:$0 sm:$0xff] }
 0x11b   : > { %v3422_v7 = vadd.f32 %v12233_v60, %v3263_v24  ;;  %v8287_v42 = vadd.f32 %v8148_v49, %v1973_v32  ;;  %v8290_v53 = vadd.f32 %v8148_v49, %v2063_v33  ;;  %v8298_v59 = vmul.f32 %v8055_v52, %v2053_v29 }
 0x11c   : > { %v1886_v35 = vmax.f32 %v1884_v62, 0.0  ;;  %v3638_v12 = vadd.f32 %v12232_v61, %v3480_v14  ;;  %v8295_v56 = vadd.f32 %v8148_v49, %v1972_v19  ;;  %v8301_v41 = vmul.f32 %v7520_v34, %v8055_v52 }
 0x11d   : > { %v8328_v25 = vmul.f32 %v7525_v1, %v8055_v52  ;;  %v12699_v9 = vrot.slane %v8256_v63, 1 }
 0x11e   : > { %1889 = vst.msk [vmem:[#allocation3 + $0x20] sm:$0xff] %vm607_vm2, %v1886_v35  ;;  %v3796_v29 = vadd.f32 %v12236_v18, %v3638_v12 }
 0x11f   : > { %v3066_v3 = vld [vmem:[#allocation3 + $0x28] sm:$0xff]  ;;  %v3063_v19 = vld [vmem:[#allocation3 + $0x10] sm:$0xff] }
 0x120   : > { %v3106_v28 = vmul.f32 %v8009_v13, %v3066_v3  ;;  %v3138_v24 = vmul.f32 %v8021_v26, %v3066_v3  ;;  %v8311_v62 = vmul.f32 %v8025_v27, %v3066_v3  ;;  %v3454_v32 = vmul.f32 %v8037_v38, %v3066_v3 }
 0x121   : > { %v8318_v33 = vmul.f32 %v8041_v39, %v3066_v3  ;;  %v8321_v34 = vmul.f32 %v8047_v47, %v3066_v3  ;;  %v3828_v14 = vmul.f32 %v8050_v50, %v3066_v3  ;;  %v8325_v43 = vmul.f32 %v8169_v36, %v3066_v3 }
 0x122   : > { %v3197_v61 = vrot.slane %v3138_v24, 1  ;;  %v3482_v60 = vadd.f32 %v3454_v32, %v3422_v7  ;;  %v8333_v20 = vmul.f32 %v8306_v6, %v3066_v3  ;;  %v3135_v7 = vmul.f32 %v8021_v26, %v3063_v19 }
 0x123   : > { %v12241_v12 = vrot.slane %v8318_v33, 1  ;;  %v3856_v18 = vadd.f32 %v3828_v14, %v3796_v29  ;;  %v12246_v24 = vrot.slane %v8325_v43, 1  ;;  %v3103_v1 = vmul.f32 %v8009_v13, %v3063_v19 }
 0x124   : > { %v3265_v22 = vadd.f32 %v3197_v61, %v3106_v28  ;;  %v3294_v35 = vmul.f32 %v8025_v27, %v3063_v19  ;;  %v3451_v15 = vmul.f32 %v8037_v38, %v3063_v19  ;;  %v12250_v28 = vrot.slane %v8333_v20, 2 }
 0x125   : > { %v3640_v32 = vadd.f32 %v12241_v12, %v3482_v60  ;;  %v4014_v3 = vadd.f32 %v12246_v24, %v3856_v18  ;;  %v3193_v29 = vrot.slane %v3135_v7, 1  ;;  %v3511_v14 = vmul.f32 %v8041_v39, %v3063_v19  ;;  %v3065_v48 = vld [vmem:[#allocation3 + $0x20] sm:$0xff] }
 0x126   : > { %v12697_v60 = vrot.slane %v8311_v62, 2  ;;  %v3352_v17 = vrot.slane %v3294_v35, 2  ;;  %v3479_v2 = vadd.f32 %v3451_v15, %v3419_v30  ;;  %v3669_v55 = vmul.f32 %v8047_v47, %v3063_v19 }
 0x127   : > { %v12698_v18 = vrot.slane %v8321_v34, 2  ;;  %v4172_v7 = vadd.f32 %v12250_v28, %v4014_v3  ;;  %v3195_v8 = vsel %vm3189_vm3, %v3193_v29, %v12699_v9  ;;  %v3567_v4 = vrot.slane %v3511_v14, 1 }
 0x128   : > { %v8354_v12 = vadd.f32 %v12697_v60, %v3265_v22  ;;  %v8369_v22 = vld [vmem:[%s12226_s9 + $0x1] ss:$0 sm:$0xff]  ;;  %v3262_v15 = vadd.f32 %v3195_v8, %v3103_v1  ;;  %v3725_v30 = vrot.slane %v3669_v55, 2  ;;  %v3105_v19 = vmul.f32 %v8009_v13, %v3065_v48 }
 0x129   : > { %v8359_v24 = vadd.f32 %v12698_v18, %v3640_v32  ;;  %v3137_v35 = vmul.f32 %v8021_v26, %v3065_v48  ;;  %v4204_v32 = vmul.f32 %v8350_v57, %v4172_v7  ;;  %v12700_v3 = vrot.slane %v8260_v40, 2 }
 0x12a   : > { %v12701_v9 = vrot.slane %v8266_v44, 1  ;;  %v3296_v14 = vmul.f32 %v8025_v27, %v3065_v48  ;;  %v3453_v55 = vmul.f32 %v8037_v38, %v3065_v48  ;;  %v12702_v28 = vrot.slane %v8269_v45, 2 }
 0x12b   : > { %v3354_v63 = vsel %vm3348_vm4, %v3352_v17, %v12700_v3  ;;  %v3196_v8 = vrot.slane %v3137_v35, 1  ;;  %v4236_v1 = vadd.f32 %v8369_v22, %v4204_v32  ;;  %v3513_v40 = vmul.f32 %v8041_v39, %v3065_v48 }
 0x12c   : > { %v3569_v29 = vsel %vm3189_vm3, %v3567_v4, %v12701_v9  ;;  %v3421_v60 = vadd.f32 %v3354_v63, %v3262_v15  ;;  %v3727_v7 = vsel %vm3348_vm4, %v3725_v30, %v12702_v28  ;;  %v3671_v17 = vmul.f32 %v8047_v47, %v3065_v48 }
 0x12d   : > { %v3637_v18 = vadd.f32 %v3569_v29, %v3479_v2  ;;  %v3198_v4 = vsel %vm3189_vm3, %v3196_v8, %v3197_v61  ;;  %v3355_v3 = vrot.slane %v3296_v14, 2  ;;  %v4264_v15 = vmax.f32 %v4236_v1, 0.0 }
 0x12e   : > { %v3481_v9 = vadd.f32 %v3453_v55, %v3421_v60  ;;  %v3264_v2 = vadd.f32 %v3198_v4, %v3105_v19  ;;  %v3570_v35 = vrot.slane %v3513_v40, 1  ;;  %v3827_v63 = vmul.f32 %v8050_v50, %v3065_v48 }
 0x12f   : > { %v3795_v44 = vadd.f32 %v3727_v7, %v3637_v18  ;;  %v3728_v29 = vrot.slane %v3671_v17, 2  ;;  %v3887_v32 = vmul.f32 %v8169_v36, %v3065_v48  ;;  %v4045_v45 = vmul.f32 %v8306_v6, %v3065_v48 }
 0x130   : > { %v1977_v28 = vmax.f32 %v8287_v42, 0.0  ;;  %v8394_v30 = vmul.f32 %v8176_v37, %v4264_v15  ;;  %v8397_v18 = vmul.f32 %v8180_v5, %v4264_v15  ;;  %v8400_v61 = vmul.f32 %v8183_v23, %v4264_v15 }
 0x131   : > { %v3855_v19 = vadd.f32 %v3827_v63, %v3795_v44  ;;  %v4296_v14 = vmul.f32 %v8173_v10, %v4264_v15  ;;  %v8404_v60 = vmul.f32 %v8186_v51, %v4264_v15  ;;  %v3943_v8 = vrot.slane %v3887_v32, 1 }
 0x132   : > { %v4101_v55 = vrot.slane %v4045_v45, 2  ;;  %1980 = vst.msk [vmem:[#allocation3 + $0x38] sm:$0xff] %vm607_vm2, %v1977_v28  ;;  %v12253_v48 = vrot.slane %v8394_v30, 1  ;;  %v12251_v42 = vrot.slane %v8397_v18, 2  ;;  %v12703_v7 = vrot.slane %v8318_v33, 1 }
 0x133   : > { %v12704_v4 = vrot.slane %v8325_v43, 1  ;;  %v2067_v63 = vmax.f32 %v8290_v53, 0.0  ;;  %v1976_v28 = vmax.f32 %v8295_v56, 0.0  ;;  %v12705_v1 = vrot.slane %v8311_v62, 2  ;;  %v2233_v56 = vpop.f32.mrf.mxu1 }
 0x134   : > { %v3572_v40 = vsel %vm3189_vm3, %v3570_v35, %v12703_v7  ;;  %v4410_v32 = vadd.f32 %v12253_v48, %v4296_v14  ;;  %v2143_v35 = vpop.f32.mrf.mxu0  ;;  %v12706_v7 = vrot.slane %v8333_v20, 2  ;;  %v2064_v53 = vadd.f32 %v8148_v49, %v8298_v59 }
 0x135   : > { %v3639_v44 = vadd.f32 %v3572_v40, %v3481_v9  ;;  %v3945_v15 = vsel %vm3189_vm3, %v3943_v8, %v12704_v4  ;;  %v3357_v33 = vsel %vm3348_vm4, %v3355_v3, %v12705_v1  ;;  %2070 = vst.msk [vmem:[#allocation3 + $0x48] sm:$0xff] %vm607_vm2, %v2067_v63  ;;  %1979 = vst.msk [vmem:[#allocation3 + $0x30] sm:$0xff] %vm607_vm2, %v1976_v28  ;;  %v12707_v20 = vrot.slane %v8321_v34, 2 }
 0x136   : > { %v4013_v45 = vadd.f32 %v3945_v15, %v3855_v19  ;;  %v4103_v9 = vsel %vm3348_vm4, %v4101_v55, %v12706_v7  ;;  %v8428_v43 = vadd.f32 %v3357_v33, %v3264_v2  ;;  %v2155_v19 = vadd.f32 %v8148_v49, %v8301_v41  ;;  %v7530_v63 = vpop.f32.mrf.mxu0 }
 0x137   : > { %v4524_v62 = vadd.f32 %v12251_v42, %v4410_v32  ;;  %v3730_v14 = vsel %vm3348_vm4, %v3728_v29, %v12707_v20  ;;  %v2245_v2 = vadd.f32 %v8148_v49, %v8328_v25  ;;  %v2066_v59 = vmax.f32 %v2064_v53, 0.0 }
 0x138   : > { %v4171_v3 = vadd.f32 %v4103_v9, %v4013_v45  ;;  %v8442_v8 = vadd.f32 %v3730_v14, %v3639_v44  ;;  %v2157_v55 = vmax.f32 %v2155_v19, 0.0  ;;  %v8445_v41 = vmul.f32 %v8055_v52, %v2143_v35 }
 0x139   : > { %v12708_v1 = vrot.slane %v8400_v61, 3  ;;  %v3068_v15 = vld [vmem:[#allocation3 + $0x38] sm:$0xff]  ;;  %v2247_v34 = vmax.f32 %v2245_v2, 0.0  ;;  %v8453_v29 = vmul.f32 %v8055_v52, %v2233_v56  ;;  %2069 = vst.msk [vmem:[#allocation3 + $0x40] sm:$0xff] %vm607_vm2, %v2066_v59  ;;  %v8480_v56 = vmul.f32 %v7530_v63, %v8055_v52 }
 0x13a   : > { %v4203_v4 = vmul.f32 %v8350_v57, %v4171_v3  ;;  %v3108_v25 = vmul.f32 %v8009_v13, %v3068_v15  ;;  %v8457_v44 = vmul.f32 %v8021_v26, %v3068_v15  ;;  %v8460_v32 = vmul.f32 %v8025_v27, %v3068_v15  ;;  %2160 = vst.msk [vmem:[#allocation3 + $0x58] sm:$0xff] %vm607_vm2, %v2157_v55 }
 0x13b   : > { %v8449_v40 = vadd.f32 %v12708_v1, %v4524_v62  ;;  %v3456_v45 = vmul.f32 %v8037_v38, %v3068_v15  ;;  %v8467_v33 = vmul.f32 %v8041_v39, %v3068_v15  ;;  %v8470_v35 = vmul.f32 %v8047_v47, %v3068_v15  ;;  %2250 = vst.msk [vmem:[#allocation3 + $0x68] sm:$0xff] %vm607_vm2, %v2247_v34 }
 0x13c   : > { %v4235_v28 = vadd.f32 %v8369_v22, %v4203_v4  ;;  %v3830_v7 = vmul.f32 %v8050_v50, %v3068_v15  ;;  %v12252_v9 = vrot.slane %v8457_v44, 1  ;;  %v8477_v19 = vmul.f32 %v8169_v36, %v3068_v15  ;;  %v3070_v1 = vld [vmem:[#allocation3 + $0x48] sm:$0xff] }
 0x13d   : > { %12709 = vst [vmem:[#allocation29_spill] sm:$0xff] %v8449_v40  ;;  %v3484_v53 = vadd.f32 %v3456_v45, %v8354_v12  ;;  %v12255_v3 = vrot.slane %v8460_v32, 2  ;;  %v12258_v20 = vrot.slane %v8467_v33, 1  ;;  %v12254_v59 = vrot.slane %v8470_v35, 2 }
 0x13e   : > { %v4263_v62 = vmax.f32 %v4235_v28, 0.0  ;;  %v3858_v14 = vadd.f32 %v3830_v7, %v8359_v24  ;;  %v3267_v2 = vadd.f32 %v12252_v9, %v3108_v25  ;;  %v12256_v12 = vrot.slane %v8477_v19, 1 }
 0x13f   : > { %v8490_v55 = vmul.f32 %v8306_v6, %v3068_v15  ;;  %v3110_v24 = vmul.f32 %v8009_v13, %v3070_v1  ;;  %v3642_v15 = vadd.f32 %v12258_v20, %v3484_v53  ;;  %v8516_v48 = vmul.f32 %v8021_v26, %v3070_v1 }
 0x140   : > { %v4319_v52 = vmul.f32 %v8176_v37, %v4263_v62  ;;  %v8494_v4 = vmul.f32 %v8180_v5, %v4263_v62  ;;  %v8497_v34 = vmul.f32 %v8183_v23, %v4263_v62  ;;  %v4295_v63 = vmul.f32 %v8173_v10, %v4263_v62  ;;  %v3069_v10 = vld [vmem:[#allocation3 + $0x40] sm:$0xff] }
 0x141   : > { %v8502_v25 = vmul.f32 %v8186_v51, %v4263_v62  ;;  %v4016_v45 = vadd.f32 %v12256_v12, %v3858_v14  ;;  %v3426_v17 = vadd.f32 %v12255_v3, %v3267_v2  ;;  %v12257_v42 = vrot.slane %v8490_v55, 2 }
 0x142   : > { %v4359_v28 = vrot.slane %v4319_v52, 1  ;;  %v3800_v62 = vadd.f32 %v12254_v59, %v3642_v15  ;;  %v8519_v53 = vmul.f32 %v8025_v27, %v3070_v1  ;;  %v12710_v14 = vrot.slane %v8394_v30, 1 }
 0x143   : > { %v4174_v2 = vadd.f32 %v12257_v42, %v4016_v45  ;;  %v3458_v7 = vmul.f32 %v8037_v38, %v3070_v1  ;;  %v8528_v9 = vmul.f32 %v8041_v39, %v3070_v1  ;;  %v3203_v59 = vrot.slane %v8516_v48, 1  ;;  %v3067_v42 = vld [vmem:[#allocation3 + $0x30] sm:$0xff] }
 0x144   : > { %v4361_v52 = vsel %vm3189_vm3, %v4359_v28, %v12710_v14  ;;  %v8534_v12 = vmul.f32 %v8047_v47, %v3070_v1  ;;  %v3832_v45 = vmul.f32 %v8050_v50, %v3070_v1  ;;  %v8542_v15 = vmul.f32 %v8169_v36, %v3070_v1 }
 0x145   : > { %v4206_v30 = vmul.f32 %v8350_v57, %v4174_v2  ;;  %v3486_v28 = vadd.f32 %v3458_v7, %v3426_v17  ;;  %v12265_v14 = vrot.slane %v8528_v9, 1  ;;  %v8539_v20 = vadd.f32 %v4361_v52, %v4295_v63 }
 0x146   : > { %v3269_v40 = vadd.f32 %v3203_v59, %v3110_v24  ;;  %v8545_v48 = vmul.f32 %v8306_v6, %v3070_v1  ;;  %v12275_v17 = vrot.slane %v8534_v12, 2  ;;  %v3860_v7 = vadd.f32 %v3832_v45, %v3800_v62 }
 0x147   : > { %v4238_v3 = vadd.f32 %v8369_v22, %v4206_v30  ;;  %v3644_v2 = vadd.f32 %v12265_v14, %v3486_v28  ;;  %v12272_v51 = vrot.slane %v8542_v15, 1  ;;  %v3107_v24 = vmul.f32 %v8009_v13, %v3067_v42 }
 0x148   : > { %v3139_v52 = vmul.f32 %v8021_v26, %v3067_v42  ;;  %v12712_v1 = vrot.slane %v8519_v53, 2  ;;  %v3298_v30 = vmul.f32 %v8025_v27, %v3067_v42  ;;  %v3455_v28 = vmul.f32 %v8037_v38, %v3067_v42 }
 0x149   : > { %v8555_v23 = vmax.f32 %v4238_v3, 0.0  ;;  %v4018_v62 = vadd.f32 %v12272_v51, %v3860_v7  ;;  %v3515_v14 = vmul.f32 %v8041_v39, %v3067_v42  ;;  %v3673_v63 = vmul.f32 %v8047_v47, %v3067_v42 }
 0x14a   : > { %v8559_v5 = vadd.f32 %v12712_v1, %v3269_v40  ;;  %v3199_v45 = vrot.slane %v3139_v52, 1  ;;  %v8569_v3 = vadd.f32 %v12275_v17, %v3644_v2  ;;  %v3483_v37 = vadd.f32 %v3455_v28, %v8428_v43 }
 0x14b   : > { %12711 = vst [vmem:[#allocation30_spill] sm:$0xff] %v8555_v23  ;;  %v3829_v40 = vmul.f32 %v8050_v50, %v3067_v42  ;;  %v3889_v1 = vmul.f32 %v8169_v36, %v3067_v42  ;;  %v12713_v21 = vrot.slane %v8545_v48, 2  ;;  %v12714_v7 = vrot.slane %v8457_v44, 1 }
 0x14c   : > { %v3358_v51 = vrot.slane %v3298_v30, 2  ;;  %v3573_v31 = vrot.slane %v3515_v14, 1  ;;  %v4047_v43 = vmul.f32 %v8306_v6, %v3067_v42  ;;  %v12715_v54 = vrot.slane %v8467_v33, 1 }
 0x14d   : > { %v4176_v0 = vadd.f32 %v12713_v21, %v4018_v62  ;;  %v3201_v52 = vsel %vm3189_vm3, %v3199_v45, %v12714_v7  ;;  %v3857_v2 = vadd.f32 %v3829_v40, %v8442_v8  ;;  %v3946_v17 = vrot.slane %v3889_v1, 1 }
 0x14e   : > { %v3266_v58 = vadd.f32 %v3201_v52, %v3107_v24  ;;  %v3575_v11 = vsel %vm3189_vm3, %v3573_v31, %v12715_v54  ;;  %v3731_v23 = vrot.slane %v3673_v63, 2  ;;  %v3141_v21 = vmul.f32 %v8021_v26, %v3069_v10 }
 0x14f   : > { %v4208_v28 = vmul.f32 %v8350_v57, %v4176_v0  ;;  %v3641_v44 = vadd.f32 %v3575_v11, %v3483_v37  ;;  %v12716_v62 = vrot.slane %v8477_v19, 1  ;;  %v4104_v24 = vrot.slane %v4047_v43, 2 }
 0x150   : > { %v8590_v8 = vmul.f32 %v8025_v27, %v3069_v10  ;;  %v3202_v0 = vrot.slane %v3141_v21, 1  ;;  %v12717_v33 = vrot.slane %v8460_v32, 2  ;;  %v12718_v31 = vrot.slane %v8490_v55, 2 }
 0x151   : > { %v3948_v14 = vsel %vm3189_vm3, %v3946_v17, %v12716_v62  ;;  %v4240_v42 = vadd.f32 %v8369_v22, %v4208_v28  ;;  %v3109_v11 = vmul.f32 %v8009_v13, %v3069_v10  ;;  %v3457_v17 = vmul.f32 %v8037_v38, %v3069_v10 }
 0x152   : > { %v4015_v30 = vadd.f32 %v3948_v14, %v3857_v2  ;;  %v3360_v54 = vsel %vm3348_vm4, %v3358_v51, %v12717_v33  ;;  %v4106_v37 = vsel %vm3348_vm4, %v4104_v24, %v12718_v31  ;;  %v3204_v45 = vsel %vm3189_vm3, %v3202_v0, %v3203_v59 }
 0x153   : > { %v3425_v19 = vadd.f32 %v3360_v54, %v3266_v58  ;;  %v3517_v1 = vmul.f32 %v8041_v39, %v3069_v10  ;;  %v8604_v7 = vmax.f32 %v4240_v42, 0.0  ;;  %v8607_v51 = vmul.f32 %v8047_v47, %v3069_v10  ;;  %v3072_v58 = vld [vmem:[#allocation3 + $0x58] sm:$0xff] }
 0x154   : > { %v4173_v63 = vadd.f32 %v4106_v37, %v4015_v30  ;;  %v12720_v55 = vrot.slane %v8470_v35, 2  ;;  %v3831_v59 = vmul.f32 %v8050_v50, %v3069_v10  ;;  %v8614_v21 = vadd.f32 %v3204_v45, %v3109_v11 }
 0x155   : > { %12719 = vst [vmem:[#allocation31_spill] sm:$0xff] %v8604_v7  ;;  %v3485_v32 = vadd.f32 %v3457_v17, %v3425_v19  ;;  %v3576_v43 = vrot.slane %v3517_v1, 1  ;;  %v3891_v14 = vmul.f32 %v8169_v36, %v3069_v10  ;;  %v4049_v24 = vmul.f32 %v8306_v6, %v3069_v10 }
 0x156   : > { %v3733_v52 = vsel %vm3348_vm4, %v3731_v23, %v12720_v55  ;;  %v4205_v2 = vmul.f32 %v8350_v57, %v4173_v63  ;;  %v12721_v42 = vrot.slane %v8528_v9, 1  ;;  %v3112_v30 = vmul.f32 %v8009_v13, %v3072_v58 }
 0x157   : > { %v3799_v28 = vadd.f32 %v3733_v52, %v3641_v44  ;;  %v8624_v0 = vmul.f32 %v8021_v26, %v3072_v58  ;;  %v3949_v33 = vrot.slane %v3891_v14, 1  ;;  %v4107_v54 = vrot.slane %v4049_v24, 2 }
 0x158   : > { %v3578_v35 = vsel %vm3189_vm3, %v3576_v43, %v12721_v42  ;;  %v4237_v44 = vadd.f32 %v8369_v22, %v4205_v2  ;;  %v8628_v31 = vmul.f32 %v8025_v27, %v3072_v58  ;;  %v3460_v9 = vmul.f32 %v8037_v38, %v3072_v58  ;;  %v2323_v42 = vpop.f32.mrf.mxu0 }
 0x159   : > { %v3859_v23 = vadd.f32 %v3831_v59, %v3799_v28  ;;  %v8630_v37 = vadd.f32 %v3578_v35, %v3485_v32  ;;  %v12282_v10 = vrot.slane %v8624_v0, 1  ;;  %v8635_v11 = vmul.f32 %v8041_v39, %v3072_v58  ;;  %v7535_v28 = vpop.f32.mrf.mxu1 }
 0x15a   : > { %v12722_v19 = vrot.slane %v8542_v15, 1  ;;  %v12723_v63 = vrot.slane %v8545_v48, 2  ;;  %v12280_v1 = vrot.slane %v8628_v31, 2  ;;  %v8645_v32 = vmul.f32 %v8047_v47, %v3072_v58  ;;  %v3074_v15 = vld [vmem:[#allocation3 + $0x68] sm:$0xff] }
 0x15b   : > { %v3271_v52 = vadd.f32 %v12282_v10, %v3112_v30  ;;  %v3488_v2 = vadd.f32 %v3460_v9, %v8559_v5  ;;  %v12281_v43 = vrot.slane %v8635_v11, 1  ;;  %v3834_v48 = vmul.f32 %v8050_v50, %v3072_v58 }
 0x15c   : > { %v3951_v17 = vsel %vm3189_vm3, %v3949_v33, %v12722_v19  ;;  %v4109_v45 = vsel %vm3348_vm4, %v4107_v54, %v12723_v63  ;;  %v12279_v59 = vrot.slane %v8645_v32, 2  ;;  %v8654_v14 = vmul.f32 %v8169_v36, %v3072_v58 }
 0x15d   : > { %v4017_v55 = vadd.f32 %v3951_v17, %v3859_v23  ;;  %v8657_v24 = vmul.f32 %v8306_v6, %v3072_v58  ;;  %v3430_v23 = vadd.f32 %v12280_v1, %v3271_v52  ;;  %v3646_v5 = vadd.f32 %v12281_v43, %v3488_v2 }
 0x15e   : > { %v3114_v30 = vmul.f32 %v8009_v13, %v3074_v15  ;;  %v3862_v33 = vadd.f32 %v3834_v48, %v8569_v3  ;;  %v12283_v54 = vrot.slane %v8654_v14, 1  ;;  %v8668_v19 = vmul.f32 %v8021_v26, %v3074_v15 }
 0x15f   : > { %v4175_v35 = vadd.f32 %v4109_v45, %v4017_v55  ;;  %v12286_v9 = vrot.slane %v8657_v24, 2  ;;  %v3804_v17 = vadd.f32 %v12279_v59, %v3646_v5  ;;  %v8674_v63 = vmul.f32 %v8025_v27, %v3074_v15  ;;  %v2413_v55 = vpop.f32.mrf.mxu1 }
 0x160   : > { %v3462_v45 = vmul.f32 %v8037_v38, %v3074_v15  ;;  %v4020_v3 = vadd.f32 %v12283_v54, %v3862_v33  ;;  %v12285_v52 = vrot.slane %v8668_v19, 1  ;;  %v8681_v2 = vmul.f32 %v8041_v39, %v3074_v15 }
 0x161   : > { %v4207_v58 = vmul.f32 %v8350_v57, %v4175_v35  ;;  %v8684_v48 = vmul.f32 %v8047_v47, %v3074_v15  ;;  %v7540_v35 = vpop.f32.mrf.mxu0  ;;  %v3836_v43 = vmul.f32 %v8050_v50, %v3074_v15  ;;  %v8695_v40 = vmax.f32 %v4237_v44, 0.0 }
 0x162   : > { %v3490_v1 = vadd.f32 %v3462_v45, %v3430_v23  ;;  %v4178_v10 = vadd.f32 %v12286_v9, %v4020_v3  ;;  %v3273_v33 = vadd.f32 %v12285_v52, %v3114_v30  ;;  %v12287_v54 = vrot.slane %v8681_v2, 1  ;;  %v7545_v45 = vpop.f32.mrf.mxu1 }
 0x163   : > { %v4239_v5 = vadd.f32 %v8369_v22, %v4207_v58  ;;  %v3864_v7 = vadd.f32 %v3836_v43, %v3804_v17  ;;  %v8698_v58 = vmul.f32 %v8169_v36, %v3074_v15  ;;  %v8701_v23 = vmul.f32 %v8306_v6, %v3074_v15  ;;  %v2503_v44 = vpop.f32.mrf.mxu0 }
 0x164   : > { %v4210_v3 = vmul.f32 %v8350_v57, %v4178_v10  ;;  %v3648_v30 = vadd.f32 %v12287_v54, %v3490_v1  ;;  %v2154_v52 = vadd.f32 %v8148_v49, %v8445_v41  ;;  %v12725_v9 = vrot.slane %v8519_v53, 2 }
 0x165   : > { %v8703_v59 = vmax.f32 %v4239_v5, 0.0  ;;  %v12726_v15 = vrot.slane %v8590_v8, 2  ;;  %v12727_v62 = vrot.slane %v8534_v12, 2  ;;  %v12728_v10 = vrot.slane %v8607_v51, 2 }
 0x166   : > { %v4242_v54 = vadd.f32 %v8369_v22, %v4210_v3  ;;  %v12729_v41 = vrot.slane %v8674_v63, 2  ;;  %v12730_v17 = vrot.slane %v8684_v48, 2  ;;  %v2156_v53 = vmax.f32 %v2154_v52, 0.0  ;;  %v2593_v3 = vpop.f32.mrf.mxu1  ;;  %v8743_v52 = vld [vmem:[%s12224_s7] ss:$0 sm:$0xff] }
 0x167   : > { %12724 = vst [vmem:[#allocation32_spill] sm:$0xff] %v8703_v59  ;;  %v3363_v5 = vsel %vm3348_vm4, %v12726_v15, %v12725_v9  ;;  %v3736_v1 = vsel %vm3348_vm4, %v12728_v10, %v12727_v62  ;;  %v12731_v8 = vrot.slane %v8698_v58, 1  ;;  %v2244_v51 = vadd.f32 %v8148_v49, %v8453_v29  ;;  %v7550_v29 = vpop.f32.mrf.mxu0 }
 0x168   : > { %v8725_v59 = vadd.f32 %v12729_v41, %v3273_v33  ;;  %v8729_v43 = vadd.f32 %v12730_v17, %v3648_v30  ;;  %v3427_v12 = vadd.f32 %v3363_v5, %v8614_v21  ;;  %v2335_v62 = vadd.f32 %v8148_v49, %v8480_v56  ;;  %2159 = vst.msk [vmem:[#allocation3 + $0x50] sm:$0xff] %vm607_vm2, %v2156_v53 }
 0x169   : > { %v4022_v9 = vadd.f32 %v12731_v8, %v3864_v7  ;;  %v3801_v33 = vadd.f32 %v3736_v1, %v8630_v37  ;;  %v2423_v7 = vmul.f32 %v8743_v52, %v7535_v28  ;;  %v2332_v21 = vmul.f32 %v8743_v52, %v2323_v42  ;;  %v7555_v8 = vpop.f32.mrf.mxu1 }
 0x16a   : > { %v2422_v30 = vmul.f32 %v8743_v52, %v2413_v55  ;;  %v12732_v17 = vrot.slane %v8701_v23, 2  ;;  %v2246_v15 = vmax.f32 %v2244_v51, 0.0  ;;  %v2337_v5 = vmax.f32 %v2335_v62, 0.0 }
 0x16b   : > { %v2513_v10 = vmul.f32 %v8743_v52, %v7540_v35  ;;  %v2425_v37 = vadd.f32 %v8148_v49, %v2423_v7  ;;  %v2334_v1 = vadd.f32 %v8148_v49, %v2332_v21  ;;  %v2603_v28 = vmul.f32 %v8743_v52, %v7545_v45  ;;  %v2683_v21 = vpop.f32.mrf.mxu0 }
 0x16c   : > { %v4180_v56 = vadd.f32 %v12732_v17, %v4022_v9  ;;  %v2424_v41 = vadd.f32 %v8148_v49, %v2422_v30  ;;  %2249 = vst.msk [vmem:[#allocation3 + $0x60] sm:$0xff] %vm607_vm2, %v2246_v15  ;;  %2340 = vst.msk [vmem:[#allocation3 + $0x78] sm:$0xff] %vm607_vm2, %v2337_v5  ;;  %v2512_v53 = vmul.f32 %v8743_v52, %v2503_v44  ;;  %v8765_v15 = vmax.f32 %v4242_v54, 0.0 }
 0x16d   : > { %v2515_v55 = vadd.f32 %v8148_v49, %v2513_v10  ;;  %v2602_v35 = vmul.f32 %v8743_v52, %v2593_v3  ;;  %v2427_v9 = vmax.f32 %v2425_v37, 0.0  ;;  %v2336_v51 = vmax.f32 %v2334_v1, 0.0 }
 0x16e   : > { %v4212_v42 = vmul.f32 %v8350_v57, %v4180_v56  ;;  %v2426_v62 = vmax.f32 %v2424_v41, 0.0  ;;  %v2605_v7 = vadd.f32 %v8148_v49, %v2603_v28  ;;  %v2514_v17 = vadd.f32 %v8148_v49, %v2512_v53  ;;  %12733 = vst [vmem:[#allocation33_spill] sm:$0xff] %v8765_v15 }
 0x16f   : > { %v2517_v30 = vmax.f32 %v2515_v55, 0.0  ;;  %v2604_v56 = vadd.f32 %v8148_v49, %v2602_v35  ;;  %2430 = vst.msk [vmem:[#allocation3 + $0x88] sm:$0xff] %vm607_vm2, %v2427_v9  ;;  %2339 = vst.msk [vmem:[#allocation3 + $0x70] sm:$0xff] %vm607_vm2, %v2336_v51  ;;  %v8771_v3 = vmul.f32 %v8743_v52, %v7550_v29  ;;  %v8774_v5 = vmul.f32 %v8743_v52, %v7555_v8  ;;  %v3071_v37 = vld [vmem:[#allocation3 + $0x50] sm:$0xff] }
 0x170   : > { %v4244_v45 = vadd.f32 %v8369_v22, %v4212_v42  ;;  %2429 = vst.msk [vmem:[#allocation3 + $0x80] sm:$0xff] %vm607_vm2, %v2426_v62  ;;  %v2607_v44 = vmax.f32 %v2605_v7, 0.0  ;;  %v2516_v49 = vmax.f32 %v2514_v17, 0.0  ;;  %v8780_v1 = vmul.f32 %v8743_v52, %v2683_v21 }
 0x171   : > { %2520 = vst.msk [vmem:[#allocation3 + $0x98] sm:$0xff] %vm607_vm2, %v2517_v30  ;;  %v2606_v54 = vmax.f32 %v2604_v56, 0.0  ;;  %v3111_v41 = vmul.f32 %v8009_v13, %v3071_v37  ;;  %v3143_v28 = vmul.f32 %v8021_v26, %v3071_v37  ;;  %v3302_v29 = vmul.f32 %v8025_v27, %v3071_v37 }
 0x172   : > { %v8776_v10 = vmax.f32 %v4244_v45, 0.0  ;;  %v3459_v42 = vmul.f32 %v8037_v38, %v3071_v37  ;;  %2610 = vst.msk [vmem:[#allocation3 + $0xa8] sm:$0xff] %vm607_vm2, %v2607_v44  ;;  %v3519_v55 = vmul.f32 %v8041_v39, %v3071_v37  ;;  %v3677_v53 = vmul.f32 %v8047_v47, %v3071_v37  ;;  %2519 = vst.msk [vmem:[#allocation3 + $0x90] sm:$0xff] %vm607_vm2, %v2516_v49 }
 0x173   : > { %v3833_v35 = vmul.f32 %v8050_v50, %v3071_v37  ;;  %v3893_v8 = vmul.f32 %v8169_v36, %v3071_v37  ;;  %2609 = vst.msk [vmem:[#allocation3 + $0xa0] sm:$0xff] %vm607_vm2, %v2606_v54  ;;  %v3205_v9 = vrot.slane %v3143_v28, 1  ;;  %v3364_v51 = vrot.slane %v3302_v29, 2  ;;  %v3073_v21 = vld [vmem:[#allocation3 + $0x60] sm:$0xff]  ;;  %v2773_v54 = vpop.f32.mrf.mxu1 }
 0x174   : > { %12734 = vst [vmem:[#allocation34_spill] sm:$0xff] %v8776_v10  ;;  %v3487_v62 = vadd.f32 %v3459_v42, %v3427_v12  ;;  %v4051_v7 = vmul.f32 %v8306_v6, %v3071_v37  ;;  %v3579_v45 = vrot.slane %v3519_v55, 1  ;;  %v3737_v30 = vrot.slane %v3677_v53, 2 }
 0x175   : > { %v3861_v17 = vadd.f32 %v3833_v35, %v3801_v33  ;;  %v3952_v56 = vrot.slane %v3893_v8, 1  ;;  %v12735_v44 = vrot.slane %v8624_v0, 1  ;;  %v3113_v46 = vmul.f32 %v8009_v13, %v3073_v21 }
 0x176   : > { %v4110_v15 = vrot.slane %v4051_v7, 2  ;;  %v3145_v49 = vmul.f32 %v8021_v26, %v3073_v21  ;;  %v12736_v12 = vrot.slane %v8635_v11, 1  ;;  %v12737_v29 = vrot.slane %v8654_v14, 1 }
 0x177   : > { %v3207_v10 = vsel %vm3189_vm3, %v3205_v9, %v12735_v44  ;;  %v8806_v42 = vmul.f32 %v8025_v27, %v3073_v21  ;;  %v12738_v53 = vrot.slane %v8657_v24, 2  ;;  %v3521_v14 = vmul.f32 %v8041_v39, %v3073_v21 }
 0x178   : > { %v3270_v28 = vadd.f32 %v3207_v10, %v3111_v41  ;;  %v3581_v37 = vsel %vm3189_vm3, %v3579_v45, %v12736_v12  ;;  %v3954_v33 = vsel %vm3189_vm3, %v3952_v56, %v12737_v29  ;;  %v3208_v8 = vrot.slane %v3145_v49, 1  ;;  %v3076_v49 = vld [vmem:[#allocation3 + $0x78] sm:$0xff] }
 0x179   : > { %v3645_v0 = vadd.f32 %v3581_v37, %v3487_v62  ;;  %v4019_v55 = vadd.f32 %v3954_v33, %v3861_v17  ;;  %v4112_v35 = vsel %vm3348_vm4, %v4110_v15, %v12738_v53  ;;  %v12739_v10 = vrot.slane %v8628_v31, 2 }
 0x17a   : > { %v3461_v41 = vmul.f32 %v8037_v38, %v3073_v21  ;;  %v8817_v9 = vmul.f32 %v8743_v52, %v2773_v54  ;;  %v12740_v62 = vrot.slane %v8668_v19, 1  ;;  %v8823_v15 = vmul.f32 %v8047_v47, %v3073_v21 }
 0x17b   : > { %v3366_v11 = vsel %vm3348_vm4, %v3364_v51, %v12739_v10  ;;  %v4177_v7 = vadd.f32 %v4112_v35, %v4019_v55  ;;  %v3367_v31 = vrot.slane %v8806_v42, 2  ;;  %v3582_v17 = vrot.slane %v3521_v14, 1 }
 0x17c   : > { %v3210_v45 = vsel %vm3189_vm3, %v3208_v8, %v12740_v62  ;;  %v3429_v24 = vadd.f32 %v3366_v11, %v3270_v28  ;;  %v12741_v51 = vrot.slane %v8645_v32, 2  ;;  %v3835_v44 = vmul.f32 %v8050_v50, %v3073_v21 }
 0x17d   : > { %v4209_v54 = vmul.f32 %v8350_v57, %v4177_v7  ;;  %v8831_v12 = vadd.f32 %v3210_v45, %v3113_v46  ;;  %v12742_v28 = vrot.slane %v8681_v2, 1  ;;  %v3895_v55 = vmul.f32 %v8169_v36, %v3073_v21 }
 0x17e   : > { %v3739_v56 = vsel %vm3348_vm4, %v3737_v30, %v12741_v51  ;;  %v3489_v19 = vadd.f32 %v3461_v41, %v3429_v24  ;;  %v4053_v32 = vmul.f32 %v8306_v6, %v3073_v21  ;;  %v3116_v35 = vmul.f32 %v8009_v13, %v3076_v49 }
 0x17f   : > { %v3803_v37 = vadd.f32 %v3739_v56, %v3645_v0  ;;  %v3584_v29 = vsel %vm3189_vm3, %v3582_v17, %v12742_v28  ;;  %v4241_v30 = vadd.f32 %v8369_v22, %v4209_v54  ;;  %v8842_v46 = vmul.f32 %v8021_v26, %v3076_v49  ;;  %v3078_v56 = vld [vmem:[#allocation3 + $0x88] sm:$0xff] }
 0x180   : > { %v3955_v8 = vrot.slane %v3895_v55, 1  ;;  %v4113_v0 = vrot.slane %v4053_v32, 2  ;;  %v8845_v2 = vmul.f32 %v8025_v27, %v3076_v49  ;;  %v3464_v10 = vmul.f32 %v8037_v38, %v3076_v49 }
 0x181   : > { %v3863_v53 = vadd.f32 %v3835_v44, %v3803_v37  ;;  %v8848_v11 = vadd.f32 %v3584_v29, %v3489_v19  ;;  %v12296_v41 = vrot.slane %v8842_v46, 1  ;;  %v8852_v21 = vmul.f32 %v8041_v39, %v3076_v49 }
 0x182   : > { %v8855_v14 = vmul.f32 %v8047_v47, %v3076_v49  ;;  %v12743_v7 = vrot.slane %v8698_v58, 1  ;;  %v12744_v45 = vrot.slane %v8701_v23, 2  ;;  %v12294_v17 = vrot.slane %v8845_v2, 2 }
 0x183   : > { %v3492_v51 = vadd.f32 %v3464_v10, %v8725_v59  ;;  %v3275_v54 = vadd.f32 %v12296_v41, %v3116_v35  ;;  %v12295_v19 = vrot.slane %v8852_v21, 1  ;;  %v3838_v58 = vmul.f32 %v8050_v50, %v3076_v49 }
 0x184   : > { %v3957_v62 = vsel %vm3189_vm3, %v3955_v8, %v12743_v7  ;;  %v4115_v24 = vsel %vm3348_vm4, %v4113_v0, %v12744_v45  ;;  %v12292_v37 = vrot.slane %v8855_v14, 2  ;;  %v8871_v28 = vmul.f32 %v8169_v36, %v3076_v49 }
 0x185   : > { %v4021_v44 = vadd.f32 %v3957_v62, %v3863_v53  ;;  %v8874_v23 = vmul.f32 %v8306_v6, %v3076_v49  ;;  %v3118_v29 = vmul.f32 %v8009_v13, %v3078_v56  ;;  %v3434_v55 = vadd.f32 %v12294_v17, %v3275_v54 }
 0x186   : > { %v3650_v32 = vadd.f32 %v12295_v19, %v3492_v51  ;;  %v8882_v53 = vmul.f32 %v8021_v26, %v3078_v56  ;;  %v3866_v35 = vadd.f32 %v3838_v58, %v8729_v43  ;;  %v12293_v8 = vrot.slane %v8871_v28, 1  ;;  %v3075_v19 = vld [vmem:[#allocation3 + $0x70] sm:$0xff] }
 0x187   : > { %v4179_v59 = vadd.f32 %v4115_v24, %v4021_v44  ;;  %v12300_v0 = vrot.slane %v8874_v23, 2  ;;  %v8888_v49 = vmul.f32 %v8025_v27, %v3078_v56  ;;  %v3466_v45 = vmul.f32 %v8037_v38, %v3078_v56 }
 0x188   : > { %v3808_v7 = vadd.f32 %v12292_v37, %v3650_v32  ;;  %v12297_v62 = vrot.slane %v8882_v53, 1  ;;  %v4024_v24 = vadd.f32 %v12293_v8, %v3866_v35  ;;  %v8899_v51 = vmul.f32 %v8041_v39, %v3078_v56 }
 0x189   : > { %v4211_v10 = vmul.f32 %v8350_v57, %v4179_v59  ;;  %v12298_v43 = vrot.slane %v8888_v49, 2  ;;  %v8902_v44 = vmul.f32 %v8047_v47, %v3078_v56  ;;  %v3494_v59 = vadd.f32 %v3466_v45, %v3434_v55 }
 0x18a   : > { %v3277_v58 = vadd.f32 %v12297_v62, %v3118_v29  ;;  %v3840_v32 = vmul.f32 %v8050_v50, %v3078_v56  ;;  %v8908_v37 = vmax.f32 %v4241_v30, 0.0  ;;  %v4182_v35 = vadd.f32 %v12300_v0, %v4024_v24 }
 0x18b   : > { %v4243_v54 = vadd.f32 %v8369_v22, %v4211_v10  ;;  %v12299_v8 = vrot.slane %v8899_v51, 1  ;;  %v8914_v17 = vmul.f32 %v8169_v36, %v3078_v56  ;;  %v12302_v10 = vrot.slane %v8902_v44, 2 }
 0x18c   : > { %12745 = vst [vmem:[#allocation35_spill] sm:$0xff] %v8908_v37  ;;  %v3868_v33 = vadd.f32 %v3840_v32, %v3808_v7  ;;  %v8920_v29 = vmul.f32 %v8306_v6, %v3078_v56  ;;  %v4214_v30 = vmul.f32 %v8350_v57, %v4182_v35  ;;  %v8925_v55 = vadd.f32 %v12298_v43, %v3277_v58  ;;  %v3077_v37 = vld [vmem:[#allocation3 + $0x80] sm:$0xff] }
 0x18d   : > { %v8916_v41 = vmax.f32 %v4243_v54, 0.0  ;;  %v3652_v45 = vadd.f32 %v12299_v8, %v3494_v59  ;;  %v12301_v24 = vrot.slane %v8914_v17, 1  ;;  %v3147_v62 = vmul.f32 %v8021_v26, %v3075_v19 }
 0x18e   : > { %v12305_v54 = vrot.slane %v8920_v29, 2  ;;  %v3306_v7 = vmul.f32 %v8025_v27, %v3075_v19  ;;  %v12747_v56 = vrot.slane %v8674_v63, 2  ;;  %v4246_v58 = vadd.f32 %v8369_v22, %v4214_v30 }
 0x18f   : > { %12746 = vst [vmem:[#allocation36_spill] sm:$0xff] %v8916_v41  ;;  %v4026_v35 = vadd.f32 %v12301_v24, %v3868_v33  ;;  %v3115_v59 = vmul.f32 %v8009_v13, %v3075_v19  ;;  %v8945_v8 = vadd.f32 %v12302_v10, %v3652_v45  ;;  %v3211_v0 = vrot.slane %v3147_v62, 1 }
 0x190   : > { %v3369_v32 = vsel %vm3348_vm4, %v3367_v31, %v12747_v56  ;;  %v3463_v63 = vmul.f32 %v8037_v38, %v3075_v19  ;;  %v3523_v42 = vmul.f32 %v8041_v39, %v3075_v19  ;;  %v3370_v30 = vrot.slane %v3306_v7, 2 }
 0x191   : > { %v3431_v43 = vadd.f32 %v3369_v32, %v8831_v12  ;;  %v4184_v31 = vadd.f32 %v12305_v54, %v4026_v35  ;;  %v3681_v56 = vmul.f32 %v8047_v47, %v3075_v19  ;;  %v12748_v33 = vrot.slane %v8684_v48, 2 }
 0x192   : > { %v12749_v24 = vrot.slane %v8823_v15, 2  ;;  %v8957_v32 = vmax.f32 %v4246_v58, 0.0  ;;  %v12751_v62 = vrot.slane %v8842_v46, 1  ;;  %v3585_v10 = vrot.slane %v3523_v42, 1 }
 0x193   : > { %v4216_v7 = vmul.f32 %v8350_v57, %v4184_v31  ;;  %v3491_v54 = vadd.f32 %v3463_v63, %v3431_v43  ;;  %v3837_v48 = vmul.f32 %v8050_v50, %v3075_v19  ;;  %v12752_v15 = vrot.slane %v8852_v21, 1 }
 0x194   : > { %v3742_v12 = vsel %vm3348_vm4, %v12749_v24, %v12748_v33  ;;  %12750 = vst [vmem:[#allocation37_spill] sm:$0xff] %v8957_v32  ;;  %v3213_v45 = vsel %vm3189_vm3, %v3211_v0, %v12751_v62  ;;  %v3743_v58 = vrot.slane %v3681_v56, 2  ;;  %v3897_v33 = vmul.f32 %v8169_v36, %v3075_v19 }
 0x195   : > { %v3805_v41 = vadd.f32 %v3742_v12, %v8848_v11  ;;  %v3274_v35 = vadd.f32 %v3213_v45, %v3115_v59  ;;  %v3587_v24 = vsel %vm3189_vm3, %v3585_v10, %v12752_v15  ;;  %v4055_v46 = vmul.f32 %v8306_v6, %v3075_v19 }
 0x196   : > { %v4248_v0 = vadd.f32 %v8369_v22, %v4216_v7  ;;  %v3117_v11 = vmul.f32 %v8009_v13, %v3077_v37  ;;  %v3149_v31 = vmul.f32 %v8021_v26, %v3077_v37  ;;  %v3958_v59 = vrot.slane %v3897_v33, 1  ;;  %v3080_v33 = vld [vmem:[#allocation3 + $0x98] sm:$0xff] }
 0x197   : > { %v3865_v42 = vadd.f32 %v3837_v48, %v3805_v41  ;;  %v4116_v43 = vrot.slane %v4055_v46, 2  ;;  %v8974_v63 = vmul.f32 %v8025_v27, %v3077_v37  ;;  %v12753_v21 = vrot.slane %v8845_v2, 2 }
 0x198   : > { %v3649_v56 = vadd.f32 %v3587_v24, %v3491_v54  ;;  %v3214_v12 = vrot.slane %v3149_v31, 1  ;;  %v3465_v6 = vmul.f32 %v8037_v38, %v3077_v37  ;;  %v8980_v19 = vmax.f32 %v4248_v0, 0.0 }
 0x199   : > { %v3372_v10 = vsel %vm3348_vm4, %v3370_v30, %v12753_v21  ;;  %v12755_v41 = vrot.slane %v8871_v28, 1  ;;  %v12756_v7 = vrot.slane %v8874_v23, 2  ;;  %v3525_v15 = vmul.f32 %v8041_v39, %v3077_v37 }
 0x19a   : > { %v3433_v62 = vadd.f32 %v3372_v10, %v3274_v35  ;;  %12754 = vst [vmem:[#allocation38_spill] sm:$0xff] %v8980_v19  ;;  %v12757_v30 = vrot.slane %v8882_v53, 1  ;;  %v8994_v24 = vmul.f32 %v8047_v47, %v3077_v37  ;;  %v12758_v23 = vrot.slane %v8855_v14, 2 }
 0x19b   : > { %v3960_v45 = vsel %vm3189_vm3, %v3958_v59, %v12755_v41  ;;  %v4118_v48 = vsel %vm3348_vm4, %v4116_v43, %v12756_v7  ;;  %v3588_v46 = vrot.slane %v3525_v15, 1  ;;  %v3839_v31 = vmul.f32 %v8050_v50, %v3077_v37 }
 0x19c   : > { %v4023_v2 = vadd.f32 %v3960_v45, %v3865_v42  ;;  %v3216_v54 = vsel %vm3189_vm3, %v3214_v12, %v12757_v30  ;;  %v3745_v0 = vsel %vm3348_vm4, %v3743_v58, %v12758_v23  ;;  %v3493_v59 = vadd.f32 %v3465_v6, %v3433_v62 }
 0x19d   : > { %v8996_v28 = vadd.f32 %v3216_v54, %v3117_v11  ;;  %v3807_v53 = vadd.f32 %v3745_v0, %v3649_v56  ;;  %v3899_v43 = vmul.f32 %v8169_v36, %v3077_v37  ;;  %v12759_v21 = vrot.slane %v8899_v51, 1  ;;  %v9009_v11 = vld [vmem:[%s12225_s8 + $0x8] ss:$0 sm:$0xff] }
 0x19e   : > { %v4181_v42 = vadd.f32 %v4118_v48, %v4023_v2  ;;  %v4057_v14 = vmul.f32 %v9009_v11, %v3077_v37  ;;  %v3120_v58 = vmul.f32 %v8009_v13, %v3080_v33  ;;  %v9014_v12 = vmul.f32 %v8021_v26, %v3080_v33 }
 0x19f   : > { %v3590_v10 = vsel %vm3189_vm3, %v3588_v46, %v12759_v21  ;;  %v3867_v6 = vadd.f32 %v3839_v31, %v3807_v53  ;;  %v3961_v51 = vrot.slane %v3899_v43, 1  ;;  %v9020_v7 = vmul.f32 %v8025_v27, %v3080_v33 }
 0x1a0   : > { %v4213_v56 = vmul.f32 %v8350_v57, %v4181_v42  ;;  %v4119_v41 = vrot.slane %v4057_v14, 2  ;;  %v12310_v45 = vrot.slane %v9014_v12, 1  ;;  %v3468_v48 = vmul.f32 %v8037_v38, %v3080_v33  ;;  %v3082_v42 = vld [vmem:[#allocation3 + $0xa8] sm:$0xff] }
 0x1a1   : > { %v9023_v37 = vadd.f32 %v3590_v10, %v3493_v59  ;;  %v12760_v15 = vrot.slane %v8914_v17, 1  ;;  %v9029_v57 = vmul.f32 %v8041_v39, %v3080_v33  ;;  %v9032_v30 = vmul.f32 %v8047_v47, %v3080_v33 }
 0x1a2   : > { %v12761_v46 = vrot.slane %v8920_v29, 2  ;;  %v3279_v0 = vadd.f32 %v12310_v45, %v3120_v58  ;;  %v12307_v31 = vrot.slane %v9020_v7, 2  ;;  %v4245_v17 = vadd.f32 %v8369_v22, %v4213_v56  ;;  %v3079_v45 = vld [vmem:[#allocation3 + $0x90] sm:$0xff] }
 0x1a3   : > { %v3963_v2 = vsel %vm3189_vm3, %v3961_v51, %v12760_v15  ;;  %v3496_v59 = vadd.f32 %v3468_v48, %v8925_v55  ;;  %v12308_v53 = vrot.slane %v9029_v57, 1  ;;  %v12306_v43 = vrot.slane %v9032_v30, 2 }
 0x1a4   : > { %v4025_v54 = vadd.f32 %v3963_v2, %v3867_v6  ;;  %v4121_v23 = vsel %vm3348_vm4, %v4119_v41, %v12761_v46  ;;  %v3438_v29 = vadd.f32 %v12307_v31, %v3279_v0  ;;  %v3842_v10 = vmul.f32 %v8050_v50, %v3080_v33  ;;  %v9062_v6 = vld [vmem:[%s12226_s9] ss:$0 sm:$0xff] }
 0x1a5   : > { %v9048_v14 = vmul.f32 %v8169_v36, %v3080_v33  ;;  %v3654_v58 = vadd.f32 %v12308_v53, %v3496_v59  ;;  %v9053_v22 = vmul.f32 %v9009_v11, %v3080_v33  ;;  %v3122_v55 = vmul.f32 %v8009_v13, %v3082_v42 }
 0x1a6   : > { %v4183_v21 = vadd.f32 %v4121_v23, %v4025_v54  ;;  %v9057_v56 = vmul.f32 %v8021_v26, %v3082_v42  ;;  %v3870_v41 = vadd.f32 %v3842_v10, %v8945_v8  ;;  %v9068_v15 = vmul.f32 %v8025_v27, %v3082_v42  ;;  %v9078_v23 = vld [vmem:[%s12226_s9 + $0x1] ss:$0 sm:$0xff] }
 0x1a7   : > { %v12309_v48 = vrot.slane %v9048_v14, 1  ;;  %v3812_v33 = vadd.f32 %v12306_v43, %v3654_v58  ;;  %v12312_v2 = vrot.slane %v9053_v22, 2  ;;  %v3470_v46 = vmul.f32 %v8037_v38, %v3082_v42 }
 0x1a8   : > { %v4215_v51 = vmul.f32 %v9062_v6, %v4183_v21  ;;  %v12311_v54 = vrot.slane %v9057_v56, 1  ;;  %v12313_v59 = vrot.slane %v9068_v15, 2  ;;  %v9085_v21 = vmul.f32 %v8041_v39, %v3082_v42 }
 0x1a9   : > { %v4028_v0 = vadd.f32 %v12309_v48, %v3870_v41  ;;  %v3498_v58 = vadd.f32 %v3470_v46, %v3438_v29  ;;  %v9090_v43 = vmul.f32 %v8047_v47, %v3082_v42  ;;  %v3844_v31 = vmul.f32 %v8050_v50, %v3082_v42 }
 0x1aa   : > { %v4247_v8 = vadd.f32 %v9078_v23, %v4215_v51  ;;  %v3281_v10 = vadd.f32 %v12311_v54, %v3122_v55  ;;  %v9093_v53 = vmax.f32 %v4245_v17, 0.0  ;;  %v12314_v41 = vrot.slane %v9085_v21, 1 }
 0x1ab   : > { %v4186_v51 = vadd.f32 %v12312_v2, %v4028_v0  ;;  %v9099_v48 = vmul.f32 %v8169_v36, %v3082_v42  ;;  %v12318_v29 = vrot.slane %v9090_v43, 2  ;;  %v3872_v55 = vadd.f32 %v3844_v31, %v3812_v33 }
 0x1ac   : > { %12762 = vst [vmem:[#allocation39_spill] sm:$0xff] %v9093_v53  ;;  %v9101_v62 = vmax.f32 %v4247_v8, 0.0  ;;  %v9105_v46 = vmul.f32 %v9009_v11, %v3082_v42  ;;  %v9110_v54 = vadd.f32 %v12313_v59, %v3281_v10  ;;  %v3656_v0 = vadd.f32 %v12314_v41, %v3498_v58  ;;  %v3081_v53 = vld [vmem:[#allocation3 + $0xa0] sm:$0xff] }
 0x1ad   : > { %v4218_v17 = vmul.f32 %v9062_v6, %v4186_v51  ;;  %v12317_v2 = vrot.slane %v9099_v48, 1  ;;  %v3151_v35 = vmul.f32 %v8021_v26, %v3079_v45  ;;  %v3310_v31 = vmul.f32 %v8025_v27, %v3079_v45 }
 0x1ae   : > { %12763 = vst [vmem:[#allocation40_spill] sm:$0xff] %v9101_v62  ;;  %v12764_v42 = vrot.slane %v8888_v49, 2  ;;  %v12765_v33 = vrot.slane %v8974_v63, 2  ;;  %v3119_v58 = vmul.f32 %v8009_v13, %v3079_v45  ;;  %v9130_v8 = vadd.f32 %v12318_v29, %v3656_v0 }
 0x1af   : > { %v4250_v10 = vadd.f32 %v9078_v23, %v4218_v17  ;;  %v4030_v59 = vadd.f32 %v12317_v2, %v3872_v55  ;;  %v3217_v19 = vrot.slane %v3151_v35, 1  ;;  %v3467_v49 = vmul.f32 %v8037_v38, %v3079_v45 }
 0x1b0   : > { %v3375_v51 = vsel %vm3348_vm4, %v12765_v33, %v12764_v42  ;;  %v3527_v63 = vmul.f32 %v8041_v39, %v3079_v45  ;;  %v12766_v42 = vrot.slane %v9105_v46, 2  ;;  %v3376_v17 = vrot.slane %v3310_v31, 2 }
 0x1b1   : > { %v3435_v41 = vadd.f32 %v3375_v51, %v8996_v28  ;;  %v3685_v62 = vmul.f32 %v8047_v47, %v3079_v45  ;;  %v12767_v55 = vrot.slane %v8902_v44, 2  ;;  %v12768_v2 = vrot.slane %v8994_v24, 2 }
 0x1b2   : > { %v4188_v33 = vadd.f32 %v12766_v42, %v4030_v59  ;;  %v9142_v51 = vmax.f32 %v4250_v10, 0.0  ;;  %v12770_v35 = vrot.slane %v9014_v12, 1  ;;  %v3591_v29 = vrot.slane %v3527_v63, 1 }
 0x1b3   : > { %v3748_v28 = vsel %vm3348_vm4, %v12768_v2, %v12767_v55  ;;  %v3495_v42 = vadd.f32 %v3467_v49, %v3435_v41  ;;  %v3841_v44 = vmul.f32 %v8050_v50, %v3079_v45  ;;  %v12771_v24 = vrot.slane %v9029_v57, 1 }
 0x1b4   : > { %12769 = vst [vmem:[#allocation41_spill] sm:$0xff] %v9142_v51  ;;  %v3219_v0 = vsel %vm3189_vm3, %v3217_v19, %v12770_v35  ;;  %v3809_v32 = vadd.f32 %v3748_v28, %v9023_v37  ;;  %v4220_v59 = vmul.f32 %v9062_v6, %v4188_v33  ;;  %v3749_v10 = vrot.slane %v3685_v62, 2  ;;  %v7560_v62 = vpop.f32.mrf.mxu0  ;;  %v12840_v51 = vld [vmem:[#allocation5_spill] sm:$0xff] }
 0x1b5   : > { %v3278_v31 = vadd.f32 %v3219_v0, %v3119_v58  ;;  %v3593_v2 = vsel %vm3189_vm3, %v3591_v29, %v12771_v24  ;;  %v3901_v55 = vmul.f32 %v8169_v36, %v3079_v45  ;;  %v4059_v12 = vmul.f32 %v9009_v11, %v3079_v45 }
 0x1b6   : > { %v4252_v19 = vadd.f32 %v9078_v23, %v4220_v59  ;;  %v3869_v63 = vadd.f32 %v3841_v44, %v3809_v32  ;;  %v3121_v37 = vmul.f32 %v8009_v13, %v3081_v53  ;;  %v3153_v33 = vmul.f32 %v8021_v26, %v3081_v53 }
 0x1b7   : > { %v3964_v58 = vrot.slane %v3901_v55, 1  ;;  %v4122_v41 = vrot.slane %v4059_v12, 2  ;;  %v3312_v49 = vmul.f32 %v8025_v27, %v3081_v53  ;;  %v12772_v57 = vrot.slane %v9020_v7, 2 }
 0x1b8   : > { %v3653_v28 = vadd.f32 %v3593_v2, %v3495_v42  ;;  %v3220_v35 = vrot.slane %v3153_v33, 1  ;;  %v3469_v45 = vmul.f32 %v8037_v38, %v3081_v53  ;;  %v12773_v32 = vrot.slane %v9048_v14, 1 }
 0x1b9   : > { %v3378_v29 = vsel %vm3348_vm4, %v3376_v17, %v12772_v57  ;;  %v12774_v44 = vrot.slane %v9053_v22, 2  ;;  %v3379_v55 = vrot.slane %v3312_v49, 2  ;;  %v3529_v12 = vmul.f32 %v8041_v39, %v3081_v53 }
 0x1ba   : > { %v3437_v0 = vadd.f32 %v3378_v29, %v3278_v31  ;;  %v3966_v59 = vsel %vm3189_vm3, %v3964_v58, %v12773_v32  ;;  %v12775_v17 = vrot.slane %v9057_v56, 1  ;;  %v3687_v31 = vmul.f32 %v8047_v47, %v3081_v53  ;;  %v7565_v56 = vpop.f32.mrf.mxu1 }
 0x1bb   : > { %v4124_v24 = vsel %vm3348_vm4, %v4122_v41, %v12774_v44  ;;  %v4027_v7 = vadd.f32 %v3966_v59, %v3869_v63  ;;  %v3594_v57 = vrot.slane %v3529_v12, 1  ;;  %v12776_v14 = vrot.slane %v9032_v30, 2  ;;  %v2863_v41 = vpop.f32.mrf.mxu0  ;;  %v7660_v30 = vld [vmem:[%s12224_s7 + $0x1] ss:$0 sm:$0xff] }
 0x1bc   : > { %v3222_v42 = vsel %vm3189_vm3, %v3220_v35, %v12775_v17  ;;  %v3497_v2 = vadd.f32 %v3469_v45, %v3437_v0  ;;  %v3843_v22 = vmul.f32 %v8050_v50, %v3081_v53  ;;  %v3752_v29 = vrot.slane %v3687_v31, 2 }
 0x1bd   : > { %v3280_v33 = vadd.f32 %v3222_v42, %v3121_v37  ;;  %v3751_v58 = vsel %vm3348_vm4, %v3749_v10, %v12776_v14  ;;  %v4185_v49 = vadd.f32 %v4124_v24, %v4027_v7  ;;  %v3903_v63 = vmul.f32 %v8169_v36, %v3081_v53  ;;  %v7570_v59 = vpop.f32.mrf.mxu0 }
 0x1be   : > { %v3811_v32 = vadd.f32 %v3751_v58, %v3653_v28  ;;  %v12777_v35 = vrot.slane %v9085_v21, 1  ;;  %v4061_v37 = vmul.f32 %v9009_v11, %v3081_v53  ;;  %v2695_v10 = vadd.f32 %v7660_v30, %v8771_v3  ;;  %v2953_v58 = vpop.f32.mrf.mxu1 }
 0x1bf   : > { %v2785_v45 = vadd.f32 %v7660_v30, %v8774_v5  ;;  %v4217_v28 = vmul.f32 %v9062_v6, %v4185_v49  ;;  %v3967_v12 = vrot.slane %v3903_v63, 1  ;;  %v2694_v42 = vadd.f32 %v7660_v30, %v8780_v1 }
 0x1c0   : > { %v3596_v0 = vsel %vm3189_vm3, %v3594_v57, %v12777_v35  ;;  %v3871_v24 = vadd.f32 %v3843_v22, %v3811_v32  ;;  %v4125_v7 = vrot.slane %v4061_v37, 2  ;;  %v2697_v21 = vmax.f32 %v2695_v10, 0.0 }
 0x1c1   : > { %v3655_v44 = vadd.f32 %v3596_v0, %v3497_v2  ;;  %v2787_v17 = vmax.f32 %v2785_v45, 0.0  ;;  %v9190_v53 = vmax.f32 %v4252_v19, 0.0  ;;  %v12779_v31 = vrot.slane %v9099_v48, 1 }
 0x1c2   : > { %v12780_v3 = vrot.slane %v9068_v15, 2  ;;  %v12781_v14 = vrot.slane %v9090_v43, 2  ;;  %v12782_v49 = vrot.slane %v9105_v46, 2  ;;  %2700 = vst.msk [vmem:[#allocation3 + $0xb8] sm:$0xff] %vm607_vm2, %v2697_v21  ;;  %v2696_v48 = vmax.f32 %v2694_v42, 0.0  ;;  %v3043_v15 = vpop.f32.mrf.mxu0  ;;  %v6806_v42 = vld [vmem:[%s12227_s10] sm:$0xff] }
 0x1c3   : > { %12778 = vst [vmem:[#allocation42_spill] sm:$0xff] %v9190_v53  ;;  %v3969_v57 = vsel %vm3189_vm3, %v3967_v12, %v12779_v31  ;;  %2790 = vst.msk [vmem:[#allocation3 + $0xc8] sm:$0xff] %vm607_vm2, %v2787_v17  ;;  %v2784_v43 = vadd.f32 %v7660_v30, %v8817_v9  ;;  %v2872_v46 = vmul.f32 %v8743_v52, %v2863_v41 }
 0x1c4   : > { %v3381_v5 = vsel %vm3348_vm4, %v3379_v55, %v12780_v3  ;;  %v3754_v2 = vsel %vm3348_vm4, %v3752_v29, %v12781_v14  ;;  %v4029_v22 = vadd.f32 %v3969_v57, %v3871_v24  ;;  %v4127_v1 = vsel %vm3348_vm4, %v4125_v7, %v12782_v49  ;;  %2699 = vst.msk [vmem:[#allocation3 + $0xb0] sm:$0xff] %vm607_vm2, %v2696_v48  ;;  %v6807_v24 = vld [vmem:[%s12227_s10 + $0x8] sm:$0xf] }
 0x1c5   : > { %v9206_v19 = vadd.f32 %v3381_v5, %v3280_v33  ;;  %v4249_v55 = vadd.f32 %v9078_v23, %v4217_v28  ;;  %v9209_v32 = vadd.f32 %v3754_v2, %v3655_v44  ;;  %v2873_v29 = vmul.f32 %v8743_v52, %v7560_v62 }
 0x1c6   : > { %v4187_v63 = vadd.f32 %v4127_v1, %v4029_v22  ;;  %v2963_v35 = vmul.f32 %v8743_v52, %v7565_v56  ;;  %v2962_v0 = vmul.f32 %v8743_v52, %v2953_v58  ;;  %v2786_v33 = vmax.f32 %v2784_v43, 0.0 }
 0x1c7   : > { %v2875_v37 = vadd.f32 %v7660_v30, %v2873_v29  ;;  %v3053_v10 = vmul.f32 %v8743_v52, %v7570_v59  ;;  %v3052_v45 = vmul.f32 %v8743_v52, %v3043_v15  ;;  %v2874_v9 = vadd.f32 %v7660_v30, %v2872_v46 }
 0x1c8   : > { %v4219_v28 = vmul.f32 %v9062_v6, %v4187_v63  ;;  %v2965_v44 = vadd.f32 %v7660_v30, %v2963_v35  ;;  %v2964_v62 = vadd.f32 %v7660_v30, %v2962_v0  ;;  %2789 = vst.msk [vmem:[#allocation3 + $0xc0] sm:$0xff] %vm607_vm2, %v2786_v33  ;;  %v12321_v52 = vmov 0.0  }
 0x1c9   : > { %v2877_v41 = vmax.f32 %v2875_v37, 0.0  ;;  %v3055_v56 = vadd.f32 %v7660_v30, %v3053_v10  ;;  %v3054_v12 = vadd.f32 %v7660_v30, %v3052_v45  ;;  %v2876_v21 = vmax.f32 %v2874_v9, 0.0  ;;  %7571 = vmatprep.subr.mxu1 %v12321_v52  ;;  %7614 = vmatprep.subr.mxu0 %v12321_v52  ;;  %v3084_v31 = vld [vmem:[#allocation3 + $0xb8] sm:$0xff] }
 0x1ca   : > { %v4251_v7 = vadd.f32 %v9078_v23, %v4219_v28  ;;  %v2967_v59 = vmax.f32 %v2965_v44, 0.0  ;;  %v2966_v17 = vmax.f32 %v2964_v62, 0.0  ;;  %7572 = vmatpush3.msk.msra.mxu1 %vm514_vm0, %v6807_v24  ;;  %v12783_v30 = vrot.slane %v8397_v18, 2  ;;  %7575 = vmatprep.mubr.msk.f32.mxu1 %vm7670_vm5, %v12321_v52  ;;  %v3086_v63 = vld [vmem:[#allocation3 + $0xc8] sm:$0xff] }
 0x1cb   : > { %2880 = vst.msk [vmem:[#allocation3 + $0xd8] sm:$0xff] %vm607_vm2, %v2877_v41  ;;  %v3057_v57 = vmax.f32 %v3055_v56, 0.0  ;;  %v3056_v3 = vmax.f32 %v3054_v12, 0.0  ;;  %v12784_v5 = vrot.slane %v8494_v4, 2  ;;  %v9239_v2 = vmax.f32 %v4249_v55, 0.0  ;;  %2879 = vst.msk [vmem:[#allocation3 + $0xd0] sm:$0xff] %vm607_vm2, %v2876_v21  ;;  %7573 = vmatprep.subr.mxu1 %v12321_v52  ;;  %7640 = vmatprep.mubr.msk.f32.mxu0 %vm7670_vm5, %v12321_v52 }
 0x1cc   : > { %v3124_v58 = vmul.f32 %v8009_v13, %v3084_v31  ;;  %v9243_v22 = vmul.f32 %v8021_v26, %v3084_v31  ;;  %v9246_v49 = vmul.f32 %v8025_v27, %v3084_v31  ;;  %2970 = vst.msk [vmem:[#allocation3 + $0xe8] sm:$0xff] %vm607_vm2, %v2967_v59  ;;  %2969 = vst.msk [vmem:[#allocation3 + $0xe0] sm:$0xff] %vm607_vm2, %v2966_v17  ;;  %7574 = vmatpush3.msra.mxu1 %v6806_v42  ;;  %v3083_v17 = vld [vmem:[#allocation3 + $0xb0] sm:$0xff] }
 0x1cd   : > { %v9237_v14 = vsel %vm3348_vm4, %v12784_v5, %v12783_v30  ;;  %12785 = vst [vmem:[#allocation43_spill] sm:$0xff] %v9239_v2  ;;  %v3472_v18 = vmul.f32 %v8037_v38, %v3084_v31  ;;  %v9256_v4 = vmul.f32 %v8041_v39, %v3084_v31  ;;  %v9259_v1 = vmul.f32 %v8047_v47, %v3084_v31 }
 0x1ce   : > { %v3846_v48 = vmul.f32 %v8050_v50, %v3084_v31  ;;  %3060 = vst.msk [vmem:[#allocation3 + $0xf8] sm:$0xff] %vm607_vm2, %v3057_v57  ;;  %3059 = vst.msk [vmem:[#allocation3 + $0xf0] sm:$0xff] %vm607_vm2, %v3056_v3  ;;  %v3224_v15 = vrot.slane %v9243_v22, 1  ;;  %v3383_v55 = vrot.slane %v9246_v49, 2  ;;  %v9267_v43 = vmul.f32 %v8169_v36, %v3084_v31 }
 0x1cf   : > { %v9270_v29 = vmul.f32 %v9009_v11, %v3084_v31  ;;  %v3500_v46 = vadd.f32 %v3472_v18, %v9110_v54  ;;  %v3598_v35 = vrot.slane %v9256_v4, 1  ;;  %v12324_v0 = vrot.slane %v9259_v1, 2 }
 0x1d0   : > { %v3874_v33 = vadd.f32 %v3846_v48, %v9130_v8  ;;  %v9278_v37 = vmax.f32 %v4251_v7, 0.0  ;;  %v3283_v10 = vadd.f32 %v3224_v15, %v3124_v58  ;;  %v3971_v45 = vrot.slane %v9267_v43, 1 }
 0x1d1   : > { %v4129_v28 = vrot.slane %v9270_v29, 2  ;;  %v3658_v9 = vadd.f32 %v3598_v35, %v3500_v46  ;;  %v9283_v44 = vmul.f32 %v8009_v13, %v3086_v63  ;;  %v9286_v62 = vmul.f32 %v8021_v26, %v3086_v63 }
 0x1d2   : > { %12786 = vst [vmem:[#allocation44_spill] sm:$0xff] %v9278_v37  ;;  %v3474_v54 = vmul.f32 %v8037_v38, %v3086_v63  ;;  %v3442_v24 = vadd.f32 %v3383_v55, %v3283_v10  ;;  %v4032_v8 = vadd.f32 %v3971_v45, %v3874_v33  ;;  %v9292_v41 = vmul.f32 %v8041_v39, %v3086_v63 }
 0x1d3   : > { %v9295_v56 = vmul.f32 %v8047_v47, %v3086_v63  ;;  %v3816_v12 = vadd.f32 %v12324_v0, %v3658_v9  ;;  %v9301_v21 = vmul.f32 %v8025_v27, %v3086_v63  ;;  %v3848_v59 = vmul.f32 %v8050_v50, %v3086_v63 }
 0x1d4   : > { %v4190_v42 = vadd.f32 %v4129_v28, %v4032_v8  ;;  %v3502_v31 = vadd.f32 %v3474_v54, %v3442_v24  ;;  %v12323_v57 = vrot.slane %v9292_v41, 1  ;;  %v9309_v5 = vmul.f32 %v8169_v36, %v3086_v63  ;;  %v3085_v54 = vld [vmem:[#allocation3 + $0xc0] sm:$0xff] }
 0x1d5   : > { %v12325_v3 = vrot.slane %v9295_v56, 2  ;;  %v3876_v30 = vadd.f32 %v3848_v59, %v3816_v12  ;;  %v9312_v58 = vmul.f32 %v9009_v11, %v3086_v63  ;;  %v3123_v22 = vmul.f32 %v8009_v13, %v3083_v17 }
 0x1d6   : > { %v4222_v18 = vmul.f32 %v9062_v6, %v4190_v42  ;;  %v3660_v4 = vadd.f32 %v12323_v57, %v3502_v31  ;;  %v3155_v48 = vmul.f32 %v8021_v26, %v3083_v17  ;;  %v3314_v43 = vmul.f32 %v8025_v27, %v3083_v17 }
 0x1d7   : > { %v3974_v46 = vrot.slane %v9309_v5, 1  ;;  %v4132_v33 = vrot.slane %v9312_v58, 2  ;;  %v3471_v10 = vmul.f32 %v8037_v38, %v3083_v17  ;;  %v3531_v63 = vmul.f32 %v8041_v39, %v3083_v17 }
 0x1d8   : > { %v4254_v9 = vadd.f32 %v9078_v23, %v4222_v18  ;;  %v3818_v24 = vadd.f32 %v12325_v3, %v3660_v4  ;;  %v3223_v8 = vrot.slane %v3155_v48, 1  ;;  %v3689_v31 = vmul.f32 %v8047_v47, %v3083_v17 }
 0x1d9   : > { %v4034_v12 = vadd.f32 %v3974_v46, %v3876_v30  ;;  %v3499_v59 = vadd.f32 %v3471_v10, %v9206_v19  ;;  %v3597_v42 = vrot.slane %v3531_v63, 1  ;;  %v3382_v7 = vrot.slane %v3314_v43, 2 }
 0x1da   : > { %v3225_v52 = vsel %vm3189_vm3, %v3223_v8, %v3224_v15  ;;  %v3845_v57 = vmul.f32 %v8050_v50, %v3083_v17  ;;  %v3905_v18 = vmul.f32 %v8169_v36, %v3083_v17  ;;  %v9335_v0 = vmax.f32 %v4254_v9, 0.0 }
 0x1db   : > { %v4192_v4 = vadd.f32 %v4132_v33, %v4034_v12  ;;  %v3282_v48 = vadd.f32 %v3225_v52, %v3123_v22  ;;  %v3599_v30 = vsel %vm3189_vm3, %v3597_v42, %v3598_v35  ;;  %v3755_v19 = vrot.slane %v3689_v31, 2 }
 0x1dc   : > { %12787 = vst [vmem:[#allocation45_spill] sm:$0xff] %v9335_v0  ;;  %v3873_v10 = vadd.f32 %v3845_v57, %v9209_v32  ;;  %v3970_v63 = vrot.slane %v3905_v18, 1  ;;  %v4063_v15 = vmul.f32 %v9009_v11, %v3083_v17  ;;  %v3657_v8 = vadd.f32 %v3599_v30, %v3499_v59 }
 0x1dd   : > { %v4224_v43 = vmul.f32 %v9062_v6, %v4192_v4  ;;  %v9344_v3 = vmul.f32 %v8021_v26, %v3085_v54  ;;  %v9347_v9 = vmul.f32 %v8025_v27, %v3085_v54  ;;  %v3384_v35 = vsel %vm3348_vm4, %v3382_v7, %v3383_v55 }
 0x1de   : > { %v3972_v12 = vsel %vm3189_vm3, %v3970_v63, %v3971_v45  ;;  %v4128_v52 = vrot.slane %v4063_v15, 2  ;;  %v3473_v32 = vmul.f32 %v8037_v38, %v3085_v54  ;;  %v9356_v22 = vmul.f32 %v8009_v13, %v3085_v54 }
 0x1df   : > { %v4256_v17 = vadd.f32 %v9078_v23, %v4224_v43  ;;  %v4031_v57 = vadd.f32 %v3972_v12, %v3873_v10  ;;  %v3226_v59 = vrot.slane %v9344_v3, 1  ;;  %v3441_v45 = vadd.f32 %v3384_v35, %v3282_v48  ;;  %v9369_v43 = vld [vmem:[#allocation3 + $0xd8] sm:$0xff] }
 0x1e0   : > { %v4130_v42 = vsel %vm3348_vm4, %v4128_v52, %v4129_v28  ;;  %v3533_v31 = vmul.f32 %v8041_v39, %v3085_v54  ;;  %v3691_v49 = vmul.f32 %v8047_v47, %v3085_v54  ;;  %v3385_v7 = vrot.slane %v9347_v9, 2 }
 0x1e1   : > { %v4189_v55 = vadd.f32 %v4130_v42, %v4031_v57  ;;  %v12788_v18 = vrot.slane %v9259_v1, 2  ;;  %v3847_v30 = vmul.f32 %v8050_v50, %v3085_v54  ;;  %v3501_v10 = vadd.f32 %v3473_v32, %v3441_v45 }
 0x1e2   : > { %v3600_v63 = vrot.slane %v3533_v31, 1  ;;  %v3758_v15 = vrot.slane %v3691_v49, 2  ;;  %v3907_v48 = vmul.f32 %v8169_v36, %v3085_v54  ;;  %v4065_v12 = vmul.f32 %v9009_v11, %v3085_v54 }
 0x1e3   : > { %v3757_v4 = vsel %vm3348_vm4, %v3755_v19, %v12788_v18  ;;  %v4221_v28 = vmul.f32 %v9062_v6, %v4189_v55  ;;  %v3850_v52 = vmul.f32 %v8050_v50, %v9369_v43  ;;  %v12789_v1 = vrot.slane %v9292_v41, 1  ;;  %v9386_v41 = vld [vmem:[#allocation3 + $0xd0] sm:$0xff] }
 0x1e4   : > { %v3815_v29 = vadd.f32 %v3757_v4, %v3657_v8  ;;  %v3910_v32 = vmul.f32 %v8169_v36, %v9369_v43  ;;  %v4068_v8 = vmul.f32 %v9009_v11, %v9369_v43  ;;  %v9383_v57 = vmax.f32 %v4256_v17, 0.0 }
 0x1e5   : > { %v3602_v19 = vsel %vm3189_vm3, %v3600_v63, %v12789_v1  ;;  %v3973_v45 = vrot.slane %v3907_v48, 1  ;;  %v4131_v31 = vrot.slane %v4065_v12, 2  ;;  %v4253_v54 = vadd.f32 %v9078_v23, %v4221_v28 }
 0x1e6   : > { %v3875_v35 = vadd.f32 %v3847_v30, %v3815_v29  ;;  %12790 = vst [vmem:[#allocation46_spill] sm:$0xff] %v9383_v57  ;;  %v3659_v42 = vadd.f32 %v3602_v19, %v3501_v10  ;;  %v3878_v49 = vadd.f32 %v3850_v52, %v3818_v24  ;;  %v3977_v55 = vrot.slane %v3910_v32, 1 }
 0x1e7   : > { %v4135_v18 = vrot.slane %v4068_v8, 2  ;;  %v3975_v4 = vsel %vm3189_vm3, %v3973_v45, %v3974_v46  ;;  %v4133_v30 = vsel %vm3348_vm4, %v4131_v31, %v4132_v33  ;;  %v3535_v17 = vmul.f32 %v8041_v39, %v9386_v41  ;;  %v9405_v46 = vld [vmem:[#allocation3 + $0xe8] sm:$0xff] }
 0x1e8   : > { %v12791_v10 = vrot.slane %v9295_v56, 2  ;;  %v4033_v24 = vadd.f32 %v3975_v4, %v3875_v35  ;;  %v4036_v29 = vadd.f32 %v3977_v55, %v3878_v49  ;;  %v3849_v48 = vmul.f32 %v8050_v50, %v9386_v41 }
 0x1e9   : > { %v3909_v5 = vmul.f32 %v8169_v36, %v9386_v41  ;;  %v4067_v58 = vmul.f32 %v9009_v11, %v9386_v41  ;;  %v12792_v33 = vrot.slane %v9286_v62, 1  ;;  %v9412_v12 = vmax.f32 %v4253_v54, 0.0 }
 0x1ea   : > { %v3760_v63 = vsel %vm3348_vm4, %v3758_v15, %v12791_v10  ;;  %v3476_v15 = vmul.f32 %v8037_v38, %v9369_v43  ;;  %v4191_v52 = vadd.f32 %v4133_v30, %v4033_v24  ;;  %v4194_v1 = vadd.f32 %v4135_v18, %v4036_v29 }
 0x1eb   : > { %v3817_v28 = vadd.f32 %v3760_v63, %v3659_v42  ;;  %v3285_v56 = vadd.f32 %v12792_v33, %v9283_v44  ;;  %12793 = vst [vmem:[#allocation47_spill] sm:$0xff] %v9412_v12  ;;  %v3976_v35 = vrot.slane %v3909_v5, 1  ;;  %v4134_v32 = vrot.slane %v4067_v58, 2 }
 0x1ec   : > { %v12794_v8 = vrot.slane %v9301_v21, 2  ;;  %v3536_v45 = vmul.f32 %v8041_v39, %v9369_v43  ;;  %v4223_v31 = vmul.f32 %v9062_v6, %v4191_v52  ;;  %v4226_v44 = vmul.f32 %v9062_v6, %v4194_v1  ;;  %v3089_v1 = vld [vmem:[#allocation3 + $0xe0] sm:$0xff] }
 0x1ed   : > { %v3877_v19 = vadd.f32 %v3849_v48, %v3817_v28  ;;  %v9422_v49 = vmul.f32 %v8041_v39, %v9405_v46  ;;  %v3694_v54 = vmul.f32 %v8047_v47, %v9369_v43  ;;  %v3978_v4 = vsel %vm3189_vm3, %v3976_v35, %v3977_v55 }
 0x1ee   : > { %v3444_v42 = vadd.f32 %v12794_v8, %v3285_v56  ;;  %v4136_v30 = vsel %vm3348_vm4, %v4134_v32, %v4135_v18  ;;  %v3604_v63 = vrot.slane %v3536_v45, 1  ;;  %v4255_v24 = vadd.f32 %v9078_v23, %v4223_v31 }
 0x1ef   : > { %v4258_v29 = vadd.f32 %v9078_v23, %v4226_v44  ;;  %v4035_v28 = vadd.f32 %v3978_v4, %v3877_v19  ;;  %v9432_v48 = vmul.f32 %v8037_v38, %v9405_v46  ;;  %v3762_v58 = vrot.slane %v3694_v54, 2 }
 0x1f0   : > { %v3504_v10 = vadd.f32 %v3476_v15, %v3444_v42  ;;  %v3852_v33 = vmul.f32 %v8050_v50, %v9405_v46  ;;  %v3912_v55 = vmul.f32 %v8169_v36, %v9405_v46  ;;  %v9438_v18 = vmax.f32 %v4255_v24, 0.0 }
 0x1f1   : > { %v4193_v56 = vadd.f32 %v4136_v30, %v4035_v28  ;;  %v3607_v15 = vrot.slane %v9422_v49, 1  ;;  %v4070_v52 = vmul.f32 %v9009_v11, %v9405_v46  ;;  %v12796_v32 = vrot.slane %v9286_v62, 1 }
 0x1f2   : > { %v3662_v5 = vadd.f32 %v3604_v63, %v3504_v10  ;;  %12795 = vst [vmem:[#allocation48_spill] sm:$0xff] %v9438_v18  ;;  %v3980_v35 = vrot.slane %v3912_v55, 1  ;;  %v12797_v42 = vrot.slane %v9301_v21, 2  ;;  %v9453_v31 = vmax.f32 %v4258_v29, 0.0 }
 0x1f3   : > { %v3228_v8 = vsel %vm3189_vm3, %v3226_v59, %v12796_v32  ;;  %v4225_v44 = vmul.f32 %v9062_v6, %v4193_v56  ;;  %v3475_v4 = vmul.f32 %v8037_v38, %v9386_v41  ;;  %v4138_v30 = vrot.slane %v4070_v52, 2  ;;  %v3092_v32 = vld [vmem:[#allocation3 + $0xf8] sm:$0xff] }
 0x1f4   : > { %v3820_v19 = vadd.f32 %v3762_v58, %v3662_v5  ;;  %v3387_v45 = vsel %vm3348_vm4, %v3385_v7, %v12797_v42  ;;  %12798 = vst [vmem:[#allocation49_spill] sm:$0xff] %v9453_v31  ;;  %v3284_v54 = vadd.f32 %v3228_v8, %v9356_v22  ;;  %v3537_v3 = vmul.f32 %v8041_v39, %v3089_v1 }
 0x1f5   : > { %v3603_v59 = vrot.slane %v3535_v17, 1  ;;  %v4257_v21 = vadd.f32 %v9078_v23, %v4225_v44  ;;  %v9462_v9 = vmul.f32 %v8037_v38, %v3089_v1  ;;  %v3693_v7 = vmul.f32 %v8047_v47, %v9386_v41 }
 0x1f6   : > { %v3880_v62 = vadd.f32 %v3852_v33, %v3820_v19  ;;  %v3443_v10 = vadd.f32 %v3387_v45, %v3284_v54  ;;  %v3606_v29 = vrot.slane %v3537_v3, 1  ;;  %v3695_v28 = vmul.f32 %v8047_v47, %v3089_v1 }
 0x1f7   : > { %v3605_v22 = vsel %vm3189_vm3, %v3603_v59, %v3604_v63  ;;  %v9468_v5 = vmax.f32 %v4257_v21, 0.0  ;;  %v3761_v39 = vrot.slane %v3693_v7, 2  ;;  %v3851_v17 = vmul.f32 %v8050_v50, %v3089_v1 }
 0x1f8   : > { %v4038_v24 = vadd.f32 %v3980_v35, %v3880_v62  ;;  %v3503_v33 = vadd.f32 %v3475_v4, %v3443_v10  ;;  %v3911_v56 = vmul.f32 %v8169_v36, %v3089_v1  ;;  %v4069_v38 = vmul.f32 %v9009_v11, %v3089_v1 }
 0x1f9   : > { %12799 = vst [vmem:[#allocation50_spill] sm:$0xff] %v9468_v5  ;;  %v3128_v52 = vmul.f32 %v8009_v13, %v9369_v43  ;;  %v3763_v63 = vsel %vm3348_vm4, %v3761_v39, %v3762_v58  ;;  %v3160_v8 = vmul.f32 %v8021_v26, %v9369_v43  ;;  %v3319_v42 = vmul.f32 %v8025_v27, %v9369_v43 }
 0x1fa   : > { %v4196_v55 = vadd.f32 %v4138_v30, %v4038_v24  ;;  %v3661_v19 = vadd.f32 %v3605_v22, %v3503_v33  ;;  %v3979_v44 = vrot.slane %v3911_v56, 1  ;;  %v4137_v54 = vrot.slane %v4069_v38, 2 }
 0x1fb   : > { %v3696_v1 = vmul.f32 %v8047_v47, %v9405_v46  ;;  %v3764_v4 = vrot.slane %v3695_v28, 2  ;;  %v3230_v3 = vrot.slane %v3160_v8, 1  ;;  %v3389_v59 = vrot.slane %v3319_v42, 2  ;;  %v3091_v46 = vld [vmem:[#allocation3 + $0xf0] sm:$0xff] }
 0x1fc   : > { %v4228_v45 = vmul.f32 %v9062_v6, %v4196_v55  ;;  %v3819_v62 = vadd.f32 %v3763_v63, %v3661_v19  ;;  %v3981_v21 = vsel %vm3189_vm3, %v3979_v44, %v3980_v35  ;;  %v4139_v10 = vsel %vm3348_vm4, %v4137_v54, %v4138_v30 }
 0x1fd   : > { %v3854_v7 = vmul.f32 %v8050_v50, %v3092_v32  ;;  %v3287_v24 = vadd.f32 %v3230_v3, %v3128_v52  ;;  %v3914_v22 = vmul.f32 %v8169_v36, %v3092_v32  ;;  %v4072_v33 = vmul.f32 %v9009_v11, %v3092_v32 }
 0x1fe   : > { %v4260_v58 = vadd.f32 %v9078_v23, %v4228_v45  ;;  %v3879_v43 = vadd.f32 %v3851_v17, %v3819_v62  ;;  %v3765_v47 = vrot.slane %v3696_v1, 2  ;;  %v3159_v28 = vmul.f32 %v8021_v26, %v9386_v41 }
 0x1ff   : > { %v3318_v35 = vmul.f32 %v8025_v27, %v9386_v41  ;;  %v3446_v30 = vadd.f32 %v3389_v59, %v3287_v24  ;;  %v3983_v56 = vrot.slane %v3914_v22, 1  ;;  %v3127_v17 = vmul.f32 %v8009_v13, %v9386_v41 }
 0x200   : > { %v9489_v39 = vmax.f32 %v4260_v58, 0.0  ;;  %v4037_v55 = vadd.f32 %v3981_v21, %v3879_v43  ;;  %v4141_v38 = vrot.slane %v4072_v33, 2  ;;  %v3229_v52 = vrot.slane %v3159_v28, 1  ;;  %v12805_v21 = vld [vmem:[#allocation10_spill] sm:$0xff] }
 0x201   : > { %v3388_v19 = vrot.slane %v3318_v35, 2  ;;  %v3608_v63 = vsel %vm3189_vm3, %v3606_v29, %v3607_v15  ;;  %v3506_v8 = vadd.f32 %v9432_v48, %v3446_v30  ;;  %v3766_v26 = vsel %vm3348_vm4, %v3764_v4, %v3765_v47 }
 0x202   : > { %12800 = vst [vmem:[#allocation51_spill] sm:$0xff] %v9489_v39  ;;  %v4195_v32 = vadd.f32 %v4139_v10, %v4037_v55  ;;  %v3913_v27 = vmul.f32 %v8169_v36, %v3091_v46  ;;  %v3231_v42 = vsel %vm3189_vm3, %v3229_v52, %v3230_v3  ;;  %v4071_v13 = vmul.f32 %v9009_v11, %v3091_v46  ;;  %v12806_v10 = vld [vmem:[#allocation30_spill] sm:$0xff] }
 0x203   : > { %v3390_v45 = vsel %vm3348_vm4, %v3388_v19, %v3389_v59  ;;  %v4523_v41 = vadd.f32 %v9237_v14, %v8539_v20  ;;  %v3664_v29 = vadd.f32 %v3607_v15, %v3506_v8  ;;  %v3286_v54 = vadd.f32 %v3231_v42, %v3127_v17 }
 0x204   : > { %v4227_v44 = vmul.f32 %v9062_v6, %v4195_v32  ;;  %v3982_v48 = vrot.slane %v3913_v27, 1  ;;  %v3853_v1 = vmul.f32 %v8050_v50, %v3091_v46  ;;  %v4140_v4 = vrot.slane %v4071_v13, 2 }
 0x205   : > { %v12801_v36 = vrot.slane %v8404_v60, 4  ;;  %v12802_v62 = vrot.slane %v8502_v25, 4  ;;  %v3822_v20 = vadd.f32 %v3765_v47, %v3664_v29  ;;  %v3445_v14 = vadd.f32 %v3390_v45, %v3286_v54 }
 0x206   : > { %v4259_v3 = vadd.f32 %v9078_v23, %v4227_v44  ;;  %v4776_v49 = vmul.f32 %v8189_v16, %v8695_v40  ;;  %v3984_v15 = vsel %vm3189_vm3, %v3982_v48, %v3983_v56  ;;  %v12803_v59 = vrot.slane %v8400_v61, 3 }
 0x207   : > { %v4704_v11 = vsel %vm514_vm0, %v12802_v62, %v12801_v36  ;;  %v12804_v50 = vrot.slane %v8497_v34, 3  ;;  %v4820_v25 = vmul.f32 %v12805_v21, %v8695_v40  ;;  %v9530_v43 = vmul.f32 %v12805_v21, %v12806_v10  ;;  %v12807_v34 = vld [vmem:[#allocation11_spill] sm:$0xff]  ;;  %v12811_v62 = vld [vmem:[#allocation32_spill] sm:$0xff] }
 0x208   : > { %v3882_v24 = vadd.f32 %v3854_v7, %v3822_v20  ;;  %v3505_v22 = vadd.f32 %v9462_v9, %v3445_v14  ;;  %v4142_v33 = vsel %vm3348_vm4, %v4140_v4, %v4141_v38  ;;  %v4934_v28 = vmul.f32 %v12807_v34, %v8695_v40  ;;  %v12808_v7 = vld [vmem:[#allocation12_spill] sm:$0xff]  ;;  %v12813_v20 = vld [vmem:[#allocation15_spill] sm:$0xff] }
 0x209   : > { %v4590_v58 = vsel %vm4587_vm6, %v12804_v50, %v12803_v59  ;;  %v4860_v46 = vrot.slane %v4820_v25, 1  ;;  %v12333_v61 = vrot.slane %v9530_v43, 1  ;;  %v9539_v35 = vmul.f32 %v12807_v34, %v12806_v10 }
 0x20a   : > { %v4638_v47 = vadd.f32 %v4590_v58, %v4523_v41  ;;  %v4040_v55 = vadd.f32 %v3983_v56, %v3882_v24  ;;  %v3663_v30 = vadd.f32 %v3608_v63, %v3505_v22  ;;  %v5048_v52 = vmul.f32 %v12808_v7, %v8695_v40  ;;  %v12810_v41 = vld [vmem:[#allocation13_spill] sm:$0xff]  ;;  %v12814_v58 = vld [vmem:[#allocation31_spill] sm:$0xff]  ;;  %v12815_v22 = vld [vmem:[#allocation16_spill] sm:$0xff] }
 0x20b   : > { %v9543_v9 = vmax.f32 %v4259_v3, 0.0  ;;  %v4974_v19 = vrot.slane %v4934_v28, 2  ;;  %v12331_v32 = vrot.slane %v9539_v35, 2  ;;  %v9548_v8 = vmul.f32 %v12808_v7, %v12806_v10 }
 0x20c   : > { %v4752_v17 = vadd.f32 %v4704_v11, %v4638_v47  ;;  %v4198_v27 = vadd.f32 %v4141_v38, %v4040_v55  ;;  %v3821_v42 = vadd.f32 %v3766_v26, %v3663_v30  ;;  %v4862_v56 = vsel %vm3189_vm3, %v4860_v46, %v12333_v61  ;;  %v12812_v11 = vld [vmem:[#allocation14_spill] sm:$0xff]  ;;  %v12829_v61 = vld [vmem:[#allocation36_spill] sm:$0xff] }
 0x20d   : > { %12809 = vst [vmem:[#allocation10_spill] sm:$0xff] %v9543_v9  ;;  %v4976_v63 = vsel %vm3348_vm4, %v4974_v19, %v12331_v32  ;;  %v5088_v13 = vrot.slane %v5048_v52, 3  ;;  %v5162_v44 = vmul.f32 %v12810_v41, %v8695_v40  ;;  %v9560_v29 = vmul.f32 %v12810_v41, %v12806_v10  ;;  %v12816_v19 = vld [vmem:[#allocation17_spill] sm:$0xff]  ;;  %v12832_v9 = vld [vmem:[#allocation34_spill] sm:$0xff] }
 0x20e   : > { %v4796_v45 = vadd.f32 %v4776_v49, %v4752_v17  ;;  %v4230_v38 = vmul.f32 %v9062_v6, %v4198_v27  ;;  %v3881_v26 = vadd.f32 %v3853_v1, %v3821_v42  ;;  %v12330_v48 = vrot.slane %v9548_v8, 3 }
 0x20f   : > { %v5202_v4 = vrot.slane %v5162_v44, 4  ;;  %v12328_v36 = vrot.slane %v9560_v29, 4  ;;  %v5276_v3 = vmul.f32 %v12812_v11, %v12811_v62  ;;  %v5320_v14 = vmul.f32 %v12813_v20, %v12811_v62 }
 0x210   : > { %v4910_v54 = vadd.f32 %v4862_v56, %v4796_v45  ;;  %v4262_v49 = vadd.f32 %v9078_v23, %v4230_v38  ;;  %v4039_v59 = vadd.f32 %v3984_v15, %v3881_v26  ;;  %v9572_v25 = vmul.f32 %v12813_v20, %v12814_v58 }
 0x211   : > { %v5090_v1 = vsel %vm4587_vm6, %v5088_v13, %v12330_v48  ;;  %v5360_v24 = vrot.slane %v5320_v14, 1  ;;  %v5434_v47 = vmul.f32 %v12815_v22, %v12811_v62  ;;  %v9581_v46 = vmul.f32 %v12815_v22, %v12814_v58 }
 0x212   : > { %v5024_v50 = vadd.f32 %v4976_v63, %v4910_v54  ;;  %v4197_v28 = vadd.f32 %v4142_v33, %v4039_v59  ;;  %v5204_v15 = vsel %vm514_vm0, %v5202_v4, %v12328_v36  ;;  %v12327_v30 = vrot.slane %v9572_v25, 1  ;;  %v12818_v63 = vld [vmem:[#allocation18_spill] sm:$0xff] }
 0x213   : > { %v5474_v17 = vrot.slane %v5434_v47, 2  ;;  %v12326_v52 = vrot.slane %v9581_v46, 2  ;;  %v5548_v27 = vmul.f32 %v12816_v19, %v12811_v62  ;;  %v9592_v42 = vmul.f32 %v12816_v19, %v12814_v58  ;;  %v12822_v47 = vld [vmem:[#allocation20_spill] sm:$0xff] }
 0x214   : > { %v5138_v55 = vadd.f32 %v5090_v1, %v5024_v50  ;;  %v9594_v45 = vmax.f32 %v4262_v49, 0.0  ;;  %v4229_v33 = vmul.f32 %v9062_v6, %v4197_v28  ;;  %v5662_v13 = vmul.f32 %v12818_v63, %v12811_v62  ;;  %v12820_v50 = vld [vmem:[#allocation35_spill] sm:$0xff] }
 0x215   : > { %v5362_v44 = vsel %vm3189_vm3, %v5360_v24, %v12327_v30  ;;  %v5476_v38 = vsel %vm3348_vm4, %v5474_v17, %v12326_v52  ;;  %v5588_v26 = vrot.slane %v5548_v27, 3  ;;  %v9607_v54 = vmul.f32 %v12818_v63, %v12814_v58  ;;  %v12821_v1 = vld [vmem:[#allocation19_spill] sm:$0xff] }
 0x216   : > { %12817 = vst [vmem:[#allocation30_spill] sm:$0xff] %v9594_v45  ;;  %v5252_v56 = vadd.f32 %v5204_v15, %v5138_v55  ;;  %v9610_v4 = vadd.f32 %v9078_v23, %v4229_v33  ;;  %v12329_v14 = vrot.slane %v9592_v42, 3  ;;  %v5702_v49 = vrot.slane %v5662_v13, 4  ;;  %v12823_v55 = vld [vmem:[#allocation33_spill] sm:$0xff]  ;;  %v12830_v45 = vld [vmem:[#allocation24_spill] sm:$0xff] }
 0x217   : > { %v12332_v59 = vrot.slane %v9607_v54, 4  ;;  %v5776_v24 = vmul.f32 %v12821_v1, %v12820_v50  ;;  %v5820_v28 = vmul.f32 %v12822_v47, %v12820_v50  ;;  %v9620_v15 = vmul.f32 %v12822_v47, %v12823_v55 }
 0x218   : > { %12819 = vst [vmem:[#allocation11_spill] sm:$0xff] %v9610_v4  ;;  %v5296_v6 = vadd.f32 %v5276_v3, %v5252_v56  ;;  %v5590_v23 = vsel %vm4587_vm6, %v5588_v26, %v12329_v14  ;;  %v12824_v3 = vld [vmem:[#allocation21_spill] sm:$0xff]  ;;  %v6276_v4 = vmul.f32 %v12830_v45, %v12829_v61  ;;  %v4297_v2 = vmul.f32 %v12840_v51, %v8695_v40 }
 0x219   : > { %v5934_v27 = vmul.f32 %v12824_v3, %v12820_v50  ;;  %v9629_v33 = vmul.f32 %v12824_v3, %v12823_v55  ;;  %v5704_v56 = vsel %vm514_vm0, %v5702_v49, %v12332_v59  ;;  %v5860_v13 = vrot.slane %v5820_v28, 1  ;;  %v12827_v49 = vld [vmem:[#allocation23_spill] sm:$0xff] }
 0x21a   : > { %v5410_v17 = vadd.f32 %v5362_v44, %v5296_v6  ;;  %v12336_v52 = vrot.slane %v9620_v15, 1  ;;  %v12825_v44 = vld [vmem:[#allocation22_spill] sm:$0xff]  ;;  %v6162_v28 = vmul.f32 %v12827_v49, %v12820_v50  ;;  %v9649_v59 = vmul.f32 %v12827_v49, %v12823_v55 }
 0x21b   : > { %v6048_v6 = vmul.f32 %v12825_v44, %v12820_v50  ;;  %v5974_v36 = vrot.slane %v5934_v27, 2  ;;  %v12339_v26 = vrot.slane %v9629_v33, 2  ;;  %v9640_v14 = vmul.f32 %v12825_v44, %v12823_v55 }
 0x21c   : > { %v5524_v30 = vadd.f32 %v5476_v38, %v5410_v17  ;;  %v5862_v48 = vsel %vm3189_vm3, %v5860_v13, %v12336_v52  ;;  %12828 = vst [vmem:[#allocation13_spill] sm:$0xff] %v9649_v59  ;;  %v6202_v39 = vrot.slane %v6162_v28, 4  ;;  %v12348_v13 = vrot.slane %v9649_v59, 4 }
 0x21d   : > { %12826 = vst [vmem:[#allocation12_spill] sm:$0xff] %v9640_v14  ;;  %v6088_v32 = vrot.slane %v6048_v6, 3  ;;  %v5976_v17 = vsel %vm3348_vm4, %v5974_v36, %v12339_v26  ;;  %v12345_v27 = vrot.slane %v9640_v14, 3  ;;  %v12831_v6 = vld [vmem:[#allocation25_spill] sm:$0xff] }
 0x21e   : > { %v5638_v38 = vadd.f32 %v5590_v23, %v5524_v30  ;;  %v6320_v52 = vmul.f32 %v12831_v6, %v12829_v61  ;;  %v9662_v31 = vmul.f32 %v12831_v6, %v12832_v9  ;;  %v12834_v23 = vld [vmem:[#allocation26_spill] sm:$0xff]  ;;  %v6204_v5 = vsel %vm514_vm0, %v6202_v39, %v12348_v13  ;;  %v12838_v39 = vld [vmem:[#allocation28_spill] sm:$0xff] }
 0x21f   : > { %v6090_v36 = vsel %vm4587_vm6, %v6088_v32, %v12345_v27  ;;  %v6434_v26 = vmul.f32 %v12834_v23, %v12829_v61  ;;  %v9671_v28 = vmul.f32 %v12834_v23, %v12832_v9  ;;  %v9691_v13 = vmul.f32 %v12838_v39, %v12832_v9 }
 0x220   : > { %12833 = vst [vmem:[#allocation32_spill] sm:$0xff] %v9662_v31  ;;  %v5752_v30 = vadd.f32 %v5704_v56, %v5638_v38  ;;  %v6360_v57 = vrot.slane %v6320_v52, 1  ;;  %v12352_v18 = vrot.slane %v9662_v31, 1  ;;  %v12836_v56 = vld [vmem:[#allocation27_spill] sm:$0xff]  ;;  %v6662_v52 = vmul.f32 %v12838_v39, %v12829_v61 }
 0x221   : > { %12835 = vst [vmem:[#allocation14_spill] sm:$0xff] %v9671_v28  ;;  %v6548_v38 = vmul.f32 %v12836_v56, %v12829_v61  ;;  %v6474_v12 = vrot.slane %v6434_v26, 2  ;;  %v12354_v32 = vrot.slane %v9671_v28, 2  ;;  %v9682_v27 = vmul.f32 %v12836_v56, %v12832_v9  ;;  %12839 = vst [vmem:[#allocation31_spill] sm:$0xff] %v9691_v13 }
 0x222   : > { %v5796_v0 = vadd.f32 %v5776_v24, %v5752_v30  ;;  %v6362_v53 = vsel %vm3189_vm3, %v6360_v57, %v12352_v18  ;;  %v6702_v31 = vrot.slane %v6662_v52, 4  ;;  %v12362_v57 = vrot.slane %v9691_v13, 4 }
 0x223   : > { %12837 = vst [vmem:[#allocation15_spill] sm:$0xff] %v9682_v27  ;;  %v6588_v37 = vrot.slane %v6548_v38, 3  ;;  %v6476_v26 = vsel %vm3348_vm4, %v6474_v12, %v12354_v32  ;;  %v12359_v30 = vrot.slane %v9682_v27, 3  ;;  %v12841_v38 = vld [vmem:[#allocation6_spill] sm:$0xff] }
 0x224   : > { %v5910_v24 = vadd.f32 %v5862_v48, %v5796_v0  ;;  %v4321_v18 = vmul.f32 %v12841_v38, %v8695_v40  ;;  %v9704_v59 = vmul.f32 %v12841_v38, %v12806_v10  ;;  %v12843_v48 = vld [vmem:[#allocation7_spill] sm:$0xff]  ;;  %v6704_v28 = vsel %vm514_vm0, %v6702_v31, %v12362_v57 }
 0x225   : > { %v6590_v12 = vsel %vm4587_vm6, %v6588_v37, %v12359_v30  ;;  %v4435_v32 = vmul.f32 %v12843_v48, %v8695_v40  ;;  %v9713_v52 = vmul.f32 %v12843_v48, %v12806_v10 }
 0x226   : > { %12842 = vst [vmem:[#allocation16_spill] sm:$0xff] %v9704_v59  ;;  %v6024_v0 = vadd.f32 %v5976_v17, %v5910_v24  ;;  %v4362_v51 = vrot.slane %v4321_v18, 1  ;;  %v12366_v38 = vrot.slane %v9704_v59, 1  ;;  %v12844_v17 = vld [vmem:[#allocation8_spill] sm:$0xff]  ;;  %v12845_v18 = vld [vmem:[#allocation9_spill] sm:$0xff] }
 0x227   : > { %v4549_v24 = vmul.f32 %v12844_v17, %v8695_v40  ;;  %v4476_v39 = vrot.slane %v4435_v32, 2  ;;  %v12380_v37 = vrot.slane %v9713_v52, 2  ;;  %v9724_v30 = vmul.f32 %v12844_v17, %v12806_v10 }
 0x228   : > { %v6138_v27 = vadd.f32 %v6090_v36, %v6024_v0  ;;  %v4364_v13 = vsel %vm3189_vm3, %v4362_v51, %v12366_v38  ;;  %v4664_v31 = vmul.f32 %v12845_v18, %v8695_v40  ;;  %v9733_v57 = vmul.f32 %v12845_v18, %v12806_v10  ;;  %v12846_v51 = vld [vmem:[#allocation29_spill] sm:$0xff] }
 0x229   : > { %v4591_v48 = vrot.slane %v4549_v24, 3  ;;  %v4411_v32 = vadd.f32 %v4364_v13, %v4297_v2  ;;  %v4478_v0 = vsel %vm3348_vm4, %v4476_v39, %v12380_v37  ;;  %v12378_v17 = vrot.slane %v9724_v30, 3 }
 0x22a   : > { %v6252_v36 = vadd.f32 %v6204_v5, %v6138_v27  ;;  %v4705_v14 = vrot.slane %v4664_v31, 4  ;;  %v12369_v59 = vrot.slane %v9733_v57, 4  ;;  %v12847_v24 = vrot.slane %v8404_v60, 4 }
 0x22b   : > { %v4777_v40 = vmul.f32 %v8189_v16, %v12806_v10  ;;  %v4525_v56 = vadd.f32 %v4478_v0, %v4411_v32  ;;  %v4593_v2 = vsel %vm4587_vm6, %v4591_v48, %v12378_v17  ;;  %v4778_v5 = vmul.f32 %v8189_v16, %v12811_v62 }
 0x22c   : > { %v4753_v38 = vadd.f32 %v12847_v24, %v12846_v51  ;;  %v6296_v18 = vadd.f32 %v6276_v4, %v6252_v36  ;;  %v4707_v27 = vsel %vm514_vm0, %v4705_v14, %v12369_v59  ;;  %v4822_v60 = vmul.f32 %v12805_v21, %v12811_v62 }
 0x22d   : > { %v9757_v39 = vmul.f32 %v12805_v21, %v12814_v58  ;;  %v4640_v31 = vadd.f32 %v4593_v2, %v4525_v56  ;;  %v4936_v48 = vmul.f32 %v12807_v34, %v12811_v62  ;;  %v9763_v36 = vmul.f32 %v12807_v34, %v12814_v58 }
 0x22e   : > { %v4797_v13 = vadd.f32 %v4777_v40, %v4753_v38  ;;  %v6410_v4 = vadd.f32 %v6362_v53, %v6296_v18  ;;  %v4863_v32 = vrot.slane %v4822_v60, 1  ;;  %v12848_v38 = vrot.slane %v9530_v43, 1 }
 0x22f   : > { %v12377_v14 = vrot.slane %v9757_v39, 1  ;;  %v5050_v51 = vmul.f32 %v12808_v7, %v12811_v62  ;;  %v4754_v40 = vadd.f32 %v4707_v27, %v4640_v31  ;;  %v4977_v53 = vrot.slane %v4936_v48, 2 }
 0x230   : > { %v4911_v0 = vadd.f32 %v12848_v38, %v4797_v13  ;;  %v6524_v24 = vadd.f32 %v6476_v26, %v6410_v4  ;;  %v12371_v56 = vrot.slane %v9763_v36, 2  ;;  %v12849_v2 = vrot.slane %v9539_v35, 2 }
 0x231   : > { %v4865_v18 = vsel %vm3189_vm3, %v4863_v32, %v12377_v14  ;;  %v9778_v59 = vmul.f32 %v12808_v7, %v12814_v58  ;;  %v5091_v43 = vrot.slane %v5050_v51, 3  ;;  %v4798_v38 = vadd.f32 %v4778_v5, %v4754_v40 }
 0x232   : > { %v5025_v60 = vadd.f32 %v12849_v2, %v4911_v0  ;;  %v6638_v13 = vadd.f32 %v6590_v12, %v6524_v24  ;;  %v4979_v26 = vsel %vm3348_vm4, %v4977_v53, %v12371_v56  ;;  %v5164_v27 = vmul.f32 %v12810_v41, %v12811_v62 }
 0x233   : > { %v12370_v4 = vrot.slane %v9778_v59, 3  ;;  %v12850_v31 = vrot.slane %v9548_v8, 3  ;;  %v9790_v48 = vmul.f32 %v12810_v41, %v12814_v58  ;;  %v5277_v12 = vmul.f32 %v12812_v11, %v12814_v58 }
 0x234   : > { %v6752_v5 = vadd.f32 %v6704_v28, %v6638_v13  ;;  %v4912_v32 = vadd.f32 %v4865_v18, %v4798_v38  ;;  %v5205_v0 = vrot.slane %v5164_v27, 4  ;;  %v5278_v51 = vmul.f32 %v12812_v11, %v12820_v50 }
 0x235   : > { %v5139_v35 = vadd.f32 %v12850_v31, %v5025_v60  ;;  %v5093_v24 = vsel %vm4587_vm6, %v5091_v43, %v12370_v4  ;;  %v12375_v8 = vrot.slane %v9790_v48, 4  ;;  %v12851_v40 = vrot.slane %v9560_v29, 4 }
 0x236   : > { %v5322_v2 = vmul.f32 %v12813_v20, %v12820_v50  ;;  %6772 = vst.msk [vmem:[#allocation4] sm:$0xff] %vm607_vm2, %v6752_v5  ;;  %v5026_v28 = vadd.f32 %v4979_v26, %v4912_v32  ;;  %v9807_v18 = vmul.f32 %v12813_v20, %v12823_v55  ;;  %v5436_v60 = vmul.f32 %v12815_v22, %v12820_v50 }
 0x237   : > { %v5253_v53 = vadd.f32 %v12851_v40, %v5139_v35  ;;  %v9813_v43 = vmul.f32 %v12815_v22, %v12823_v55  ;;  %v5207_v29 = vsel %vm514_vm0, %v5205_v0, %v12375_v8  ;;  %v5550_v26 = vmul.f32 %v12816_v19, %v12820_v50 }
 0x238   : > { %v5363_v38 = vrot.slane %v5322_v2, 1  ;;  %v5140_v27 = vadd.f32 %v5093_v24, %v5026_v28  ;;  %v12373_v31 = vrot.slane %v9807_v18, 1  ;;  %v5477_v35 = vrot.slane %v5436_v60, 2 }
 0x239   : > { %v5297_v13 = vadd.f32 %v5277_v12, %v5253_v53  ;;  %v12372_v5 = vrot.slane %v9813_v43, 2  ;;  %v12852_v32 = vrot.slane %v9572_v25, 1  ;;  %v9826_v4 = vmul.f32 %v12816_v19, %v12823_v55 }
 0x23a   : > { %v5591_v56 = vrot.slane %v5550_v26, 3  ;;  %v5664_v12 = vmul.f32 %v12818_v63, %v12820_v50  ;;  %v5254_v0 = vadd.f32 %v5207_v29, %v5140_v27  ;;  %v5365_v24 = vsel %vm3189_vm3, %v5363_v38, %v12373_v31 }
 0x23b   : > { %v5411_v40 = vadd.f32 %v12852_v32, %v5297_v13  ;;  %v5479_v53 = vsel %vm3348_vm4, %v5477_v35, %v12372_v5  ;;  %v9838_v25 = vmul.f32 %v12818_v63, %v12823_v55  ;;  %v12853_v2 = vrot.slane %v9581_v46, 2 }
 0x23c   : > { %v12374_v60 = vrot.slane %v9826_v4, 3  ;;  %v5705_v13 = vrot.slane %v5664_v12, 4  ;;  %v5777_v29 = vmul.f32 %v12821_v1, %v12823_v55  ;;  %v5298_v26 = vadd.f32 %v5278_v51, %v5254_v0 }
 0x23d   : > { %v5525_v28 = vadd.f32 %v12853_v2, %v5411_v40  ;;  %v12376_v38 = vrot.slane %v9838_v25, 4  ;;  %v5778_v27 = vmul.f32 %v12821_v1, %v12829_v61  ;;  %v5822_v35 = vmul.f32 %v12822_v47, %v12829_v61  ;;  %v6793_v32 = vld [vmem:[#allocation4] sm:$0xff] }
 0x23e   : > { %v5593_v46 = vsel %vm4587_vm6, %v5591_v56, %v12374_v60  ;;  %v12854_v40 = vrot.slane %v9592_v42, 3  ;;  %v9857_v2 = vmul.f32 %v12822_v47, %v12832_v9  ;;  %v5936_v51 = vmul.f32 %v12824_v3, %v12829_v61  ;;  %7576 = vmatmul.mubr.msk.f32.vlgmr.msra.gmra.mxu1 %vm607_vm2, %v6793_v32 }
 0x23f   : > { %v5412_v0 = vadd.f32 %v5365_v24, %v5298_v26  ;;  %v5707_v5 = vsel %vm514_vm0, %v5705_v13, %v12376_v38  ;;  %v5863_v31 = vrot.slane %v5822_v35, 1  ;;  %v9867_v56 = vmul.f32 %v12824_v3, %v12832_v9 }
 0x240   : > { %v5639_v12 = vadd.f32 %v12854_v40, %v5525_v28  ;;  %12855 = vst [vmem:[#allocation17_spill] sm:$0xff] %v9857_v2  ;;  %v12857_v42 = vmov 0.0   ;;  %v12858_v28 = vrot.slane %v9607_v54, 4  ;;  %v12379_v60 = vrot.slane %v9857_v2, 1  ;;  %v12872_v2 = vld [vmem:[#allocation13_spill] sm:$0xff] }
 0x241   : > { %12856 = vst [vmem:[#allocation18_spill] sm:$0xff] %v9867_v56  ;;  %7578 = vmatprep.mubr.msk.f32.mxu1 %vm7670_vm5, %v12857_v42  ;;  %v5977_v8 = vrot.slane %v5936_v51, 2  ;;  %v6050_v24 = vmul.f32 %v12825_v44, %v12829_v61  ;;  %v5526_v26 = vadd.f32 %v5479_v53, %v5412_v0  ;;  %v12382_v13 = vrot.slane %v9867_v56, 2 }
 0x242   : > { %v5753_v40 = vadd.f32 %v12858_v28, %v5639_v12  ;;  %v9879_v35 = vmul.f32 %v12825_v44, %v12832_v9  ;;  %v6164_v32 = vmul.f32 %v12827_v49, %v12829_v61  ;;  %v5865_v54 = vsel %vm3189_vm3, %v5863_v31, %v12379_v60 }
 0x243   : > { %v6091_v12 = vrot.slane %v6050_v24, 3  ;;  %v9888_v51 = vmul.f32 %v12827_v49, %v12832_v9  ;;  %v5640_v53 = vadd.f32 %v5593_v46, %v5526_v26  ;;  %v5979_v0 = vsel %vm3348_vm4, %v5977_v8, %v12382_v13  ;;  %v12862_v24 = vld [vmem:[#allocation39_spill] sm:$0xff]  ;;  %v12863_v26 = vld [vmem:[#allocation37_spill] sm:$0xff] }
 0x244   : > { %12859 = vst [vmem:[#allocation35_spill] sm:$0xff] %v9879_v35  ;;  %v5797_v38 = vadd.f32 %v5777_v29, %v5753_v40  ;;  %v12381_v28 = vrot.slane %v9879_v35, 3  ;;  %v6205_v14 = vrot.slane %v6164_v32, 4  ;;  %v12861_v17 = vrot.slane %v9620_v15, 1  ;;  %v12867_v35 = vld [vmem:[#allocation27_spill] sm:$0xff] }
 0x245   : > { %12860 = vst [vmem:[#allocation19_spill] sm:$0xff] %v9888_v51  ;;  %v12386_v40 = vrot.slane %v9888_v51, 4  ;;  %v6277_v31 = vmul.f32 %v12830_v45, %v12832_v9  ;;  %v6278_v60 = vmul.f32 %v12830_v45, %v12862_v24  ;;  %v5754_v37 = vadd.f32 %v5707_v5, %v5640_v53 }
 0x246   : > { %v5911_v29 = vadd.f32 %v12861_v17, %v5797_v38  ;;  %v6093_v46 = vsel %vm4587_vm6, %v6091_v12, %v12381_v28  ;;  %v6322_v8 = vmul.f32 %v12831_v6, %v12862_v24  ;;  %v9908_v15 = vmul.f32 %v12831_v6, %v12863_v26 }
 0x247   : > { %v12865_v17 = vrot.slane %v9629_v33, 2  ;;  %v6207_v32 = vsel %vm514_vm0, %v6205_v14, %v12386_v40  ;;  %v6436_v5 = vmul.f32 %v12834_v23, %v12862_v24  ;;  %v9919_v12 = vmul.f32 %v12834_v23, %v12863_v26  ;;  %v12868_v33 = vld [vmem:[#allocation12_spill] sm:$0xff] }
 0x248   : > { %12864 = vst [vmem:[#allocation33_spill] sm:$0xff] %v9908_v15  ;;  %v5798_v53 = vadd.f32 %v5778_v27, %v5754_v37  ;;  %v6363_v28 = vrot.slane %v6322_v8, 1  ;;  %v12391_v13 = vrot.slane %v9908_v15, 1  ;;  %v6550_v56 = vmul.f32 %v12867_v35, %v12862_v24  ;;  %v12871_v8 = vld [vmem:[#allocation28_spill] sm:$0xff] }
 0x249   : > { %v6025_v38 = vadd.f32 %v12865_v17, %v5911_v29  ;;  %12866 = vst [vmem:[#allocation36_spill] sm:$0xff] %v9919_v12  ;;  %v12869_v29 = vrot.slane %v12868_v33, 3  ;;  %v6477_v51 = vrot.slane %v6436_v5, 2  ;;  %v12392_v14 = vrot.slane %v9919_v12, 2 }
 0x24a   : > { %v9929_v40 = vmul.f32 %v12867_v35, %v12863_v26  ;;  %v5912_v6 = vadd.f32 %v5865_v54, %v5798_v53  ;;  %v6365_v37 = vsel %vm3189_vm3, %v6363_v28, %v12391_v13  ;;  %v6591_v27 = vrot.slane %v6550_v56, 3  ;;  %v12875_v56 = vld [vmem:[#allocation5_spill] sm:$0xff] }
 0x24b   : > { %v6139_v17 = vadd.f32 %v12869_v29, %v6025_v38  ;;  %v6664_v23 = vmul.f32 %v12871_v8, %v12862_v24  ;;  %v12873_v45 = vrot.slane %v12872_v2, 4  ;;  %v6479_v38 = vsel %vm3348_vm4, %v6477_v51, %v12392_v14  ;;  %v12876_v14 = vld [vmem:[#allocation6_spill] sm:$0xff] }
 0x24c   : > { %12870 = vst [vmem:[#allocation34_spill] sm:$0xff] %v9929_v40  ;;  %v12395_v5 = vrot.slane %v9929_v40, 3  ;;  %v9944_v54 = vmul.f32 %v12871_v8, %v12863_v26  ;;  %v6026_v53 = vadd.f32 %v5979_v0, %v5912_v6  ;;  %v4298_v28 = vmul.f32 %v12875_v56, %v12806_v10 }
 0x24d   : > { %v6253_v33 = vadd.f32 %v12873_v45, %v6139_v17  ;;  %v6705_v29 = vrot.slane %v6664_v23, 4  ;;  %v4299_v51 = vmul.f32 %v12875_v56, %v12811_v62  ;;  %v4323_v12 = vmul.f32 %v12876_v14, %v12811_v62  ;;  %v12877_v23 = vld [vmem:[#allocation16_spill] sm:$0xff] }
 0x24e   : > { %12874 = vst [vmem:[#allocation29_spill] sm:$0xff] %v9944_v54  ;;  %v6593_v45 = vsel %vm4587_vm6, %v6591_v27, %v12395_v5  ;;  %v12399_v2 = vrot.slane %v9944_v54, 4  ;;  %v6140_v17 = vadd.f32 %v6093_v46, %v6026_v53  ;;  %v9958_v6 = vmul.f32 %v12876_v14, %v12814_v58  ;;  %v12881_v5 = vld [vmem:[#allocation7_spill] sm:$0xff] }
 0x24f   : > { %v6297_v13 = vadd.f32 %v6277_v31, %v6253_v33  ;;  %v12878_v10 = vrot.slane %v12877_v23, 1  ;;  %v12879_v31 = vld [vmem:[#allocation32_spill] sm:$0xff]  ;;  %v4437_v46 = vmul.f32 %v12881_v5, %v12811_v62  ;;  %v9971_v53 = vmul.f32 %v12881_v5, %v12814_v58 }
 0x250   : > { %v12880_v33 = vrot.slane %v12879_v31, 1  ;;  %v6707_v27 = vsel %vm514_vm0, %v6705_v29, %v12399_v2  ;;  %v6254_v15 = vadd.f32 %v6207_v32, %v6140_v17  ;;  %v4365_v14 = vrot.slane %v4323_v12, 1  ;;  %v12885_v2 = vld [vmem:[#allocation8_spill] sm:$0xff] }
 0x251   : > { %v4412_v0 = vadd.f32 %v12878_v10, %v4298_v28  ;;  %v12402_v56 = vrot.slane %v9958_v6, 1  ;;  %v12882_v28 = vrot.slane %v9713_v52, 2  ;;  %v12883_v10 = vld [vmem:[#allocation14_spill] sm:$0xff]  ;;  %v12415_v29 = vrot.slane %v9971_v53, 2 }
 0x252   : > { %v6411_v40 = vadd.f32 %v12880_v33, %v6297_v13  ;;  %v12884_v13 = vrot.slane %v12883_v10, 2  ;;  %v4479_v33 = vrot.slane %v4437_v46, 2  ;;  %v4551_v54 = vmul.f32 %v12885_v2, %v12811_v62 }
 0x253   : > { %v4526_v23 = vadd.f32 %v12882_v28, %v4412_v0  ;;  %v6298_v8 = vadd.f32 %v6278_v60, %v6254_v15  ;;  %v4367_v32 = vsel %vm3189_vm3, %v4365_v14, %v12402_v56  ;;  %v9986_v12 = vmul.f32 %v12885_v2, %v12814_v58  ;;  %v12887_v0 = vld [vmem:[#allocation15_spill] sm:$0xff]  ;;  %v12889_v14 = vld [vmem:[#allocation9_spill] sm:$0xff] }
 0x254   : > { %v6525_v31 = vadd.f32 %v12884_v13, %v6411_v40  ;;  %v12886_v52 = vrot.slane %v9724_v30, 3  ;;  %v12888_v40 = vrot.slane %v12887_v0, 3  ;;  %v4413_v28 = vadd.f32 %v4367_v32, %v4299_v51  ;;  %v12890_v30 = vld [vmem:[#allocation31_spill] sm:$0xff] }
 0x255   : > { %v4481_v10 = vsel %vm3348_vm4, %v4479_v33, %v12415_v29  ;;  %v4594_v60 = vrot.slane %v4551_v54, 3  ;;  %v6412_v15 = vadd.f32 %v6365_v37, %v6298_v8  ;;  %v12414_v13 = vrot.slane %v9986_v12, 3 }
 0x256   : > { %v4641_v17 = vadd.f32 %v12886_v52, %v4526_v23  ;;  %v6639_v46 = vadd.f32 %v12888_v40, %v6525_v31  ;;  %v4666_v56 = vmul.f32 %v12889_v14, %v12811_v62  ;;  %v10000_v2 = vmul.f32 %v12889_v14, %v12814_v58 }
 0x257   : > { %v12891_v23 = vrot.slane %v12890_v30, 4  ;;  %v4527_v31 = vadd.f32 %v4481_v10, %v4413_v28  ;;  %v12892_v51 = vrot.slane %v9733_v57, 4  ;;  %v4779_v54 = vmul.f32 %v8189_v16, %v12814_v58 }
 0x258   : > { %v6526_v37 = vadd.f32 %v6479_v38, %v6412_v15  ;;  %v4596_v8 = vsel %vm4587_vm6, %v4594_v60, %v12414_v13  ;;  %v4708_v62 = vrot.slane %v4666_v56, 4  ;;  %v12412_v33 = vrot.slane %v10000_v2, 4 }
 0x259   : > { %v6753_v52 = vadd.f32 %v12891_v23, %v6639_v46  ;;  %v4755_v32 = vadd.f32 %v12892_v51, %v4641_v17  ;;  %v4642_v0 = vadd.f32 %v4596_v8, %v4527_v31  ;;  %v4780_v40 = vmul.f32 %v8189_v16, %v12820_v50 }
 0x25a   : > { %v4824_v57 = vmul.f32 %v12805_v21, %v12820_v50  ;;  %v6640_v17 = vadd.f32 %v6593_v45, %v6526_v37  ;;  %v4710_v38 = vsel %vm514_vm0, %v4708_v62, %v12412_v33  ;;  %v10022_v56 = vmul.f32 %v12805_v21, %v12823_v55 }
 0x25b   : > { %6774 = vst.msk [vmem:[#allocation4 + $0x8] sm:$0x3] %vm6773_vm7, %v6753_v52  ;;  %v4799_v46 = vadd.f32 %v4779_v54, %v4755_v32  ;;  %v4938_v28 = vmul.f32 %v12807_v34, %v12820_v50  ;;  %v4756_v10 = vadd.f32 %v4710_v38, %v4642_v0  ;;  %v12893_v15 = vrot.slane %v9757_v39, 1 }
 0x25c   : > { %v4866_v60 = vrot.slane %v4824_v57, 1  ;;  %v10030_v23 = vmul.f32 %v12807_v34, %v12823_v55  ;;  %v6754_v45 = vadd.f32 %v6707_v27, %v6640_v17  ;;  %v12411_v52 = vrot.slane %v10022_v56, 1 }
 0x25d   : > { %v4913_v30 = vadd.f32 %v12893_v15, %v4799_v46  ;;  %v4980_v31 = vrot.slane %v4938_v28, 2  ;;  %v5052_v51 = vmul.f32 %v12808_v7, %v12820_v50  ;;  %v4800_v32 = vadd.f32 %v4780_v40, %v4756_v10 }
 0x25e   : > { %v12406_v54 = vrot.slane %v10030_v23, 2  ;;  %v12894_v37 = vrot.slane %v9763_v36, 2  ;;  %v10040_v39 = vmul.f32 %v12808_v7, %v12823_v55  ;;  %6775 = vst.msk [vmem:[#allocation4 + $0xa] sm:$0xff] %vm607_vm2, %v6754_v45  ;;  %v4868_v27 = vsel %vm3189_vm3, %v4866_v60, %v12411_v52 }
 0x25f   : > { %v5094_v62 = vrot.slane %v5052_v51, 3  ;;  %v5166_v0 = vmul.f32 %v12810_v41, %v12820_v50  ;;  %v10050_v40 = vmul.f32 %v12810_v41, %v12823_v55  ;;  %v4914_v36 = vadd.f32 %v4868_v27, %v4800_v32 }
 0x260   : > { %v5027_v8 = vadd.f32 %v12894_v37, %v4913_v30  ;;  %v4982_v46 = vsel %vm3348_vm4, %v4980_v31, %v12406_v54  ;;  %v12405_v57 = vrot.slane %v10040_v39, 3  ;;  %v12895_v17 = vrot.slane %v9778_v59, 3 }
 0x261   : > { %v5208_v28 = vrot.slane %v5166_v0, 4  ;;  %v12404_v10 = vrot.slane %v10050_v40, 4  ;;  %v5279_v60 = vmul.f32 %v12812_v11, %v12823_v55  ;;  %v5280_v15 = vmul.f32 %v12812_v11, %v12829_v61 }
 0x262   : > { %v5141_v38 = vadd.f32 %v12895_v17, %v5027_v8  ;;  %v5028_v30 = vadd.f32 %v4982_v46, %v4914_v36  ;;  %v5096_v45 = vsel %vm4587_vm6, %v5094_v62, %v12405_v57  ;;  %v12896_v31 = vrot.slane %v9790_v48, 4 }
 0x263   : > { %v5324_v59 = vmul.f32 %v12813_v20, %v12829_v61  ;;  %v5210_v32 = vsel %vm514_vm0, %v5208_v28, %v12404_v10  ;;  %v10075_v37 = vmul.f32 %v12813_v20, %v12832_v9  ;;  %v5438_v8 = vmul.f32 %v12815_v22, %v12829_v61 }
 0x264   : > { %v5255_v51 = vadd.f32 %v12896_v31, %v5141_v38  ;;  %v10081_v27 = vmul.f32 %v12815_v22, %v12832_v9  ;;  %v5142_v48 = vadd.f32 %v5096_v45, %v5028_v30  ;;  %v5552_v36 = vmul.f32 %v12816_v19, %v12829_v61 }
 0x265   : > { %v5366_v0 = vrot.slane %v5324_v59, 1  ;;  %v12409_v46 = vrot.slane %v10075_v37, 1  ;;  %v5480_v17 = vrot.slane %v5438_v8, 2  ;;  %v10089_v28 = vmul.f32 %v12816_v19, %v12832_v9  ;;  %v6794_v31 = vld [vmem:[#allocation4 + $0x8] sm:$0xff] }
 0x266   : > { %v5299_v62 = vadd.f32 %v5279_v60, %v5255_v51  ;;  %v12408_v38 = vrot.slane %v10081_v27, 2  ;;  %v5256_v10 = vadd.f32 %v5210_v32, %v5142_v48  ;;  %v12897_v57 = vrot.slane %v9807_v18, 1  ;;  %7579 = vmatmul.mubr.msk.f32.gmra.mxu1 %vm607_vm2, %v6794_v31 }
 0x267   : > { %v5594_v30 = vrot.slane %v5552_v36, 3  ;;  %v5666_v60 = vmul.f32 %v12818_v63, %v12829_v61  ;;  %v5368_v45 = vsel %vm3189_vm3, %v5366_v0, %v12409_v46  ;;  %v12407_v59 = vrot.slane %v10089_v28, 3  ;;  %7581 = vmatprep.mubr.msk.f32.mxu1 %vm7670_vm5, %v12857_v42 }
 0x268   : > { %v5413_v54 = vadd.f32 %v12897_v57, %v5299_v62  ;;  %v5482_v51 = vsel %vm3348_vm4, %v5480_v17, %v12408_v38  ;;  %v10105_v18 = vmul.f32 %v12818_v63, %v12832_v9  ;;  %v5300_v57 = vadd.f32 %v5280_v15, %v5256_v10 }
 0x269   : > { %v12899_v32 = vrot.slane %v9813_v43, 2  ;;  %v5708_v48 = vrot.slane %v5666_v60, 4  ;;  %v5779_v62 = vmul.f32 %v12821_v1, %v12832_v9  ;;  %v5596_v0 = vsel %vm4587_vm6, %v5594_v30, %v12407_v59 }
 0x26a   : > { %12898 = vst [vmem:[#allocation39_spill] sm:$0xff] %v10105_v18  ;;  %v12410_v36 = vrot.slane %v10105_v18, 4  ;;  %v5780_v17 = vmul.f32 %v12821_v1, %v12862_v24  ;;  %v5824_v31 = vmul.f32 %v12822_v47, %v12862_v24  ;;  %v5414_v10 = vadd.f32 %v5368_v45, %v5300_v57 }
 0x26b   : > { %v5527_v8 = vadd.f32 %v12899_v32, %v5413_v54  ;;  %v12900_v43 = vrot.slane %v9826_v4, 3  ;;  %v10125_v15 = vmul.f32 %v12822_v47, %v12863_v26  ;;  %v5938_v60 = vmul.f32 %v12824_v3, %v12862_v24 }
 0x26c   : > { %v5710_v30 = vsel %vm514_vm0, %v5708_v48, %v12410_v36  ;;  %v5866_v32 = vrot.slane %v5824_v31, 1  ;;  %v10134_v59 = vmul.f32 %v12824_v3, %v12863_v26  ;;  %v6052_v4 = vmul.f32 %v12825_v44, %v12862_v24 }
 0x26d   : > { %v5641_v54 = vadd.f32 %v12900_v43, %v5527_v8  ;;  %12901 = vst [vmem:[#allocation37_spill] sm:$0xff] %v10125_v15  ;;  %v5528_v45 = vadd.f32 %v5482_v51, %v5414_v10  ;;  %v12903_v57 = vrot.slane %v9838_v25, 4  ;;  %v12413_v43 = vrot.slane %v10125_v15, 1 }
 0x26e   : > { %12902 = vst [vmem:[#allocation12_spill] sm:$0xff] %v10134_v59  ;;  %v5980_v38 = vrot.slane %v5938_v60, 2  ;;  %v12416_v46 = vrot.slane %v10134_v59, 2  ;;  %v10144_v48 = vmul.f32 %v12825_v44, %v12863_v26  ;;  %v6094_v31 = vrot.slane %v6052_v4, 3  ;;  %v12906_v4 = vld [vmem:[#allocation24_spill] sm:$0xff] }
 0x26f   : > { %v5755_v8 = vadd.f32 %v12903_v57, %v5641_v54  ;;  %v6166_v36 = vmul.f32 %v12827_v49, %v12862_v24  ;;  %v5642_v52 = vadd.f32 %v5596_v0, %v5528_v45  ;;  %v5868_v25 = vsel %vm3189_vm3, %v5866_v32, %v12413_v43  ;;  %v12909_v43 = vld [vmem:[#allocation40_spill] sm:$0xff] }
 0x270   : > { %12904 = vst [vmem:[#allocation13_spill] sm:$0xff] %v10144_v48  ;;  %v10153_v51 = vmul.f32 %v12827_v49, %v12863_v26  ;;  %v5982_v10 = vsel %vm3348_vm4, %v5980_v38, %v12416_v46  ;;  %v12420_v54 = vrot.slane %v10144_v48, 3  ;;  %v6279_v57 = vmul.f32 %v12906_v4, %v12863_v26  ;;  %v12910_v38 = vld [vmem:[#allocation25_spill] sm:$0xff] }
 0x271   : > { %v5799_v33 = vadd.f32 %v5779_v62, %v5755_v8  ;;  %v6208_v60 = vrot.slane %v6166_v36, 4  ;;  %v5756_v0 = vadd.f32 %v5710_v30, %v5642_v52  ;;  %v12907_v62 = vld [vmem:[#allocation17_spill] sm:$0xff]  ;;  %v6280_v13 = vmul.f32 %v12906_v4, %v12909_v43  ;;  %v12911_v36 = vld [vmem:[#allocation38_spill] sm:$0xff] }
 0x272   : > { %12905 = vst [vmem:[#allocation16_spill] sm:$0xff] %v10153_v51  ;;  %v12908_v45 = vrot.slane %v12907_v62, 1  ;;  %v6096_v29 = vsel %vm4587_vm6, %v6094_v31, %v12420_v54  ;;  %v6324_v46 = vmul.f32 %v12910_v38, %v12909_v43  ;;  %v10173_v59 = vmul.f32 %v12910_v38, %v12911_v36  ;;  %v12913_v52 = vld [vmem:[#allocation26_spill] sm:$0xff] }
 0x273   : > { %v6438_v30 = vmul.f32 %v12913_v52, %v12909_v43  ;;  %v12914_v62 = vld [vmem:[#allocation18_spill] sm:$0xff]  ;;  %v12916_v15 = vrot.slane %v10153_v51, 4  ;;  %v10184_v31 = vmul.f32 %v12913_v52, %v12911_v36  ;;  %v6552_v49 = vmul.f32 %v12867_v35, %v12909_v43 }
 0x274   : > { %v5913_v8 = vadd.f32 %v12908_v45, %v5799_v33  ;;  %12912 = vst [vmem:[#allocation32_spill] sm:$0xff] %v10173_v59  ;;  %v5800_v33 = vadd.f32 %v5780_v17, %v5756_v0  ;;  %v12915_v45 = vrot.slane %v12914_v62, 2  ;;  %v6366_v54 = vrot.slane %v6324_v46, 1  ;;  %v12918_v17 = vld [vmem:[#allocation35_spill] sm:$0xff] }
 0x275   : > { %v6210_v48 = vsel %vm514_vm0, %v6208_v60, %v12916_v15  ;;  %12917 = vst [vmem:[#allocation14_spill] sm:$0xff] %v10184_v31  ;;  %v12428_v4 = vrot.slane %v10173_v59, 1  ;;  %v6480_v38 = vrot.slane %v6438_v30, 2  ;;  %v12919_v0 = vrot.slane %v12918_v17, 3  ;;  %v12921_v30 = vld [vmem:[#allocation28_spill] sm:$0xff] }
 0x276   : > { %v6027_v32 = vadd.f32 %v12915_v45, %v5913_v8  ;;  %v5914_v18 = vadd.f32 %v5868_v25, %v5800_v33  ;;  %v12432_v8 = vrot.slane %v10184_v31, 2  ;;  %v10194_v15 = vmul.f32 %v12867_v35, %v12911_v36  ;;  %v12932_v31 = vld [vmem:[#allocation36_spill] sm:$0xff] }
 0x277   : > { %v6368_v46 = vsel %vm3189_vm3, %v6366_v54, %v12428_v4  ;;  %v6594_v60 = vrot.slane %v6552_v49, 3  ;;  %v6666_v45 = vmul.f32 %v12921_v30, %v12909_v43  ;;  %v10203_v25 = vmul.f32 %v12921_v30, %v12911_v36  ;;  %v12925_v54 = vld [vmem:[#allocation5_spill] sm:$0xff] }
 0x278   : > { %v6141_v62 = vadd.f32 %v12919_v0, %v6027_v32  ;;  %12920 = vst [vmem:[#allocation15_spill] sm:$0xff] %v10194_v15  ;;  %v6028_v33 = vadd.f32 %v5982_v10, %v5914_v18  ;;  %v12923_v32 = vld [vmem:[#allocation19_spill] sm:$0xff]  ;;  %v6482_v51 = vsel %vm3348_vm4, %v6480_v38, %v12432_v8  ;;  %v12431_v59 = vrot.slane %v10194_v15, 3 }
 0x279   : > { %12922 = vst [vmem:[#allocation9_spill] sm:$0xff] %v10203_v25  ;;  %v12924_v17 = vrot.slane %v12923_v32, 4  ;;  %v6708_v35 = vrot.slane %v6666_v45, 4  ;;  %v12433_v49 = vrot.slane %v10203_v25, 4  ;;  %v4300_v4 = vmul.f32 %v12925_v54, %v12814_v58 }
 0x27a   : > { %v4301_v30 = vmul.f32 %v12925_v54, %v12820_v50  ;;  %v6142_v52 = vadd.f32 %v6096_v29, %v6028_v33  ;;  %v6596_v10 = vsel %vm4587_vm6, %v6594_v60, %v12431_v59  ;;  %v12927_v58 = vrot.slane %v9958_v6, 1  ;;  %v12928_v33 = vld [vmem:[#allocation33_spill] sm:$0xff]  ;;  %v12931_v6 = vld [vmem:[#allocation8_spill] sm:$0xff] }
 0x27b   : > { %v6255_v0 = vadd.f32 %v12924_v17, %v6141_v62  ;;  %v12926_v62 = vld [vmem:[#allocation6_spill] sm:$0xff]  ;;  %v6710_v45 = vsel %vm514_vm0, %v6708_v35, %v12433_v49  ;;  %v4439_v29 = vmul.f32 %v12881_v5, %v12820_v50  ;;  %v12929_v60 = vrot.slane %v12928_v33, 1 }
 0x27c   : > { %v4325_v38 = vmul.f32 %v12926_v62, %v12820_v50  ;;  %v10226_v32 = vmul.f32 %v12926_v62, %v12823_v55  ;;  %v4414_v17 = vadd.f32 %v12927_v58, %v4300_v4  ;;  %v10236_v8 = vmul.f32 %v12881_v5, %v12823_v55 }
 0x27d   : > { %v6299_v18 = vadd.f32 %v6279_v57, %v6255_v0  ;;  %v6256_v57 = vadd.f32 %v6210_v48, %v6142_v52  ;;  %v4482_v49 = vrot.slane %v4439_v29, 2  ;;  %v12930_v25 = vrot.slane %v9971_v53, 2 }
 0x27e   : > { %v4368_v59 = vrot.slane %v4325_v38, 1  ;;  %v12450_v35 = vrot.slane %v10226_v32, 1  ;;  %v4553_v4 = vmul.f32 %v12931_v6, %v12820_v50  ;;  %v12933_v48 = vrot.slane %v12932_v31, 2  ;;  %v12935_v31 = vld [vmem:[#allocation34_spill] sm:$0xff] }
 0x27f   : > { %v6413_v0 = vadd.f32 %v12929_v60, %v6299_v18  ;;  %v4528_v15 = vadd.f32 %v12930_v25, %v4414_v17  ;;  %v6300_v58 = vadd.f32 %v6280_v13, %v6256_v57  ;;  %v12448_v18 = vrot.slane %v10236_v8, 2 }
 0x280   : > { %v10248_v38 = vmul.f32 %v12931_v6, %v12823_v55  ;;  %v4370_v29 = vsel %vm3189_vm3, %v4368_v59, %v12450_v35  ;;  %v4597_v33 = vrot.slane %v4553_v4, 3  ;;  %v12934_v53 = vrot.slane %v9986_v12, 3 }
 0x281   : > { %v6527_v52 = vadd.f32 %v12933_v48, %v6413_v0  ;;  %v4668_v13 = vmul.f32 %v12889_v14, %v12820_v50  ;;  %v6414_v17 = vadd.f32 %v6368_v46, %v6300_v58  ;;  %v12936_v57 = vrot.slane %v12935_v31, 3  ;;  %v12938_v46 = vld [vmem:[#allocation29_spill] sm:$0xff] }
 0x282   : > { %v4643_v25 = vadd.f32 %v12934_v53, %v4528_v15  ;;  %v4415_v0 = vadd.f32 %v4370_v29, %v4301_v30  ;;  %v4484_v48 = vsel %vm3348_vm4, %v4482_v49, %v12448_v18  ;;  %v12447_v6 = vrot.slane %v10248_v38, 3 }
 0x283   : > { %v6641_v60 = vadd.f32 %v12936_v57, %v6527_v52  ;;  %v10265_v59 = vmul.f32 %v12889_v14, %v12823_v55  ;;  %v4711_v12 = vrot.slane %v4668_v13, 4  ;;  %v12937_v15 = vrot.slane %v10000_v2, 4 }
 0x284   : > { %v6528_v50 = vadd.f32 %v6482_v51, %v6414_v17  ;;  %v12939_v58 = vrot.slane %v12938_v46, 4  ;;  %v4529_v52 = vadd.f32 %v4484_v48, %v4415_v0  ;;  %v4781_v30 = vmul.f32 %v8189_v16, %v12823_v55 }
 0x285   : > { %v4757_v4 = vadd.f32 %v12937_v15, %v4643_v25  ;;  %v4599_v49 = vsel %vm4587_vm6, %v4597_v33, %v12447_v6  ;;  %v12445_v29 = vrot.slane %v10265_v59, 4  ;;  %v4782_v13 = vmul.f32 %v8189_v16, %v12829_v61 }
 0x286   : > { %v6755_v53 = vadd.f32 %v12939_v58, %v6641_v60  ;;  %v4826_v2 = vmul.f32 %v12805_v21, %v12829_v61  ;;  %v6642_v51 = vadd.f32 %v6596_v10, %v6528_v50  ;;  %v4644_v25 = vadd.f32 %v4599_v49, %v4529_v52 }
 0x287   : > { %v4801_v17 = vadd.f32 %v4781_v30, %v4757_v4  ;;  %v10284_v31 = vmul.f32 %v12805_v21, %v12832_v9  ;;  %v4713_v33 = vsel %vm514_vm0, %v4711_v12, %v12445_v29  ;;  %v4940_v60 = vmul.f32 %v12807_v34, %v12829_v61 }
 0x288   : > { %6776 = vst.msk [vmem:[#allocation4 + $0x12] sm:$0x3] %vm6773_vm7, %v6755_v53  ;;  %v4869_v57 = vrot.slane %v4826_v2, 1  ;;  %v10293_v0 = vmul.f32 %v12807_v34, %v12832_v9  ;;  %v6756_v10 = vadd.f32 %v6710_v45, %v6642_v51  ;;  %v4758_v48 = vadd.f32 %v4713_v33, %v4644_v25 }
 0x289   : > { %v12444_v15 = vrot.slane %v10284_v31, 1  ;;  %v12940_v4 = vrot.slane %v10022_v56, 1  ;;  %v4983_v46 = vrot.slane %v4940_v60, 2  ;;  %v5054_v12 = vmul.f32 %v12808_v7, %v12829_v61 }
 0x28a   : > { %v12443_v58 = vrot.slane %v10293_v0, 2  ;;  %v10303_v53 = vmul.f32 %v12808_v7, %v12832_v9  ;;  %6777 = vst.msk [vmem:[#allocation4 + $0x14] sm:$0xff] %vm607_vm2, %v6756_v10  ;;  %v4802_v52 = vadd.f32 %v4782_v13, %v4758_v48  ;;  %v12941_v56 = vrot.slane %v10030_v23, 2 }
 0x28b   : > { %v4915_v50 = vadd.f32 %v12940_v4, %v4801_v17  ;;  %v4871_v45 = vsel %vm3189_vm3, %v4869_v57, %v12444_v15  ;;  %v5168_v49 = vmul.f32 %v12810_v41, %v12829_v61  ;;  %v5097_v51 = vrot.slane %v5054_v12, 3 }
 0x28c   : > { %v4985_v2 = vsel %vm3348_vm4, %v4983_v46, %v12443_v58  ;;  %v12438_v25 = vrot.slane %v10303_v53, 3  ;;  %v10319_v13 = vmul.f32 %v12810_v41, %v12832_v9  ;;  %v4916_v17 = vadd.f32 %v4871_v45, %v4802_v52 }
 0x28d   : > { %v5029_v30 = vadd.f32 %v12941_v56, %v4915_v50  ;;  %v12942_v33 = vrot.slane %v10040_v39, 3  ;;  %v5211_v23 = vrot.slane %v5168_v49, 4  ;;  %v5281_v60 = vmul.f32 %v12812_v11, %v12832_v9 }
 0x28e   : > { %v5099_v10 = vsel %vm4587_vm6, %v5097_v51, %v12438_v25  ;;  %v12439_v48 = vrot.slane %v10319_v13, 4  ;;  %v5282_v4 = vmul.f32 %v12812_v11, %v12862_v24  ;;  %v5326_v50 = vmul.f32 %v12813_v20, %v12862_v24 }
 0x28f   : > { %v5143_v57 = vadd.f32 %v12942_v33, %v5029_v30  ;;  %v5030_v46 = vadd.f32 %v4985_v2, %v4916_v17  ;;  %v12943_v39 = vrot.slane %v10050_v40, 4  ;;  %v10337_v52 = vmul.f32 %v12813_v20, %v12863_v26 }
 0x290   : > { %v5440_v45 = vmul.f32 %v12815_v22, %v12862_v24  ;;  %v5213_v56 = vsel %vm514_vm0, %v5211_v23, %v12439_v48  ;;  %v5369_v30 = vrot.slane %v5326_v50, 1  ;;  %v10346_v49 = vmul.f32 %v12815_v22, %v12863_v26 }
 0x291   : > { %v5257_v12 = vadd.f32 %v12943_v39, %v5143_v57  ;;  %v5554_v40 = vmul.f32 %v12816_v19, %v12862_v24  ;;  %v5144_v2 = vadd.f32 %v5099_v10, %v5030_v46  ;;  %v12440_v17 = vrot.slane %v10337_v52, 1  ;;  %v6795_v57 = vld [vmem:[#allocation4 + $0x10] sm:$0xff] }
 0x292   : > { %v5483_v33 = vrot.slane %v5440_v45, 2  ;;  %v12442_v39 = vrot.slane %v10346_v49, 2  ;;  %v10354_v25 = vmul.f32 %v12816_v19, %v12863_v26  ;;  %v5668_v50 = vmul.f32 %v12818_v63, %v12862_v24  ;;  %7582 = vmatmul.mubr.msk.f32.gmra.mxu1 %vm607_vm2, %v6795_v57 }
 0x293   : > { %v5301_v51 = vadd.f32 %v5281_v60, %v5257_v12  ;;  %v5597_v23 = vrot.slane %v5554_v40, 3  ;;  %v5258_v48 = vadd.f32 %v5213_v56, %v5144_v2  ;;  %v5371_v60 = vsel %vm3189_vm3, %v5369_v30, %v12440_v17  ;;  %7584 = vmatprep.mubr.msk.f32.mxu1 %vm7670_vm5, %v12857_v42 }
 0x294   : > { %v12944_v10 = vrot.slane %v10075_v37, 1  ;;  %v10366_v12 = vmul.f32 %v12818_v63, %v12863_v26  ;;  %v5485_v45 = vsel %vm3348_vm4, %v5483_v33, %v12442_v39  ;;  %v12441_v56 = vrot.slane %v10354_v25, 3 }
 0x295   : > { %v5711_v40 = vrot.slane %v5668_v50, 4  ;;  %v5781_v30 = vmul.f32 %v12821_v1, %v12863_v26  ;;  %v5302_v2 = vadd.f32 %v5282_v4, %v5258_v48  ;;  %v12946_v37 = vrot.slane %v10081_v27, 2 }
 0x296   : > { %v5415_v46 = vadd.f32 %v12944_v10, %v5301_v51  ;;  %12945 = vst [vmem:[#allocation31_spill] sm:$0xff] %v10366_v12  ;;  %v12446_v57 = vrot.slane %v10366_v12, 4  ;;  %v5782_v10 = vmul.f32 %v12821_v1, %v12909_v43  ;;  %v5599_v17 = vsel %vm4587_vm6, %v5597_v23, %v12441_v56 }
 0x297   : > { %v5826_v33 = vmul.f32 %v12822_v47, %v12909_v43  ;;  %v10388_v50 = vmul.f32 %v12822_v47, %v12911_v36  ;;  %v5940_v27 = vmul.f32 %v12824_v3, %v12909_v43  ;;  %v5416_v48 = vadd.f32 %v5371_v60, %v5302_v2  ;;  %v12950_v60 = vld [vmem:[#allocation39_spill] sm:$0xff] }
 0x298   : > { %v5529_v51 = vadd.f32 %v12946_v37, %v5415_v46  ;;  %v12948_v4 = vrot.slane %v10089_v28, 3  ;;  %v5713_v37 = vsel %vm514_vm0, %v5711_v40, %v12446_v57  ;;  %v10399_v23 = vmul.f32 %v12824_v3, %v12911_v36 }
 0x299   : > { %12947 = vst [vmem:[#allocation17_spill] sm:$0xff] %v10388_v50  ;;  %v5869_v56 = vrot.slane %v5826_v33, 1  ;;  %v12449_v39 = vrot.slane %v10388_v50, 1  ;;  %v5983_v58 = vrot.slane %v5940_v27, 2  ;;  %v6054_v15 = vmul.f32 %v12825_v44, %v12909_v43  ;;  %v12953_v27 = vld [vmem:[#allocation23_spill] sm:$0xff] }
 0x29a   : > { %v5643_v46 = vadd.f32 %v12948_v4, %v5529_v51  ;;  %12949 = vst [vmem:[#allocation40_spill] sm:$0xff] %v10399_v23  ;;  %v5530_v29 = vadd.f32 %v5485_v45, %v5416_v48  ;;  %v12951_v2 = vrot.slane %v12950_v60, 4  ;;  %v12454_v51 = vrot.slane %v10399_v23, 2 }
 0x29b   : > { %v10409_v40 = vmul.f32 %v12825_v44, %v12911_v36  ;;  %v5871_v33 = vsel %vm3189_vm3, %v5869_v56, %v12449_v39  ;;  %v6097_v4 = vrot.slane %v6054_v15, 3  ;;  %v6168_v57 = vmul.f32 %v12953_v27, %v12909_v43  ;;  %v12955_v15 = vld [vmem:[#allocation24_spill] sm:$0xff]  ;;  %v12956_v39 = vld [vmem:[#allocation43_spill] sm:$0xff] }
 0x29c   : > { %v5757_v28 = vadd.f32 %v12951_v2, %v5643_v46  ;;  %v10418_v45 = vmul.f32 %v12953_v27, %v12911_v36  ;;  %v5644_v48 = vadd.f32 %v5599_v17, %v5530_v29  ;;  %v5985_v60 = vsel %vm3348_vm4, %v5983_v58, %v12454_v51  ;;  %v12957_v27 = vld [vmem:[#allocation37_spill] sm:$0xff] }
 0x29d   : > { %12952 = vst [vmem:[#allocation38_spill] sm:$0xff] %v10409_v40  ;;  %v12455_v2 = vrot.slane %v10409_v40, 3  ;;  %v6211_v6 = vrot.slane %v6168_v57, 4  ;;  %v6281_v56 = vmul.f32 %v12955_v15, %v12911_v36  ;;  %v6282_v35 = vmul.f32 %v12955_v15, %v12956_v39  ;;  %v12959_v58 = vld [vmem:[#allocation25_spill] sm:$0xff] }
 0x29e   : > { %12954 = vst [vmem:[#allocation18_spill] sm:$0xff] %v10418_v45  ;;  %v5801_v46 = vadd.f32 %v5781_v30, %v5757_v28  ;;  %v12459_v18 = vrot.slane %v10418_v45, 4  ;;  %v5758_v50 = vadd.f32 %v5713_v37, %v5644_v48  ;;  %v12958_v44 = vrot.slane %v12957_v27, 1  ;;  %v12960_v28 = vld [vmem:[#allocation41_spill] sm:$0xff]  ;;  %v12962_v37 = vld [vmem:[#allocation26_spill] sm:$0xff]  ;;  %v12966_v45 = vld [vmem:[#allocation27_spill] sm:$0xff] }
 0x29f   : > { %v6099_v17 = vsel %vm4587_vm6, %v6097_v4, %v12455_v2  ;;  %v6326_v30 = vmul.f32 %v12959_v58, %v12956_v39  ;;  %v10441_v51 = vmul.f32 %v12959_v58, %v12960_v28  ;;  %v6440_v48 = vmul.f32 %v12962_v37, %v12956_v39  ;;  %v12964_v4 = vld [vmem:[#allocation12_spill] sm:$0xff] }
 0x2a0   : > { %v5915_v29 = vadd.f32 %v12958_v44, %v5801_v46  ;;  %v6213_v57 = vsel %vm514_vm0, %v6211_v6, %v12459_v18  ;;  %v10447_v44 = vmul.f32 %v12962_v37, %v12960_v28  ;;  %v5802_v27 = vadd.f32 %v5782_v10, %v5758_v50  ;;  %v12968_v37 = vld [vmem:[#allocation13_spill] sm:$0xff] }
 0x2a1   : > { %12961 = vst [vmem:[#allocation35_spill] sm:$0xff] %v10441_v51  ;;  %v12965_v46 = vrot.slane %v12964_v4, 2  ;;  %v6369_v40 = vrot.slane %v6326_v30, 1  ;;  %v6554_v23 = vmul.f32 %v12966_v45, %v12956_v39  ;;  %v12467_v6 = vrot.slane %v10441_v51, 1 }
 0x2a2   : > { %12963 = vst [vmem:[#allocation19_spill] sm:$0xff] %v10447_v44  ;;  %v6483_v18 = vrot.slane %v6440_v48, 2  ;;  %v12466_v58 = vrot.slane %v10447_v44, 2  ;;  %v10457_v12 = vmul.f32 %v12966_v45, %v12960_v28  ;;  %v5916_v3 = vadd.f32 %v5871_v33, %v5802_v27 }
 0x2a3   : > { %v6029_v2 = vadd.f32 %v12965_v46, %v5915_v29  ;;  %v12969_v47 = vrot.slane %v12968_v37, 3  ;;  %v6597_v50 = vrot.slane %v6554_v23, 3  ;;  %v12970_v29 = vld [vmem:[#allocation28_spill] sm:$0xff]  ;;  %v6371_v4 = vsel %vm3189_vm3, %v6369_v40, %v12467_v6 }
 0x2a4   : > { %12967 = vst [vmem:[#allocation33_spill] sm:$0xff] %v10457_v12  ;;  %v6668_v30 = vmul.f32 %v12970_v29, %v12956_v39  ;;  %v6485_v48 = vsel %vm3348_vm4, %v6483_v18, %v12466_v58  ;;  %v12469_v46 = vrot.slane %v10457_v12, 3  ;;  %v10472_v33 = vmul.f32 %v12970_v29, %v12960_v28 }
 0x2a5   : > { %v6143_v10 = vadd.f32 %v12969_v47, %v6029_v2  ;;  %v6030_v37 = vadd.f32 %v5985_v60, %v5916_v3  ;;  %v12972_v47 = vld [vmem:[#allocation16_spill] sm:$0xff]  ;;  %v4302_v51 = vmul.f32 %v12925_v54, %v12823_v55  ;;  %v4783_v58 = vmul.f32 %v8189_v16, %v12832_v9 }
 0x2a6   : > { %12971 = vst [vmem:[#allocation36_spill] sm:$0xff] %v10472_v33  ;;  %v12973_v23 = vrot.slane %v12972_v47, 4  ;;  %v6711_v27 = vrot.slane %v6668_v30, 4  ;;  %v6599_v40 = vsel %vm4587_vm6, %v6597_v50, %v12469_v46  ;;  %v12468_v18 = vrot.slane %v10472_v33, 4 }
 0x2a7   : > { %v10486_v6 = vmul.f32 %v12812_v11, %v12863_v26  ;;  %v6144_v3 = vadd.f32 %v6099_v17, %v6030_v37  ;;  %v10492_v55 = vmul.f32 %v12821_v1, %v12911_v36  ;;  %v10499_v47 = vmul.f32 %v12955_v15, %v12960_v28 }
 0x2a8   : > { %v6257_v2 = vadd.f32 %v12973_v23, %v6143_v10  ;;  %v12974_v10 = vrot.slane %v10226_v32, 1  ;;  %v6713_v50 = vsel %vm514_vm0, %v6711_v27, %v12468_v18  ;;  %v4303_v23 = vmul.f32 %v12925_v54, %v12829_v61 }
 0x2a9   : > { %12975 = vst [vmem:[#allocation34_spill] sm:$0xff] %v10499_v47  ;;  %v6258_v32 = vadd.f32 %v6213_v57, %v6144_v3  ;;  %v10511_v27 = vmul.f32 %v12926_v62, %v12832_v9  ;;  %v4441_v46 = vmul.f32 %v12881_v5, %v12829_v61  ;;  %v10517_v33 = vmul.f32 %v12881_v5, %v12832_v9  ;;  %v12979_v57 = vld [vmem:[#allocation8_spill] sm:$0xff]  ;;  %v12983_v47 = vld [vmem:[#allocation15_spill] sm:$0xff] }
 0x2aa   : > { %v6301_v60 = vadd.f32 %v6281_v56, %v6257_v2  ;;  %v4416_v30 = vadd.f32 %v12974_v10, %v4302_v51  ;;  %v4327_v56 = vmul.f32 %v12926_v62, %v12829_v61  ;;  %v12976_v51 = vld [vmem:[#allocation32_spill] sm:$0xff]  ;;  %v12978_v2 = vrot.slane %v10236_v8, 2 }
 0x2ab   : > { %v12977_v17 = vrot.slane %v12976_v51, 1  ;;  %v4555_v3 = vmul.f32 %v12979_v57, %v12829_v61  ;;  %v6302_v51 = vadd.f32 %v6282_v35, %v6258_v32  ;;  %v12488_v12 = vrot.slane %v10511_v27, 1 }
 0x2ac   : > { %v4530_v10 = vadd.f32 %v12978_v2, %v4416_v30  ;;  %v4371_v18 = vrot.slane %v4327_v56, 1  ;;  %v12982_v30 = vrot.slane %v10248_v38, 3  ;;  %v4485_v56 = vrot.slane %v4441_v46, 2 }
 0x2ad   : > { %v6415_v37 = vadd.f32 %v12977_v17, %v6301_v60  ;;  %v12980_v60 = vld [vmem:[#allocation14_spill] sm:$0xff]  ;;  %v12487_v44 = vrot.slane %v10517_v33, 2  ;;  %v10529_v62 = vmul.f32 %v12979_v57, %v12832_v9  ;;  %v4600_v5 = vrot.slane %v4555_v3, 3 }
 0x2ae   : > { %v12981_v17 = vrot.slane %v12980_v60, 2  ;;  %v4645_v2 = vadd.f32 %v12982_v30, %v4530_v10  ;;  %v6416_v54 = vadd.f32 %v6371_v4, %v6302_v51  ;;  %v12984_v29 = vrot.slane %v12983_v47, 3  ;;  %v12986_v47 = vld [vmem:[#allocation9_spill] sm:$0xff] }
 0x2af   : > { %v12985_v32 = vrot.slane %v10265_v59, 4  ;;  %v4373_v38 = vsel %vm3189_vm3, %v4371_v18, %v12488_v12  ;;  %v4487_v46 = vsel %vm3348_vm4, %v4485_v56, %v12487_v44  ;;  %v12486_v60 = vrot.slane %v10529_v62, 3 }
 0x2b0   : > { %v6529_v8 = vadd.f32 %v12981_v17, %v6415_v37  ;;  %v4417_v10 = vadd.f32 %v4373_v38, %v4303_v23  ;;  %v4670_v4 = vmul.f32 %v12889_v14, %v12829_v61  ;;  %v6530_v3 = vadd.f32 %v6485_v48, %v6416_v54 }
 0x2b1   : > { %v4759_v37 = vadd.f32 %v12985_v32, %v4645_v2  ;;  %v10548_v17 = vmul.f32 %v12889_v14, %v12832_v9  ;;  %v4602_v23 = vsel %vm4587_vm6, %v4600_v5, %v12486_v60  ;;  %v4784_v30 = vmul.f32 %v8189_v16, %v12862_v24 }
 0x2b2   : > { %v6643_v35 = vadd.f32 %v12984_v29, %v6529_v8  ;;  %v12987_v29 = vrot.slane %v12986_v47, 4  ;;  %v4531_v18 = vadd.f32 %v4487_v46, %v4417_v10  ;;  %v4714_v8 = vrot.slane %v4670_v4, 4 }
 0x2b3   : > { %v4803_v59 = vadd.f32 %v4783_v58, %v4759_v37  ;;  %v6644_v2 = vadd.f32 %v6599_v40, %v6530_v3  ;;  %v12988_v61 = vrot.slane %v10284_v31, 1  ;;  %v12484_v58 = vrot.slane %v10548_v17, 4 }
 0x2b4   : > { %v6757_v51 = vadd.f32 %v12987_v29, %v6643_v35  ;;  %v4828_v48 = vmul.f32 %v12805_v21, %v12862_v24  ;;  %v4646_v56 = vadd.f32 %v4602_v23, %v4531_v18  ;;  %v10563_v35 = vmul.f32 %v12805_v21, %v12863_v26 }
 0x2b5   : > { %v4917_v54 = vadd.f32 %v12988_v61, %v4803_v59  ;;  %v4942_v5 = vmul.f32 %v12807_v34, %v12862_v24  ;;  %v10569_v40 = vmul.f32 %v12807_v34, %v12863_v26  ;;  %v6758_v32 = vadd.f32 %v6713_v50, %v6644_v2 }
 0x2b6   : > { %6778 = vst.msk [vmem:[#allocation4 + $0x1c] sm:$0x3] %vm6773_vm7, %v6757_v51  ;;  %v12989_v31 = vrot.slane %v10293_v0, 2  ;;  %v4716_v38 = vsel %vm514_vm0, %v4714_v8, %v12484_v58  ;;  %v4872_v10 = vrot.slane %v4828_v48, 1  ;;  %v12483_v4 = vrot.slane %v10563_v35, 1 }
 0x2b7   : > { %v4760_v46 = vadd.f32 %v4716_v38, %v4646_v56  ;;  %v4986_v3 = vrot.slane %v4942_v5, 2  ;;  %v12482_v47 = vrot.slane %v10569_v40, 2  ;;  %6779 = vst.msk [vmem:[#allocation4 + $0x1e] sm:$0xff] %vm607_vm2, %v6758_v32  ;;  %v12990_v29 = vrot.slane %v10303_v53, 3 }
 0x2b8   : > { %v5031_v37 = vadd.f32 %v12989_v31, %v4917_v54  ;;  %v5056_v0 = vmul.f32 %v12808_v7, %v12862_v24  ;;  %v10585_v50 = vmul.f32 %v12808_v7, %v12863_v26  ;;  %v5170_v59 = vmul.f32 %v12810_v41, %v12862_v24 }
 0x2b9   : > { %v4804_v18 = vadd.f32 %v4784_v30, %v4760_v46  ;;  %v4874_v23 = vsel %vm3189_vm3, %v4872_v10, %v12483_v4  ;;  %v4988_v53 = vsel %vm3348_vm4, %v4986_v3, %v12482_v47  ;;  %v10597_v8 = vmul.f32 %v12810_v41, %v12863_v26  ;;  %v13002_v47 = vld [vmem:[#allocation22_spill] sm:$0xff] }
 0x2ba   : > { %v5145_v51 = vadd.f32 %v12990_v29, %v5031_v37  ;;  %v12991_v2 = vrot.slane %v10319_v13, 4  ;;  %v5100_v54 = vrot.slane %v5056_v0, 3  ;;  %v12480_v48 = vrot.slane %v10585_v50, 3 }
 0x2bb   : > { %v5214_v56 = vrot.slane %v5170_v59, 4  ;;  %v4918_v30 = vadd.f32 %v4874_v23, %v4804_v18  ;;  %v12478_v5 = vrot.slane %v10597_v8, 4  ;;  %v5284_v32 = vmul.f32 %v12812_v11, %v12909_v43 }
 0x2bc   : > { %v5259_v61 = vadd.f32 %v12991_v2, %v5145_v51  ;;  %v5328_v31 = vmul.f32 %v12813_v20, %v12909_v43  ;;  %v5102_v13 = vsel %vm4587_vm6, %v5100_v54, %v12480_v48  ;;  %v10613_v38 = vmul.f32 %v12813_v20, %v12911_v36 }
 0x2bd   : > { %v5442_v10 = vmul.f32 %v12815_v22, %v12909_v43  ;;  %v5032_v46 = vadd.f32 %v4988_v53, %v4918_v30  ;;  %v5216_v3 = vsel %vm514_vm0, %v5214_v56, %v12478_v5  ;;  %v12992_v51 = vrot.slane %v10337_v52, 1 }
 0x2be   : > { %v5303_v37 = vadd.f32 %v10486_v6, %v5259_v61  ;;  %v5372_v29 = vrot.slane %v5328_v31, 1  ;;  %v10622_v6 = vmul.f32 %v12815_v22, %v12911_v36  ;;  %v12477_v59 = vrot.slane %v10613_v38, 1  ;;  %v6796_v2 = vld [vmem:[#allocation4 + $0x18] sm:$0xff] }
 0x2bf   : > { %v5486_v18 = vrot.slane %v5442_v10, 2  ;;  %v5556_v23 = vmul.f32 %v12816_v19, %v12909_v43  ;;  %v5146_v53 = vadd.f32 %v5102_v13, %v5032_v46  ;;  %v10632_v54 = vmul.f32 %v12816_v19, %v12911_v36  ;;  %7585 = vmatmul.mubr.msk.f32.gmra.mxu1 %vm607_vm2, %v6796_v2 }
 0x2c0   : > { %v5417_v0 = vadd.f32 %v12992_v51, %v5303_v37  ;;  %v12479_v61 = vrot.slane %v10622_v6, 2  ;;  %v5670_v56 = vmul.f32 %v12818_v63, %v12909_v43  ;;  %v12993_v52 = vrot.slane %v10346_v49, 2  ;;  %7587 = vmatprep.mubr.msk.f32.mxu1 %vm7670_vm5, %v12857_v42 }
 0x2c1   : > { %v5374_v31 = vsel %vm3189_vm3, %v5372_v29, %v12477_v59  ;;  %v5600_v37 = vrot.slane %v5556_v23, 3  ;;  %v10644_v13 = vmul.f32 %v12818_v63, %v12911_v36  ;;  %v5260_v10 = vadd.f32 %v5216_v3, %v5146_v53 }
 0x2c2   : > { %v5531_v30 = vadd.f32 %v12993_v52, %v5417_v0  ;;  %v5488_v46 = vsel %vm3348_vm4, %v5486_v18, %v12479_v61  ;;  %v12481_v49 = vrot.slane %v10632_v54, 3  ;;  %v5714_v51 = vrot.slane %v5670_v56, 4  ;;  %v12996_v52 = vld [vmem:[#allocation20_spill] sm:$0xff]  ;;  %v12999_v56 = vld [vmem:[#allocation31_spill] sm:$0xff] }
 0x2c3   : > { %12994 = vst [vmem:[#allocation29_spill] sm:$0xff] %v10644_v13  ;;  %v12995_v0 = vrot.slane %v10354_v25, 3  ;;  %v12485_v29 = vrot.slane %v10644_v13, 4  ;;  %v5784_v23 = vmul.f32 %v12821_v1, %v12956_v39  ;;  %v5828_v59 = vmul.f32 %v12996_v52, %v12956_v39  ;;  %v12998_v25 = vld [vmem:[#allocation21_spill] sm:$0xff] }
 0x2c4   : > { %v5304_v5 = vadd.f32 %v5284_v32, %v5260_v10  ;;  %v5602_v3 = vsel %vm4587_vm6, %v5600_v37, %v12481_v49  ;;  %v10664_v18 = vmul.f32 %v12996_v52, %v12960_v28  ;;  %v5942_v53 = vmul.f32 %v12998_v25, %v12956_v39 }
 0x2c5   : > { %v5645_v2 = vadd.f32 %v12995_v0, %v5531_v30  ;;  %v13000_v30 = vrot.slane %v12999_v56, 4  ;;  %v5716_v61 = vsel %vm514_vm0, %v5714_v51, %v12485_v29  ;;  %v5872_v48 = vrot.slane %v5828_v59, 1  ;;  %v13004_v59 = vld [vmem:[#allocation23_spill] sm:$0xff] }
 0x2c6   : > { %12997 = vst [vmem:[#allocation39_spill] sm:$0xff] %v10664_v18  ;;  %v10675_v32 = vmul.f32 %v12998_v25, %v12960_v28  ;;  %v5418_v37 = vadd.f32 %v5374_v31, %v5304_v5  ;;  %v12490_v10 = vrot.slane %v10664_v18, 1  ;;  %v5986_v49 = vrot.slane %v5942_v53, 2  ;;  %v13008_v18 = vld [vmem:[#allocation44_spill] sm:$0xff] }
 0x2c7   : > { %v5759_v0 = vadd.f32 %v13000_v30, %v5645_v2  ;;  %v6056_v4 = vmul.f32 %v13002_v47, %v12956_v39  ;;  %v10684_v56 = vmul.f32 %v13002_v47, %v12960_v28  ;;  %v6170_v51 = vmul.f32 %v13004_v59, %v12956_v39  ;;  %v13023_v47 = vld [vmem:[#allocation34_spill] sm:$0xff] }
 0x2c8   : > { %13001 = vst [vmem:[#allocation43_spill] sm:$0xff] %v10675_v32  ;;  %v12493_v2 = vrot.slane %v10675_v32, 2  ;;  %v5532_v30 = vadd.f32 %v5488_v46, %v5418_v37  ;;  %v5874_v5 = vsel %vm3189_vm3, %v5872_v48, %v12490_v10  ;;  %v10693_v53 = vmul.f32 %v13004_v59, %v12960_v28  ;;  %v13009_v48 = vld [vmem:[#allocation25_spill] sm:$0xff]  ;;  %v13010_v59 = vld [vmem:[#allocation40_spill] sm:$0xff] }
 0x2c9   : > { %v5803_v58 = vadd.f32 %v10492_v55, %v5759_v0  ;;  %13003 = vst [vmem:[#allocation37_spill] sm:$0xff] %v10684_v56  ;;  %v6100_v31 = vrot.slane %v6056_v4, 3  ;;  %v13006_v55 = vld [vmem:[#allocation17_spill] sm:$0xff]  ;;  %v12495_v44 = vrot.slane %v10684_v56, 3  ;;  %v6214_v12 = vrot.slane %v6170_v51, 4 }
 0x2ca   : > { %13005 = vst [vmem:[#allocation41_spill] sm:$0xff] %v10693_v53  ;;  %v13007_v0 = vrot.slane %v13006_v55, 1  ;;  %v5988_v60 = vsel %vm3348_vm4, %v5986_v49, %v12493_v2  ;;  %v5646_v46 = vadd.f32 %v5602_v3, %v5532_v30  ;;  %v12499_v37 = vrot.slane %v10693_v53, 4  ;;  %v13012_v49 = vld [vmem:[#allocation42_spill] sm:$0xff] }
 0x2cb   : > { %v6284_v4 = vmul.f32 %v12955_v15, %v13008_v18  ;;  %v6328_v10 = vmul.f32 %v13009_v48, %v13008_v18  ;;  %v13011_v13 = vrot.slane %v13010_v59, 2  ;;  %v13014_v3 = vld [vmem:[#allocation26_spill] sm:$0xff] }
 0x2cc   : > { %v5917_v29 = vadd.f32 %v13007_v0, %v5803_v58  ;;  %v6102_v58 = vsel %vm4587_vm6, %v6100_v31, %v12495_v44  ;;  %v10713_v0 = vmul.f32 %v13009_v48, %v13012_v49  ;;  %v6442_v51 = vmul.f32 %v13014_v3, %v13008_v18 }
 0x2cd   : > { %v5760_v30 = vadd.f32 %v5716_v61, %v5646_v46  ;;  %v6216_v2 = vsel %vm514_vm0, %v6214_v12, %v12499_v37  ;;  %v6372_v32 = vrot.slane %v6328_v10, 1  ;;  %v6556_v48 = vmul.f32 %v12966_v45, %v13008_v18  ;;  %v13019_v10 = vld [vmem:[#allocation28_spill] sm:$0xff]  ;;  %v13020_v37 = vld [vmem:[#allocation18_spill] sm:$0xff] }
 0x2ce   : > { %v6031_v55 = vadd.f32 %v13011_v13, %v5917_v29  ;;  %13013 = vst [vmem:[#allocation12_spill] sm:$0xff] %v10713_v0  ;;  %v10722_v13 = vmul.f32 %v13014_v3, %v13012_v49  ;;  %v13016_v29 = vld [vmem:[#allocation38_spill] sm:$0xff]  ;;  %v12504_v44 = vrot.slane %v10713_v0, 1  ;;  %v6486_v56 = vrot.slane %v6442_v51, 2 }
 0x2cf   : > { %v13017_v59 = vrot.slane %v13016_v29, 3  ;;  %v5804_v15 = vadd.f32 %v5784_v23, %v5760_v30  ;;  %v10732_v12 = vmul.f32 %v12966_v45, %v13012_v49  ;;  %v6670_v46 = vmul.f32 %v13019_v10, %v13008_v18 }
 0x2d0   : > { %13015 = vst [vmem:[#allocation13_spill] sm:$0xff] %v10722_v13  ;;  %v12505_v61 = vrot.slane %v10722_v13, 2  ;;  %v13021_v53 = vrot.slane %v13020_v37, 4  ;;  %v6600_v51 = vrot.slane %v6556_v48, 3  ;;  %v10743_v23 = vmul.f32 %v13019_v10, %v13012_v49 }
 0x2d1   : > { %v6145_v31 = vadd.f32 %v13017_v59, %v6031_v55  ;;  %13018 = vst [vmem:[#allocation16_spill] sm:$0xff] %v10732_v12  ;;  %v6374_v55 = vsel %vm3189_vm3, %v6372_v32, %v12504_v44  ;;  %v5918_v30 = vadd.f32 %v5874_v5, %v5804_v15  ;;  %v12507_v45 = vrot.slane %v10732_v12, 3  ;;  %v13029_v12 = vld [vmem:[#allocation7_spill] sm:$0xff] }
 0x2d2   : > { %13022 = vst [vmem:[#allocation32_spill] sm:$0xff] %v10743_v23  ;;  %v6488_v59 = vsel %vm3348_vm4, %v6486_v56, %v12505_v61  ;;  %v6714_v3 = vrot.slane %v6670_v46, 4  ;;  %v13025_v56 = vld [vmem:[#allocation6_spill] sm:$0xff] }
 0x2d3   : > { %v6259_v29 = vadd.f32 %v13021_v53, %v6145_v31  ;;  %v12512_v53 = vrot.slane %v10743_v23, 4  ;;  %v13024_v31 = vld [vmem:[#allocation5_spill] sm:$0xff]  ;;  %v6032_v44 = vadd.f32 %v5988_v60, %v5918_v30  ;;  %v6602_v15 = vsel %vm4587_vm6, %v6600_v51, %v12507_v45 }
 0x2d4   : > { %v4304_v32 = vmul.f32 %v13024_v31, %v12832_v9  ;;  %v4305_v48 = vmul.f32 %v13024_v31, %v12862_v24  ;;  %v4329_v5 = vmul.f32 %v13025_v56, %v12862_v24  ;;  %v10762_v46 = vmul.f32 %v13025_v56, %v12863_v26 }
 0x2d5   : > { %v6303_v37 = vadd.f32 %v13023_v47, %v6259_v29  ;;  %v13026_v47 = vld [vmem:[#allocation35_spill] sm:$0xff]  ;;  %v6716_v9 = vsel %vm514_vm0, %v6714_v3, %v12512_v53  ;;  %v13028_v60 = vrot.slane %v10511_v27, 1  ;;  %v4443_v51 = vmul.f32 %v13029_v12, %v12862_v24 }
 0x2d6   : > { %v13027_v29 = vrot.slane %v13026_v47, 1  ;;  %v6146_v45 = vadd.f32 %v6102_v58, %v6032_v44  ;;  %v4374_v13 = vrot.slane %v4329_v5, 1  ;;  %v12513_v0 = vrot.slane %v10762_v46, 1  ;;  %v13030_v47 = vld [vmem:[#allocation19_spill] sm:$0xff] }
 0x2d7   : > { %v4418_v30 = vadd.f32 %v13028_v60, %v4304_v32  ;;  %v10776_v56 = vmul.f32 %v13029_v12, %v12863_v26  ;;  %v4488_v23 = vrot.slane %v4443_v51, 2  ;;  %v13032_v3 = vrot.slane %v10517_v33, 2  ;;  %v13033_v60 = vld [vmem:[#allocation33_spill] sm:$0xff] }
 0x2d8   : > { %v6417_v61 = vadd.f32 %v13027_v29, %v6303_v37  ;;  %v13031_v37 = vrot.slane %v13030_v47, 2  ;;  %v4557_v27 = vmul.f32 %v12979_v57, %v12862_v24  ;;  %v6260_v32 = vadd.f32 %v6216_v2, %v6146_v45 }
 0x2d9   : > { %v4532_v53 = vadd.f32 %v13032_v3, %v4418_v30  ;;  %v4376_v44 = vsel %vm3189_vm3, %v4374_v13, %v12513_v0  ;;  %v12527_v58 = vrot.slane %v10776_v56, 2  ;;  %v10790_v5 = vmul.f32 %v12979_v57, %v12863_v26  ;;  %v13036_v0 = vld [vmem:[#allocation36_spill] sm:$0xff] }
 0x2da   : > { %v6531_v29 = vadd.f32 %v13031_v37, %v6417_v61  ;;  %v13034_v61 = vrot.slane %v13033_v60, 3  ;;  %v4419_v47 = vadd.f32 %v4376_v44, %v4305_v48  ;;  %v4603_v33 = vrot.slane %v4557_v27, 3 }
 0x2db   : > { %v13035_v30 = vrot.slane %v10529_v62, 3  ;;  %v6304_v3 = vadd.f32 %v6284_v4, %v6260_v32  ;;  %v4490_v45 = vsel %vm3348_vm4, %v4488_v23, %v12527_v58  ;;  %v12526_v2 = vrot.slane %v10790_v5, 3 }
 0x2dc   : > { %v6645_v51 = vadd.f32 %v13034_v61, %v6531_v29  ;;  %v4672_v13 = vmul.f32 %v12889_v14, %v12862_v24  ;;  %v13037_v57 = vrot.slane %v13036_v0, 4  ;;  %v4533_v60 = vadd.f32 %v4490_v45, %v4419_v47 }
 0x2dd   : > { %v4647_v37 = vadd.f32 %v13035_v30, %v4532_v53  ;;  %v10806_v48 = vmul.f32 %v12889_v14, %v12863_v26  ;;  %v13038_v62 = vrot.slane %v10548_v17, 4  ;;  %v6418_v53 = vadd.f32 %v6374_v55, %v6304_v3 }
 0x2de   : > { %v6759_v12 = vadd.f32 %v13037_v57, %v6645_v51  ;;  %v4605_v23 = vsel %vm4587_vm6, %v4603_v33, %v12526_v2  ;;  %v4717_v29 = vrot.slane %v4672_v13, 4  ;;  %v4785_v24 = vmul.f32 %v8189_v16, %v12863_v26 }
 0x2df   : > { %v4761_v4 = vadd.f32 %v13038_v62, %v4647_v37  ;;  %v4648_v57 = vadd.f32 %v4605_v23, %v4533_v60  ;;  %v12524_v0 = vrot.slane %v10806_v48, 4  ;;  %v4786_v27 = vmul.f32 %v8189_v16, %v12909_v43 }
 0x2e0   : > { %6780 = vst.msk [vmem:[#allocation4 + $0x26] sm:$0x3] %vm6773_vm7, %v6759_v12  ;;  %v4830_v17 = vmul.f32 %v12805_v21, %v12909_v43  ;;  %v6532_v55 = vadd.f32 %v6488_v59, %v6418_v53  ;;  %v10823_v44 = vmul.f32 %v12805_v21, %v12911_v36  ;;  %v4944_v61 = vmul.f32 %v12807_v34, %v12909_v43 }
 0x2e1   : > { %v4805_v32 = vadd.f32 %v4785_v24, %v4761_v4  ;;  %v4719_v12 = vsel %vm514_vm0, %v4717_v29, %v12524_v0  ;;  %v10832_v47 = vmul.f32 %v12807_v34, %v12911_v36  ;;  %v5058_v59 = vmul.f32 %v12808_v7, %v12909_v43 }
 0x2e2   : > { %v4875_v51 = vrot.slane %v4830_v17, 1  ;;  %v6646_v33 = vadd.f32 %v6602_v15, %v6532_v55  ;;  %v4762_v30 = vadd.f32 %v4719_v12, %v4648_v57  ;;  %v12523_v37 = vrot.slane %v10823_v44, 1 }
 0x2e3   : > { %v13039_v3 = vrot.slane %v10563_v35, 1  ;;  %v4989_v13 = vrot.slane %v4944_v61, 2  ;;  %v12521_v60 = vrot.slane %v10832_v47, 2  ;;  %v10842_v62 = vmul.f32 %v12808_v7, %v12911_v36 }
 0x2e4   : > { %v5103_v4 = vrot.slane %v5058_v59, 3  ;;  %v6760_v53 = vadd.f32 %v6716_v9, %v6646_v33  ;;  %v4806_v23 = vadd.f32 %v4786_v27, %v4762_v30  ;;  %v4877_v15 = vsel %vm3189_vm3, %v4875_v51, %v12523_v37 }
 0x2e5   : > { %v4919_v45 = vadd.f32 %v13039_v3, %v4805_v32  ;;  %v13040_v29 = vrot.slane %v10569_v40, 2  ;;  %v4991_v35 = vsel %vm3348_vm4, %v4989_v13, %v12521_v60  ;;  %v12520_v57 = vrot.slane %v10842_v62, 3 }
 0x2e6   : > { %v5172_v17 = vmul.f32 %v12810_v41, %v12909_v43  ;;  %v10857_v9 = vmul.f32 %v12810_v41, %v12911_v36  ;;  %6781 = vst.msk [vmem:[#allocation4 + $0x28] sm:$0xff] %vm607_vm2, %v6760_v53  ;;  %v4920_v55 = vadd.f32 %v4877_v15, %v4806_v23  ;;  %v13041_v40 = vrot.slane %v10585_v50, 3 }
 0x2e7   : > { %v5033_v24 = vadd.f32 %v13040_v29, %v4919_v45  ;;  %v6797_v27 = vld [vmem:[#allocation4 + $0x20] sm:$0xff]  ;;  %v5285_v61 = vmul.f32 %v12812_v11, %v12911_v36  ;;  %v5286_v12 = vmul.f32 %v12812_v11, %v12956_v39  ;;  %v5105_v51 = vsel %vm4587_vm6, %v5103_v4, %v12520_v57 }
 0x2e8   : > { %7588 = vmatmul.mubr.msk.f32.gmra.mxu1 %vm607_vm2, %v6797_v27  ;;  %v5217_v59 = vrot.slane %v5172_v17, 4  ;;  %v12519_v33 = vrot.slane %v10857_v9, 4  ;;  %v5330_v30 = vmul.f32 %v12813_v20, %v12956_v39  ;;  %v5034_v50 = vadd.f32 %v4991_v35, %v4920_v55 }
 0x2e9   : > { %v5147_v32 = vadd.f32 %v13041_v40, %v5033_v24  ;;  %7590 = vmatprep.mubr.msk.f32.mxu1 %vm7670_vm5, %v12857_v42  ;;  %v13042_v3 = vrot.slane %v10597_v8, 4  ;;  %v10879_v13 = vmul.f32 %v12813_v20, %v12960_v28  ;;  %v5444_v4 = vmul.f32 %v12815_v22, %v12956_v39 }
 0x2ea   : > { %v5219_v53 = vsel %vm514_vm0, %v5217_v59, %v12519_v33  ;;  %v5375_v23 = vrot.slane %v5330_v30, 1  ;;  %v10888_v15 = vmul.f32 %v12815_v22, %v12960_v28  ;;  %v5558_v8 = vmul.f32 %v12816_v19, %v12956_v39  ;;  %v13049_v33 = vld [vmem:[#allocation22_spill] sm:$0xff] }
 0x2eb   : > { %v5261_v45 = vadd.f32 %v13042_v3, %v5147_v32  ;;  %v5148_v29 = vadd.f32 %v5105_v51, %v5034_v50  ;;  %v12518_v35 = vrot.slane %v10879_v13, 1  ;;  %v5489_v17 = vrot.slane %v5444_v4, 2 }
 0x2ec   : > { %v12517_v27 = vrot.slane %v10888_v15, 2  ;;  %v10896_v55 = vmul.f32 %v12816_v19, %v12960_v28  ;;  %v5603_v40 = vrot.slane %v5558_v8, 3  ;;  %v5672_v32 = vmul.f32 %v12818_v63, %v12956_v39 }
 0x2ed   : > { %v5305_v24 = vadd.f32 %v5285_v61, %v5261_v45  ;;  %v5262_v59 = vadd.f32 %v5219_v53, %v5148_v29  ;;  %v5377_v30 = vsel %vm3189_vm3, %v5375_v23, %v12518_v35  ;;  %v13043_v61 = vrot.slane %v10613_v38, 1  ;;  %v6798_v3 = vld [vmem:[#allocation4 + $0x28] sm:$0xff] }
 0x2ee   : > { %v10907_v50 = vmul.f32 %v12818_v63, %v12960_v28  ;;  %v5491_v45 = vsel %vm3348_vm4, %v5489_v17, %v12517_v27  ;;  %v12516_v4 = vrot.slane %v10896_v55, 3  ;;  %v5717_v8 = vrot.slane %v5672_v32, 4  ;;  %7591 = vmatmul.mubr.msk.f32.gmra.mxu1 %vm607_vm2, %v6798_v3 }
 0x2ef   : > { %v5419_v51 = vadd.f32 %v13043_v61, %v5305_v24  ;;  %v5785_v53 = vmul.f32 %v12821_v1, %v12960_v28  ;;  %v5306_v23 = vadd.f32 %v5286_v12, %v5262_v59  ;;  %v13045_v38 = vrot.slane %v10622_v6, 2  ;;  %7593 = vmatprep.mubr.msk.f32.mxu1 %vm7670_vm5, %v12857_v42 }
 0x2f0   : > { %13044 = vst [vmem:[#allocation14_spill] sm:$0xff] %v10907_v50  ;;  %v12522_v24 = vrot.slane %v10907_v50, 4  ;;  %v5786_v61 = vmul.f32 %v12821_v1, %v13008_v18  ;;  %v5605_v17 = vsel %vm4587_vm6, %v5603_v40, %v12516_v4  ;;  %v5830_v32 = vmul.f32 %v12996_v52, %v13008_v18 }
 0x2f1   : > { %v5533_v29 = vadd.f32 %v13045_v38, %v5419_v51  ;;  %v10930_v12 = vmul.f32 %v12996_v52, %v13012_v49  ;;  %v5944_v6 = vmul.f32 %v12998_v25, %v13008_v18  ;;  %v5420_v59 = vadd.f32 %v5377_v30, %v5306_v23  ;;  %v13050_v30 = vld [vmem:[#allocation29_spill] sm:$0xff] }
 0x2f2   : > { %v13047_v51 = vrot.slane %v10632_v54, 3  ;;  %v5719_v38 = vsel %vm514_vm0, %v5717_v8, %v12522_v24  ;;  %v10941_v40 = vmul.f32 %v12998_v25, %v13012_v49  ;;  %v5875_v4 = vrot.slane %v5830_v32, 1 }
 0x2f3   : > { %13046 = vst [vmem:[#allocation15_spill] sm:$0xff] %v10930_v12  ;;  %v12525_v27 = vrot.slane %v10930_v12, 1  ;;  %v5989_v35 = vrot.slane %v5944_v6, 2  ;;  %v6058_v57 = vmul.f32 %v13049_v33, %v13008_v18  ;;  %v5534_v60 = vadd.f32 %v5491_v45, %v5420_v59  ;;  %v13053_v6 = vld [vmem:[#allocation23_spill] sm:$0xff] }
 0x2f4   : > { %v5647_v3 = vadd.f32 %v13047_v51, %v5533_v29  ;;  %13048 = vst [vmem:[#allocation9_spill] sm:$0xff] %v10941_v40  ;;  %v13051_v23 = vrot.slane %v13050_v30, 4  ;;  %v12530_v29 = vrot.slane %v10941_v40, 2  ;;  %v10951_v8 = vmul.f32 %v13049_v33, %v13012_v49  ;;  %v13057_v12 = vld [vmem:[#allocation39_spill] sm:$0xff] }
 0x2f5   : > { %v5877_v32 = vsel %vm3189_vm3, %v5875_v4, %v12525_v27  ;;  %v6103_v51 = vrot.slane %v6058_v57, 3  ;;  %v6172_v24 = vmul.f32 %v13053_v6, %v13008_v18  ;;  %v10960_v45 = vmul.f32 %v13053_v6, %v13012_v49  ;;  %v13055_v57 = vld [vmem:[#allocation24_spill] sm:$0xff]  ;;  %v13056_v27 = vld [vmem:[#allocation47_spill] sm:$0xff] }
 0x2f6   : > { %v5761_v54 = vadd.f32 %v13051_v23, %v5647_v3  ;;  %13052 = vst [vmem:[#allocation20_spill] sm:$0xff] %v10951_v8  ;;  %v5648_v59 = vadd.f32 %v5605_v17, %v5534_v60  ;;  %v5991_v30 = vsel %vm3348_vm4, %v5989_v35, %v12530_v29  ;;  %v12531_v23 = vrot.slane %v10951_v8, 3  ;;  %v13059_v35 = vld [vmem:[#allocation25_spill] sm:$0xff] }
 0x2f7   : > { %13054 = vst [vmem:[#allocation31_spill] sm:$0xff] %v10960_v45  ;;  %v6217_v37 = vrot.slane %v6172_v24, 4  ;;  %v12535_v0 = vrot.slane %v10960_v45, 4  ;;  %v6285_v4 = vmul.f32 %v13055_v57, %v13012_v49  ;;  %v6286_v2 = vmul.f32 %v13055_v57, %v13056_v27  ;;  %v13066_v45 = vld [vmem:[#allocation27_spill] sm:$0xff] }
 0x2f8   : > { %v5805_v3 = vadd.f32 %v5785_v53, %v5761_v54  ;;  %v5762_v58 = vadd.f32 %v5719_v38, %v5648_v59  ;;  %v13058_v6 = vrot.slane %v13057_v12, 1  ;;  %v6105_v53 = vsel %vm4587_vm6, %v6103_v51, %v12531_v23  ;;  %v13060_v54 = vld [vmem:[#allocation45_spill] sm:$0xff]  ;;  %v13062_v38 = vld [vmem:[#allocation26_spill] sm:$0xff]  ;;  %v13064_v51 = vld [vmem:[#allocation43_spill] sm:$0xff] }
 0x2f9   : > { %v6330_v17 = vmul.f32 %v13059_v35, %v13056_v27  ;;  %v6219_v24 = vsel %vm514_vm0, %v6217_v37, %v12535_v0  ;;  %v10983_v29 = vmul.f32 %v13059_v35, %v13060_v54  ;;  %v6444_v59 = vmul.f32 %v13062_v38, %v13056_v27 }
 0x2fa   : > { %v5919_v60 = vadd.f32 %v13058_v6, %v5805_v3  ;;  %v10989_v12 = vmul.f32 %v13062_v38, %v13060_v54  ;;  %v5806_v6 = vadd.f32 %v5786_v61, %v5762_v58  ;;  %v13065_v3 = vrot.slane %v13064_v51, 2  ;;  %v13068_v38 = vld [vmem:[#allocation37_spill] sm:$0xff] }
 0x2fb   : > { %13061 = vst [vmem:[#allocation17_spill] sm:$0xff] %v10983_v29  ;;  %v6375_v8 = vrot.slane %v6330_v17, 1  ;;  %v6558_v40 = vmul.f32 %v13066_v45, %v13056_v27  ;;  %v12542_v37 = vrot.slane %v10983_v29, 1  ;;  %v6489_v0 = vrot.slane %v6444_v59, 2 }
 0x2fc   : > { %13063 = vst [vmem:[#allocation44_spill] sm:$0xff] %v10989_v12  ;;  %v6033_v23 = vadd.f32 %v13065_v3, %v5919_v60  ;;  %v12541_v35 = vrot.slane %v10989_v12, 2  ;;  %v10999_v57 = vmul.f32 %v13066_v45, %v13060_v54  ;;  %v5920_v50 = vadd.f32 %v5877_v32, %v5806_v6 }
 0x2fd   : > { %v13069_v33 = vrot.slane %v13068_v38, 3  ;;  %v6603_v61 = vrot.slane %v6558_v40, 3  ;;  %v6672_v60 = vmul.f32 %v13019_v10, %v13056_v27  ;;  %v6377_v17 = vsel %vm3189_vm3, %v6375_v8, %v12542_v37  ;;  %v13073_v37 = vld [vmem:[#allocation6_spill] sm:$0xff] }
 0x2fe   : > { %13067 = vst [vmem:[#allocation40_spill] sm:$0xff] %v10999_v57  ;;  %v6491_v59 = vsel %vm3348_vm4, %v6489_v0, %v12541_v35  ;;  %v12544_v51 = vrot.slane %v10999_v57, 3  ;;  %v11014_v32 = vmul.f32 %v13019_v10, %v13060_v54  ;;  %v6034_v38 = vadd.f32 %v5991_v30, %v5920_v50 }
 0x2ff   : > { %v6147_v58 = vadd.f32 %v13069_v33, %v6033_v23  ;;  %v13071_v33 = vld [vmem:[#allocation41_spill] sm:$0xff]  ;;  %v6717_v6 = vrot.slane %v6672_v60, 4  ;;  %v4306_v3 = vmul.f32 %v13024_v31, %v12863_v26  ;;  %v4307_v35 = vmul.f32 %v13024_v31, %v12909_v43 }
 0x300   : > { %13070 = vst [vmem:[#allocation42_spill] sm:$0xff] %v11014_v32  ;;  %v13072_v40 = vrot.slane %v13071_v33, 4  ;;  %v6605_v8 = vsel %vm4587_vm6, %v6603_v61, %v12544_v51  ;;  %v12547_v0 = vrot.slane %v11014_v32, 4  ;;  %v4331_v12 = vmul.f32 %v13073_v37, %v12909_v43 }
 0x301   : > { %v6148_v50 = vadd.f32 %v6105_v53, %v6034_v38  ;;  %v13074_v26 = vrot.slane %v10762_v46, 1  ;;  %v13076_v53 = vld [vmem:[#allocation12_spill] sm:$0xff]  ;;  %v13078_v46 = vrot.slane %v10776_v56, 2  ;;  %v13082_v56 = vrot.slane %v10790_v5, 3 }
 0x302   : > { %v6261_v23 = vadd.f32 %v13072_v40, %v6147_v58  ;;  %v11030_v58 = vmul.f32 %v13073_v37, %v12911_v36  ;;  %v6719_v61 = vsel %vm514_vm0, %v6717_v6, %v12547_v0  ;;  %v4377_v33 = vrot.slane %v4331_v12, 1  ;;  %v13075_v40 = vld [vmem:[#allocation7_spill] sm:$0xff]  ;;  %v13079_v12 = vld [vmem:[#allocation8_spill] sm:$0xff] }
 0x303   : > { %v4420_v60 = vadd.f32 %v13074_v26, %v4306_v3  ;;  %v4445_v51 = vmul.f32 %v13075_v40, %v12909_v43  ;;  %v11041_v57 = vmul.f32 %v13075_v40, %v12911_v36  ;;  %v13077_v38 = vrot.slane %v13076_v53, 1 }
 0x304   : > { %v6305_v30 = vadd.f32 %v6285_v4, %v6261_v23  ;;  %v6262_v4 = vadd.f32 %v6219_v24, %v6148_v50  ;;  %v12564_v29 = vrot.slane %v11030_v58, 1  ;;  %v4559_v0 = vmul.f32 %v13079_v12, %v12909_v43  ;;  %v13080_v24 = vld [vmem:[#allocation13_spill] sm:$0xff] }
 0x305   : > { %v4534_v3 = vadd.f32 %v13078_v46, %v4420_v60  ;;  %v4491_v26 = vrot.slane %v4445_v51, 2  ;;  %v12562_v6 = vrot.slane %v11041_v57, 2  ;;  %v11053_v32 = vmul.f32 %v13079_v12, %v12911_v36 }
 0x306   : > { %v6419_v23 = vadd.f32 %v13077_v38, %v6305_v30  ;;  %v6306_v40 = vadd.f32 %v6286_v2, %v6262_v4  ;;  %v13081_v50 = vrot.slane %v13080_v24, 2  ;;  %v4379_v30 = vsel %vm3189_vm3, %v4377_v33, %v12564_v29  ;;  %v13083_v2 = vld [vmem:[#allocation16_spill] sm:$0xff] }
 0x307   : > { %v4649_v51 = vadd.f32 %v13082_v56, %v4534_v3  ;;  %v4421_v60 = vadd.f32 %v4379_v30, %v4307_v35  ;;  %v4493_v38 = vsel %vm3348_vm4, %v4491_v26, %v12562_v6  ;;  %v4606_v46 = vrot.slane %v4559_v0, 3  ;;  %v13086_v26 = vld [vmem:[#allocation32_spill] sm:$0xff] }
 0x308   : > { %v6533_v53 = vadd.f32 %v13081_v50, %v6419_v23  ;;  %v12561_v12 = vrot.slane %v11053_v32, 3  ;;  %v6420_v37 = vadd.f32 %v6377_v17, %v6306_v40  ;;  %v13084_v4 = vrot.slane %v13083_v2, 3 }
 0x309   : > { %v4674_v23 = vmul.f32 %v12889_v14, %v12909_v43  ;;  %v11072_v33 = vmul.f32 %v12889_v14, %v12911_v36  ;;  %v4535_v5 = vadd.f32 %v4493_v38, %v4421_v60  ;;  %v13085_v0 = vrot.slane %v10806_v48, 4 }
 0x30a   : > { %v6647_v24 = vadd.f32 %v13084_v4, %v6533_v53  ;;  %v4608_v35 = vsel %vm4587_vm6, %v4606_v46, %v12561_v12  ;;  %v4787_v17 = vmul.f32 %v8189_v16, %v12911_v36  ;;  %v6534_v40 = vadd.f32 %v6491_v59, %v6420_v37 }
 0x30b   : > { %v4763_v3 = vadd.f32 %v13085_v0, %v4649_v51  ;;  %v13087_v50 = vrot.slane %v13086_v26, 4  ;;  %v4720_v43 = vrot.slane %v4674_v23, 4  ;;  %v12560_v30 = vrot.slane %v11072_v33, 4 }
 0x30c   : > { %v4650_v56 = vadd.f32 %v4608_v35, %v4535_v5  ;;  %v4788_v60 = vmul.f32 %v8189_v16, %v12956_v39  ;;  %v4832_v46 = vmul.f32 %v12805_v21, %v12956_v39  ;;  %v6648_v48 = vadd.f32 %v6605_v8, %v6534_v40 }
 0x30d   : > { %v6761_v53 = vadd.f32 %v13087_v50, %v6647_v24  ;;  %v4807_v38 = vadd.f32 %v4787_v17, %v4763_v3  ;;  %v4722_v37 = vsel %vm514_vm0, %v4720_v43, %v12560_v30  ;;  %v11094_v59 = vmul.f32 %v12805_v21, %v12960_v28 }
 0x30e   : > { %v4946_v51 = vmul.f32 %v12807_v34, %v12956_v39  ;;  %v4764_v2 = vadd.f32 %v4722_v37, %v4650_v56  ;;  %v4878_v4 = vrot.slane %v4832_v46, 1  ;;  %v13088_v24 = vrot.slane %v10823_v44, 1 }
 0x30f   : > { %6782 = vst.msk [vmem:[#allocation4 + $0x30] sm:$0x3] %vm6773_vm7, %v6761_v53  ;;  %v11102_v8 = vmul.f32 %v12807_v34, %v12960_v28  ;;  %v6762_v5 = vadd.f32 %v6719_v61, %v6648_v48  ;;  %v12558_v35 = vrot.slane %v11094_v59, 1  ;;  %v5060_v3 = vmul.f32 %v12808_v7, %v12956_v39 }
 0x310   : > { %v4921_v23 = vadd.f32 %v13088_v24, %v4807_v38  ;;  %v4992_v0 = vrot.slane %v4946_v51, 2  ;;  %v4808_v17 = vadd.f32 %v4788_v60, %v4764_v2  ;;  %v13089_v26 = vrot.slane %v10832_v47, 2 }
 0x311   : > { %v12557_v40 = vrot.slane %v11102_v8, 2  ;;  %v11112_v44 = vmul.f32 %v12808_v7, %v12960_v28  ;;  %6783 = vst.msk [vmem:[#allocation4 + $0x32] sm:$0xff] %vm607_vm2, %v6762_v5  ;;  %v4880_v61 = vsel %vm3189_vm3, %v4878_v4, %v12558_v35  ;;  %v5106_v53 = vrot.slane %v5060_v3, 3 }
 0x312   : > { %v5035_v50 = vadd.f32 %v13089_v26, %v4921_v23  ;;  %v5174_v43 = vmul.f32 %v12810_v41, %v12956_v39  ;;  %v11122_v56 = vmul.f32 %v12810_v41, %v12960_v28  ;;  %v4922_v47 = vadd.f32 %v4880_v61, %v4808_v17 }
 0x313   : > { %v4994_v60 = vsel %vm3348_vm4, %v4992_v0, %v12557_v40  ;;  %v12553_v38 = vrot.slane %v11112_v44, 3  ;;  %v13090_v46 = vrot.slane %v10842_v62, 3  ;;  %v5287_v2 = vmul.f32 %v12812_v11, %v12960_v28 }
 0x314   : > { %v5220_v37 = vrot.slane %v5174_v43, 4  ;;  %v12552_v51 = vrot.slane %v11122_v56, 4  ;;  %v5288_v4 = vmul.f32 %v12812_v11, %v13008_v18  ;;  %v5036_v24 = vadd.f32 %v4994_v60, %v4922_v47 }
 0x315   : > { %v5149_v48 = vadd.f32 %v13090_v46, %v5035_v50  ;;  %v5108_v23 = vsel %vm4587_vm6, %v5106_v53, %v12553_v38  ;;  %v13091_v5 = vrot.slane %v10857_v9, 4  ;;  %v5332_v62 = vmul.f32 %v12813_v20, %v13008_v18 }
 0x316   : > { %v5222_v3 = vsel %vm514_vm0, %v5220_v37, %v12552_v51  ;;  %v11147_v17 = vmul.f32 %v12813_v20, %v13012_v49  ;;  %v5446_v26 = vmul.f32 %v12815_v22, %v13008_v18  ;;  %v11153_v50 = vmul.f32 %v12815_v22, %v13012_v49 }
 0x317   : > { %v5263_v0 = vadd.f32 %v13091_v5, %v5149_v48  ;;  %v5150_v9 = vadd.f32 %v5108_v23, %v5036_v24  ;;  %v5378_v53 = vrot.slane %v5332_v62, 1  ;;  %v5560_v43 = vmul.f32 %v12816_v19, %v13008_v18 }
 0x318   : > { %v12556_v47 = vrot.slane %v11147_v17, 1  ;;  %v5492_v60 = vrot.slane %v5446_v26, 2  ;;  %v12555_v46 = vrot.slane %v11153_v50, 2  ;;  %v11161_v48 = vmul.f32 %v12816_v19, %v13012_v49  ;;  %v6799_v37 = vld [vmem:[#allocation4 + $0x30] sm:$0xff] }
 0x319   : > { %v5307_v61 = vadd.f32 %v5287_v2, %v5263_v0  ;;  %v5264_v5 = vadd.f32 %v5222_v3, %v5150_v9  ;;  %v13092_v51 = vrot.slane %v10879_v13, 1  ;;  %v5606_v24 = vrot.slane %v5560_v43, 3  ;;  %7594 = vmatmul.mubr.msk.f32.gmra.mxu1 %vm607_vm2, %v6799_v37 }
 0x31a   : > { %v5674_v2 = vmul.f32 %v12818_v63, %v13008_v18  ;;  %v5380_v23 = vsel %vm3189_vm3, %v5378_v53, %v12556_v47  ;;  %v5494_v0 = vsel %vm3348_vm4, %v5492_v60, %v12555_v46  ;;  %v12554_v62 = vrot.slane %v11161_v48, 3  ;;  %7596 = vmatprep.mubr.msk.f32.mxu1 %vm7670_vm5, %v12857_v42 }
 0x31b   : > { %v5421_v38 = vadd.f32 %v13092_v51, %v5307_v61  ;;  %v11177_v13 = vmul.f32 %v12818_v63, %v13012_v49  ;;  %v5308_v51 = vadd.f32 %v5288_v4, %v5264_v5  ;;  %v13094_v3 = vrot.slane %v10888_v15, 2 }
 0x31c   : > { %v5720_v9 = vrot.slane %v5674_v2, 4  ;;  %v5787_v61 = vmul.f32 %v12821_v1, %v13012_v49  ;;  %v5608_v53 = vsel %vm4587_vm6, %v5606_v24, %v12554_v62  ;;  %v5788_v60 = vmul.f32 %v12821_v1, %v13056_v27 }
 0x31d   : > { %13093 = vst [vmem:[#allocation38_spill] sm:$0xff] %v11177_v13  ;;  %v5535_v26 = vadd.f32 %v13094_v3, %v5421_v38  ;;  %v12559_v43 = vrot.slane %v11177_v13, 4  ;;  %v5832_v37 = vmul.f32 %v12996_v52, %v13056_v27  ;;  %v5422_v4 = vadd.f32 %v5380_v23, %v5308_v51  ;;  %v13098_v23 = vld [vmem:[#allocation22_spill] sm:$0xff] }
 0x31e   : > { %v13095_v15 = vrot.slane %v10896_v55, 3  ;;  %v11197_v5 = vmul.f32 %v12996_v52, %v13060_v54  ;;  %v5946_v2 = vmul.f32 %v12998_v25, %v13056_v27  ;;  %v11206_v62 = vmul.f32 %v12998_v25, %v13060_v54 }
 0x31f   : > { %v5722_v24 = vsel %vm514_vm0, %v5720_v9, %v12559_v43  ;;  %v5878_v3 = vrot.slane %v5832_v37, 1  ;;  %v6060_v55 = vmul.f32 %v13098_v23, %v13056_v27  ;;  %v5536_v51 = vadd.f32 %v5494_v0, %v5422_v4  ;;  %v13102_v43 = vld [vmem:[#allocation23_spill] sm:$0xff] }
 0x320   : > { %v5649_v38 = vadd.f32 %v13095_v15, %v5535_v26  ;;  %13096 = vst [vmem:[#allocation18_spill] sm:$0xff] %v11197_v5  ;;  %13097 = vst [vmem:[#allocation34_spill] sm:$0xff] %v11206_v62  ;;  %v13099_v26 = vld [vmem:[#allocation14_spill] sm:$0xff]  ;;  %v12563_v47 = vrot.slane %v11197_v5, 1  ;;  %v5992_v40 = vrot.slane %v5946_v2, 2  ;;  %v12566_v35 = vrot.slane %v11206_v62, 2 }
 0x321   : > { %v13100_v15 = vrot.slane %v13099_v26, 4  ;;  %v11216_v9 = vmul.f32 %v13098_v23, %v13060_v54  ;;  %v6106_v37 = vrot.slane %v6060_v55, 3  ;;  %v6174_v30 = vmul.f32 %v13102_v43, %v13056_v27  ;;  %v13104_v26 = vld [vmem:[#allocation24_spill] sm:$0xff] }
 0x322   : > { %v5650_v12 = vadd.f32 %v5608_v53, %v5536_v51  ;;  %v5880_v0 = vsel %vm3189_vm3, %v5878_v3, %v12563_v47  ;;  %v11225_v4 = vmul.f32 %v13102_v43, %v13060_v54  ;;  %v13107_v47 = vld [vmem:[#allocation48_spill] sm:$0xff] }
 0x323   : > { %v5763_v46 = vadd.f32 %v13100_v15, %v5649_v38  ;;  %13101 = vst [vmem:[#allocation35_spill] sm:$0xff] %v11216_v9  ;;  %v5994_v38 = vsel %vm3348_vm4, %v5992_v40, %v12566_v35  ;;  %v12570_v2 = vrot.slane %v11216_v9, 3  ;;  %v6220_v55 = vrot.slane %v6174_v30, 4  ;;  %v13108_v40 = vld [vmem:[#allocation25_spill] sm:$0xff]  ;;  %v13109_v30 = vld [vmem:[#allocation46_spill] sm:$0xff] }
 0x324   : > { %13103 = vst [vmem:[#allocation19_spill] sm:$0xff] %v11225_v4  ;;  %v6287_v15 = vmul.f32 %v13104_v26, %v13060_v54  ;;  %v5764_v53 = vadd.f32 %v5722_v24, %v5650_v12  ;;  %v6288_v29 = vmul.f32 %v13104_v26, %v13107_v47  ;;  %v6332_v35 = vmul.f32 %v13108_v40, %v13107_v47  ;;  %v13111_v12 = vld [vmem:[#allocation26_spill] sm:$0xff] }
 0x325   : > { %v5807_v6 = vadd.f32 %v5787_v61, %v5763_v46  ;;  %v13105_v46 = vld [vmem:[#allocation15_spill] sm:$0xff]  ;;  %v6108_v62 = vsel %vm4587_vm6, %v6106_v37, %v12570_v2  ;;  %v11245_v5 = vmul.f32 %v13108_v40, %v13109_v30  ;;  %v6446_v24 = vmul.f32 %v13111_v12, %v13107_v47 }
 0x326   : > { %v13106_v61 = vrot.slane %v13105_v46, 1  ;;  %v13112_v46 = vld [vmem:[#allocation9_spill] sm:$0xff]  ;;  %v13114_v26 = vrot.slane %v11225_v4, 4  ;;  %v11256_v37 = vmul.f32 %v13111_v12, %v13109_v30  ;;  %v6378_v2 = vrot.slane %v6332_v35, 1 }
 0x327   : > { %13110 = vst [vmem:[#allocation33_spill] sm:$0xff] %v11245_v5  ;;  %v12577_v43 = vrot.slane %v11245_v5, 1  ;;  %v6492_v40 = vrot.slane %v6446_v24, 2  ;;  %v6560_v13 = vmul.f32 %v13066_v45, %v13107_v47  ;;  %v6674_v24 = vmul.f32 %v13019_v10, %v13107_v47 }
 0x328   : > { %v5921_v51 = vadd.f32 %v13106_v61, %v5807_v6  ;;  %v5808_v6 = vadd.f32 %v5788_v60, %v5764_v53  ;;  %v13113_v61 = vrot.slane %v13112_v46, 2  ;;  %v6222_v9 = vsel %vm514_vm0, %v6220_v55, %v13114_v26  ;;  %13115 = vst [vmem:[#allocation36_spill] sm:$0xff] %v11256_v37  ;;  %v13116_v60 = vld [vmem:[#allocation20_spill] sm:$0xff] }
 0x329   : > { %v13117_v53 = vrot.slane %v13116_v60, 3  ;;  %v11266_v55 = vmul.f32 %v13066_v45, %v13109_v30  ;;  %v6380_v35 = vsel %vm3189_vm3, %v6378_v2, %v12577_v43  ;;  %v6606_v26 = vrot.slane %v6560_v13, 3 }
 0x32a   : > { %v6035_v3 = vadd.f32 %v13113_v61, %v5921_v51  ;;  %v5922_v23 = vadd.f32 %v5880_v0, %v5808_v6  ;;  %v12580_v51 = vrot.slane %v11256_v37, 2  ;;  %v11275_v0 = vmul.f32 %v13019_v10, %v13109_v30 }
 0x32b   : > { %13118 = vst [vmem:[#allocation29_spill] sm:$0xff] %v11266_v55  ;;  %v12579_v5 = vrot.slane %v11266_v55, 3  ;;  %v6720_v4 = vrot.slane %v6674_v24, 4  ;;  %v4308_v2 = vmul.f32 %v13024_v31, %v12911_v36  ;;  %v4309_v43 = vmul.f32 %v13024_v31, %v12956_v39 }
 0x32c   : > { %v6149_v46 = vadd.f32 %v13117_v53, %v6035_v3  ;;  %13119 = vst [vmem:[#allocation47_spill] sm:$0xff] %v11275_v0  ;;  %v6036_v6 = vadd.f32 %v5994_v38, %v5922_v23  ;;  %v13120_v3 = vld [vmem:[#allocation31_spill] sm:$0xff]  ;;  %v6494_v53 = vsel %vm3348_vm4, %v6492_v40, %v12580_v51  ;;  %v12582_v13 = vrot.slane %v11275_v0, 4 }
 0x32d   : > { %v13121_v61 = vrot.slane %v13120_v3, 4  ;;  %v6608_v38 = vsel %vm4587_vm6, %v6606_v26, %v12579_v5  ;;  %v13123_v36 = vrot.slane %v11030_v58, 1  ;;  %v13127_v55 = vrot.slane %v11041_v57, 2  ;;  %v13128_v58 = vld [vmem:[#allocation8_spill] sm:$0xff] }
 0x32e   : > { %v6150_v10 = vadd.f32 %v6108_v62, %v6036_v6  ;;  %v6722_v24 = vsel %vm514_vm0, %v6720_v4, %v12582_v13  ;;  %v13124_v62 = vld [vmem:[#allocation7_spill] sm:$0xff]  ;;  %v13131_v57 = vrot.slane %v11053_v32, 3 }
 0x32f   : > { %v6263_v60 = vadd.f32 %v13121_v61, %v6149_v46  ;;  %v13122_v46 = vld [vmem:[#allocation6_spill] sm:$0xff]  ;;  %v4422_v61 = vadd.f32 %v13123_v36, %v4308_v2  ;;  %v11308_v0 = vmul.f32 %v13124_v62, %v12960_v28  ;;  %v4561_v2 = vmul.f32 %v13128_v58, %v12956_v39 }
 0x330   : > { %v4333_v40 = vmul.f32 %v13122_v46, %v12956_v39  ;;  %v11298_v3 = vmul.f32 %v13122_v46, %v12960_v28  ;;  %v6264_v6 = vadd.f32 %v6222_v9, %v6150_v10  ;;  %v13129_v46 = vld [vmem:[#allocation44_spill] sm:$0xff] }
 0x331   : > { %v6307_v23 = vadd.f32 %v6287_v15, %v6263_v60  ;;  %v4447_v15 = vmul.f32 %v13124_v62, %v12956_v39  ;;  %v13125_v60 = vld [vmem:[#allocation17_spill] sm:$0xff]  ;;  %v4536_v37 = vadd.f32 %v13127_v55, %v4422_v61  ;;  %v13130_v10 = vrot.slane %v13129_v46, 2  ;;  %v13132_v46 = vld [vmem:[#allocation40_spill] sm:$0xff] }
 0x332   : > { %v13126_v26 = vrot.slane %v13125_v60, 1  ;;  %v4380_v51 = vrot.slane %v4333_v40, 1  ;;  %v12598_v4 = vrot.slane %v11298_v3, 1  ;;  %v6308_v36 = vadd.f32 %v6288_v29, %v6264_v6 }
 0x333   : > { %v4494_v13 = vrot.slane %v4447_v15, 2  ;;  %v11320_v40 = vmul.f32 %v13128_v58, %v12960_v28  ;;  %v4609_v60 = vrot.slane %v4561_v2, 3  ;;  %v4651_v55 = vadd.f32 %v13131_v57, %v4536_v37 }
 0x334   : > { %v6421_v5 = vadd.f32 %v13126_v26, %v6307_v23  ;;  %v12597_v23 = vrot.slane %v11308_v0, 2  ;;  %v4382_v15 = vsel %vm3189_vm3, %v4380_v51, %v12598_v4  ;;  %v4676_v29 = vmul.f32 %v12889_v14, %v12956_v39 }
 0x335   : > { %v6422_v61 = vadd.f32 %v6380_v35, %v6308_v36  ;;  %v4423_v26 = vadd.f32 %v4382_v15, %v4309_v43  ;;  %v12595_v58 = vrot.slane %v11320_v40, 3  ;;  %v11337_v51 = vmul.f32 %v12889_v14, %v12960_v28  ;;  %v13135_v35 = vld [vmem:[#allocation42_spill] sm:$0xff] }
 0x336   : > { %v6535_v9 = vadd.f32 %v13130_v10, %v6421_v5  ;;  %v13133_v5 = vrot.slane %v13132_v46, 3  ;;  %v4496_v10 = vsel %vm3348_vm4, %v4494_v13, %v12597_v23  ;;  %v4723_v32 = vrot.slane %v4676_v29, 4 }
 0x337   : > { %v13134_v37 = vrot.slane %v11072_v33, 4  ;;  %v6536_v39 = vadd.f32 %v6494_v53, %v6422_v61  ;;  %v13136_v36 = vrot.slane %v13135_v35, 4  ;;  %v4789_v43 = vmul.f32 %v8189_v16, %v12960_v28 }
 0x338   : > { %v6649_v6 = vadd.f32 %v13133_v5, %v6535_v9  ;;  %v4537_v9 = vadd.f32 %v4496_v10, %v4423_v26  ;;  %v4611_v13 = vsel %vm4587_vm6, %v4609_v60, %v12595_v58  ;;  %v12594_v15 = vrot.slane %v11337_v51, 4 }
 0x339   : > { %v4765_v2 = vadd.f32 %v13134_v37, %v4651_v55  ;;  %v4790_v29 = vmul.f32 %v8189_v16, %v13008_v18  ;;  %v4834_v33 = vmul.f32 %v12805_v21, %v13008_v18  ;;  %v6650_v53 = vadd.f32 %v6608_v38, %v6536_v39 }
 0x33a   : > { %v6763_v57 = vadd.f32 %v13136_v36, %v6649_v6  ;;  %v4652_v55 = vadd.f32 %v4611_v13, %v4537_v9  ;;  %v11356_v46 = vmul.f32 %v12805_v21, %v13012_v49  ;;  %v4725_v60 = vsel %vm514_vm0, %v4723_v32, %v12594_v15 }
 0x33b   : > { %v4809_v61 = vadd.f32 %v4789_v43, %v4765_v2  ;;  %v4881_v5 = vrot.slane %v4834_v33, 1  ;;  %v4948_v6 = vmul.f32 %v12807_v34, %v13008_v18  ;;  %v11365_v26 = vmul.f32 %v12807_v34, %v13012_v49 }
 0x33c   : > { %6784 = vst.msk [vmem:[#allocation4 + $0x3a] sm:$0x3] %vm6773_vm7, %v6763_v57  ;;  %v6764_v38 = vadd.f32 %v6722_v24, %v6650_v53  ;;  %v4766_v10 = vadd.f32 %v4725_v60, %v4652_v55  ;;  %v12593_v37 = vrot.slane %v11356_v46, 1  ;;  %v13137_v2 = vrot.slane %v11094_v59, 1 }
 0x33d   : > { %v4995_v35 = vrot.slane %v4948_v6, 2  ;;  %v12592_v36 = vrot.slane %v11365_v26, 2  ;;  %v5062_v32 = vmul.f32 %v12808_v7, %v13008_v18  ;;  %v11375_v57 = vmul.f32 %v12808_v7, %v13012_v49 }
 0x33e   : > { %v4923_v39 = vadd.f32 %v13137_v2, %v4809_v61  ;;  %6785 = vst.msk [vmem:[#allocation4 + $0x3c] sm:$0xff] %vm607_vm2, %v6764_v38  ;;  %v4810_v9 = vadd.f32 %v4790_v29, %v4766_v10  ;;  %v4883_v24 = vsel %vm3189_vm3, %v4881_v5, %v12593_v37  ;;  %v13138_v59 = vrot.slane %v11102_v8, 2  ;;  %v13147_v37 = vld [vmem:[#allocation22_spill] sm:$0xff] }
 0x33f   : > { %v5176_v13 = vmul.f32 %v12810_v41, %v13008_v18  ;;  %v4997_v33 = vsel %vm3348_vm4, %v4995_v35, %v12592_v36  ;;  %v5109_v53 = vrot.slane %v5062_v32, 3  ;;  %v12587_v55 = vrot.slane %v11375_v57, 3 }
 0x340   : > { %v5037_v43 = vadd.f32 %v13138_v59, %v4923_v39  ;;  %v11391_v29 = vmul.f32 %v12810_v41, %v13012_v49  ;;  %v4924_v61 = vadd.f32 %v4883_v24, %v4810_v9  ;;  %v13139_v60 = vrot.slane %v11112_v44, 3 }
 0x341   : > { %v5223_v8 = vrot.slane %v5176_v13, 4  ;;  %v5289_v6 = vmul.f32 %v12812_v11, %v13012_v49  ;;  %v5111_v38 = vsel %vm4587_vm6, %v5109_v53, %v12587_v55  ;;  %v5290_v2 = vmul.f32 %v12812_v11, %v13056_v27 }
 0x342   : > { %v5151_v5 = vadd.f32 %v13139_v60, %v5037_v43  ;;  %v12588_v10 = vrot.slane %v11391_v29, 4  ;;  %v5334_v39 = vmul.f32 %v12813_v20, %v13056_v27  ;;  %v5038_v35 = vadd.f32 %v4997_v33, %v4924_v61 }
 0x343   : > { %v13140_v44 = vrot.slane %v11122_v56, 4  ;;  %v11409_v9 = vmul.f32 %v12813_v20, %v13060_v54  ;;  %v5448_v24 = vmul.f32 %v12815_v22, %v13056_v27  ;;  %v11418_v13 = vmul.f32 %v12815_v22, %v13060_v54 }
 0x344   : > { %v5225_v59 = vsel %vm514_vm0, %v5223_v8, %v12588_v10  ;;  %v5381_v43 = vrot.slane %v5334_v39, 1  ;;  %v5562_v56 = vmul.f32 %v12816_v19, %v13056_v27  ;;  %v5152_v33 = vadd.f32 %v5111_v38, %v5038_v35 }
 0x345   : > { %v5265_v32 = vadd.f32 %v13140_v44, %v5151_v5  ;;  %v12589_v61 = vrot.slane %v11409_v9, 1  ;;  %v5495_v60 = vrot.slane %v5448_v24, 2  ;;  %v6800_v5 = vld [vmem:[#allocation4 + $0x38] sm:$0xff]  ;;  %v12591_v44 = vrot.slane %v11418_v13, 2 }
 0x346   : > { %v11426_v55 = vmul.f32 %v12816_v19, %v13060_v54  ;;  %v5609_v8 = vrot.slane %v5562_v56, 3  ;;  %v5676_v39 = vmul.f32 %v12818_v63, %v13056_v27  ;;  %7597 = vmatmul.mubr.msk.f32.gmra.mxu1 %vm607_vm2, %v6800_v5  ;;  %v5266_v10 = vadd.f32 %v5225_v59, %v5152_v33 }
 0x347   : > { %v5309_v53 = vadd.f32 %v5289_v6, %v5265_v32  ;;  %v5383_v6 = vsel %vm3189_vm3, %v5381_v43, %v12589_v61  ;;  %v13141_v38 = vrot.slane %v11147_v17, 1  ;;  %v11438_v32 = vmul.f32 %v12818_v63, %v13060_v54  ;;  %7599 = vmatprep.mubr.msk.f32.mxu1 %vm7670_vm5, %v12857_v42 }
 0x348   : > { %v5497_v24 = vsel %vm3348_vm4, %v5495_v60, %v12591_v44  ;;  %v12590_v59 = vrot.slane %v11426_v55, 3  ;;  %v5723_v56 = vrot.slane %v5676_v39, 4  ;;  %v5789_v43 = vmul.f32 %v12821_v1, %v13060_v54 }
 0x349   : > { %v5423_v35 = vadd.f32 %v13141_v38, %v5309_v53  ;;  %13142 = vst [vmem:[#allocation39_spill] sm:$0xff] %v11438_v32  ;;  %v5310_v33 = vadd.f32 %v5290_v2, %v5266_v10  ;;  %v13143_v17 = vrot.slane %v11153_v50, 2  ;;  %v12596_v5 = vrot.slane %v11438_v32, 4 }
 0x34a   : > { %v5790_v38 = vmul.f32 %v12821_v1, %v13107_v47  ;;  %v5611_v61 = vsel %vm4587_vm6, %v5609_v8, %v12590_v59  ;;  %v5834_v60 = vmul.f32 %v12996_v52, %v13107_v47  ;;  %v11460_v39 = vmul.f32 %v12996_v52, %v13109_v30 }
 0x34b   : > { %v5537_v53 = vadd.f32 %v13143_v17, %v5423_v35  ;;  %v5948_v50 = vmul.f32 %v12998_v25, %v13107_v47  ;;  %v5424_v10 = vadd.f32 %v5383_v6, %v5310_v33  ;;  %v13145_v2 = vrot.slane %v11161_v48, 3  ;;  %v13148_v6 = vld [vmem:[#allocation38_spill] sm:$0xff] }
 0x34c   : > { %13144 = vst [vmem:[#allocation45_spill] sm:$0xff] %v11460_v39  ;;  %v5725_v17 = vsel %vm514_vm0, %v5723_v56, %v12596_v5  ;;  %v11471_v8 = vmul.f32 %v12998_v25, %v13109_v30  ;;  %v5881_v59 = vrot.slane %v5834_v60, 1  ;;  %v12599_v44 = vrot.slane %v11460_v39, 1 }
 0x34d   : > { %v5651_v35 = vadd.f32 %v13145_v2, %v5537_v53  ;;  %v5995_v36 = vrot.slane %v5948_v50, 2  ;;  %v6062_v15 = vmul.f32 %v13147_v37, %v13107_v47  ;;  %v5538_v58 = vadd.f32 %v5497_v24, %v5424_v10  ;;  %v13151_v50 = vld [vmem:[#allocation23_spill] sm:$0xff] }
 0x34e   : > { %13146 = vst [vmem:[#allocation43_spill] sm:$0xff] %v11471_v8  ;;  %v13149_v33 = vrot.slane %v13148_v6, 4  ;;  %v12604_v53 = vrot.slane %v11471_v8, 2  ;;  %v11481_v56 = vmul.f32 %v13147_v37, %v13109_v30  ;;  %v5883_v60 = vsel %vm3189_vm3, %v5881_v59, %v12599_v44  ;;  %v13154_v44 = vld [vmem:[#allocation50_spill] sm:$0xff] }
 0x34f   : > { %v6109_v2 = vrot.slane %v6062_v15, 3  ;;  %v6176_v5 = vmul.f32 %v13151_v50, %v13107_v47  ;;  %v11490_v24 = vmul.f32 %v13151_v50, %v13109_v30  ;;  %v5652_v10 = vadd.f32 %v5611_v61, %v5538_v58  ;;  %v13153_v15 = vld [vmem:[#allocation24_spill] sm:$0xff]  ;;  %v13155_v50 = vld [vmem:[#allocation18_spill] sm:$0xff] }
 0x350   : > { %v5765_v48 = vadd.f32 %v13149_v33, %v5651_v35  ;;  %13150 = vst [vmem:[#allocation37_spill] sm:$0xff] %v11481_v56  ;;  %v5997_v6 = vsel %vm3348_vm4, %v5995_v36, %v12604_v53  ;;  %v12605_v33 = vrot.slane %v11481_v56, 3  ;;  %v6289_v59 = vmul.f32 %v13153_v15, %v13109_v30  ;;  %v13157_v36 = vld [vmem:[#allocation25_spill] sm:$0xff] }
 0x351   : > { %13152 = vst [vmem:[#allocation41_spill] sm:$0xff] %v11490_v24  ;;  %v6223_v23 = vrot.slane %v6176_v5, 4  ;;  %v12607_v4 = vrot.slane %v11490_v24, 4  ;;  %v6290_v39 = vmul.f32 %v13153_v15, %v13154_v44  ;;  %v5766_v37 = vadd.f32 %v5725_v17, %v5652_v10 }
 0x352   : > { %v5809_v35 = vadd.f32 %v5789_v43, %v5765_v48  ;;  %v13156_v32 = vrot.slane %v13155_v50, 1  ;;  %v6111_v61 = vsel %vm4587_vm6, %v6109_v2, %v12605_v33  ;;  %v6334_v43 = vmul.f32 %v13157_v36, %v13154_v44  ;;  %v13158_v48 = vld [vmem:[#allocation49_spill] sm:$0xff]  ;;  %v13161_v2 = vld [vmem:[#allocation34_spill] sm:$0xff] }
 0x353   : > { %v6225_v5 = vsel %vm514_vm0, %v6223_v23, %v12607_v4  ;;  %v11513_v53 = vmul.f32 %v13157_v36, %v13158_v48  ;;  %v6448_v17 = vmul.f32 %v13111_v12, %v13154_v44  ;;  %v5810_v50 = vadd.f32 %v5790_v38, %v5766_v37 }
 0x354   : > { %v5923_v58 = vadd.f32 %v13156_v32, %v5809_v35  ;;  %v11519_v32 = vmul.f32 %v13111_v12, %v13158_v48  ;;  %v13162_v10 = vrot.slane %v13161_v2, 2  ;;  %v6381_v33 = vrot.slane %v6334_v43, 1  ;;  %v13164_v12 = vld [vmem:[#allocation35_spill] sm:$0xff] }
 0x355   : > { %13159 = vst [vmem:[#allocation12_spill] sm:$0xff] %v11513_v53  ;;  %v6562_v24 = vmul.f32 %v13066_v45, %v13154_v44  ;;  %v12615_v23 = vrot.slane %v11513_v53, 1  ;;  %v6495_v4 = vrot.slane %v6448_v17, 2  ;;  %v11529_v8 = vmul.f32 %v13066_v45, %v13158_v48 }
 0x356   : > { %13160 = vst [vmem:[#allocation13_spill] sm:$0xff] %v11519_v32  ;;  %v6037_v35 = vadd.f32 %v13162_v10, %v5923_v58  ;;  %v12614_v56 = vrot.slane %v11519_v32, 2  ;;  %v5924_v36 = vadd.f32 %v5883_v60, %v5810_v50  ;;  %v13165_v25 = vrot.slane %v13164_v12, 3  ;;  %v13166_v58 = vld [vmem:[#allocation28_spill] sm:$0xff] }
 0x357   : > { %13163 = vst [vmem:[#allocation16_spill] sm:$0xff] %v11529_v8  ;;  %v6609_v38 = vrot.slane %v6562_v24, 3  ;;  %v6676_v43 = vmul.f32 %v13166_v58, %v13154_v44  ;;  %v6383_v2 = vsel %vm3189_vm3, %v6381_v33, %v12615_v23  ;;  %v12616_v10 = vrot.slane %v11529_v8, 3 }
 0x358   : > { %v6151_v37 = vadd.f32 %v13165_v25, %v6037_v35  ;;  %v6497_v17 = vsel %vm3348_vm4, %v6495_v4, %v12614_v56  ;;  %v11544_v60 = vmul.f32 %v13166_v58, %v13158_v48  ;;  %v6038_v12 = vadd.f32 %v5997_v6, %v5924_v36  ;;  %v13168_v25 = vld [vmem:[#allocation19_spill] sm:$0xff]  ;;  %v13180_v58 = vld [vmem:[#allocation29_spill] sm:$0xff] }
 0x359   : > { %v13169_v24 = vrot.slane %v13168_v25, 4  ;;  %v6723_v35 = vrot.slane %v6676_v43, 4  ;;  %v4310_v53 = vmul.f32 %v13024_v31, %v12960_v28  ;;  %v6611_v33 = vsel %vm4587_vm6, %v6609_v38, %v12616_v10 }
 0x35a   : > { %13167 = vst [vmem:[#allocation32_spill] sm:$0xff] %v11544_v60  ;;  %v12617_v4 = vrot.slane %v11544_v60, 4  ;;  %v4791_v56 = vmul.f32 %v8189_v16, %v13012_v49  ;;  %v11558_v23 = vmul.f32 %v12812_v11, %v13060_v54  ;;  %v6152_v6 = vadd.f32 %v6111_v61, %v6038_v12 }
 0x35b   : > { %v6265_v50 = vadd.f32 %v13169_v24, %v6151_v37  ;;  %v13170_v37 = vrot.slane %v11298_v3, 1  ;;  %v11564_v28 = vmul.f32 %v12821_v1, %v13109_v30  ;;  %v11571_v25 = vmul.f32 %v13153_v15, %v13158_v48 }
 0x35c   : > { %v6725_v38 = vsel %vm514_vm0, %v6723_v35, %v12617_v4  ;;  %v4311_v24 = vmul.f32 %v13024_v31, %v13008_v18  ;;  %v6266_v3 = vadd.f32 %v6225_v5, %v6152_v6  ;;  %v4449_v60 = vmul.f32 %v13124_v62, %v13008_v18  ;;  %v13176_v5 = vld [vmem:[#allocation8_spill] sm:$0xff] }
 0x35d   : > { %v6309_v36 = vadd.f32 %v6289_v59, %v6265_v50  ;;  %v4424_v43 = vadd.f32 %v13170_v37, %v4310_v53  ;;  %13171 = vst [vmem:[#allocation14_spill] sm:$0xff] %v11571_v25  ;;  %v13172_v59 = vld [vmem:[#allocation6_spill] sm:$0xff]  ;;  %v13173_v53 = vld [vmem:[#allocation33_spill] sm:$0xff]  ;;  %v13175_v37 = vrot.slane %v11308_v0, 2  ;;  %v11589_v8 = vmul.f32 %v13124_v62, %v13012_v49 }
 0x35e   : > { %v4335_v61 = vmul.f32 %v13172_v59, %v13008_v18  ;;  %v13174_v12 = vrot.slane %v13173_v53, 1  ;;  %v11583_v35 = vmul.f32 %v13172_v59, %v13012_v49  ;;  %v4563_v6 = vmul.f32 %v13176_v5, %v13008_v18 }
 0x35f   : > { %v4538_v10 = vadd.f32 %v13175_v37, %v4424_v43  ;;  %v6310_v53 = vadd.f32 %v6290_v39, %v6266_v3  ;;  %v13179_v43 = vrot.slane %v11320_v40, 3  ;;  %v12635_v59 = vrot.slane %v11589_v8, 2 }
 0x360   : > { %v6423_v50 = vadd.f32 %v13174_v12, %v6309_v36  ;;  %v4383_v4 = vrot.slane %v4335_v61, 1  ;;  %v13177_v36 = vld [vmem:[#allocation36_spill] sm:$0xff]  ;;  %v12637_v32 = vrot.slane %v11583_v35, 1  ;;  %v4497_v61 = vrot.slane %v4449_v60, 2 }
 0x361   : > { %v13178_v12 = vrot.slane %v13177_v36, 2  ;;  %v4653_v37 = vadd.f32 %v13179_v43, %v4538_v10  ;;  %v11601_v31 = vmul.f32 %v13176_v5, %v13012_v49  ;;  %v4612_v62 = vrot.slane %v4563_v6, 3  ;;  %v11616_v6 = vpop.f32.mrf.mxu1 }
 0x362   : > { %v6424_v25 = vadd.f32 %v6383_v2, %v6310_v53  ;;  %v13181_v45 = vrot.slane %v13180_v58, 3  ;;  %v13182_v3 = vrot.slane %v11337_v51, 4  ;;  %v4385_v40 = vsel %vm3189_vm3, %v4383_v4, %v12637_v32  ;;  %13183 = vst [vmem:[#allocation15_spill] sm:$0xff] %v11616_v6  ;;  %v13184_v58 = vld [vmem:[#allocation47_spill] sm:$0xff] }
 0x363   : > { %v6537_v0 = vadd.f32 %v13178_v12, %v6423_v50  ;;  %v4425_v10 = vadd.f32 %v4385_v40, %v4311_v24  ;;  %v4499_v60 = vsel %vm3348_vm4, %v4497_v61, %v12635_v59  ;;  %v12634_v36 = vrot.slane %v11601_v31, 3 }
 0x364   : > { %v4767_v50 = vadd.f32 %v13182_v3, %v4653_v37  ;;  %v4678_v2 = vmul.f32 %v12889_v14, %v13008_v18  ;;  %v13185_v51 = vrot.slane %v13184_v58, 4  ;;  %v11622_v4 = vmul.f32 %v12889_v14, %v13012_v49  ;;  %v7577_v37 = vpop.f32.mrf.mxu1 }
 0x365   : > { %v6651_v39 = vadd.f32 %v13181_v45, %v6537_v0  ;;  %v6538_v45 = vadd.f32 %v6497_v17, %v6424_v25  ;;  %v4539_v24 = vadd.f32 %v4499_v60, %v4425_v10  ;;  %v4614_v0 = vsel %vm4587_vm6, %v4612_v62, %v12634_v36 }
 0x366   : > { %v4811_v12 = vadd.f32 %v4791_v56, %v4767_v50  ;;  %v4726_v43 = vrot.slane %v4678_v2, 4  ;;  %v4792_v18 = vmul.f32 %v8189_v16, %v13056_v27  ;;  %v13186_v17 = vrot.slane %v11356_v46, 1  ;;  %v11645_v40 = vpop.f32.mrf.mxu1 }
 0x367   : > { %v6765_v53 = vadd.f32 %v13185_v51, %v6651_v39  ;;  %v6652_v61 = vadd.f32 %v6611_v33, %v6538_v45  ;;  %v12633_v25 = vrot.slane %v11622_v4, 4  ;;  %v4836_v39 = vmul.f32 %v12805_v21, %v13056_v27  ;;  %13187 = vst [vmem:[#allocation48_spill] sm:$0xff] %v11645_v40 }
 0x368   : > { %v4925_v56 = vadd.f32 %v13186_v17, %v4811_v12  ;;  %v4654_v3 = vadd.f32 %v4614_v0, %v4539_v24  ;;  %v11637_v62 = vmul.f32 %v12805_v21, %v13060_v54  ;;  %v4950_v50 = vmul.f32 %v12807_v34, %v13056_v27  ;;  %v7580_v24 = vpop.f32.mrf.mxu1 }
 0x369   : > { %6786 = vst.msk [vmem:[#allocation4 + $0x44] sm:$0x3] %vm6773_vm7, %v6765_v53  ;;  %v11643_v33 = vmul.f32 %v12807_v34, %v13060_v54  ;;  %v6766_v46 = vadd.f32 %v6725_v38, %v6652_v61  ;;  %v13188_v10 = vrot.slane %v11365_v26, 2  ;;  %v4728_v2 = vsel %vm514_vm0, %v4726_v43, %v12633_v25  ;;  %v13201_v25 = vld [vmem:[#allocation22_spill] sm:$0xff] }
 0x36a   : > { %v4884_v45 = vrot.slane %v4836_v39, 1  ;;  %v4768_v58 = vadd.f32 %v4728_v2, %v4654_v3  ;;  %v12631_v51 = vrot.slane %v11637_v62, 1  ;;  %v4998_v53 = vrot.slane %v4950_v50, 2 }
 0x36b   : > { %v5039_v60 = vadd.f32 %v13188_v10, %v4925_v56  ;;  %v12629_v12 = vrot.slane %v11643_v33, 2  ;;  %6787 = vst.msk [vmem:[#allocation4 + $0x46] sm:$0xff] %vm607_vm2, %v6766_v46  ;;  %v13189_v0 = vrot.slane %v11375_v57, 3  ;;  %v5064_v26 = vmul.f32 %v12808_v7, %v13056_v27 }
 0x36c   : > { %v11661_v37 = vmul.f32 %v12808_v7, %v13060_v54  ;;  %v5178_v43 = vmul.f32 %v12810_v41, %v13056_v27  ;;  %v4812_v61 = vadd.f32 %v4792_v18, %v4768_v58  ;;  %v4886_v17 = vsel %vm3189_vm3, %v4884_v45, %v12631_v51  ;;  %v11678_v18 = vpop.f32.mrf.mxu1 }
 0x36d   : > { %v5153_v38 = vadd.f32 %v13189_v0, %v5039_v60  ;;  %v5000_v57 = vsel %vm3348_vm4, %v4998_v53, %v12629_v12  ;;  %v11673_v56 = vmul.f32 %v12810_v41, %v13060_v54  ;;  %v13190_v39 = vrot.slane %v11391_v29, 4  ;;  %13191 = vst [vmem:[#allocation46_spill] sm:$0xff] %v11678_v18  ;;  %v13207_v18 = vld [vmem:[#allocation10_spill] sm:$0xff] }
 0x36e   : > { %v5112_v50 = vrot.slane %v5064_v26, 3  ;;  %v12626_v46 = vrot.slane %v11661_v37, 3  ;;  %v5226_v10 = vrot.slane %v5178_v43, 4  ;;  %v4926_v60 = vadd.f32 %v4886_v17, %v4812_v61 }
 0x36f   : > { %v5267_v3 = vadd.f32 %v13190_v39, %v5153_v38  ;;  %v12627_v2 = vrot.slane %v11673_v56, 4  ;;  %v5292_v45 = vmul.f32 %v12812_v11, %v13107_v47  ;;  %v5336_v58 = vmul.f32 %v12813_v20, %v13107_v47  ;;  %v7583_v38 = vpop.f32.mrf.mxu1 }
 0x370   : > { %v5114_v29 = vsel %vm4587_vm6, %v5112_v50, %v12626_v46  ;;  %v11691_v24 = vmul.f32 %v12813_v20, %v13109_v30  ;;  %v5450_v0 = vmul.f32 %v12815_v22, %v13107_v47  ;;  %v5040_v26 = vadd.f32 %v5000_v57, %v4926_v60 }
 0x371   : > { %v5311_v53 = vadd.f32 %v11558_v23, %v5267_v3  ;;  %v5228_v43 = vsel %vm514_vm0, %v5226_v10, %v12627_v2  ;;  %v5384_v61 = vrot.slane %v5336_v58, 1  ;;  %v11700_v23 = vmul.f32 %v12815_v22, %v13109_v30 }
 0x372   : > { %v13192_v17 = vrot.slane %v11409_v9, 1  ;;  %v12628_v3 = vrot.slane %v11691_v24, 1  ;;  %v5498_v50 = vrot.slane %v5450_v0, 2  ;;  %v5564_v46 = vmul.f32 %v12816_v19, %v13107_v47  ;;  %v6801_v38 = vld [vmem:[#allocation4 + $0x40] sm:$0xff] }
 0x373   : > { %v5154_v57 = vadd.f32 %v5114_v29, %v5040_v26  ;;  %v12630_v60 = vrot.slane %v11700_v23, 2  ;;  %v11710_v10 = vmul.f32 %v12816_v19, %v13109_v30  ;;  %v5678_v58 = vmul.f32 %v12818_v63, %v13107_v47  ;;  %7600 = vmatmul.mubr.msk.f32.gmra.mxu1 %vm607_vm2, %v6801_v38 }
 0x374   : > { %v5425_v39 = vadd.f32 %v13192_v17, %v5311_v53  ;;  %v13193_v9 = vrot.slane %v11418_v13, 2  ;;  %v5386_v0 = vsel %vm3189_vm3, %v5384_v61, %v12628_v3  ;;  %v5612_v17 = vrot.slane %v5564_v46, 3  ;;  %7602 = vmatprep.mubr.msk.f32.mxu1 %vm7670_vm5, %v12857_v42 }
 0x375   : > { %v11722_v29 = vmul.f32 %v12818_v63, %v13109_v30  ;;  %v5268_v26 = vadd.f32 %v5228_v43, %v5154_v57  ;;  %v5500_v38 = vsel %vm3348_vm4, %v5498_v50, %v12630_v60  ;;  %v12632_v13 = vrot.slane %v11710_v10, 3 }
 0x376   : > { %v5539_v53 = vadd.f32 %v13193_v9, %v5425_v39  ;;  %v5726_v39 = vrot.slane %v5678_v58, 4  ;;  %v13195_v9 = vrot.slane %v11426_v55, 3  ;;  %v5792_v61 = vmul.f32 %v12821_v1, %v13154_v44  ;;  %v13197_v55 = vld [vmem:[#allocation21_spill] sm:$0xff]  ;;  %v13198_v58 = vld [vmem:[#allocation39_spill] sm:$0xff] }
 0x377   : > { %13194 = vst [vmem:[#allocation9_spill] sm:$0xff] %v11722_v29  ;;  %v12636_v46 = vrot.slane %v11722_v29, 4  ;;  %v5836_v3 = vmul.f32 %v12996_v52, %v13154_v44  ;;  %v5312_v12 = vadd.f32 %v5292_v45, %v5268_v26  ;;  %v5614_v43 = vsel %vm4587_vm6, %v5612_v17, %v12632_v13 }
 0x378   : > { %v5653_v2 = vadd.f32 %v13195_v9, %v5539_v53  ;;  %v11742_v50 = vmul.f32 %v12996_v52, %v13158_v48  ;;  %v5950_v57 = vmul.f32 %v13197_v55, %v13154_v44  ;;  %v13199_v53 = vrot.slane %v13198_v58, 4 }
 0x379   : > { %v5728_v60 = vsel %vm514_vm0, %v5726_v39, %v12636_v46  ;;  %v5884_v51 = vrot.slane %v5836_v3, 1  ;;  %v11753_v45 = vmul.f32 %v13197_v55, %v13158_v48  ;;  %v5426_v17 = vadd.f32 %v5386_v0, %v5312_v12  ;;  %v13203_v3 = vld [vmem:[#allocation23_spill] sm:$0xff] }
 0x37a   : > { %13196 = vst [vmem:[#allocation20_spill] sm:$0xff] %v11742_v50  ;;  %v5767_v9 = vadd.f32 %v13199_v53, %v5653_v2  ;;  %v12638_v26 = vrot.slane %v11742_v50, 1  ;;  %v5998_v13 = vrot.slane %v5950_v57, 2  ;;  %v6064_v36 = vmul.f32 %v13201_v25, %v13154_v44  ;;  %v13209_v50 = vld [vmem:[#allocation43_spill] sm:$0xff] }
 0x37b   : > { %13200 = vst [vmem:[#allocation31_spill] sm:$0xff] %v11753_v45  ;;  %v12641_v2 = vrot.slane %v11753_v45, 2  ;;  %v11762_v58 = vmul.f32 %v13201_v25, %v13158_v48  ;;  %v6178_v39 = vmul.f32 %v13203_v3, %v13154_v44  ;;  %v5540_v53 = vadd.f32 %v5500_v38, %v5426_v17  ;;  %v13223_v25 = vld [vmem:[#allocation14_spill] sm:$0xff] }
 0x37c   : > { %v5811_v59 = vadd.f32 %v11564_v28, %v5767_v9  ;;  %v5886_v12 = vsel %vm3189_vm3, %v5884_v51, %v12638_v26  ;;  %v6112_v0 = vrot.slane %v6064_v36, 3  ;;  %v11771_v57 = vmul.f32 %v13203_v3, %v13158_v48  ;;  %v13205_v28 = vld [vmem:[#allocation45_spill] sm:$0xff] }
 0x37d   : > { %13202 = vst [vmem:[#allocation17_spill] sm:$0xff] %v11762_v58  ;;  %v13206_v9 = vrot.slane %v13205_v28, 1  ;;  %v6000_v32 = vsel %vm3348_vm4, %v5998_v13, %v12641_v2  ;;  %v12643_v6 = vrot.slane %v11762_v58, 3  ;;  %v6226_v40 = vrot.slane %v6178_v39, 4  ;;  %v13208_v51 = vld [vmem:[#allocation25_spill] sm:$0xff]  ;;  %v13211_v13 = vld [vmem:[#allocation51_spill] sm:$0xff] }
 0x37e   : > { %13204 = vst [vmem:[#allocation44_spill] sm:$0xff] %v11771_v57  ;;  %v5654_v38 = vadd.f32 %v5614_v43, %v5540_v53  ;;  %v12648_v17 = vrot.slane %v11771_v57, 4  ;;  %v6292_v36 = vmul.f32 %v13153_v15, %v13207_v18  ;;  %v6336_v26 = vmul.f32 %v13208_v51, %v13207_v18  ;;  %v13213_v43 = vld [vmem:[#allocation26_spill] sm:$0xff] }
 0x37f   : > { %v5925_v46 = vadd.f32 %v13206_v9, %v5811_v59  ;;  %v13210_v3 = vrot.slane %v13209_v50, 2  ;;  %v6114_v59 = vsel %vm4587_vm6, %v6112_v0, %v12643_v6  ;;  %v11791_v9 = vmul.f32 %v13208_v51, %v13211_v13  ;;  %v13215_v50 = vld [vmem:[#allocation37_spill] sm:$0xff]  ;;  %v13217_v51 = vld [vmem:[#allocation27_spill] sm:$0xff] }
 0x380   : > { %v6450_v39 = vmul.f32 %v13213_v43, %v13207_v18  ;;  %v5768_v53 = vadd.f32 %v5728_v60, %v5654_v38  ;;  %v6228_v2 = vsel %vm514_vm0, %v6226_v40, %v12648_v17  ;;  %v6384_v45 = vrot.slane %v6336_v26, 1  ;;  %v13219_v26 = vld [vmem:[#allocation28_spill] sm:$0xff]  ;;  %v13220_v17 = vld [vmem:[#allocation41_spill] sm:$0xff] }
 0x381   : > { %v6039_v28 = vadd.f32 %v13210_v3, %v5925_v46  ;;  %13212 = vst [vmem:[#allocation40_spill] sm:$0xff] %v11791_v9  ;;  %v11800_v46 = vmul.f32 %v13213_v43, %v13211_v13  ;;  %v13216_v3 = vrot.slane %v13215_v50, 3  ;;  %v12653_v6 = vrot.slane %v11791_v9, 1 }
 0x382   : > { %v6498_v58 = vrot.slane %v6450_v39, 2  ;;  %v6564_v15 = vmul.f32 %v13217_v51, %v13207_v18  ;;  %v5812_v29 = vadd.f32 %v5792_v61, %v5768_v53  ;;  %v11810_v40 = vmul.f32 %v13217_v51, %v13211_v13 }
 0x383   : > { %13214 = vst [vmem:[#allocation42_spill] sm:$0xff] %v11800_v46  ;;  %v6153_v0 = vadd.f32 %v13216_v3, %v6039_v28  ;;  %v12654_v60 = vrot.slane %v11800_v46, 2  ;;  %v6678_v38 = vmul.f32 %v13219_v26, %v13207_v18  ;;  %v13221_v57 = vrot.slane %v13220_v17, 4 }
 0x384   : > { %13218 = vst [vmem:[#allocation38_spill] sm:$0xff] %v11810_v40  ;;  %v6386_v28 = vsel %vm3189_vm3, %v6384_v45, %v12653_v6  ;;  %v6612_v39 = vrot.slane %v6564_v15, 3  ;;  %v11821_v61 = vmul.f32 %v13219_v26, %v13211_v13  ;;  %v5926_v53 = vadd.f32 %v5886_v12, %v5812_v29 }
 0x385   : > { %v6267_v50 = vadd.f32 %v13221_v57, %v6153_v0  ;;  %v6500_v3 = vsel %vm3348_vm4, %v6498_v58, %v12654_v60  ;;  %v12656_v51 = vrot.slane %v11810_v40, 3  ;;  %v6726_v43 = vrot.slane %v6678_v38, 4  ;;  %v13224_v0 = vld [vmem:[#allocation5_spill] sm:$0xff]  ;;  %v13225_v58 = vld [vmem:[#allocation6_spill] sm:$0xff]  ;;  %v13229_v40 = vld [vmem:[#allocation7_spill] sm:$0xff] }
 0x386   : > { %13222 = vst [vmem:[#allocation50_spill] sm:$0xff] %v11821_v61  ;;  %v12660_v57 = vrot.slane %v11821_v61, 4  ;;  %v4312_v45 = vmul.f32 %v13224_v0, %v13012_v49  ;;  %v4313_v15 = vmul.f32 %v13224_v0, %v13056_v27  ;;  %v6040_v6 = vadd.f32 %v6000_v32, %v5926_v53 }
 0x387   : > { %v6311_v17 = vadd.f32 %v13223_v25, %v6267_v50  ;;  %v6614_v29 = vsel %vm4587_vm6, %v6612_v39, %v12656_v51  ;;  %v4337_v12 = vmul.f32 %v13225_v58, %v13056_v27  ;;  %v11840_v38 = vmul.f32 %v13225_v58, %v13060_v54  ;;  %v13226_v25 = vld [vmem:[#allocation12_spill] sm:$0xff] }
 0x388   : > { %v13227_v50 = vrot.slane %v13226_v25, 1  ;;  %v6728_v49 = vsel %vm514_vm0, %v6726_v43, %v12660_v57  ;;  %v13228_v32 = vrot.slane %v11583_v35, 1  ;;  %v4451_v39 = vmul.f32 %v13229_v40, %v13056_v27  ;;  %v13230_v25 = vld [vmem:[#allocation13_spill] sm:$0xff] }
 0x389   : > { %v6154_v51 = vadd.f32 %v6114_v59, %v6040_v6  ;;  %v4386_v46 = vrot.slane %v4337_v12, 1  ;;  %v12661_v9 = vrot.slane %v11840_v38, 1  ;;  %v11854_v58 = vmul.f32 %v13229_v40, %v13060_v54  ;;  %v13233_v12 = vld [vmem:[#allocation16_spill] sm:$0xff] }
 0x38a   : > { %v6425_v60 = vadd.f32 %v13227_v50, %v6311_v17  ;;  %v4426_v53 = vadd.f32 %v13228_v32, %v4312_v45  ;;  %v13231_v17 = vrot.slane %v13230_v25, 2  ;;  %v4500_v61 = vrot.slane %v4451_v39, 2 }
 0x38b   : > { %v13232_v43 = vrot.slane %v11589_v8, 2  ;;  %v4565_v35 = vmul.f32 %v13176_v5, %v13056_v27  ;;  %v6268_v45 = vadd.f32 %v6228_v2, %v6154_v51  ;;  %v4388_v6 = vsel %vm3189_vm3, %v4386_v46, %v12661_v9 }
 0x38c   : > { %v6539_v50 = vadd.f32 %v13231_v17, %v6425_v60  ;;  %v4501_v59 = vrot.slane %v11854_v58, 2  ;;  %v11868_v40 = vmul.f32 %v13176_v5, %v13060_v54  ;;  %v13234_v60 = vrot.slane %v13233_v12, 3  ;;  %v13236_v5 = vld [vmem:[#allocation32_spill] sm:$0xff] }
 0x38d   : > { %v4540_v57 = vadd.f32 %v13232_v43, %v4426_v53  ;;  %v4427_v39 = vadd.f32 %v4388_v6, %v4313_v15  ;;  %v4615_v8 = vrot.slane %v4565_v35, 3  ;;  %v13235_v53 = vrot.slane %v11601_v31, 3  ;;  %v13239_v35 = vld [vmem:[#allocation11_spill] sm:$0xff]  ;;  %v13271_v58 = vld [vmem:[#allocation50_spill] sm:$0xff] }
 0x38e   : > { %v6653_v32 = vadd.f32 %v13234_v60, %v6539_v50  ;;  %v6312_v17 = vadd.f32 %v6292_v36, %v6268_v45  ;;  %v4502_v2 = vsel %vm3348_vm4, %v4500_v61, %v4501_v59  ;;  %v4616_v51 = vrot.slane %v11868_v40, 3 }
 0x38f   : > { %v4655_v25 = vadd.f32 %v13235_v53, %v4540_v57  ;;  %v4680_v46 = vmul.f32 %v12889_v14, %v13056_v27  ;;  %v13237_v43 = vrot.slane %v13236_v5, 4  ;;  %v4541_v12 = vadd.f32 %v4502_v2, %v4427_v39 }
 0x390   : > { %v11884_v15 = vmul.f32 %v12889_v14, %v13060_v54  ;;  %v13238_v31 = vrot.slane %v11622_v4, 4  ;;  %v6426_v57 = vadd.f32 %v6386_v28, %v6312_v17  ;;  %v4617_v61 = vsel %vm4587_vm6, %v4615_v8, %v4616_v51 }
 0x391   : > { %v6767_v9 = vadd.f32 %v13237_v43, %v6653_v32  ;;  %v4729_v50 = vrot.slane %v4680_v46, 4  ;;  %v4793_v27 = vmul.f32 %v8189_v16, %v13060_v54  ;;  %v11894_v45 = vmax.f32 %v13239_v35, 0.0 }
 0x392   : > { %v4769_v36 = vadd.f32 %v13238_v31, %v4655_v25  ;;  %v4656_v6 = vadd.f32 %v4617_v61, %v4541_v12  ;;  %v4730_v14 = vrot.slane %v11884_v15, 4  ;;  %v4838_v4 = vmul.f32 %v12805_v21, %v13107_v47 }
 0x393   : > { %6788 = vst.msk [vmem:[#allocation4 + $0x4e] sm:$0x3] %vm6773_vm7, %v6767_v9  ;;  %v6540_v28 = vadd.f32 %v6500_v3, %v6426_v57  ;;  %v11902_v32 = vmul.f32 %v12805_v21, %v13109_v30  ;;  %v4952_v39 = vmul.f32 %v12807_v34, %v13107_v47  ;;  %v11911_v53 = vmul.f32 %v12807_v34, %v13109_v30 }
 0x394   : > { %v4813_v60 = vadd.f32 %v4793_v27, %v4769_v36  ;;  %v4731_v8 = vsel %vm514_vm0, %v4729_v50, %v4730_v14  ;;  %v4887_v9 = vrot.slane %v4838_v4, 1  ;;  %v5066_v3 = vmul.f32 %v12808_v7, %v13107_v47 }
 0x395   : > { %v6654_v25 = vadd.f32 %v6614_v29, %v6540_v28  ;;  %v4770_v17 = vadd.f32 %v4731_v8, %v4656_v6  ;;  %v4794_v21 = vmul.f32 %v8189_v16, %v13107_v47  ;;  %v13240_v2 = vrot.slane %v11637_v62, 1  ;;  %v11951_v8 = vpop.f32.mrf.mxu1 }
 0x396   : > { %v4888_v5 = vrot.slane %v11902_v32, 1  ;;  %v5001_v43 = vrot.slane %v4952_v39, 2  ;;  %v5002_v12 = vrot.slane %v11911_v53, 2  ;;  %v11923_v34 = vmul.f32 %v12808_v7, %v13109_v30 }
 0x397   : > { %v4927_v46 = vadd.f32 %v13240_v2, %v4813_v60  ;;  %v6768_v31 = vadd.f32 %v6728_v49, %v6654_v25  ;;  %v4814_v36 = vadd.f32 %v4794_v21, %v4770_v17  ;;  %v13241_v29 = vrot.slane %v11643_v33, 2 }
 0x398   : > { %v5115_v61 = vrot.slane %v5066_v3, 3  ;;  %v4889_v62 = vsel %vm3189_vm3, %v4887_v9, %v4888_v5  ;;  %v5003_v50 = vsel %vm3348_vm4, %v5001_v43, %v5002_v12  ;;  %v5180_v27 = vmul.f32 %v12810_v41, %v13107_v47  ;;  %v7586_v43 = vpop.f32.mrf.mxu1 }
 0x399   : > { %v5041_v57 = vadd.f32 %v13241_v29, %v4927_v46  ;;  %v11937_v7 = vmul.f32 %v12810_v41, %v13109_v30  ;;  %6789 = vst.msk [vmem:[#allocation4 + $0x50] sm:$0xff] %vm607_vm2, %v6768_v31  ;;  %v4928_v33 = vadd.f32 %v4889_v62, %v4814_v36  ;;  %v5116_v35 = vrot.slane %v11923_v34, 3 }
 0x39a   : > { %v6802_v49 = vld [vmem:[#allocation4 + $0x48] sm:$0xff]  ;;  %v13242_v6 = vrot.slane %v11661_v37, 3  ;;  %v5293_v28 = vmul.f32 %v12812_v11, %v13109_v30  ;;  %v5229_v60 = vrot.slane %v5180_v27, 4  ;;  %v5294_v41 = vmul.f32 %v12812_v11, %v13154_v44 }
 0x39b   : > { %7603 = vmatmul.mubr.msk.f32.gmra.mxu1 %vm607_vm2, %v6802_v49  ;;  %v12672_v47 = vrot.slane %v11937_v7, 4  ;;  %v5338_v39 = vmul.f32 %v12813_v20, %v13154_v44  ;;  %v5042_v37 = vadd.f32 %v5003_v50, %v4928_v33  ;;  %v13243_v9 = vrot.slane %v11673_v56, 4 }
 0x39c   : > { %v5155_v4 = vadd.f32 %v13242_v6, %v5041_v57  ;;  %7605 = vmatprep.mubr.msk.f32.mxu1 %vm7670_vm5, %v12857_v42  ;;  %v11959_v25 = vmul.f32 %v12813_v20, %v13158_v48  ;;  %v5452_v17 = vmul.f32 %v12815_v22, %v13154_v44  ;;  %v5117_v21 = vsel %vm4587_vm6, %v5115_v61, %v5116_v35 }
 0x39d   : > { %v5387_v2 = vrot.slane %v5338_v39, 1  ;;  %v11968_v46 = vmul.f32 %v12815_v22, %v13158_v48  ;;  %v5566_v56 = vmul.f32 %v12816_v19, %v13154_v44  ;;  %v5156_v31 = vadd.f32 %v5117_v21, %v5042_v37 }
 0x39e   : > { %v5269_v3 = vadd.f32 %v13243_v9, %v5155_v4  ;;  %v5231_v20 = vsel %vm514_vm0, %v5229_v60, %v12672_v47  ;;  %v5501_v29 = vrot.slane %v5452_v17, 2  ;;  %v12670_v57 = vrot.slane %v11959_v25, 1 }
 0x39f   : > { %v12668_v61 = vrot.slane %v11968_v46, 2  ;;  %v11979_v62 = vmul.f32 %v12816_v19, %v13158_v48  ;;  %v5680_v22 = vmul.f32 %v12818_v63, %v13154_v44  ;;  %v5270_v50 = vadd.f32 %v5231_v20, %v5156_v31 }
 0x3a0   : > { %v5313_v36 = vadd.f32 %v5293_v28, %v5269_v3  ;;  %v13244_v27 = vrot.slane %v11691_v24, 1  ;;  %v5615_v33 = vrot.slane %v5566_v56, 3  ;;  %v11987_v6 = vmul.f32 %v12818_v63, %v13158_v48  ;;  %v6803_v4 = vld [vmem:[#allocation4 + $0x50] sm:$0xff] }
 0x3a1   : > { %v5389_v28 = vsel %vm3189_vm3, %v5387_v2, %v12670_v57  ;;  %v5503_v19 = vsel %vm3348_vm4, %v5501_v29, %v12668_v61  ;;  %v12667_v44 = vrot.slane %v11979_v62, 3  ;;  %v5729_v60 = vrot.slane %v5680_v22, 4  ;;  %7606 = vmatmul.mubr.msk.f32.gmra.mxu1 %vm607_vm2, %v6803_v4  ;;  %v13247_v29 = vld [vmem:[#allocation22_spill] sm:$0xff] }
 0x3a2   : > { %v5427_v49 = vadd.f32 %v13244_v27, %v5313_v36  ;;  %v5314_v24 = vadd.f32 %v5294_v41, %v5270_v50  ;;  %v13245_v39 = vrot.slane %v11700_v23, 2  ;;  %v12666_v63 = vrot.slane %v11987_v6, 4  ;;  %7608 = vmatprep.mubr.msk.f32.mxu1 %vm7670_vm5, %v12857_v42  ;;  %v13248_v27 = vld [vmem:[#allocation9_spill] sm:$0xff] }
 0x3a3   : > { %v5793_v9 = vmul.f32 %v12821_v1, %v13158_v48  ;;  %v5794_v3 = vmul.f32 %v12821_v1, %v13207_v18  ;;  %v5838_v17 = vmul.f32 %v12996_v52, %v13207_v18  ;;  %v12010_v41 = vmul.f32 %v12996_v52, %v13211_v13 }
 0x3a4   : > { %v5541_v37 = vadd.f32 %v13245_v39, %v5427_v49  ;;  %v5952_v23 = vmul.f32 %v13197_v55, %v13207_v18  ;;  %v5428_v21 = vadd.f32 %v5389_v28, %v5314_v24  ;;  %v5617_v2 = vsel %vm4587_vm6, %v5615_v33, %v12667_v44  ;;  %v13250_v24 = vld [vmem:[#allocation23_spill] sm:$0xff] }
 0x3a5   : > { %v13246_v56 = vrot.slane %v11710_v10, 3  ;;  %v12021_v31 = vmul.f32 %v13197_v55, %v13211_v13  ;;  %v5887_v20 = vrot.slane %v5838_v17, 1  ;;  %v12664_v36 = vrot.slane %v12010_v41, 1 }
 0x3a6   : > { %v6001_v52 = vrot.slane %v5952_v23, 2  ;;  %v6066_v22 = vmul.f32 %v13247_v29, %v13207_v18  ;;  %v5542_v50 = vadd.f32 %v5503_v19, %v5428_v21  ;;  %v13249_v49 = vrot.slane %v13248_v27, 4  ;;  %v13252_v27 = vld [vmem:[#allocation20_spill] sm:$0xff] }
 0x3a7   : > { %v5655_v43 = vadd.f32 %v13246_v56, %v5541_v37  ;;  %v12663_v33 = vrot.slane %v12021_v31, 2  ;;  %v12031_v10 = vmul.f32 %v13247_v29, %v13211_v13  ;;  %v5889_v55 = vsel %vm3189_vm3, %v5887_v20, %v12664_v36 }
 0x3a8   : > { %v6115_v28 = vrot.slane %v6066_v22, 3  ;;  %v6180_v39 = vmul.f32 %v13250_v24, %v13207_v18  ;;  %v12040_v19 = vmul.f32 %v13250_v24, %v13211_v13  ;;  %v5656_v37 = vadd.f32 %v5617_v2, %v5542_v50  ;;  %v13251_v18 = vld [vmem:[#allocation24_spill] sm:$0xff]  ;;  %v13254_v50 = vld [vmem:[#allocation25_spill] sm:$0xff] }
 0x3a9   : > { %v5769_v4 = vadd.f32 %v13249_v49, %v5655_v43  ;;  %v6003_v23 = vsel %vm3348_vm4, %v6001_v52, %v12663_v33  ;;  %v12662_v21 = vrot.slane %v12031_v10, 3  ;;  %v5731_v56 = vsel %vm514_vm0, %v5729_v60, %v12666_v63  ;;  %v13259_v33 = vld [vmem:[#allocation27_spill] sm:$0xff] }
 0x3aa   : > { %v6229_v43 = vrot.slane %v6180_v39, 4  ;;  %v12665_v20 = vrot.slane %v12040_v19, 4  ;;  %v6293_v29 = vmul.f32 %v13251_v18, %v13211_v13  ;;  %v5770_v22 = vadd.f32 %v5731_v56, %v5656_v37  ;;  %v13256_v39 = vld [vmem:[#allocation26_spill] sm:$0xff] }
 0x3ab   : > { %v5813_v17 = vadd.f32 %v5793_v9, %v5769_v4  ;;  %v13253_v2 = vrot.slane %v13252_v27, 1  ;;  %v6117_v52 = vsel %vm4587_vm6, %v6115_v28, %v12662_v21  ;;  %v6338_v49 = vmul.f32 %v13254_v50, %v11894_v45  ;;  %v13255_v4 = vld [vmem:[#allocation30_spill] sm:$0xff]  ;;  %v13257_v28 = vld [vmem:[#allocation31_spill] sm:$0xff] }
 0x3ac   : > { %v6231_v60 = vsel %vm514_vm0, %v6229_v43, %v12665_v20  ;;  %v12064_v24 = vmul.f32 %v13254_v50, %v13255_v4  ;;  %v6452_v37 = vmul.f32 %v13256_v39, %v11894_v45  ;;  %v5814_v56 = vadd.f32 %v5794_v3, %v5770_v22 }
 0x3ad   : > { %v5927_v9 = vadd.f32 %v13253_v2, %v5813_v17  ;;  %v12070_v17 = vmul.f32 %v13256_v39, %v13255_v4  ;;  %v13258_v27 = vrot.slane %v13257_v28, 2  ;;  %v6387_v21 = vrot.slane %v6338_v49, 1  ;;  %v13260_v39 = vld [vmem:[#allocation17_spill] sm:$0xff] }
 0x3ae   : > { %v6566_v36 = vmul.f32 %v13259_v33, %v11894_v45  ;;  %v12669_v43 = vrot.slane %v12064_v24, 1  ;;  %v6501_v20 = vrot.slane %v6452_v37, 2  ;;  %v12080_v63 = vmul.f32 %v13259_v33, %v13255_v4 }
 0x3af   : > { %v6041_v2 = vadd.f32 %v13258_v27, %v5927_v9  ;;  %v12671_v50 = vrot.slane %v12070_v17, 2  ;;  %v5928_v44 = vadd.f32 %v5889_v55, %v5814_v56  ;;  %v13261_v61 = vrot.slane %v13260_v39, 3  ;;  %v13262_v56 = vld [vmem:[#allocation44_spill] sm:$0xff] }
 0x3b0   : > { %v6615_v22 = vrot.slane %v6566_v36, 3  ;;  %v6680_v9 = vmul.f32 %v13219_v26, %v11894_v45  ;;  %v6389_v49 = vsel %vm3189_vm3, %v6387_v21, %v12669_v43  ;;  %v6616_v28 = vrot.slane %v12080_v63, 3 }
 0x3b1   : > { %v6155_v3 = vadd.f32 %v13261_v61, %v6041_v2  ;;  %v6503_v37 = vsel %vm3348_vm4, %v6501_v20, %v12671_v50  ;;  %v6681_v33 = vmul.f32 %v13219_v26, %v13255_v4  ;;  %v6042_v55 = vadd.f32 %v6003_v23, %v5928_v44  ;;  %v13265_v44 = vld [vmem:[#allocation40_spill] sm:$0xff] }
 0x3b2   : > { %v13263_v61 = vrot.slane %v13262_v56, 4  ;;  %v6729_v27 = vrot.slane %v6680_v9, 4  ;;  %v4314_v2 = vmul.f32 %v13224_v0, %v13060_v54  ;;  %v6617_v39 = vsel %vm4587_vm6, %v6615_v22, %v6616_v28  ;;  %v13267_v22 = vld [vmem:[#allocation42_spill] sm:$0xff] }
 0x3b3   : > { %v6730_v21 = vrot.slane %v6681_v33, 4  ;;  %v6156_v43 = vadd.f32 %v6117_v52, %v6042_v55  ;;  %v13264_v20 = vrot.slane %v11840_v38, 1  ;;  %v6294_v26 = vmul.f32 %v13251_v18, %v11894_v45  ;;  %v13269_v33 = vld [vmem:[#allocation38_spill] sm:$0xff] }
 0x3b4   : > { %v6269_v36 = vadd.f32 %v13263_v61, %v6155_v3  ;;  %v13266_v23 = vrot.slane %v13265_v44, 1  ;;  %v13268_v9 = vrot.slane %v13267_v22, 2  ;;  %v13270_v55 = vrot.slane %v13269_v33, 3 }
 0x3b5   : > { %v4428_v50 = vadd.f32 %v13264_v20, %v4314_v2  ;;  %v6731_v63 = vsel %vm514_vm0, %v6729_v27, %v6730_v21  ;;  %v6270_v47 = vadd.f32 %v6231_v60, %v6156_v43  ;;  %v5295_v61 = vmul.f32 %v12812_v11, %v13158_v48 }
 0x3b6   : > { %v6313_v57 = vadd.f32 %v6293_v29, %v6269_v36  ;;  %v13274_v36 = vrot.slane %v11959_v25, 1  ;;  %v13275_v2 = vrot.slane %v11968_v46, 2  ;;  %v13277_v11 = vrot.slane %v11987_v6, 4 }
 0x3b7   : > { %v4542_v54 = vadd.f32 %v4501_v59, %v4428_v50  ;;  %v6314_v0 = vadd.f32 %v6294_v26, %v6270_v47  ;;  %v13272_v59 = vrot.slane %v13271_v58, 4  ;;  %v5795_v25 = vmul.f32 %v12821_v1, %v13211_v13 }
 0x3b8   : > { %v6427_v3 = vadd.f32 %v13266_v23, %v6313_v57  ;;  %v4795_v57 = vmul.f32 %v8189_v16, %v13109_v30  ;;  %v13273_v30 = vrot.slane %v11937_v7, 4  ;;  %v13276_v7 = vrot.slane %v11979_v62, 3 }
 0x3b9   : > { %v4657_v38 = vadd.f32 %v4616_v51, %v4542_v54  ;;  %v6428_v29 = vadd.f32 %v6389_v49, %v6314_v0  ;;  %v12124_v51 = vpop.f32.mrf.mxu1  ;;  %v13278_v20 = vrot.slane %v12010_v41, 1  ;;  %v13279_v26 = vrot.slane %v12021_v31, 2 }
 0x3ba   : > { %v6541_v52 = vadd.f32 %v13268_v9, %v6427_v3  ;;  %v13280_v44 = vrot.slane %v12031_v10, 3  ;;  %v13281_v3 = vrot.slane %v12040_v19, 4  ;;  %v6295_v6 = vmul.f32 %v13251_v18, %v13255_v4 }
 0x3bb   : > { %v4771_v45 = vadd.f32 %v4730_v14, %v4657_v38  ;;  %v6542_v43 = vadd.f32 %v6503_v37, %v6428_v29  ;;  %v7589_v14 = vpop.f32.mrf.mxu1  ;;  %v13282_v0 = vrot.slane %v12064_v24, 1  ;;  %v13283_v13 = vrot.slane %v12070_v17, 2  ;;  %v7030_v17 = vld [vmem:[%s12230_s13] sm:$0x1f] }
 0x3bc   : > { %v6655_v60 = vadd.f32 %v13270_v55, %v6541_v52 }
 0x3bd   : > { %v4815_v50 = vadd.f32 %v4795_v57, %v4771_v45  ;;  %v6656_v56 = vadd.f32 %v6617_v39, %v6542_v43  ;;  %v7323_v45 = vld [vmem:[%s12228_s11] ss:$0 sm:$0xff] }
 0x3be   : > { %v6769_v47 = vadd.f32 %v13272_v59, %v6655_v60  ;;  %v7324_v59 = vld [vmem:[%s12228_s11 + $0x1] ss:$0 sm:$0xff] }
 0x3bf   : > { %v4929_v40 = vadd.f32 %v4888_v5, %v4815_v50  ;;  %v6770_v49 = vadd.f32 %v6731_v63, %v6656_v56  ;;  %v12135_v5 = vpop.f32.mrf.mxu1 }
 0x3c0   : > { %6790 = vst.msk [vmem:[#allocation4 + $0x58] sm:$0x3] %vm6773_vm7, %v6769_v47 }
 0x3c1   : > { %v5043_v15 = vadd.f32 %v5002_v12, %v4929_v40  ;;  %6791 = vst.msk [vmem:[#allocation4 + $0x5a] sm:$0xff] %vm607_vm2, %v6770_v49  ;;  %v7592_v53 = vpop.f32.mrf.mxu1 }
 0x3c3   : > { %v5157_v16 = vadd.f32 %v5116_v35, %v5043_v15 }
 0x3c5   : > { %v5271_v37 = vadd.f32 %v13273_v30, %v5157_v16 }
 0x3c7   : > { %v5315_v32 = vadd.f32 %v5295_v61, %v5271_v37 }
 0x3c8   : > { %v6804_v12 = vld [vmem:[#allocation4 + $0x58] sm:$0xff] }
 0x3c9   : > { %v5429_v27 = vadd.f32 %v13274_v36, %v5315_v32  ;;  %7609 = vmatmul.mubr.msk.f32.gmra.mxu1 %vm607_vm2, %v6804_v12 }
 0x3ca   : > { %7611 = vmatprep.mubr.msk.f32.mxu1 %vm7670_vm5, %v12857_v42 }
 0x3cb   : > { %v5543_v34 = vadd.f32 %v13275_v2, %v5429_v27 }
 0x3cd   : > { %v5657_v35 = vadd.f32 %v13276_v7, %v5543_v34  ;;  %v6990_v34 = vmul.f32 %v7323_v45, %v12135_v5  ;;  %v13284_v5 = vld [vmem:[#allocation46_spill] sm:$0xff] }
 0x3cf   : > { %v5771_v48 = vadd.f32 %v13277_v11, %v5657_v35  ;;  %v6989_v11 = vmul.f32 %v7323_v45, %v12124_v51  ;;  %v13285_v51 = vld [vmem:[#allocation48_spill] sm:$0xff] }
 0x3d1   : > { %v5815_v39 = vadd.f32 %v5795_v25, %v5771_v48  ;;  %v7008_v48 = vadd.f32 %v7324_v59, %v6990_v34 }
 0x3d3   : > { %v5929_v63 = vadd.f32 %v13278_v20, %v5815_v39  ;;  %v6988_v39 = vmul.f32 %v7323_v45, %v11951_v8  ;;  %v7007_v20 = vadd.f32 %v7324_v59, %v6989_v11  ;;  %v13286_v8 = vld [vmem:[#allocation15_spill] sm:$0xff] }
 0x3d5   : > { %v6043_v46 = vadd.f32 %v13279_v26, %v5929_v63  ;;  %v7021_v63 = vmax.f32 %v7008_v48, 0.0  ;;  %v6987_v26 = vmul.f32 %v7323_v45, %v13284_v5 }
 0x3d7   : > { %v6157_v23 = vadd.f32 %v13280_v44, %v6043_v46  ;;  %v7006_v46 = vadd.f32 %v7324_v59, %v6988_v39  ;;  %v7020_v44 = vmax.f32 %v7007_v20, 0.0 }
 0x3d9   : > { %v6271_v62 = vadd.f32 %v13281_v3, %v6157_v23  ;;  %v6946_v10 = vpop.f32.mrf.mxu1  ;;  %v6986_v23 = vmul.f32 %v7323_v45, %v13285_v51  ;;  %v7005_v3 = vadd.f32 %v7324_v59, %v6987_v26 }
 0x3da   : > { %v6991_v53 = vmul.f32 %v7323_v45, %v6946_v10 }
 0x3db   : > { %v6315_v54 = vadd.f32 %v6295_v6, %v6271_v62  ;;  %v7595_v19 = vpop.f32.mrf.mxu1  ;;  %v7019_v62 = vmax.f32 %v7006_v46, 0.0  ;;  %v6985_v6 = vmul.f32 %v7323_v45, %v13286_v8 }
 0x3dc   : > { %v7009_v7 = vadd.f32 %v7324_v59, %v6991_v53 }
 0x3dd   : > { %v6429_v1 = vadd.f32 %v13282_v0, %v6315_v54  ;;  %v7004_v54 = vadd.f32 %v7324_v59, %v6986_v23  ;;  %v7018_v0 = vmax.f32 %v7005_v3, 0.0 }
 0x3de   : > { %v7022_v25 = vmax.f32 %v7009_v7, 0.0 }
 0x3df   : > { %v6543_v41 = vadd.f32 %v13283_v13, %v6429_v1  ;;  %v7003_v1 = vadd.f32 %v7324_v59, %v6985_v6  ;;  %v7017_v13 = vmax.f32 %v7004_v54, 0.0 }
 0x3e1   : > { %v6657_v22 = vadd.f32 %v6616_v28, %v6543_v41  ;;  %v7671_v28 = vmov 0   ;;  %v7016_v41 = vmax.f32 %v7003_v1, 0.0 }
 0x3e2   : > { %7655 = vset.pattern.permute.xlu0 %v7671_v28 }
 0x3e3   : > { %v6771_v9 = vadd.f32 %v6730_v21, %v6657_v22  ;;  %7033 = vperm.xlu0 %7655, %v7030_v17   ;;  %v7029_v22 = vld [vmem:[%s12229_s12] sm:$0x1f] }
 0x3e5   : > { %6792 = vst.msk [vmem:[#allocation4 + $0x62] sm:$0x3] %vm6773_vm7, %v6771_v9 }
 0x3ec   : > { %v6805_v31 = vld [vmem:[#allocation4 + $0x60] sm:$0xf] }
 0x3ed   : > { %7612 = vmatmul.mubr.msk.f32.gmra.mxu1 %vm607_vm2, %v6805_v31 }
 0x406   : > { %v6951_v52 = vpop.f32.mrf.mxu1 }
 0x407   : > { %v6992_v32 = vmul.f32 %v7323_v45, %v6951_v52 }
 0x408   : > { %v7598_v38 = vpop.f32.mrf.mxu1 }
 0x409   : > { %v7010_v12 = vadd.f32 %v7324_v59, %v6992_v32 }
 0x40b   : > { %v7023_v35 = vmax.f32 %v7010_v12, 0.0 }
 0x433   : > { %v6956_v29 = vpop.f32.mrf.mxu1 }
 0x434   : > { %v6993_v30 = vmul.f32 %v7323_v45, %v6956_v29 }
 0x435   : > { %v7601_v18 = vpop.f32.mrf.mxu1 }
 0x436   : > { %v7011_v36 = vadd.f32 %v7324_v59, %v6993_v30 }
 0x438   : > { %v7024_v2 = vmax.f32 %v7011_v36, 0.0 }
 0x45b   : > { %v6961_v4 = vpop.f32.mrf.mxu1 }
 0x45c   : > { %v6994_v15 = vmul.f32 %v7323_v45, %v6961_v4 }
 0x45d   : > { %v7604_v33 = vpop.f32.mrf.mxu1 }
 0x45e   : > { %v7012_v37 = vadd.f32 %v7324_v59, %v6994_v15  ;;  %v7034_v9 = vpop.permute.xlu0 %7033 }
 0x460   : > { %v7025_v27 = vmax.f32 %v7012_v37, 0.0 }
 0x461   : > { %v6966_v24 = vpop.f32.mrf.mxu1 }
 0x462   : > { %v6995_v56 = vmul.f32 %v7323_v45, %v6966_v24 }
 0x463   : > { %v7607_v55 = vpop.f32.mrf.mxu1 }
 0x464   : > { %v7013_v14 = vadd.f32 %v7324_v59, %v6995_v56 }
 0x466   : > { %v7026_v61 = vmax.f32 %v7013_v14, 0.0 }
 0x489   : > { %v6971_v21 = vpop.f32.mrf.mxu1 }
 0x48a   : > { %v6996_v43 = vmul.f32 %v7323_v45, %v6971_v21 }
 0x48b   : > { %v7610_v60 = vpop.f32.mrf.mxu1 }
 0x48c   : > { %v7014_v40 = vadd.f32 %v7324_v59, %v6996_v43 }
 0x48e   : > { %v7027_v16 = vmax.f32 %v7014_v40, 0.0 }
 0x4ad   : > { %v6976_v57 = vpop.f32.mrf.mxu1 }
 0x4ae   : > { %v6997_v58 = vmul.f32 %v7323_v45, %v6976_v57 }
 0x4af   : > { %v7613_v47 = vpop.f32.mrf.mxu1 }
 0x4b0   : > { %v7015_v50 = vadd.f32 %v7324_v59, %v6997_v58 }
 0x4b2   : > { %v7028_v49 = vmax.f32 %v7015_v50, 0.0 }
 0x4b4   : > { %7615 = vmatpush3.xpose.msk.msra.mxu0 %vm607_vm2, %v7028_v49 }
 0x4b5   : > { %7616 = vmatprep.subr.mxu0 %v12857_v42 }
 0x4b8   : > { %7617 = vmatpush3.xpose.msk.msra.mxu0 %vm607_vm2, %v7027_v16 }
 0x4b9   : > { %7618 = vmatprep.subr.mxu0 %v12857_v42 }
 0x4bc   : > { %7619 = vmatpush3.xpose.msk.msra.mxu0 %vm607_vm2, %v7026_v61 }
 0x4bd   : > { %7620 = vmatprep.subr.mxu0 %v12857_v42 }
 0x4c0   : > { %7621 = vmatpush3.xpose.msk.msra.mxu0 %vm607_vm2, %v7025_v27 }
 0x4c1   : > { %7622 = vmatprep.subr.mxu0 %v12857_v42 }
 0x4c4   : > { %7623 = vmatpush3.xpose.msk.msra.mxu0 %vm607_vm2, %v7024_v2 }
 0x4c5   : > { %7624 = vmatprep.subr.mxu0 %v12857_v42 }
 0x4c8   : > { %7625 = vmatpush3.xpose.msk.msra.mxu0 %vm607_vm2, %v7023_v35 }
 0x4c9   : > { %7626 = vmatprep.subr.mxu0 %v12857_v42 }
 0x4cc   : > { %7627 = vmatpush3.xpose.msk.msra.mxu0 %vm607_vm2, %v7022_v25 }
 0x4cd   : > { %7628 = vmatprep.subr.mxu0 %v12857_v42 }
 0x4d0   : > { %7629 = vmatpush3.xpose.msk.msra.mxu0 %vm607_vm2, %v7021_v63 }
 0x4d1   : > { %7630 = vmatprep.subr.mxu0 %v12857_v42 }
 0x4d4   : > { %7631 = vmatpush3.xpose.msk.msra.mxu0 %vm607_vm2, %v7020_v44 }
 0x4d5   : > { %7632 = vmatprep.subr.mxu0 %v12857_v42 }
 0x4d8   : > { %7633 = vmatpush3.xpose.msk.msra.mxu0 %vm607_vm2, %v7019_v62 }
 0x4d9   : > { %7634 = vmatprep.subr.mxu0 %v12857_v42 }
 0x4dc   : > { %7635 = vmatpush3.xpose.msk.msra.mxu0 %vm607_vm2, %v7018_v0 }
 0x4dd   : > { %7636 = vmatprep.subr.mxu0 %v12857_v42 }
 0x4e0   : > { %7637 = vmatpush3.xpose.msk.msra.mxu0 %vm607_vm2, %v7017_v13 }
 0x4e1   : > { %7638 = vmatprep.subr.mxu0 %v12857_v42 }
 0x4e4   : > { %7639 = vmatpush3.xpose.msk.msra.mxu0 %vm607_vm2, %v7016_v41 }
 0x4e7   : > { %7641 = vmatmul.mubr.msk.f32.vlgmr.msra.gmra.mxu0 %vm607_vm2, %v7029_v22 }
 0x5a7   : > { %v7144_v31 = vpop.f32.mrf.mxu0 }
 0x5a8   : > { %v7145_v10 = vadd.f32 %v7144_v31, %v7034_v9 }
 0x5a9   : > { %v7642_v19 = vpop.f32.mrf.mxu0 }
 0x5aa   : > { %7149 = vst.msk [vmem:[%s485_s20] sm:$0x1f] %vm7148_vm8, %v7145_v10 }
 0x5ab PF: > { %s24_s29 = sadd.s32 1, %s7667_s29  }
 0x5ac   : > { %p21_p4 = scmp.ge.s32.totalorder %s24_s29, 4  }
 0x5ae   :  { %23 = sbr.rel (!%p21_p4) target bundleno = 1 (0x1), region = 132 }

</bundles_post_ra>
